<compile_context>
chip_gen: v6e
topology: v6e:2x2x1
jax: 0.10.0
libtpu: 0.0.40
codegen_flags: <defaults>
</compile_context>

<pallas_src>
import numpy as np

import jax
import jax.numpy as jnp
from jax.experimental import pallas as pl
from jax.experimental.pallas import tpu as pltpu

NC = 3
NDF = 32
LEAK = 0.2
BN_EPS = 1e-5

# (Cout, kh, kw, sh, sw, ph, pw, has_bn) for cv0 .. cv4
_LAYER_CFG = (
    (NDF,     4, 4, 2, 1, 1, 0, False),   # cv0: k=4, s=(2,1), p=(1,0)
    (NDF * 2, 3, 3, 2, 2, 1, 1, True),    # cv1: k=3, s=2, p=1  (+BN1)
    (NDF * 4, 3, 3, 2, 2, 1, 1, True),    # cv2: k=3, s=2, p=1  (+BN2)
    (NDF * 8, 3, 3, 1, 1, 0, 0, True),    # cv3: k=3, s=1, p=0  (+BN3)
    (1,       2, 1, 1, 1, 0, 0, False),   # cv4: k=(2,1), s=1, p=0
)

_ARG_ORDER = ("R0", "M0",
              "R1", "M1", "P1", "g1", "b1",
              "R2", "M2", "P2", "g2", "b2",
              "R3", "M3", "P3", "g3", "b3",
              "R4", "M4")


# ------------------------------ Pallas kernel -------------------------------

def _fused_kernel(x_ref, r0, m0,
                  r1, m1, p1, g1, b1,
                  r2, m2, p2, g2, b2,
                  r3, m3, p3, g3, b3,
                  r4, m4, o_ref):
    def conv(x, r_ref, m_ref):
        # out = sum_i (R_i @ x) @ M_i  — row gather (exact, f32) then bf16 MXU
        # matmul with f32 accumulation.
        acc = None
        for i in range(r_ref.shape[0]):
            rows = jnp.dot(r_ref[i], x, preferred_element_type=jnp.float32)
            t = jnp.dot(rows.astype(jnp.bfloat16), m_ref[i],
                        preferred_element_type=jnp.float32)
            acc = t if acc is None else acc + t
        return acc

    def lrelu(y):
        return jnp.where(y > 0, y, LEAK * y)

    def bn_lrelu(y, p_ref, g_ref, b_ref):
        # Train-mode BatchNorm: per-channel batch stats over (N, Ho, Wo).
        # P pools lanes of the same channel (and divides by the count), so the
        # result is already broadcast back to every (wo, c) lane.
        colsum = jnp.sum(y, axis=0, keepdims=True)
        colsq = jnp.sum(y * y, axis=0, keepdims=True)
        mean = jnp.dot(colsum, p_ref[...], preferred_element_type=jnp.float32)
        meansq = jnp.dot(colsq, p_ref[...], preferred_element_type=jnp.float32)
        var = meansq - mean * mean           # biased variance (PyTorch train norm)
        inv = jax.lax.rsqrt(var + BN_EPS)
        return lrelu((y - mean) * inv * g_ref[...] + b_ref[...])

    x = x_ref[...]                                   # [N*H0, W0*C0] f32
    x = lrelu(conv(x, r0, m0))                       # cv0 + LeakyReLU
    x = bn_lrelu(conv(x, r1, m1), p1, g1, b1)        # cv1 + BN1 + LeakyReLU
    x = bn_lrelu(conv(x, r2, m2), p2, g2, b2)        # cv2 + BN2 + LeakyReLU
    x = bn_lrelu(conv(x, r3, m3), p3, g3, b3)        # cv3 + BN3 + LeakyReLU
    y = conv(x, r4, m4)                              # cv4 logits [N, 1]
    # Sigmoid: exp + approx reciprocal both run on the EUP slot (VPU stays free).
    # The min() only trims the ~2^-12 approx error so the output stays in [0,1].
    o_ref[...] = jnp.minimum(pl.reciprocal(1.0 + jnp.exp(-y), approx=True), 1.0)


# ------------------------------ Pallas wrapper -------------------------------

def _fused_forward(x2d, prep):
    n = prep["R4"].shape[1]                  # last layer has Ho = Wo = 1 -> N
    args = [x2d] + [prep[k] for k in _ARG_ORDER]

    # Every operand is a single full-array VMEM block (block == array shape
    # satisfies the (8,128) rule); total resident constants are ~4 MiB.
    in_specs = [pl.BlockSpec(a.shape, lambda i, nd=a.ndim: (0,) * nd)
                for a in args]

    flops = 0
    for l in range(5):
        kh, mo, mi = prep[f"R{l}"].shape
        _, kk, nn = prep[f"M{l}"].shape
        flops += 2 * kh * (mo * mi * kk + mo * kk * nn)
    bytes_accessed = sum(int(a.size) * a.dtype.itemsize for a in args) + n * 4

    return pl.pallas_call(
        _fused_kernel,
        out_shape=jax.ShapeDtypeStruct((n, 1), jnp.float32),
        grid=(1,),
        in_specs=in_specs,
        out_specs=pl.BlockSpec((n, 1), lambda i: (0, 0)),
        compiler_params=pltpu.CompilerParams(dimension_semantics=("arbitrary",)),
        cost_estimate=pl.CostEstimate(flops=int(flops),
                                      transcendentals=int(4 * n + 2048),
                                      bytes_accessed=int(bytes_accessed)),
    )(*args)


def discriminator_detalle_forward(x, prep):
    # x: NCHW like PyTorch.  Single transpose to a channels-last 2-D slab
    # X[n*H + h, w*C + c]; everything after this is one fused Pallas kernel.
    N, C, H, W = x.shape
    x2d = x.transpose(0, 2, 3, 1).reshape(N * H, W * C).astype(jnp.float32)
    return _fused_forward(x2d, prep).reshape(N)


# --------------------- one-time constant preparation ------------------------

def prepare_constants(params, N, H, W):
    """Precompute (outside the jitted hot path) the kernel constants:
    row-selection matrices R (f32), weight-scatter matrices M (bf16),
    BatchNorm pooling matrices P and lane-tiled gamma/beta (f32)."""
    prep = {}
    w_keys = ("w0", "w1", "w2", "w3", "w4")
    gb_keys = (None, ("g1", "b1"), ("g2", "b2"), ("g3", "b3"), None)
    Hin, Win = H, W
    for l, (cout, kh, kw, sh, sw, ph, pw, has_bn) in enumerate(_LAYER_CFG):
        w = params[w_keys[l]].astype(jnp.float32)        # [Cout, Cin, kh, kw]
        cin = w.shape[1]
        Ho = (Hin + 2 * ph - kh) // sh + 1
        Wo = (Win + 2 * pw - kw) // sw + 1

        # R[i][n*Ho+ho, n*Hin+h] = 1 iff h == ho*sh - ph + i (in range); rows
        # falling into the zero-padding region are all-zero.
        R = np.zeros((kh, N * Ho, N * Hin), np.float32)
        for i in range(kh):
            for n in range(N):
                for ho in range(Ho):
                    h = ho * sh - ph + i
                    if 0 <= h < Hin:
                        R[i, n * Ho + ho, n * Hin + h] = 1.0
        prep[f"R{l}"] = jnp.asarray(R)

        # S[v, wo, j] = 1 iff input col v == wo*sw - pw + j (in range).
        S = np.zeros((Win, Wo, kw), np.float32)
        for wo in range(Wo):
            for j in range(kw):
                v = wo * sw - pw + j
                if 0 <= v < Win:
                    S[v, wo, j] = 1.0
        # M[i][v*Cin+ci, wo*Cout+co] = w[co, ci, i, j] where v == wo*sw - pw + j
        M = jnp.einsum("vwj,ocij->ivcwo", jnp.asarray(S), w)
        prep[f"M{l}"] = M.reshape(kh, Win * cin, Wo * cout).astype(jnp.bfloat16)

        if has_bn:
            cnt = N * Ho * Wo
            P = np.kron(np.ones((Wo, Wo), np.float32),
                        np.eye(cout, dtype=np.float32)) / float(cnt)
            prep[f"P{l}"] = jnp.asarray(P)
            gk, bk = gb_keys[l]
            prep[f"g{l}"] = jnp.tile(params[gk].astype(jnp.float32), Wo).reshape(1, Wo * cout)
            prep[f"b{l}"] = jnp.tile(params[bk].astype(jnp.float32), Wo).reshape(1, Wo * cout)

        Hin, Win = Ho, Wo
    return prep


def init_params(key, ndf=NDF, nc=NC):
    ks = jax.random.split(key, 5)

    def w(k, shape):
        return 0.05 * jax.random.normal(k, shape, jnp.float32)

    return {
        "w0": w(ks[0], (ndf, nc, 4, 4)),
        "w1": w(ks[1], (ndf * 2, ndf, 3, 3)),
        "g1": jnp.ones((ndf * 2,), jnp.float32),
        "b1": jnp.zeros((ndf * 2,), jnp.float32),
        "w2": w(ks[2], (ndf * 4, ndf * 2, 3, 3)),
        "g2": jnp.ones((ndf * 4,), jnp.float32),
        "b2": jnp.zeros((ndf * 4,), jnp.float32),
        "w3": w(ks[3], (ndf * 8, ndf * 4, 3, 3)),
        "g3": jnp.ones((ndf * 8,), jnp.float32),
        "b3": jnp.zeros((ndf * 8,), jnp.float32),
        "w4": w(ks[4], (1, ndf * 8, 2, 1)),
    }


# TODO(synk): BatchNorm running-stat (momentum) buffer updates are not modeled;
# normalization uses train-mode batch statistics, matching a freshly
# constructed module's forward pass.

if __name__ == "__main__":
    key = jax.random.PRNGKey(0)
    pkey, xkey = jax.random.split(key)
    params = init_params(pkey)

    # 32x15 is the smallest natural spatial size for which the strided conv
    # stack collapses to a 1x1 output, so the final .view(N) is valid.
    N, H, W = 2, 32, 15
    x = jax.random.normal(xkey, (N, NC, H, W), jnp.float32)

    prep = prepare_constants(params, N, H, W)   # one-time, off the hot path

    fwd = jax.jit(discriminator_detalle_forward)
    out = jax.block_until_ready(fwd(x, prep))

    assert out.shape == (N,), out.shape
    assert bool(jnp.all((out >= 0.0) & (out <= 1.0)))
    print("KERNEL_OK")
</pallas_src>

<mosaic_0001>
module attributes {stable_mosaic.version = 11 : i64} {
  func.func @_fused_kernel(%arg0: i32, %arg1: memref<64x45xf32, #tpu.memory_space<vmem>>, %arg2: memref<4x32x64xf32, #tpu.memory_space<vmem>>, %arg3: memref<4x45x384xbf16, #tpu.memory_space<vmem>>, %arg4: memref<3x16x32xf32, #tpu.memory_space<vmem>>, %arg5: memref<3x384x384xbf16, #tpu.memory_space<vmem>>, %arg6: memref<384x384xf32, #tpu.memory_space<vmem>>, %arg7: memref<1x384xf32, #tpu.memory_space<vmem>>, %arg8: memref<1x384xf32, #tpu.memory_space<vmem>>, %arg9: memref<3x8x16xf32, #tpu.memory_space<vmem>>, %arg10: memref<3x384x384xbf16, #tpu.memory_space<vmem>>, %arg11: memref<384x384xf32, #tpu.memory_space<vmem>>, %arg12: memref<1x384xf32, #tpu.memory_space<vmem>>, %arg13: memref<1x384xf32, #tpu.memory_space<vmem>>, %arg14: memref<3x4x8xf32, #tpu.memory_space<vmem>>, %arg15: memref<3x384x256xbf16, #tpu.memory_space<vmem>>, %arg16: memref<256x256xf32, #tpu.memory_space<vmem>>, %arg17: memref<1x256xf32, #tpu.memory_space<vmem>>, %arg18: memref<1x256xf32, #tpu.memory_space<vmem>>, %arg19: memref<2x2x4xf32, #tpu.memory_space<vmem>>, %arg20: memref<2x256x1xbf16, #tpu.memory_space<vmem>>, %arg21: memref<2x1xf32, #tpu.memory_space<vmem>>) attributes {dimension_semantics = [#tpu.dimension_semantics<arbitrary>], iteration_bounds = array<i64: 1>, scalar_prefetch = 0 : i64, scratch_operands = 0 : i64, tpu.core_type = #tpu.core_type<tc>, window_params = [{pipeline_mode = #tpu.pipeline_mode<synchronous>, transform_indices = @transform_0, window_bounds = array<i64: 64, 45>}, {pipeline_mode = #tpu.pipeline_mode<synchronous>, transform_indices = @transform_1, window_bounds = array<i64: 4, 32, 64>}, {pipeline_mode = #tpu.pipeline_mode<synchronous>, transform_indices = @transform_2, window_bounds = array<i64: 4, 45, 384>}, {pipeline_mode = #tpu.pipeline_mode<synchronous>, transform_indices = @transform_3, window_bounds = array<i64: 3, 16, 32>}, {pipeline_mode = #tpu.pipeline_mode<synchronous>, transform_indices = @transform_4, window_bounds = array<i64: 3, 384, 384>}, {pipeline_mode = #tpu.pipeline_mode<synchronous>, transform_indices = @transform_5, window_bounds = array<i64: 384, 384>}, {pipeline_mode = #tpu.pipeline_mode<synchronous>, transform_indices = @transform_6, window_bounds = array<i64: 1, 384>}, {pipeline_mode = #tpu.pipeline_mode<synchronous>, transform_indices = @transform_7, window_bounds = array<i64: 1, 384>}, {pipeline_mode = #tpu.pipeline_mode<synchronous>, transform_indices = @transform_8, window_bounds = array<i64: 3, 8, 16>}, {pipeline_mode = #tpu.pipeline_mode<synchronous>, transform_indices = @transform_9, window_bounds = array<i64: 3, 384, 384>}, {pipeline_mode = #tpu.pipeline_mode<synchronous>, transform_indices = @transform_10, window_bounds = array<i64: 384, 384>}, {pipeline_mode = #tpu.pipeline_mode<synchronous>, transform_indices = @transform_11, window_bounds = array<i64: 1, 384>}, {pipeline_mode = #tpu.pipeline_mode<synchronous>, transform_indices = @transform_12, window_bounds = array<i64: 1, 384>}, {pipeline_mode = #tpu.pipeline_mode<synchronous>, transform_indices = @transform_13, window_bounds = array<i64: 3, 4, 8>}, {pipeline_mode = #tpu.pipeline_mode<synchronous>, transform_indices = @transform_14, window_bounds = array<i64: 3, 384, 256>}, {pipeline_mode = #tpu.pipeline_mode<synchronous>, transform_indices = @transform_15, window_bounds = array<i64: 256, 256>}, {pipeline_mode = #tpu.pipeline_mode<synchronous>, transform_indices = @transform_16, window_bounds = array<i64: 1, 256>}, {pipeline_mode = #tpu.pipeline_mode<synchronous>, transform_indices = @transform_17, window_bounds = array<i64: 1, 256>}, {pipeline_mode = #tpu.pipeline_mode<synchronous>, transform_indices = @transform_18, window_bounds = array<i64: 2, 2, 4>}, {pipeline_mode = #tpu.pipeline_mode<synchronous>, transform_indices = @transform_19, window_bounds = array<i64: 2, 256, 1>}, {pipeline_mode = #tpu.pipeline_mode<synchronous>, transform_indices = @transform_20, window_bounds = array<i64: 2, 1>}]} {
    %c0 = arith.constant 0 : index
    %c0_0 = arith.constant 0 : index
    %0 = vector.load %arg1[%c0, %c0_0] : memref<64x45xf32, #tpu.memory_space<vmem>>, vector<64x45xf32>
    %c0_1 = arith.constant 0 : index
    %c0_2 = arith.constant 0 : index
    %c0_3 = arith.constant 0 : index
    %1 = vector.load %arg2[%c0_1, %c0_2, %c0_3] : memref<4x32x64xf32, #tpu.memory_space<vmem>>, vector<1x32x64xf32>
    %2 = vector.shape_cast %1 : vector<1x32x64xf32> to vector<32x64xf32>
    %cst = arith.constant dense<0.000000e+00> : vector<32x45xf32>
    %3 = tpu.matmul %2, %0, %cst {dimension_numbers = #tpu.dot_dimension_numbers<[1], [0], [0], [1], [0, 0, 1, 1], [], []>} : vector<32x64xf32>, vector<64x45xf32>, vector<32x45xf32> -> vector<32x45xf32>
    %4 = arith.truncf %3 : vector<32x45xf32> to vector<32x45xbf16>
    %c0_4 = arith.constant 0 : index
    %c0_5 = arith.constant 0 : index
    %c0_6 = arith.constant 0 : index
    %5 = vector.load %arg3[%c0_4, %c0_5, %c0_6] : memref<4x45x384xbf16, #tpu.memory_space<vmem>>, vector<1x45x384xbf16>
    %6 = vector.shape_cast %5 : vector<1x45x384xbf16> to vector<45x384xbf16>
    %cst_7 = arith.constant dense<0.000000e+00> : vector<32x384xf32>
    %7 = tpu.matmul %4, %6, %cst_7 {dimension_numbers = #tpu.dot_dimension_numbers<[1], [0], [0], [1], [0, 0, 1, 1], [], []>} : vector<32x45xbf16>, vector<45x384xbf16>, vector<32x384xf32> -> vector<32x384xf32>
    %c1 = arith.constant 1 : index
    %c0_8 = arith.constant 0 : index
    %c0_9 = arith.constant 0 : index
    %8 = vector.load %arg2[%c1, %c0_8, %c0_9] : memref<4x32x64xf32, #tpu.memory_space<vmem>>, vector<1x32x64xf32>
    %9 = vector.shape_cast %8 : vector<1x32x64xf32> to vector<32x64xf32>
    %cst_10 = arith.constant dense<0.000000e+00> : vector<32x45xf32>
    %10 = tpu.matmul %9, %0, %cst_10 {dimension_numbers = #tpu.dot_dimension_numbers<[1], [0], [0], [1], [0, 0, 1, 1], [], []>} : vector<32x64xf32>, vector<64x45xf32>, vector<32x45xf32> -> vector<32x45xf32>
    %11 = arith.truncf %10 : vector<32x45xf32> to vector<32x45xbf16>
    %c1_11 = arith.constant 1 : index
    %c0_12 = arith.constant 0 : index
    %c0_13 = arith.constant 0 : index
    %12 = vector.load %arg3[%c1_11, %c0_12, %c0_13] : memref<4x45x384xbf16, #tpu.memory_space<vmem>>, vector<1x45x384xbf16>
    %13 = vector.shape_cast %12 : vector<1x45x384xbf16> to vector<45x384xbf16>
    %cst_14 = arith.constant dense<0.000000e+00> : vector<32x384xf32>
    %14 = tpu.matmul %11, %13, %cst_14 {dimension_numbers = #tpu.dot_dimension_numbers<[1], [0], [0], [1], [0, 0, 1, 1], [], []>} : vector<32x45xbf16>, vector<45x384xbf16>, vector<32x384xf32> -> vector<32x384xf32>
    %15 = arith.addf %7, %14 : vector<32x384xf32>
    %c2 = arith.constant 2 : index
    %c0_15 = arith.constant 0 : index
    %c0_16 = arith.constant 0 : index
    %16 = vector.load %arg2[%c2, %c0_15, %c0_16] : memref<4x32x64xf32, #tpu.memory_space<vmem>>, vector<1x32x64xf32>
    %17 = vector.shape_cast %16 : vector<1x32x64xf32> to vector<32x64xf32>
    %cst_17 = arith.constant dense<0.000000e+00> : vector<32x45xf32>
    %18 = tpu.matmul %17, %0, %cst_17 {dimension_numbers = #tpu.dot_dimension_numbers<[1], [0], [0], [1], [0, 0, 1, 1], [], []>} : vector<32x64xf32>, vector<64x45xf32>, vector<32x45xf32> -> vector<32x45xf32>
    %19 = arith.truncf %18 : vector<32x45xf32> to vector<32x45xbf16>
    %c2_18 = arith.constant 2 : index
    %c0_19 = arith.constant 0 : index
    %c0_20 = arith.constant 0 : index
    %20 = vector.load %arg3[%c2_18, %c0_19, %c0_20] : memref<4x45x384xbf16, #tpu.memory_space<vmem>>, vector<1x45x384xbf16>
    %21 = vector.shape_cast %20 : vector<1x45x384xbf16> to vector<45x384xbf16>
    %cst_21 = arith.constant dense<0.000000e+00> : vector<32x384xf32>
    %22 = tpu.matmul %19, %21, %cst_21 {dimension_numbers = #tpu.dot_dimension_numbers<[1], [0], [0], [1], [0, 0, 1, 1], [], []>} : vector<32x45xbf16>, vector<45x384xbf16>, vector<32x384xf32> -> vector<32x384xf32>
    %23 = arith.addf %15, %22 : vector<32x384xf32>
    %c3 = arith.constant 3 : index
    %c0_22 = arith.constant 0 : index
    %c0_23 = arith.constant 0 : index
    %24 = vector.load %arg2[%c3, %c0_22, %c0_23] : memref<4x32x64xf32, #tpu.memory_space<vmem>>, vector<1x32x64xf32>
    %25 = vector.shape_cast %24 : vector<1x32x64xf32> to vector<32x64xf32>
    %cst_24 = arith.constant dense<0.000000e+00> : vector<32x45xf32>
    %26 = tpu.matmul %25, %0, %cst_24 {dimension_numbers = #tpu.dot_dimension_numbers<[1], [0], [0], [1], [0, 0, 1, 1], [], []>} : vector<32x64xf32>, vector<64x45xf32>, vector<32x45xf32> -> vector<32x45xf32>
    %27 = arith.truncf %26 : vector<32x45xf32> to vector<32x45xbf16>
    %c3_25 = arith.constant 3 : index
    %c0_26 = arith.constant 0 : index
    %c0_27 = arith.constant 0 : index
    %28 = vector.load %arg3[%c3_25, %c0_26, %c0_27] : memref<4x45x384xbf16, #tpu.memory_space<vmem>>, vector<1x45x384xbf16>
    %29 = vector.shape_cast %28 : vector<1x45x384xbf16> to vector<45x384xbf16>
    %cst_28 = arith.constant dense<0.000000e+00> : vector<32x384xf32>
    %30 = tpu.matmul %27, %29, %cst_28 {dimension_numbers = #tpu.dot_dimension_numbers<[1], [0], [0], [1], [0, 0, 1, 1], [], []>} : vector<32x45xbf16>, vector<45x384xbf16>, vector<32x384xf32> -> vector<32x384xf32>
    %31 = arith.addf %23, %30 : vector<32x384xf32>
    %cst_29 = arith.constant 0.000000e+00 : f32
    %32 = vector.broadcast %cst_29 : f32 to vector<32x384xf32>
    %33 = arith.cmpf ogt, %31, %32 : vector<32x384xf32>
    %cst_30 = arith.constant 2.000000e-01 : f32
    %34 = vector.broadcast %cst_30 : f32 to vector<32x384xf32>
    %35 = arith.mulf %34, %31 : vector<32x384xf32>
    %36 = arith.select %33, %31, %35 : vector<32x384xi1>, vector<32x384xf32>
    %c0_31 = arith.constant 0 : index
    %c0_32 = arith.constant 0 : index
    %c0_33 = arith.constant 0 : index
    %37 = vector.load %arg4[%c0_31, %c0_32, %c0_33] : memref<3x16x32xf32, #tpu.memory_space<vmem>>, vector<1x16x32xf32>
    %38 = vector.shape_cast %37 : vector<1x16x32xf32> to vector<16x32xf32>
    %cst_34 = arith.constant dense<0.000000e+00> : vector<16x384xf32>
    %39 = tpu.matmul %38, %36, %cst_34 {dimension_numbers = #tpu.dot_dimension_numbers<[1], [0], [0], [1], [0, 0, 1, 1], [], []>} : vector<16x32xf32>, vector<32x384xf32>, vector<16x384xf32> -> vector<16x384xf32>
    %40 = arith.truncf %39 : vector<16x384xf32> to vector<16x384xbf16>
    %c0_35 = arith.constant 0 : index
    %c0_36 = arith.constant 0 : index
    %c0_37 = arith.constant 0 : index
    %41 = vector.load %arg5[%c0_35, %c0_36, %c0_37] : memref<3x384x384xbf16, #tpu.memory_space<vmem>>, vector<1x384x384xbf16>
    %42 = vector.shape_cast %41 : vector<1x384x384xbf16> to vector<384x384xbf16>
    %cst_38 = arith.constant dense<0.000000e+00> : vector<16x384xf32>
    %43 = tpu.matmul %40, %42, %cst_38 {dimension_numbers = #tpu.dot_dimension_numbers<[1], [0], [0], [1], [0, 0, 1, 1], [], []>} : vector<16x384xbf16>, vector<384x384xbf16>, vector<16x384xf32> -> vector<16x384xf32>
    %c1_39 = arith.constant 1 : index
    %c0_40 = arith.constant 0 : index
    %c0_41 = arith.constant 0 : index
    %44 = vector.load %arg4[%c1_39, %c0_40, %c0_41] : memref<3x16x32xf32, #tpu.memory_space<vmem>>, vector<1x16x32xf32>
    %45 = vector.shape_cast %44 : vector<1x16x32xf32> to vector<16x32xf32>
    %cst_42 = arith.constant dense<0.000000e+00> : vector<16x384xf32>
    %46 = tpu.matmul %45, %36, %cst_42 {dimension_numbers = #tpu.dot_dimension_numbers<[1], [0], [0], [1], [0, 0, 1, 1], [], []>} : vector<16x32xf32>, vector<32x384xf32>, vector<16x384xf32> -> vector<16x384xf32>
    %47 = arith.truncf %46 : vector<16x384xf32> to vector<16x384xbf16>
    %c1_43 = arith.constant 1 : index
    %c0_44 = arith.constant 0 : index
    %c0_45 = arith.constant 0 : index
    %48 = vector.load %arg5[%c1_43, %c0_44, %c0_45] : memref<3x384x384xbf16, #tpu.memory_space<vmem>>, vector<1x384x384xbf16>
    %49 = vector.shape_cast %48 : vector<1x384x384xbf16> to vector<384x384xbf16>
    %cst_46 = arith.constant dense<0.000000e+00> : vector<16x384xf32>
    %50 = tpu.matmul %47, %49, %cst_46 {dimension_numbers = #tpu.dot_dimension_numbers<[1], [0], [0], [1], [0, 0, 1, 1], [], []>} : vector<16x384xbf16>, vector<384x384xbf16>, vector<16x384xf32> -> vector<16x384xf32>
    %51 = arith.addf %43, %50 : vector<16x384xf32>
    %c2_47 = arith.constant 2 : index
    %c0_48 = arith.constant 0 : index
    %c0_49 = arith.constant 0 : index
    %52 = vector.load %arg4[%c2_47, %c0_48, %c0_49] : memref<3x16x32xf32, #tpu.memory_space<vmem>>, vector<1x16x32xf32>
    %53 = vector.shape_cast %52 : vector<1x16x32xf32> to vector<16x32xf32>
    %cst_50 = arith.constant dense<0.000000e+00> : vector<16x384xf32>
    %54 = tpu.matmul %53, %36, %cst_50 {dimension_numbers = #tpu.dot_dimension_numbers<[1], [0], [0], [1], [0, 0, 1, 1], [], []>} : vector<16x32xf32>, vector<32x384xf32>, vector<16x384xf32> -> vector<16x384xf32>
    %55 = arith.truncf %54 : vector<16x384xf32> to vector<16x384xbf16>
    %c2_51 = arith.constant 2 : index
    %c0_52 = arith.constant 0 : index
    %c0_53 = arith.constant 0 : index
    %56 = vector.load %arg5[%c2_51, %c0_52, %c0_53] : memref<3x384x384xbf16, #tpu.memory_space<vmem>>, vector<1x384x384xbf16>
    %57 = vector.shape_cast %56 : vector<1x384x384xbf16> to vector<384x384xbf16>
    %cst_54 = arith.constant dense<0.000000e+00> : vector<16x384xf32>
    %58 = tpu.matmul %55, %57, %cst_54 {dimension_numbers = #tpu.dot_dimension_numbers<[1], [0], [0], [1], [0, 0, 1, 1], [], []>} : vector<16x384xbf16>, vector<384x384xbf16>, vector<16x384xf32> -> vector<16x384xf32>
    %59 = arith.addf %51, %58 : vector<16x384xf32>
    %cst_55 = arith.constant dense<0.000000e+00> : vector<384xf32>
    %60 = vector.multi_reduction <add>, %59, %cst_55 [0] : vector<16x384xf32> to vector<384xf32>
    %61 = vector.shape_cast %60 : vector<384xf32> to vector<1x384xf32>
    %62 = arith.mulf %59, %59 : vector<16x384xf32>
    %cst_56 = arith.constant dense<0.000000e+00> : vector<384xf32>
    %63 = vector.multi_reduction <add>, %62, %cst_56 [0] : vector<16x384xf32> to vector<384xf32>
    %64 = vector.shape_cast %63 : vector<384xf32> to vector<1x384xf32>
    %c0_57 = arith.constant 0 : index
    %c0_58 = arith.constant 0 : index
    %65 = vector.load %arg6[%c0_57, %c0_58] : memref<384x384xf32, #tpu.memory_space<vmem>>, vector<384x384xf32>
    %cst_59 = arith.constant dense<0.000000e+00> : vector<1x384xf32>
    %66 = tpu.matmul %61, %65, %cst_59 {dimension_numbers = #tpu.dot_dimension_numbers<[1], [0], [0], [1], [0, 0, 1, 1], [], []>} : vector<1x384xf32>, vector<384x384xf32>, vector<1x384xf32> -> vector<1x384xf32>
    %c0_60 = arith.constant 0 : index
    %c0_61 = arith.constant 0 : index
    %67 = vector.load %arg6[%c0_60, %c0_61] : memref<384x384xf32, #tpu.memory_space<vmem>>, vector<384x384xf32>
    %cst_62 = arith.constant dense<0.000000e+00> : vector<1x384xf32>
    %68 = tpu.matmul %64, %67, %cst_62 {dimension_numbers = #tpu.dot_dimension_numbers<[1], [0], [0], [1], [0, 0, 1, 1], [], []>} : vector<1x384xf32>, vector<384x384xf32>, vector<1x384xf32> -> vector<1x384xf32>
    %69 = arith.mulf %66, %66 : vector<1x384xf32>
    %70 = arith.subf %68, %69 : vector<1x384xf32>
    %cst_63 = arith.constant 9.99999974E-6 : f32
    %71 = vector.broadcast %cst_63 : f32 to vector<1x384xf32>
    %72 = arith.addf %70, %71 : vector<1x384xf32>
    %73 = math.rsqrt %72 : vector<1x384xf32>
    %74 = vector.broadcast %66 : vector<1x384xf32> to vector<16x384xf32>
    %75 = arith.subf %59, %74 : vector<16x384xf32>
    %76 = vector.broadcast %73 : vector<1x384xf32> to vector<16x384xf32>
    %77 = arith.mulf %75, %76 : vector<16x384xf32>
    %c0_64 = arith.constant 0 : index
    %c0_65 = arith.constant 0 : index
    %78 = vector.load %arg7[%c0_64, %c0_65] : memref<1x384xf32, #tpu.memory_space<vmem>>, vector<1x384xf32>
    %79 = vector.broadcast %78 : vector<1x384xf32> to vector<16x384xf32>
    %80 = arith.mulf %77, %79 : vector<16x384xf32>
    %c0_66 = arith.constant 0 : index
    %c0_67 = arith.constant 0 : index
    %81 = vector.load %arg8[%c0_66, %c0_67] : memref<1x384xf32, #tpu.memory_space<vmem>>, vector<1x384xf32>
    %82 = vector.broadcast %81 : vector<1x384xf32> to vector<16x384xf32>
    %83 = arith.addf %80, %82 : vector<16x384xf32>
    %cst_68 = arith.constant 0.000000e+00 : f32
    %84 = vector.broadcast %cst_68 : f32 to vector<16x384xf32>
    %85 = arith.cmpf ogt, %83, %84 : vector<16x384xf32>
    %cst_69 = arith.constant 2.000000e-01 : f32
    %86 = vector.broadcast %cst_69 : f32 to vector<16x384xf32>
    %87 = arith.mulf %86, %83 : vector<16x384xf32>
    %88 = arith.select %85, %83, %87 : vector<16x384xi1>, vector<16x384xf32>
    %c0_70 = arith.constant 0 : index
    %c0_71 = arith.constant 0 : index
    %c0_72 = arith.constant 0 : index
    %89 = vector.load %arg9[%c0_70, %c0_71, %c0_72] : memref<3x8x16xf32, #tpu.memory_space<vmem>>, vector<1x8x16xf32>
    %90 = vector.shape_cast %89 : vector<1x8x16xf32> to vector<8x16xf32>
    %cst_73 = arith.constant dense<0.000000e+00> : vector<8x384xf32>
    %91 = tpu.matmul %90, %88, %cst_73 {dimension_numbers = #tpu.dot_dimension_numbers<[1], [0], [0], [1], [0, 0, 1, 1], [], []>} : vector<8x16xf32>, vector<16x384xf32>, vector<8x384xf32> -> vector<8x384xf32>
    %92 = arith.truncf %91 : vector<8x384xf32> to vector<8x384xbf16>
    %c0_74 = arith.constant 0 : index
    %c0_75 = arith.constant 0 : index
    %c0_76 = arith.constant 0 : index
    %93 = vector.load %arg10[%c0_74, %c0_75, %c0_76] : memref<3x384x384xbf16, #tpu.memory_space<vmem>>, vector<1x384x384xbf16>
    %94 = vector.shape_cast %93 : vector<1x384x384xbf16> to vector<384x384xbf16>
    %cst_77 = arith.constant dense<0.000000e+00> : vector<8x384xf32>
    %95 = tpu.matmul %92, %94, %cst_77 {dimension_numbers = #tpu.dot_dimension_numbers<[1], [0], [0], [1], [0, 0, 1, 1], [], []>} : vector<8x384xbf16>, vector<384x384xbf16>, vector<8x384xf32> -> vector<8x384xf32>
    %c1_78 = arith.constant 1 : index
    %c0_79 = arith.constant 0 : index
    %c0_80 = arith.constant 0 : index
    %96 = vector.load %arg9[%c1_78, %c0_79, %c0_80] : memref<3x8x16xf32, #tpu.memory_space<vmem>>, vector<1x8x16xf32>
    %97 = vector.shape_cast %96 : vector<1x8x16xf32> to vector<8x16xf32>
    %cst_81 = arith.constant dense<0.000000e+00> : vector<8x384xf32>
    %98 = tpu.matmul %97, %88, %cst_81 {dimension_numbers = #tpu.dot_dimension_numbers<[1], [0], [0], [1], [0, 0, 1, 1], [], []>} : vector<8x16xf32>, vector<16x384xf32>, vector<8x384xf32> -> vector<8x384xf32>
    %99 = arith.truncf %98 : vector<8x384xf32> to vector<8x384xbf16>
    %c1_82 = arith.constant 1 : index
    %c0_83 = arith.constant 0 : index
    %c0_84 = arith.constant 0 : index
    %100 = vector.load %arg10[%c1_82, %c0_83, %c0_84] : memref<3x384x384xbf16, #tpu.memory_space<vmem>>, vector<1x384x384xbf16>
    %101 = vector.shape_cast %100 : vector<1x384x384xbf16> to vector<384x384xbf16>
    %cst_85 = arith.constant dense<0.000000e+00> : vector<8x384xf32>
    %102 = tpu.matmul %99, %101, %cst_85 {dimension_numbers = #tpu.dot_dimension_numbers<[1], [0], [0], [1], [0, 0, 1, 1], [], []>} : vector<8x384xbf16>, vector<384x384xbf16>, vector<8x384xf32> -> vector<8x384xf32>
    %103 = arith.addf %95, %102 : vector<8x384xf32>
    %c2_86 = arith.constant 2 : index
    %c0_87 = arith.constant 0 : index
    %c0_88 = arith.constant 0 : index
    %104 = vector.load %arg9[%c2_86, %c0_87, %c0_88] : memref<3x8x16xf32, #tpu.memory_space<vmem>>, vector<1x8x16xf32>
    %105 = vector.shape_cast %104 : vector<1x8x16xf32> to vector<8x16xf32>
    %cst_89 = arith.constant dense<0.000000e+00> : vector<8x384xf32>
    %106 = tpu.matmul %105, %88, %cst_89 {dimension_numbers = #tpu.dot_dimension_numbers<[1], [0], [0], [1], [0, 0, 1, 1], [], []>} : vector<8x16xf32>, vector<16x384xf32>, vector<8x384xf32> -> vector<8x384xf32>
    %107 = arith.truncf %106 : vector<8x384xf32> to vector<8x384xbf16>
    %c2_90 = arith.constant 2 : index
    %c0_91 = arith.constant 0 : index
    %c0_92 = arith.constant 0 : index
    %108 = vector.load %arg10[%c2_90, %c0_91, %c0_92] : memref<3x384x384xbf16, #tpu.memory_space<vmem>>, vector<1x384x384xbf16>
    %109 = vector.shape_cast %108 : vector<1x384x384xbf16> to vector<384x384xbf16>
    %cst_93 = arith.constant dense<0.000000e+00> : vector<8x384xf32>
    %110 = tpu.matmul %107, %109, %cst_93 {dimension_numbers = #tpu.dot_dimension_numbers<[1], [0], [0], [1], [0, 0, 1, 1], [], []>} : vector<8x384xbf16>, vector<384x384xbf16>, vector<8x384xf32> -> vector<8x384xf32>
    %111 = arith.addf %103, %110 : vector<8x384xf32>
    %cst_94 = arith.constant dense<0.000000e+00> : vector<384xf32>
    %112 = vector.multi_reduction <add>, %111, %cst_94 [0] : vector<8x384xf32> to vector<384xf32>
    %113 = vector.shape_cast %112 : vector<384xf32> to vector<1x384xf32>
    %114 = arith.mulf %111, %111 : vector<8x384xf32>
    %cst_95 = arith.constant dense<0.000000e+00> : vector<384xf32>
    %115 = vector.multi_reduction <add>, %114, %cst_95 [0] : vector<8x384xf32> to vector<384xf32>
    %116 = vector.shape_cast %115 : vector<384xf32> to vector<1x384xf32>
    %c0_96 = arith.constant 0 : index
    %c0_97 = arith.constant 0 : index
    %117 = vector.load %arg11[%c0_96, %c0_97] : memref<384x384xf32, #tpu.memory_space<vmem>>, vector<384x384xf32>
    %cst_98 = arith.constant dense<0.000000e+00> : vector<1x384xf32>
    %118 = tpu.matmul %113, %117, %cst_98 {dimension_numbers = #tpu.dot_dimension_numbers<[1], [0], [0], [1], [0, 0, 1, 1], [], []>} : vector<1x384xf32>, vector<384x384xf32>, vector<1x384xf32> -> vector<1x384xf32>
    %c0_99 = arith.constant 0 : index
    %c0_100 = arith.constant 0 : index
    %119 = vector.load %arg11[%c0_99, %c0_100] : memref<384x384xf32, #tpu.memory_space<vmem>>, vector<384x384xf32>
    %cst_101 = arith.constant dense<0.000000e+00> : vector<1x384xf32>
    %120 = tpu.matmul %116, %119, %cst_101 {dimension_numbers = #tpu.dot_dimension_numbers<[1], [0], [0], [1], [0, 0, 1, 1], [], []>} : vector<1x384xf32>, vector<384x384xf32>, vector<1x384xf32> -> vector<1x384xf32>
    %121 = arith.mulf %118, %118 : vector<1x384xf32>
    %122 = arith.subf %120, %121 : vector<1x384xf32>
    %cst_102 = arith.constant 9.99999974E-6 : f32
    %123 = vector.broadcast %cst_102 : f32 to vector<1x384xf32>
    %124 = arith.addf %122, %123 : vector<1x384xf32>
    %125 = math.rsqrt %124 : vector<1x384xf32>
    %126 = vector.broadcast %118 : vector<1x384xf32> to vector<8x384xf32>
    %127 = arith.subf %111, %126 : vector<8x384xf32>
    %128 = vector.broadcast %125 : vector<1x384xf32> to vector<8x384xf32>
    %129 = arith.mulf %127, %128 : vector<8x384xf32>
    %c0_103 = arith.constant 0 : index
    %c0_104 = arith.constant 0 : index
    %130 = vector.load %arg12[%c0_103, %c0_104] : memref<1x384xf32, #tpu.memory_space<vmem>>, vector<1x384xf32>
    %131 = vector.broadcast %130 : vector<1x384xf32> to vector<8x384xf32>
    %132 = arith.mulf %129, %131 : vector<8x384xf32>
    %c0_105 = arith.constant 0 : index
    %c0_106 = arith.constant 0 : index
    %133 = vector.load %arg13[%c0_105, %c0_106] : memref<1x384xf32, #tpu.memory_space<vmem>>, vector<1x384xf32>
    %134 = vector.broadcast %133 : vector<1x384xf32> to vector<8x384xf32>
    %135 = arith.addf %132, %134 : vector<8x384xf32>
    %cst_107 = arith.constant 0.000000e+00 : f32
    %136 = vector.broadcast %cst_107 : f32 to vector<8x384xf32>
    %137 = arith.cmpf ogt, %135, %136 : vector<8x384xf32>
    %cst_108 = arith.constant 2.000000e-01 : f32
    %138 = vector.broadcast %cst_108 : f32 to vector<8x384xf32>
    %139 = arith.mulf %138, %135 : vector<8x384xf32>
    %140 = arith.select %137, %135, %139 : vector<8x384xi1>, vector<8x384xf32>
    %c0_109 = arith.constant 0 : index
    %c0_110 = arith.constant 0 : index
    %c0_111 = arith.constant 0 : index
    %141 = vector.load %arg14[%c0_109, %c0_110, %c0_111] : memref<3x4x8xf32, #tpu.memory_space<vmem>>, vector<1x4x8xf32>
    %142 = vector.shape_cast %141 : vector<1x4x8xf32> to vector<4x8xf32>
    %cst_112 = arith.constant dense<0.000000e+00> : vector<4x384xf32>
    %143 = tpu.matmul %142, %140, %cst_112 {dimension_numbers = #tpu.dot_dimension_numbers<[1], [0], [0], [1], [0, 0, 1, 1], [], []>} : vector<4x8xf32>, vector<8x384xf32>, vector<4x384xf32> -> vector<4x384xf32>
    %144 = arith.truncf %143 : vector<4x384xf32> to vector<4x384xbf16>
    %c0_113 = arith.constant 0 : index
    %c0_114 = arith.constant 0 : index
    %c0_115 = arith.constant 0 : index
    %145 = vector.load %arg15[%c0_113, %c0_114, %c0_115] : memref<3x384x256xbf16, #tpu.memory_space<vmem>>, vector<1x384x256xbf16>
    %146 = vector.shape_cast %145 : vector<1x384x256xbf16> to vector<384x256xbf16>
    %cst_116 = arith.constant dense<0.000000e+00> : vector<4x256xf32>
    %147 = tpu.matmul %144, %146, %cst_116 {dimension_numbers = #tpu.dot_dimension_numbers<[1], [0], [0], [1], [0, 0, 1, 1], [], []>} : vector<4x384xbf16>, vector<384x256xbf16>, vector<4x256xf32> -> vector<4x256xf32>
    %c1_117 = arith.constant 1 : index
    %c0_118 = arith.constant 0 : index
    %c0_119 = arith.constant 0 : index
    %148 = vector.load %arg14[%c1_117, %c0_118, %c0_119] : memref<3x4x8xf32, #tpu.memory_space<vmem>>, vector<1x4x8xf32>
    %149 = vector.shape_cast %148 : vector<1x4x8xf32> to vector<4x8xf32>
    %cst_120 = arith.constant dense<0.000000e+00> : vector<4x384xf32>
    %150 = tpu.matmul %149, %140, %cst_120 {dimension_numbers = #tpu.dot_dimension_numbers<[1], [0], [0], [1], [0, 0, 1, 1], [], []>} : vector<4x8xf32>, vector<8x384xf32>, vector<4x384xf32> -> vector<4x384xf32>
    %151 = arith.truncf %150 : vector<4x384xf32> to vector<4x384xbf16>
    %c1_121 = arith.constant 1 : index
    %c0_122 = arith.constant 0 : index
    %c0_123 = arith.constant 0 : index
    %152 = vector.load %arg15[%c1_121, %c0_122, %c0_123] : memref<3x384x256xbf16, #tpu.memory_space<vmem>>, vector<1x384x256xbf16>
    %153 = vector.shape_cast %152 : vector<1x384x256xbf16> to vector<384x256xbf16>
    %cst_124 = arith.constant dense<0.000000e+00> : vector<4x256xf32>
    %154 = tpu.matmul %151, %153, %cst_124 {dimension_numbers = #tpu.dot_dimension_numbers<[1], [0], [0], [1], [0, 0, 1, 1], [], []>} : vector<4x384xbf16>, vector<384x256xbf16>, vector<4x256xf32> -> vector<4x256xf32>
    %155 = arith.addf %147, %154 : vector<4x256xf32>
    %c2_125 = arith.constant 2 : index
    %c0_126 = arith.constant 0 : index
    %c0_127 = arith.constant 0 : index
    %156 = vector.load %arg14[%c2_125, %c0_126, %c0_127] : memref<3x4x8xf32, #tpu.memory_space<vmem>>, vector<1x4x8xf32>
    %157 = vector.shape_cast %156 : vector<1x4x8xf32> to vector<4x8xf32>
    %cst_128 = arith.constant dense<0.000000e+00> : vector<4x384xf32>
    %158 = tpu.matmul %157, %140, %cst_128 {dimension_numbers = #tpu.dot_dimension_numbers<[1], [0], [0], [1], [0, 0, 1, 1], [], []>} : vector<4x8xf32>, vector<8x384xf32>, vector<4x384xf32> -> vector<4x384xf32>
    %159 = arith.truncf %158 : vector<4x384xf32> to vector<4x384xbf16>
    %c2_129 = arith.constant 2 : index
    %c0_130 = arith.constant 0 : index
    %c0_131 = arith.constant 0 : index
    %160 = vector.load %arg15[%c2_129, %c0_130, %c0_131] : memref<3x384x256xbf16, #tpu.memory_space<vmem>>, vector<1x384x256xbf16>
    %161 = vector.shape_cast %160 : vector<1x384x256xbf16> to vector<384x256xbf16>
    %cst_132 = arith.constant dense<0.000000e+00> : vector<4x256xf32>
    %162 = tpu.matmul %159, %161, %cst_132 {dimension_numbers = #tpu.dot_dimension_numbers<[1], [0], [0], [1], [0, 0, 1, 1], [], []>} : vector<4x384xbf16>, vector<384x256xbf16>, vector<4x256xf32> -> vector<4x256xf32>
    %163 = arith.addf %155, %162 : vector<4x256xf32>
    %cst_133 = arith.constant dense<0.000000e+00> : vector<256xf32>
    %164 = vector.multi_reduction <add>, %163, %cst_133 [0] : vector<4x256xf32> to vector<256xf32>
    %165 = vector.shape_cast %164 : vector<256xf32> to vector<1x256xf32>
    %166 = arith.mulf %163, %163 : vector<4x256xf32>
    %cst_134 = arith.constant dense<0.000000e+00> : vector<256xf32>
    %167 = vector.multi_reduction <add>, %166, %cst_134 [0] : vector<4x256xf32> to vector<256xf32>
    %168 = vector.shape_cast %167 : vector<256xf32> to vector<1x256xf32>
    %c0_135 = arith.constant 0 : index
    %c0_136 = arith.constant 0 : index
    %169 = vector.load %arg16[%c0_135, %c0_136] : memref<256x256xf32, #tpu.memory_space<vmem>>, vector<256x256xf32>
    %cst_137 = arith.constant dense<0.000000e+00> : vector<1x256xf32>
    %170 = tpu.matmul %165, %169, %cst_137 {dimension_numbers = #tpu.dot_dimension_numbers<[1], [0], [0], [1], [0, 0, 1, 1], [], []>} : vector<1x256xf32>, vector<256x256xf32>, vector<1x256xf32> -> vector<1x256xf32>
    %c0_138 = arith.constant 0 : index
    %c0_139 = arith.constant 0 : index
    %171 = vector.load %arg16[%c0_138, %c0_139] : memref<256x256xf32, #tpu.memory_space<vmem>>, vector<256x256xf32>
    %cst_140 = arith.constant dense<0.000000e+00> : vector<1x256xf32>
    %172 = tpu.matmul %168, %171, %cst_140 {dimension_numbers = #tpu.dot_dimension_numbers<[1], [0], [0], [1], [0, 0, 1, 1], [], []>} : vector<1x256xf32>, vector<256x256xf32>, vector<1x256xf32> -> vector<1x256xf32>
    %173 = arith.mulf %170, %170 : vector<1x256xf32>
    %174 = arith.subf %172, %173 : vector<1x256xf32>
    %cst_141 = arith.constant 9.99999974E-6 : f32
    %175 = vector.broadcast %cst_141 : f32 to vector<1x256xf32>
    %176 = arith.addf %174, %175 : vector<1x256xf32>
    %177 = math.rsqrt %176 : vector<1x256xf32>
    %178 = vector.broadcast %170 : vector<1x256xf32> to vector<4x256xf32>
    %179 = arith.subf %163, %178 : vector<4x256xf32>
    %180 = vector.broadcast %177 : vector<1x256xf32> to vector<4x256xf32>
    %181 = arith.mulf %179, %180 : vector<4x256xf32>
    %c0_142 = arith.constant 0 : index
    %c0_143 = arith.constant 0 : index
    %182 = vector.load %arg17[%c0_142, %c0_143] : memref<1x256xf32, #tpu.memory_space<vmem>>, vector<1x256xf32>
    %183 = vector.broadcast %182 : vector<1x256xf32> to vector<4x256xf32>
    %184 = arith.mulf %181, %183 : vector<4x256xf32>
    %c0_144 = arith.constant 0 : index
    %c0_145 = arith.constant 0 : index
    %185 = vector.load %arg18[%c0_144, %c0_145] : memref<1x256xf32, #tpu.memory_space<vmem>>, vector<1x256xf32>
    %186 = vector.broadcast %185 : vector<1x256xf32> to vector<4x256xf32>
    %187 = arith.addf %184, %186 : vector<4x256xf32>
    %cst_146 = arith.constant 0.000000e+00 : f32
    %188 = vector.broadcast %cst_146 : f32 to vector<4x256xf32>
    %189 = arith.cmpf ogt, %187, %188 : vector<4x256xf32>
    %cst_147 = arith.constant 2.000000e-01 : f32
    %190 = vector.broadcast %cst_147 : f32 to vector<4x256xf32>
    %191 = arith.mulf %190, %187 : vector<4x256xf32>
    %192 = arith.select %189, %187, %191 : vector<4x256xi1>, vector<4x256xf32>
    %c0_148 = arith.constant 0 : index
    %c0_149 = arith.constant 0 : index
    %c0_150 = arith.constant 0 : index
    %193 = vector.load %arg19[%c0_148, %c0_149, %c0_150] : memref<2x2x4xf32, #tpu.memory_space<vmem>>, vector<1x2x4xf32>
    %194 = vector.shape_cast %193 : vector<1x2x4xf32> to vector<2x4xf32>
    %cst_151 = arith.constant dense<0.000000e+00> : vector<2x256xf32>
    %195 = tpu.matmul %194, %192, %cst_151 {dimension_numbers = #tpu.dot_dimension_numbers<[1], [0], [0], [1], [0, 0, 1, 1], [], []>} : vector<2x4xf32>, vector<4x256xf32>, vector<2x256xf32> -> vector<2x256xf32>
    %196 = arith.truncf %195 : vector<2x256xf32> to vector<2x256xbf16>
    %c0_152 = arith.constant 0 : index
    %c0_153 = arith.constant 0 : index
    %c0_154 = arith.constant 0 : index
    %197 = vector.load %arg20[%c0_152, %c0_153, %c0_154] : memref<2x256x1xbf16, #tpu.memory_space<vmem>>, vector<1x256x1xbf16>
    %198 = vector.shape_cast %197 : vector<1x256x1xbf16> to vector<256x1xbf16>
    %cst_155 = arith.constant dense<0.000000e+00> : vector<2x1xf32>
    %199 = tpu.matmul %196, %198, %cst_155 {dimension_numbers = #tpu.dot_dimension_numbers<[1], [0], [0], [1], [0, 0, 1, 1], [], []>} : vector<2x256xbf16>, vector<256x1xbf16>, vector<2x1xf32> -> vector<2x1xf32>
    %c1_156 = arith.constant 1 : index
    %c0_157 = arith.constant 0 : index
    %c0_158 = arith.constant 0 : index
    %200 = vector.load %arg19[%c1_156, %c0_157, %c0_158] : memref<2x2x4xf32, #tpu.memory_space<vmem>>, vector<1x2x4xf32>
    %201 = vector.shape_cast %200 : vector<1x2x4xf32> to vector<2x4xf32>
    %cst_159 = arith.constant dense<0.000000e+00> : vector<2x256xf32>
    %202 = tpu.matmul %201, %192, %cst_159 {dimension_numbers = #tpu.dot_dimension_numbers<[1], [0], [0], [1], [0, 0, 1, 1], [], []>} : vector<2x4xf32>, vector<4x256xf32>, vector<2x256xf32> -> vector<2x256xf32>
    %203 = arith.truncf %202 : vector<2x256xf32> to vector<2x256xbf16>
    %c1_160 = arith.constant 1 : index
    %c0_161 = arith.constant 0 : index
    %c0_162 = arith.constant 0 : index
    %204 = vector.load %arg20[%c1_160, %c0_161, %c0_162] : memref<2x256x1xbf16, #tpu.memory_space<vmem>>, vector<1x256x1xbf16>
    %205 = vector.shape_cast %204 : vector<1x256x1xbf16> to vector<256x1xbf16>
    %cst_163 = arith.constant dense<0.000000e+00> : vector<2x1xf32>
    %206 = tpu.matmul %203, %205, %cst_163 {dimension_numbers = #tpu.dot_dimension_numbers<[1], [0], [0], [1], [0, 0, 1, 1], [], []>} : vector<2x256xbf16>, vector<256x1xbf16>, vector<2x1xf32> -> vector<2x1xf32>
    %207 = arith.addf %199, %206 : vector<2x1xf32>
    %cst_164 = arith.constant 0.000000e+00 : f32
    %208 = vector.broadcast %cst_164 : f32 to vector<2x1xf32>
    %209 = arith.subf %208, %207 : vector<2x1xf32>
    %210 = math.exp %209 : vector<2x1xf32>
    %cst_165 = arith.constant 1.000000e+00 : f32
    %211 = vector.broadcast %cst_165 : f32 to vector<2x1xf32>
    %212 = arith.addf %211, %210 : vector<2x1xf32>
    %213 = tpu.reciprocal %212 {approx = true} : vector<2x1xf32> -> vector<2x1xf32>
    %cst_166 = arith.constant 1.000000e+00 : f32
    %214 = vector.broadcast %cst_166 : f32 to vector<2x1xf32>
    %215 = arith.minimumf %213, %214 : vector<2x1xf32>
    %c0_167 = arith.constant 0 : index
    %c0_168 = arith.constant 0 : index
    %216 = vector.load %arg21[%c0_167, %c0_168] : memref<2x1xf32, #tpu.memory_space<vmem>>, vector<2x1xf32>
    tpu.vector_store %arg21[%c0_167, %c0_168], %215 {strides = array<i32>} : memref<2x1xf32, #tpu.memory_space<vmem>>, vector<2x1xf32>,
    return
  }
  func.func @transform_0(%arg0: i32) -> (i32, i32) {
    %c0_i32 = arith.constant 0 : i32
    %c0_i32_0 = arith.constant 0 : i32
    %c0_i32_1 = arith.constant 0 : i32
    return %c0_i32, %c0_i32_0 : i32, i32
  }
  func.func @transform_1(%arg0: i32) -> (i32, i32, i32) {
    %c0_i32 = arith.constant 0 : i32
    %c0_i32_0 = arith.constant 0 : i32
    %c0_i32_1 = arith.constant 0 : i32
    %c0_i32_2 = arith.constant 0 : i32
    return %c0_i32, %c0_i32_0, %c0_i32_1 : i32, i32, i32
  }
  func.func @transform_2(%arg0: i32) -> (i32, i32, i32) {
    %c0_i32 = arith.constant 0 : i32
    %c0_i32_0 = arith.constant 0 : i32
    %c0_i32_1 = arith.constant 0 : i32
    %c0_i32_2 = arith.constant 0 : i32
    return %c0_i32, %c0_i32_0, %c0_i32_1 : i32, i32, i32
  }
  func.func @transform_3(%arg0: i32) -> (i32, i32, i32) {
    %c0_i32 = arith.constant 0 : i32
    %c0_i32_0 = arith.constant 0 : i32
    %c0_i32_1 = arith.constant 0 : i32
    %c0_i32_2 = arith.constant 0 : i32
    return %c0_i32, %c0_i32_0, %c0_i32_1 : i32, i32, i32
  }
  func.func @transform_4(%arg0: i32) -> (i32, i32, i32) {
    %c0_i32 = arith.constant 0 : i32
    %c0_i32_0 = arith.constant 0 : i32
    %c0_i32_1 = arith.constant 0 : i32
    %c0_i32_2 = arith.constant 0 : i32
    return %c0_i32, %c0_i32_0, %c0_i32_1 : i32, i32, i32
  }
  func.func @transform_5(%arg0: i32) -> (i32, i32) {
    %c0_i32 = arith.constant 0 : i32
    %c0_i32_0 = arith.constant 0 : i32
    %c0_i32_1 = arith.constant 0 : i32
    return %c0_i32, %c0_i32_0 : i32, i32
  }
  func.func @transform_6(%arg0: i32) -> (i32, i32) {
    %c0_i32 = arith.constant 0 : i32
    %c0_i32_0 = arith.constant 0 : i32
    %c0_i32_1 = arith.constant 0 : i32
    return %c0_i32, %c0_i32_0 : i32, i32
  }
  func.func @transform_7(%arg0: i32) -> (i32, i32) {
    %c0_i32 = arith.constant 0 : i32
    %c0_i32_0 = arith.constant 0 : i32
    %c0_i32_1 = arith.constant 0 : i32
    return %c0_i32, %c0_i32_0 : i32, i32
  }
  func.func @transform_8(%arg0: i32) -> (i32, i32, i32) {
    %c0_i32 = arith.constant 0 : i32
    %c0_i32_0 = arith.constant 0 : i32
    %c0_i32_1 = arith.constant 0 : i32
    %c0_i32_2 = arith.constant 0 : i32
    return %c0_i32, %c0_i32_0, %c0_i32_1 : i32, i32, i32
  }
  func.func @transform_9(%arg0: i32) -> (i32, i32, i32) {
    %c0_i32 = arith.constant 0 : i32
    %c0_i32_0 = arith.constant 0 : i32
    %c0_i32_1 = arith.constant 0 : i32
    %c0_i32_2 = arith.constant 0 : i32
    return %c0_i32, %c0_i32_0, %c0_i32_1 : i32, i32, i32
  }
  func.func @transform_10(%arg0: i32) -> (i32, i32) {
    %c0_i32 = arith.constant 0 : i32
    %c0_i32_0 = arith.constant 0 : i32
    %c0_i32_1 = arith.constant 0 : i32
    return %c0_i32, %c0_i32_0 : i32, i32
  }
  func.func @transform_11(%arg0: i32) -> (i32, i32) {
    %c0_i32 = arith.constant 0 : i32
    %c0_i32_0 = arith.constant 0 : i32
    %c0_i32_1 = arith.constant 0 : i32
    return %c0_i32, %c0_i32_0 : i32, i32
  }
  func.func @transform_12(%arg0: i32) -> (i32, i32) {
    %c0_i32 = arith.constant 0 : i32
    %c0_i32_0 = arith.constant 0 : i32
    %c0_i32_1 = arith.constant 0 : i32
    return %c0_i32, %c0_i32_0 : i32, i32
  }
  func.func @transform_13(%arg0: i32) -> (i32, i32, i32) {
    %c0_i32 = arith.constant 0 : i32
    %c0_i32_0 = arith.constant 0 : i32
    %c0_i32_1 = arith.constant 0 : i32
    %c0_i32_2 = arith.constant 0 : i32
    return %c0_i32, %c0_i32_0, %c0_i32_1 : i32, i32, i32
  }
  func.func @transform_14(%arg0: i32) -> (i32, i32, i32) {
    %c0_i32 = arith.constant 0 : i32
    %c0_i32_0 = arith.constant 0 : i32
    %c0_i32_1 = arith.constant 0 : i32
    %c0_i32_2 = arith.constant 0 : i32
    return %c0_i32, %c0_i32_0, %c0_i32_1 : i32, i32, i32
  }
  func.func @transform_15(%arg0: i32) -> (i32, i32) {
    %c0_i32 = arith.constant 0 : i32
    %c0_i32_0 = arith.constant 0 : i32
    %c0_i32_1 = arith.constant 0 : i32
    return %c0_i32, %c0_i32_0 : i32, i32
  }
  func.func @transform_16(%arg0: i32) -> (i32, i32) {
    %c0_i32 = arith.constant 0 : i32
    %c0_i32_0 = arith.constant 0 : i32
    %c0_i32_1 = arith.constant 0 : i32
    return %c0_i32, %c0_i32_0 : i32, i32
  }
  func.func @transform_17(%arg0: i32) -> (i32, i32) {
    %c0_i32 = arith.constant 0 : i32
    %c0_i32_0 = arith.constant 0 : i32
    %c0_i32_1 = arith.constant 0 : i32
    return %c0_i32, %c0_i32_0 : i32, i32
  }
  func.func @transform_18(%arg0: i32) -> (i32, i32, i32) {
    %c0_i32 = arith.constant 0 : i32
    %c0_i32_0 = arith.constant 0 : i32
    %c0_i32_1 = arith.constant 0 : i32
    %c0_i32_2 = arith.constant 0 : i32
    return %c0_i32, %c0_i32_0, %c0_i32_1 : i32, i32, i32
  }
  func.func @transform_19(%arg0: i32) -> (i32, i32, i32) {
    %c0_i32 = arith.constant 0 : i32
    %c0_i32_0 = arith.constant 0 : i32
    %c0_i32_1 = arith.constant 0 : i32
    %c0_i32_2 = arith.constant 0 : i32
    return %c0_i32, %c0_i32_0, %c0_i32_1 : i32, i32, i32
  }
  func.func @transform_20(%arg0: i32) -> (i32, i32) {
    %c0_i32 = arith.constant 0 : i32
    %c0_i32_0 = arith.constant 0 : i32
    %c0_i32_1 = arith.constant 0 : i32
    return %c0_i32, %c0_i32_0 : i32, i32
  }
}

</mosaic_0001>

<bundles_post_ra>
// kernel: discriminator_detalle_forward.1
= control target key start
LH: loop header
LB: loop body
LE: loop exit
PB: predicated region body
PF: predicated region fallthrough
CT: control target
= control target key end

     0   :  { %s15879_s0 = inlined_call_operand.vmem [shape: f32[64,45], index: 0, kind: input, shape index: {}]   ;;  %s15880_s1 = inlined_call_operand.hbm [shape: f32[4,32,64], index: 1, kind: input, shape index: {}]   ;;  %s15881_s2 = inlined_call_operand.vmem [shape: bf16[4,45,384], index: 2, kind: input, shape index: {}]   ;;  %s15882_s3 = inlined_call_operand.vmem [shape: f32[3,16,32], index: 3, kind: input, shape index: {}]   ;;  %s15883_s4 = inlined_call_operand.hbm [shape: bf16[3,384,384], index: 4, kind: input, shape index: {}]   ;;  %s15884_s5 = inlined_call_operand.vmem [shape: f32[384,384], index: 5, kind: input, shape index: {}]   ;;  %s15885_s6 = inlined_call_operand.vmem [shape: f32[1,384], index: 6, kind: input, shape index: {}]   ;;  %s15886_s7 = inlined_call_operand.vmem [shape: f32[1,384], index: 7, kind: input, shape index: {}]   ;;  %s15887_s8 = inlined_call_operand.vmem [shape: f32[3,8,16], index: 8, kind: input, shape index: {}]   ;;  %s15888_s9 = inlined_call_operand.hbm [shape: bf16[3,384,384], index: 9, kind: input, shape index: {}]   ;;  %s15889_s10 = inlined_call_operand.hbm [shape: f32[384,384], index: 10, kind: input, shape index: {}]   ;;  %s15890_s11 = inlined_call_operand.vmem [shape: f32[1,384], index: 11, kind: input, shape index: {}]   ;;  %s15891_s12 = inlined_call_operand.vmem [shape: f32[1,384], index: 12, kind: input, shape index: {}]   ;;  %s15892_s13 = inlined_call_operand.vmem [shape: f32[3,4,8], index: 13, kind: input, shape index: {}]   ;;  %s15893_s14 = inlined_call_operand.hbm [shape: bf16[3,384,256], index: 14, kind: input, shape index: {}]   ;;  %s15894_s15 = inlined_call_operand.hbm [shape: f32[256,256], index: 15, kind: input, shape index: {}]   ;;  %s15895_s16 = inlined_call_operand.vmem [shape: f32[1,256], index: 16, kind: input, shape index: {}]   ;;  %s15896_s17 = inlined_call_operand.vmem [shape: f32[1,256], index: 17, kind: input, shape index: {}]   ;;  %s15897_s18 = inlined_call_operand.vmem [shape: f32[2,2,4], index: 18, kind: input, shape index: {}]   ;;  %s15898_s19 = inlined_call_operand.vmem [shape: bf16[2,256,1], index: 19, kind: input, shape index: {}]   ;;  %s15899_s20 = inlined_call_operand.vmem [shape: f32[2,1], index: 20, kind: output, shape index: {}]  }
   0x1   :  { %16050 = sst [smem:[#allocation85_spill]] %s15879_s0 }
   0x2   :  { %16051 = sst [smem:[#allocation86_spill]] %s15880_s1 }
   0x3   :  { %16052 = sst [smem:[#allocation87_spill]] %s15881_s2 }
   0x4   :  { %16053 = sst [smem:[#allocation88_spill]] %s15882_s3 }
   0x5   :  { %16054 = sst [smem:[#allocation89_spill]] %s15883_s4 }
   0x6   :  { %25 = vsyncpa [#allocation3], 0 }
   0x7   :  { %26 = vsyncpa [#allocation5], 0 }
   0x8   :  { %27 = vsyncpa [#allocation8], 0 }
   0x9   :  { %28 = vsyncpa [#allocation11], 0  ;;  %s13064_s1 = smov [#allocation4]  }
   0xa   :  { %s52_s22 = sshll.u32 %s13064_s1, 4  ;;  %s53_s22 = int_to_ptr.vmem [resolvable:$true] %s52_s22 }
   0xb   :  { %s12944_s23 = scalar_lea.vmem %s53_s22, 27648  ;;  %p12949_p1 = scmp.lt.s32.totalorder %s53_s22, %s53_s22 }
   0xc   :  { %p12945_p0 = scmp.ne.s32.totalorder %s53_s22, %s12944_s23  ;;  %p12950_p2 = scmp.lt.s32.totalorder %s12944_s23, %s12944_s23 }
   0xe   :  { %p12951_p3 = por %p12950_p2, %p12949_p1 }
  0x10   :  { %p12952_p4 = pnand %p12951_p3, %p12945_p0 }
  0x12   :  { %12955 = shalt.err (!%p12952_p4)
}
  0x13   :  { %s15903_s24 = smov 192   ;;  %s15904_s2 = smov 12  }
  0x14   :  { %s16055_s26 = sld [smem:[#allocation89_spill]]  ;;  %s13067_s27 = smov [#allocation7]  }
  0x15   :  { %s84_s28 = sshll.u32 %s13067_s27, 4  ;;  %s85_s28 = int_to_ptr.vmem [resolvable:$true] %s84_s28 }
  0x16   :  { %s12964_s4 = scalar_lea.vmem %s85_s28, 18432  ;;  %p12969_p6 = scmp.lt.s32.totalorder %s85_s28, %s85_s28 }
  0x17   :  { %p12965_p5 = scmp.ne.s32.totalorder %s85_s28, %s12964_s4  ;;  %p12970_p7 = scmp.lt.s32.totalorder %s12964_s4, %s12964_s4 }
  0x19   :  { %p12971_p8 = por %p12970_p7, %p12969_p6 }
  0x1a   :  { %58 = dma.hbm_to_vmem [thread:$0]  %s16055_s26, 27648, %s53_s22, [#allocation5], %s15903_s24, %s15903_s24, %s15904_s2  }
  0x1b   :  { %p12972_p9 = pnand %p12971_p8, %p12965_p5 }
  0x1d   :  { %12975 = shalt.err (!%p12972_p9)
}
  0x1e   :  { %s13068_s29 = smov 384   ;;  %s13069_s30 = smov 24  }
  0x1f   :  { %90 = dma.hbm_to_vmem [thread:$0]  %s15889_s10, 18432, %s85_s28, [#allocation8], %s13068_s29, %s13068_s29, %s13069_s30  }
  0x20   :  { %s13070_s1 = smov [#allocation2]  }
  0x21   :  { %s36_s23 = sshll.u32 %s13070_s1, 4  ;;  %s37_s23 = int_to_ptr.vmem [resolvable:$true] %s36_s23 }
  0x22   :  { %s12984_s22 = scalar_lea.vmem %s37_s23, 2048  ;;  %p12989_p11 = scmp.lt.s32.totalorder %s37_s23, %s37_s23 }
  0x23   :  { %p12985_p10 = scmp.ne.s32.totalorder %s37_s23, %s12984_s22  ;;  %p12990_p12 = scmp.lt.s32.totalorder %s12984_s22, %s12984_s22 }
  0x25   :  { %p12991_p13 = por %p12990_p12, %p12989_p11 }
  0x27   :  { %p12992_p0 = pnand %p12991_p13, %p12985_p10 }
  0x29   :  { %12995 = shalt.err (!%p12992_p0)
}
  0x2a   :  { %s13071_s25 = smov 128   ;;  %s13072_s3 = smov 8  }
  0x2b   :  { %s16056_s4 = sld [smem:[#allocation86_spill]]  ;;  %s13073_s24 = smov [#allocation6]  }
  0x2c   :  { %s72_s2 = sshll.u32 %s13073_s24, 4  ;;  %s13074_s10 = smov [#allocation9]   ;;  %s73_s2 = int_to_ptr.vmem [resolvable:$true] %s72_s2 }
  0x2d   :  { %s102_s28 = sshll.u32 %s13074_s10, 4  ;;  %s13004_s29 = scalar_lea.vmem %s73_s2, 27648  ;;  %s103_s28 = int_to_ptr.vmem [resolvable:$true] %s102_s28 }
  0x2e   :  { %p13005_p1 = scmp.ne.s32.totalorder %s73_s2, %s13004_s29  ;;  %p13009_p2 = scmp.lt.s32.totalorder %s73_s2, %s73_s2 }
  0x2f   :  { %p13010_p3 = scmp.lt.s32.totalorder %s13004_s29, %s13004_s29 }
  0x31   :  { %42 = dma.hbm_to_vmem [thread:$0]  %s16056_s4, 2048, %s37_s23, [#allocation3], %s13071_s25, %s13071_s25, %s13072_s3  }
  0x32   :  { %p13011_p4 = por %p13010_p3, %p13009_p2 }
  0x34   :  { %p13012_p5 = pnand %p13011_p4, %p13005_p1 }
  0x36   :  { %13015 = shalt.err (!%p13012_p5)
}
  0x37   :  { %s16057_s30 = smov 12   ;;  %s16058_s0 = smov 192  }
  0x38   :  { %78 = dma.hbm_to_vmem [thread:$0]  %s15888_s9, 27648, %s73_s2, [#allocation5], %s16058_s0, %s16058_s0, %s16057_s30  }
  0x39   :  { %s13024_s23 = scalar_lea.vmem %s103_s28, 18432  ;;  %p13029_p7 = scmp.lt.s32.totalorder %s103_s28, %s103_s28 }
  0x3a   :  { %p13025_p6 = scmp.ne.s32.totalorder %s103_s28, %s13024_s23  ;;  %p13030_p8 = scmp.lt.s32.totalorder %s13024_s23, %s13024_s23 }
  0x3c   :  { %p13031_p9 = por %p13030_p8, %p13029_p7 }
  0x3e   :  { %p13032_p10 = pnand %p13031_p9, %p13025_p6 }
  0x40   :  { %13035 = shalt.err (!%p13032_p10)
}
  0x41   :  { %108 = dma.hbm_to_vmem [thread:$0]  %s15893_s14, 18432, %s103_s28, [#allocation8], %s13071_s25, %s13071_s25, %s13072_s3  }
  0x42   :  { %s13075_s26 = smov [#allocation10]  }
  0x43   :  { %s114_s27 = sshll.u32 %s13075_s26, 4  ;;  %s115_s27 = int_to_ptr.vmem [resolvable:$true] %s114_s27 }
  0x44   :  { %s13044_s4 = scalar_lea.vmem %s115_s27, 8192  ;;  %p13049_p12 = scmp.lt.s32.totalorder %s115_s27, %s115_s27 }
  0x45   :  { %p13045_p11 = scmp.ne.s32.totalorder %s115_s27, %s13044_s4  ;;  %p13050_p13 = scmp.lt.s32.totalorder %s13044_s4, %s13044_s4 }
  0x47   :  { %p13051_p0 = por %p13050_p13, %p13049_p12 }
  0x49   :  { %p13052_p1 = pnand %p13051_p0, %p13045_p11 }
  0x4b   :  { %13055 = shalt.err (!%p13052_p1)
}
  0x4c   :  { %s13076_s9 = smov 256   ;;  %s13077_s2 = smov 16  }
  0x4d   :  { %120 = dma.hbm_to_vmem [thread:$0]  %s15894_s15, 8192, %s115_s27, [#allocation11], %s13076_s9, %s13076_s9, %s13077_s2  }
  0x4e   :  { %13056 = dma.done.wait [#allocation3], 2048  }
  0x4f   :  { %13057 = vsyncadd [#allocation3], 4294965248 }
  0x50   :  { %13058 = dma.done.wait [#allocation5], 55296  }
  0x51   :  { %13059 = vsyncadd [#allocation5], 4294912000 }
  0x52   :  { %13060 = dma.done.wait [#allocation8], 36864  }
  0x53   :  { %13061 = vsyncadd [#allocation8], 4294930432 }
  0x54   :  { %13062 = dma.done.wait [#allocation11], 8192  }
  0x55   :  { %13063 = vsyncadd [#allocation11], 4294959104  ;;  %s16059_s3 = sld [smem:[#allocation85_spill]]  ;;  %vm441_vm0 = vcmask 1045504   ;;  %vm442_vm1 = vcmask 1046528   ;;  %v13078_v7 = vmov 65535  }
  0x56   :  { %v443_v8 = vsel %vm441_vm0, 4294967295, %v13078_v7  ;;  %s16060_s14 = sld [smem:[#allocation87_spill]]  ;;  %v156_v12 = vld [vmem:[#allocation2] sm:$0xff]  ;;  %vm160_vm2 = vcmask 523264   ;;  %v157_v17 = vld [vmem:[#allocation2 + $0x8] sm:$0xff]  ;;  %v158_v19 = vld [vmem:[#allocation2 + $0x10] sm:$0xff] }
  0x57   :  { %v273_v15 = vld [vmem:[#allocation2 + $0x20] sm:$0xff]  ;;  %v13254_v16 = vsel %vm442_vm1, %v443_v8, 0  ;;  %v274_v18 = vld [vmem:[#allocation2 + $0x28] sm:$0xff]  ;;  %v275_v20 = vld [vmem:[#allocation2 + $0x30] sm:$0xff]  ;;  %11577 = vmatprep.mubr.msk.f32.mxu0 %vm160_vm2, %v156_v12  ;;  %v15905_v35 = vmov 0   ;;  %vm434_vm3 = vcmask 367616  }
  0x58   :  { %11599 = vmatprep.mubr.msk.f32.mxu1 %vm160_vm2, %v273_v15  ;;  %v159_v23 = vld [vmem:[#allocation2 + $0x18] sm:$0xff]  ;;  %v719_v58 = vld [vmem:[#allocation2 + $0x40] sm:$0xff]  ;;  %v720_v61 = vld [vmem:[#allocation2 + $0x48] sm:$0xff]  ;;  %s16061_s29 = sld [smem:[#allocation88_spill]]  ;;  %vm1338_vm4 = vcmask 261120   ;;  %vm13081_vm1 = vmmov 0  }
  0x59   :  { %v276_v24 = vld [vmem:[#allocation2 + $0x38] sm:$0xff] }
  0x5b   :  { %v13214_v0 = vld [vmem:[%s16059_s3 + $0x38] sm:$0xff]  ;;  %v154_v1 = vld [vmem:[%s16059_s3 + $0x30] sm:$0xff]  ;;  %v153_v2 = vld [vmem:[%s16059_s3 + $0x28] sm:$0xff] }
  0x5c   :  { %11561 = vmatprep.subr.mxu0 %v13214_v0  ;;  %11583 = vmatprep.subr.mxu1 %v13214_v0  ;;  %v152_v3 = vld [vmem:[%s16059_s3 + $0x20] sm:$0xff]  ;;  %v151_v4 = vld [vmem:[%s16059_s3 + $0x18] sm:$0xff]  ;;  %v150_v5 = vld [vmem:[%s16059_s3 + $0x10] sm:$0xff] }
  0x5d   :  { %11562 = vmatpush3.msra.mxu0 %v13214_v0  ;;  %11584 = vmatpush3.msra.mxu1 %v13214_v0  ;;  %v149_v6 = vld [vmem:[%s16059_s3 + $0x8] sm:$0xff]  ;;  %v148_v9 = vld [vmem:[%s16059_s3] sm:$0xff]  ;;  %v12039_v14 = vld [vmem:[%s16060_s14 + $0x30] ss:$12 sps:$4 sm:$0x7f]  }
  0x5e   :  { %11563 = vmatprep.subr.mxu0 %v154_v1  ;;  %11585 = vmatprep.subr.mxu1 %v154_v1  ;;  %v12038_v10 = vld [vmem:[%s16060_s14 + $0x7c] ss:$12 sps:$4 sm:$0x7f]   ;;  %v12041_v11 = vld [vmem:[%s16060_s14 + $0x34] ss:$12 sps:$4 sm:$0x7f]   ;;  %v608_v26 = vand.u32 %v12039_v14, %v13254_v16 }
  0x5f   :  { %11564 = vmatpush3.msra.mxu0 %v154_v1  ;;  %11586 = vmatpush3.msra.mxu1 %v154_v1  ;;  %v12036_v13 = vld [vmem:[%s16060_s14 + $0x78] ss:$12 sps:$4 sm:$0x7f]   ;;  %v449_v21 = vand.u32 %v12038_v10, %v13254_v16  ;;  %v611_v22 = vand.u32 %v12041_v11, %v13254_v16  ;;  %v12047_v28 = vld [vmem:[%s16060_s14 + $0x1c] ss:$12 sps:$4 sm:$0xff]   ;;  %v13319_v51 = vld [vmem:[%s16059_s3 + $0x30] sm:$0xff] }
  0x60   :  { %11565 = vmatprep.subr.mxu0 %v153_v2  ;;  %11587 = vmatprep.subr.mxu1 %v153_v2  ;;  %v446_v25 = vand.u32 %v12036_v13, %v13254_v16  ;;  %v12044_v27 = vld [vmem:[%s16060_s14 + $0x64] ss:$12 sps:$4 sm:$0xff]   ;;  %v12042_v29 = vld [vmem:[%s16060_s14 + $0x60] ss:$12 sps:$4 sm:$0xff]   ;;  %v12048_v33 = vld [vmem:[%s16060_s14 + $0x48] ss:$12 sps:$4 sm:$0xff]  }
  0x61   :  { %11566 = vmatpush3.msra.mxu0 %v153_v2  ;;  %11588 = vmatpush3.msra.mxu1 %v153_v2  ;;  %v12045_v30 = vld [vmem:[%s16060_s14 + $0x18] ss:$12 sps:$4 sm:$0xff]   ;;  %v12051_v34 = vld [vmem:[%s16060_s14] ss:$12 sps:$4 sm:$0xff]   ;;  %v12055_v42 = vld [vmem:[%s16060_s14 + $0x68] ss:$12 sps:$4 sm:$0xff]  }
  0x62   :  { %11567 = vmatprep.subr.mxu0 %v152_v3  ;;  %11589 = vmatprep.subr.mxu1 %v152_v3  ;;  %v12050_v31 = vld [vmem:[%s16060_s14 + $0x4c] ss:$12 sps:$4 sm:$0xff]   ;;  %v12053_v32 = vld [vmem:[%s16060_s14 + $0x4] ss:$12 sps:$4 sm:$0xff]   ;;  %v12063_v11 = vld [vmem:[%s16060_s14 + $0xa8] ss:$12 sps:$4 sm:$0xff]  }
  0x63   :  { %11568 = vmatpush3.msra.mxu0 %v152_v3  ;;  %11590 = vmatpush3.msra.mxu1 %v152_v3  ;;  %v12054_v36 = vld [vmem:[%s16060_s14 + $0x80] ss:$12 sps:$4 sm:$0x7f]   ;;  %v12056_v47 = vld [vmem:[%s16060_s14 + $0x50] ss:$12 sps:$4 sm:$0xff]  }
  0x64   :  { %11569 = vmatprep.subr.mxu0 %v151_v4  ;;  %11591 = vmatprep.subr.mxu1 %v151_v4  ;;  %v452_v37 = vand.u32 %v12054_v36, %v13254_v16  ;;  %v13310_v48 = vld [vmem:[%s16059_s3 + $0x38] sm:$0xff]  ;;  %v13327_v53 = vld [vmem:[%s16059_s3 + $0x28] sm:$0xff]  ;;  %v13335_v56 = vld [vmem:[%s16059_s3 + $0x20] sm:$0xff] }
  0x65   :  { %11570 = vmatpush3.msra.mxu0 %v151_v4  ;;  %11592 = vmatpush3.msra.mxu1 %v151_v4  ;;  %v12057_v50 = vld [vmem:[%s16060_s14 + $0x38] ss:$12 sps:$4 sm:$0x7f]   ;;  %v13353_v60 = vld [vmem:[%s16059_s3 + $0x10] sm:$0xff]  ;;  %v12058_v62 = vld [vmem:[%s16060_s14 + $0x20] ss:$12 sps:$4 sm:$0xff]  }
  0x66   :  { %11571 = vmatprep.subr.mxu0 %v150_v5  ;;  %11593 = vmatprep.subr.mxu1 %v150_v5  ;;  %v614_v57 = vand.u32 %v12057_v50, %v13254_v16  ;;  %v13345_v59 = vld [vmem:[%s16059_s3 + $0x18] sm:$0xff]  ;;  %v13364_v63 = vld [vmem:[%s16059_s3 + $0x8] sm:$0xff]  ;;  %v13371_v1 = vld [vmem:[%s16059_s3] sm:$0xff] }
  0x67   :  { %11572 = vmatpush3.msra.mxu0 %v150_v5  ;;  %11594 = vmatpush3.msra.mxu1 %v150_v5  ;;  %v722_v2 = vld [vmem:[#allocation2 + $0x58] sm:$0xff]  ;;  %v12059_v3 = vld [vmem:[%s16060_s14 + $0x8] ss:$12 sps:$4 sm:$0xff]   ;;  %v12062_v4 = vld [vmem:[%s16060_s14 + $0xc4] ss:$12 sps:$4 sm:$0x7f]  }
  0x68   :  { %11573 = vmatprep.subr.mxu0 %v149_v6  ;;  %11595 = vmatprep.subr.mxu1 %v149_v6  ;;  %v12060_v5 = vld [vmem:[%s16060_s14 + $0xc0] ss:$12 sps:$4 sm:$0x7f]   ;;  %v12066_v8 = vld [vmem:[%s16060_s14 + $0xc8] ss:$12 sps:$4 sm:$0x7f]  }
  0x69   :  { %11574 = vmatpush3.msra.mxu0 %v149_v6  ;;  %11596 = vmatpush3.msra.mxu1 %v149_v6  ;;  %v890_v6 = vand.u32 %v12062_v4, %v13254_v16  ;;  %v887_v7 = vand.u32 %v12060_v5, %v13254_v16  ;;  %v893_v10 = vand.u32 %v12066_v8, %v13254_v16  ;;  %v12069_v12 = vld [vmem:[%s16060_s14 + $0x94] ss:$12 sps:$4 sm:$0xff]   ;;  %v12070_v13 = vld [vmem:[%s16060_s14 + $0xb0] ss:$12 sps:$4 sm:$0xff]   ;;  %v12071_v15 = vld [vmem:[%s16060_s14 + $0x98] ss:$12 sps:$4 sm:$0xff]  }
  0x6a   :  { %11575 = vmatprep.subr.mxu0 %v148_v9  ;;  %11597 = vmatprep.subr.mxu1 %v148_v9  ;;  %v12067_v14 = vld [vmem:[%s16060_s14 + $0x90] ss:$12 sps:$4 sm:$0xff]  }
  0x6b   :  { %11576 = vmatpush3.msra.mxu0 %v148_v9  ;;  %11598 = vmatpush3.msra.mxu1 %v148_v9  ;;  %v12065_v9 = vld [vmem:[%s16060_s14 + $0xac] ss:$12 sps:$4 sm:$0xff]  }
  0x6c   :  { %11578 = vmatmul.mubr.msk.f32.vlgmr.msra.gmra.mxu0 %vm160_vm2, %v157_v17  ;;  %11600 = vmatmul.mubr.msk.f32.vlgmr.msra.gmra.mxu1 %vm160_vm2, %v274_v18 }
  0x6d   :  { %11580 = vmatprep.mubr.msk.f32.mxu0 %vm160_vm2, %v158_v19  ;;  %11602 = vmatprep.mubr.msk.f32.mxu1 %vm160_vm2, %v275_v20 }
  0x6e   :  { %464 = vmatprep.subr.bf16.mxu0 %v449_v21  ;;  %626 = vmatprep.subr.bf16.mxu1 %v611_v22 }
  0x6f   :  { %465 = vmatpush1.bf16.msra.mxu0 %v446_v25  ;;  %627 = vmatpush1.bf16.msra.mxu1 %v608_v26 }
  0x70   :  { %11581 = vmatmul.mubr.msk.f32.gmra.mxu0 %vm160_vm2, %v159_v23  ;;  %11603 = vmatmul.mubr.msk.f32.gmra.mxu1 %vm160_vm2, %v276_v24 }
  0x71   :  { %466 = vmatprep.subr.bf16.mxu0 %v12044_v27  ;;  %628 = vmatprep.subr.bf16.mxu1 %v12047_v28 }
  0x72   :  { %486 = vmatprep.mubr.bf16.mxu0 %v15905_v35  ;;  %648 = vmatprep.mubr.bf16.mxu1 %v15905_v35 }
  0x73   :  { %467 = vmatpush1.bf16.msra.mxu0 %v12042_v29  ;;  %629 = vmatpush1.bf16.msra.mxu1 %v12045_v30 }
  0x74   :  { %468 = vmatprep.subr.bf16.mxu0 %v12050_v31  ;;  %630 = vmatprep.subr.bf16.mxu1 %v12053_v32 }
  0x77   :  { %469 = vmatpush1.bf16.msra.mxu0 %v12048_v33  ;;  %631 = vmatpush1.bf16.msra.mxu1 %v12051_v34 }
  0x78   :  { %11625 = vmatprep.subr.mxu1 %v13214_v0  ;;  %11605 = vmatprep.subr.bf16.mxu0 %v452_v37  ;;  %v721_v0 = vld [vmem:[#allocation2 + $0x50] sm:$0xff] }
 0x12c   :  { %v11579_v38 = vpop.f32.mrf.mxu0  ;;  %v11601_v39 = vpop.f32.mrf.mxu1 }
 0x12e   :  { %v239_v40 = vpop.f32.mrf.mxu0  ;;  %v355_v41 = vpop.f32.mrf.mxu1 }
 0x12f   :  { %v258_v43 = vpack.c.bf16 %v11579_v38, %v239_v40  ;;  %v374_v44 = vpack.c.bf16 %v11601_v39, %v355_v41 }
 0x130   :  { %v11582_v45 = vpop.f32.mrf.mxu0  ;;  %v11604_v46 = vpop.f32.mrf.mxu1 }
 0x131   :  { %10268 = vmatmul.mubr.msk.bf16.vlgmr.msra.gmra.mxu0 %vm434_vm3, %v374_v44  ;;  %10281 = vmatmul.mubr.msk.bf16.vlgmr.msra.gmra.mxu1 %vm434_vm3, %v258_v43 }
 0x132   :  { %11626 = vmatpush3.msra.mxu1 %v13310_v48  ;;  %11606 = vmatpush3.bf16.msra.mxu0 %v452_v37  ;;  %v365_v49 = vpop.f32.mrf.mxu1  ;;  %v249_v52 = vpop.f32.mrf.mxu0 }
 0x133   :  { %11627 = vmatprep.subr.mxu1 %v13319_v51  ;;  %496 = vmatprep.mubr.bf16.mxu0 %v15905_v35  ;;  %v375_v54 = vpack.c.bf16 %v11604_v46, %v365_v49  ;;  %v259_v55 = vpack.c.bf16 %v11582_v45, %v249_v52 }
 0x134   :  { %11628 = vmatpush3.msra.mxu1 %v13319_v51  ;;  %11607 = vmatprep.subr.bf16.mxu0 %v12055_v42 }
 0x135   :  { %11629 = vmatprep.subr.mxu1 %v13327_v53  ;;  %658 = vmatprep.mubr.bf16.mxu1 %v15905_v35 }
 0x136   :  { %11630 = vmatpush3.msra.mxu1 %v13327_v53  ;;  %11608 = vmatpush3.bf16.msra.mxu0 %v12055_v42 }
 0x137   :  { %11631 = vmatprep.subr.mxu1 %v13335_v56  ;;  %11609 = vmatprep.subr.bf16.mxu0 %v12056_v47 }
 0x138   :  { %11632 = vmatpush3.msra.mxu1 %v13335_v56 }
 0x139   :  { %10269 = vmatmul.mubr.msk.bf16.gmra.mxu0 %vm434_vm3, %v375_v54  ;;  %10282 = vmatmul.mubr.msk.bf16.gmra.mxu1 %vm434_vm3, %v259_v55 }
 0x13a   :  { %11633 = vmatprep.subr.mxu1 %v13345_v59  ;;  %11610 = vmatpush3.bf16.msra.mxu0 %v12056_v47 }
 0x13b   :  { %11634 = vmatpush3.msra.mxu1 %v13345_v59  ;;  %11611 = vmatprep.mubr.msk.bf16.mxu0 %vm434_vm3, %v374_v44 }
 0x13c   :  { %11635 = vmatprep.subr.mxu1 %v13353_v60  ;;  %11615 = vmatprep.subr.bf16.mxu0 %v614_v57 }
 0x13d   :  { %11636 = vmatpush3.msra.mxu1 %v13353_v60  ;;  %11641 = vmatprep.mubr.msk.f32.mxu1 %vm160_vm2, %v719_v58  ;;  %v12072_v58 = vld [vmem:[%s16060_s14 + $0x108] ss:$12 sps:$4 sm:$0x7f]  }
 0x13e   :  { %11637 = vmatprep.subr.mxu1 %v13364_v63 }
 0x13f   :  { %11638 = vmatpush3.msra.mxu1 %v13364_v63 }
 0x140   :  { %11639 = vmatprep.subr.mxu1 %v13371_v1 }
 0x141   :  { %11640 = vmatpush3.msra.mxu1 %v13371_v1  ;;  %11612 = vmatmul.mubr.msk.bf16.vlgmr.msra.gmra.mxu0 %vm434_vm3, %v375_v54  ;;  %v1011_v54 = vld [vmem:[#allocation2 + $0x68] sm:$0xff] }
 0x142   :  { %11616 = vmatpush3.bf16.msra.mxu0 %v614_v57  ;;  %11642 = vmatmul.mubr.msk.f32.vlgmr.msra.gmra.mxu1 %vm160_vm2, %v720_v61  ;;  %v12074_v57 = vld [vmem:[%s16060_s14 + $0x10c] ss:$12 sps:$4 sm:$0x7f]   ;;  %v12078_v61 = vld [vmem:[%s16060_s14 + $0x110] ss:$12 sps:$4 sm:$0x7f]  }
 0x143   :  { %11621 = vmatprep.mubr.msk.bf16.mxu0 %vm434_vm3, %v258_v43  ;;  %11617 = vmatprep.subr.bf16.mxu0 %v12058_v62 }
 0x144   :  { %11644 = vmatprep.mubr.msk.f32.mxu1 %vm160_vm2, %v721_v0  ;;  %11647 = vmatprep.subr.bf16.mxu1 %v893_v10  ;;  %v12075_v0 = vld [vmem:[%s16060_s14 + $0xf0] ss:$12 sps:$4 sm:$0xff]  }
 0x145   :  { %11648 = vmatpush3.bf16.msra.mxu1 %v893_v10 }
 0x146   :  { %11618 = vmatpush3.bf16.msra.mxu0 %v12058_v62  ;;  %11645 = vmatmul.mubr.msk.f32.gmra.mxu1 %vm160_vm2, %v722_v2  ;;  %v12077_v62 = vld [vmem:[%s16060_s14 + $0xf4] ss:$12 sps:$4 sm:$0xff]   ;;  %v12082_v2 = vld [vmem:[%s16060_s14 + $0xf8] ss:$12 sps:$4 sm:$0xff]  }
 0x147   :  { %11619 = vmatprep.subr.bf16.mxu0 %v12059_v3  ;;  %11649 = vmatprep.subr.bf16.mxu1 %v12070_v13 }
 0x149   :  { %11650 = vmatpush3.bf16.msra.mxu1 %v12070_v13 }
 0x14a   :  { %11620 = vmatpush3.bf16.msra.mxu0 %v12059_v3  ;;  %11651 = vmatprep.subr.bf16.mxu1 %v12071_v15  ;;  %v12083_v3 = vld [vmem:[%s16060_s14 + $0xe0] ss:$12 sps:$4 sm:$0xff]  }
 0x14b   :  { %905 = vmatprep.subr.bf16.mxu0 %v890_v6 }
 0x14d   :  { %11622 = vmatmul.mubr.msk.bf16.vlgmr.msra.gmra.mxu0 %vm434_vm3, %v259_v55  ;;  %11652 = vmatpush3.bf16.msra.mxu1 %v12071_v15  ;;  %v1012_v55 = vld [vmem:[#allocation2 + $0x70] sm:$0xff] }
 0x14e   :  { %927 = vmatprep.mubr.bf16.mxu0 %v15905_v35  ;;  %906 = vmatpush1.bf16.msra.mxu0 %v887_v7 }
 0x14f   :  { %907 = vmatprep.subr.bf16.mxu0 %v12065_v9 }
 0x152   :  { %908 = vmatpush1.bf16.msra.mxu0 %v12063_v11 }
 0x153   :  { %909 = vmatprep.subr.bf16.mxu0 %v12069_v12 }
 0x156   :  { %910 = vmatpush1.bf16.msra.mxu0 %v12067_v14 }
 0x157   :  { %11657 = vmatprep.subr.mxu0 %v13310_v48 }
 0x1f1   :  { %v488_v17 = vpop.f32.mrf.mxu0  ;;  %v650_v18 = vpop.f32.mrf.mxu1 }
 0x1f2   :  { %v13416_v19 = vadd.f32 %v650_v18, %v488_v17 }
 0x1f3   :  { %v13418_v20 = vpop.f32.mrf.mxu0  ;;  %v13420_v21 = vpop.f32.mrf.mxu1 }
 0x1f5   :  { %v492_v22 = vpop.f32.mrf.mxu0  ;;  %v654_v23 = vpop.f32.mrf.mxu1 }
 0x1f6   :  { %v13422_v24 = vadd.f32 %v654_v23, %v492_v22 }
 0x1f7   :  { %v13424_v25 = vpop.f32.mrf.mxu0  ;;  %v13426_v26 = vpop.f32.mrf.mxu1 }
 0x1f8   :  { %v657_v9 = vadd.f32 %v13426_v26, %v13424_v25 }
 0x1f9   :  { %v498_v27 = vpop.f32.mrf.mxu0  ;;  %v660_v28 = vpop.f32.mrf.mxu1 }
 0x1fa   :  { %v13428_v29 = vadd.f32 %v660_v28, %v498_v27 }
 0x1fb   :  { %v13430_v30 = vpop.f32.mrf.mxu0  ;;  %v13432_v31 = vpop.f32.mrf.mxu1 }
 0x1fc   :  { %v663_v14 = vadd.f32 %v13432_v31, %v13430_v30  ;;  %v13529_v31 = vld [vmem:[%s16061_s29] sm:$0xff] }
 0x1fd   :  { %v502_v32 = vpop.f32.mrf.mxu0  ;;  %v664_v33 = vpop.f32.mrf.mxu1 }
 0x1fe   :  { %v13434_v34 = vadd.f32 %v664_v33, %v502_v32  ;;  %v15907_v33 = vmov 0.0  }
 0x1ff   :  { %v13436_v36 = vpop.f32.mrf.mxu0  ;;  %v13438_v37 = vpop.f32.mrf.mxu1 }
 0x200   :  { %v667_v22 = vadd.f32 %v13438_v37, %v13436_v36 }
 0x201   :  { %v11613_v38 = vpop.f32.mrf.mxu0 }
 0x202   :  { %v11643_v39 = vpop.f32.mrf.mxu1 }
 0x203   :  { %v13440_v40 = vpop.f32.mrf.mxu0 }
 0x204   :  { %v801_v41 = vpop.f32.mrf.mxu1 }
 0x205   :  { %v820_v42 = vpack.c.bf16 %v11643_v39, %v801_v41  ;;  %v11614_v43 = vpop.f32.mrf.mxu0 }
 0x206   :  { %v11646_v44 = vpop.f32.mrf.mxu1 }
 0x207   :  { %10310 = vmatmul.mubr.msk.bf16.vlgmr.msra.gmra.mxu0 %vm434_vm3, %v820_v42  ;;  %11653 = vmatprep.mubr.msk.bf16.mxu1 %vm434_vm3, %v820_v42  ;;  %v13447_v47 = vpop.f32.mrf.mxu0 }
 0x208   :  { %v811_v45 = vpop.f32.mrf.mxu1  ;;  %11658 = vmatpush3.msra.mxu0 %v13310_v48  ;;  %937 = vmatprep.mubr.bf16.mxu0 %v15905_v35  ;;  %v1010_v48 = vld [vmem:[#allocation2 + $0x60] sm:$0xff] }
 0x209   :  { %v821_v46 = vpack.c.bf16 %v11646_v44, %v811_v45  ;;  %11659 = vmatprep.subr.mxu0 %v13319_v51 }
 0x20a   :  { %11660 = vmatpush3.msra.mxu0 %v13319_v51 }
 0x20b   :  { %11654 = vmatmul.mubr.msk.bf16.vlgmr.msra.gmra.mxu1 %vm434_vm3, %v821_v46  ;;  %11661 = vmatprep.subr.mxu0 %v13327_v53 }
 0x20c   :  { %11662 = vmatpush3.msra.mxu0 %v13327_v53  ;;  %1218 = vmatprep.mubr.bf16.mxu1 %v15905_v35 }
 0x20d   :  { %v11623_v49 = vpop.f32.mrf.mxu0  ;;  %11663 = vmatprep.subr.mxu0 %v13335_v56 }
 0x20e   :  { %v13455_v50 = vadd.f32 %v11623_v49, %v11613_v38  ;;  %11664 = vmatpush3.msra.mxu0 %v13335_v56  ;;  %v1013_v56 = vld [vmem:[#allocation2 + $0x78] sm:$0xff] }
 0x20f   :  { %v13458_v52 = vpop.f32.mrf.mxu0  ;;  %10311 = vmatmul.mubr.msk.bf16.gmra.mxu0 %vm434_vm3, %v821_v46  ;;  %11665 = vmatprep.subr.mxu0 %v13345_v59 }
 0x210   :  { %11666 = vmatpush3.msra.mxu0 %v13345_v59  ;;  %11673 = vmatprep.mubr.msk.f32.mxu0 %vm160_vm2, %v1010_v48  ;;  %v1181_v59 = vand.u32 %v12074_v57, %v13254_v16  ;;  %v704_v49 = vadd.f32 %v13458_v52, %v13440_v40 }
 0x211   :  { %v11624_v51 = vpop.f32.mrf.mxu0  ;;  %11667 = vmatprep.subr.mxu0 %v13353_v60 }
 0x212   :  { %v13465_v53 = vadd.f32 %v11624_v51, %v11614_v43  ;;  %11668 = vmatpush3.msra.mxu0 %v13353_v60  ;;  %v1178_v60 = vand.u32 %v12072_v58, %v13254_v16  ;;  %1196 = vmatprep.subr.bf16.mxu1 %v1181_v59  ;;  %v653_v59 = vadd.f32 %v13420_v21, %v13418_v20 }
 0x213   :  { %11669 = vmatprep.subr.mxu0 %v13364_v63  ;;  %v706_v4 = vpop.f32.mrf.mxu0 }
 0x214   :  { %11670 = vmatpush3.msra.mxu0 %v13364_v63  ;;  %1197 = vmatpush1.bf16.msra.mxu1 %v1178_v60  ;;  %v1184_v63 = vand.u32 %v12078_v61, %v13254_v16  ;;  %v12079_v16 = vld [vmem:[%s16060_s14 + $0xd8] ss:$12 sps:$4 sm:$0xff]  }
 0x215   :  { %11671 = vmatprep.subr.mxu0 %v13371_v1  ;;  %1198 = vmatprep.subr.bf16.mxu1 %v12077_v62 }
 0x216   :  { %11672 = vmatpush3.msra.mxu0 %v13371_v1  ;;  %v12081_v1 = vld [vmem:[%s16060_s14 + $0xdc] ss:$12 sps:$4 sm:$0xff]  }
 0x217   :  { %11674 = vmatmul.mubr.msk.f32.vlgmr.msra.gmra.mxu0 %vm160_vm2, %v1011_v54  ;;  %11679 = vmatprep.subr.bf16.mxu0 %v1184_v63  ;;  %v707_v54 = vadd.f32 %v706_v4, %v13447_v47 }
 0x218   :  { %11676 = vmatprep.mubr.msk.f32.mxu0 %vm160_vm2, %v1012_v55  ;;  %1199 = vmatpush1.bf16.msra.mxu1 %v12075_v0 }
 0x219   :  { %11680 = vmatpush3.bf16.msra.mxu0 %v1184_v63  ;;  %1200 = vmatprep.subr.bf16.mxu1 %v12081_v1 }
 0x21a   :  { %11681 = vmatprep.subr.bf16.mxu0 %v12082_v2 }
 0x21b   :  { %11677 = vmatmul.mubr.msk.f32.gmra.mxu0 %vm160_vm2, %v1013_v56 }
 0x21c   :  { %1201 = vmatpush1.bf16.msra.mxu1 %v12079_v16 }
 0x21d   :  { %11682 = vmatpush3.bf16.msra.mxu0 %v12082_v2 }
 0x21e   :  { %11683 = vmatprep.subr.bf16.mxu0 %v12083_v3 }
 0x221   :  { %11684 = vmatpush3.bf16.msra.mxu0 %v12083_v3 }
 0x2c7   :  { %v929_v5 = vpop.f32.mrf.mxu0 }
 0x2c8   :  { %v13506_v6 = vadd.f32 %v929_v5, %v13416_v19 }
 0x2c9   :  { %v931_v7 = vpop.f32.mrf.mxu0 }
 0x2ca   :  { %v998_v40 = vadd.f32 %v931_v7, %v653_v59  ;;  %v12126_v59 = vld [vmem:[#allocation4 + $0x408] ss:$12 sps:$4 sm:$0xff]  }
 0x2cb   :  { %v933_v8 = vpop.f32.mrf.mxu0 }
 0x2cc   :  { %v13511_v10 = vadd.f32 %v933_v8, %v13422_v24 }
 0x2cd   :  { %v935_v11 = vpop.f32.mrf.mxu0 }
 0x2ce   :  { %v13513_v12 = vadd.f32 %v935_v11, %v657_v9 }
 0x2cf   :  { %v939_v13 = vpop.f32.mrf.mxu0 }
 0x2d0   :  { %v1003_v15 = vadd.f32 %v939_v13, %v13428_v29 }
 0x2d1   :  { %v941_v17 = vpop.f32.mrf.mxu0 }
 0x2d2   :  { %v1004_v18 = vadd.f32 %v941_v17, %v663_v14 }
 0x2d3   :  { %v943_v19 = vpop.f32.mrf.mxu0 }
 0x2d4   :  { %v1006_v23 = vadd.f32 %v943_v19, %v13434_v34  ;;  %v11655_v34 = vpop.f32.mrf.mxu1 }
 0x2d5   :  { %v945_v25 = vpop.f32.mrf.mxu0  ;;  %v1005_v44 = vadd.f32 %v11655_v34, %v13455_v50  ;;  %v10347_v34 = vld [vmem:[%s16061_s29 + $0x10] sm:$0xff] }
 0x2d6   :  { %v1007_v24 = vadd.f32 %v945_v25, %v667_v22  ;;  %v982_v36 = vpop.f32.mrf.mxu1 }
 0x2d7   :  { %v11675_v26 = vpop.f32.mrf.mxu0  ;;  %v999_v57 = vadd.f32 %v982_v36, %v704_v49  ;;  %v10348_v36 = vld [vmem:[%s16061_s29 + $0x18] sm:$0xff] }
 0x2d8   :  { %v11656_v37 = vpop.f32.mrf.mxu1  ;;  %v12114_v49 = vld [vmem:[#allocation4 + $0x438] ss:$12 sps:$4 sm:$0xff]  }
 0x2d9   :  { %v1092_v27 = vpop.f32.mrf.mxu0  ;;  %v1008_v48 = vadd.f32 %v11656_v37, %v13465_v53  ;;  %v12104_v37 = vld [vmem:[#allocation4 + $0x46c] ss:$12 sps:$4 sm:$0xff]  }
 0x2da   :  { %v1111_v28 = vpack.c.bf16 %v11675_v26, %v1092_v27  ;;  %v985_v38 = vpop.f32.mrf.mxu1 }
 0x2db   :  { %v11678_v32 = vpop.f32.mrf.mxu0  ;;  %v1002_v60 = vadd.f32 %v985_v38, %v707_v54  ;;  %v12110_v38 = vld [vmem:[#allocation4 + $0x454] ss:$12 sps:$4 sm:$0xff]   ;;  %v12095_v54 = vld [vmem:[#allocation4 + $0x2a4] ss:$12 sps:$4 sm:$0xff]  }
 0x2dc   :  { %10339 = vmatmul.mubr.msk.bf16.vlgmr.msra.gmra.mxu1 %vm434_vm3, %v1111_v28  ;;  %11685 = vmatprep.mubr.msk.bf16.mxu0 %vm434_vm3, %v1111_v28 }
 0x2dd   :  { %v1102_v30 = vpop.f32.mrf.mxu0  ;;  %1228 = vmatprep.mubr.bf16.mxu1 %v15905_v35 }
 0x2de   :  { %v1112_v29 = vpack.c.bf16 %v11678_v32, %v1102_v30 }
 0x2e0   :  { %11686 = vmatmul.mubr.msk.bf16.vlgmr.msra.gmra.mxu0 %vm434_vm3, %v1112_v29 }
 0x2e1   :  { %1409 = vmatprep.mubr.f32.mxu0 %v15907_v33 }
 0x2e4   :  { %10340 = vmatmul.mubr.msk.bf16.gmra.mxu1 %vm434_vm3, %v1112_v29 }
 0x2e5   :  { %11697 = vmatprep.mubr.msk.f32.mxu1 %vm1338_vm4, %v13529_v31 }
 0x39c   :  { %v1220_v39 = vpop.f32.mrf.mxu1 }
 0x39e   :  { %v1222_v41 = vpop.f32.mrf.mxu1 }
 0x39f   :  { %v1289_v16 = vadd.f32 %v1222_v41, %v998_v40  ;;  %v12084_v41 = vld [vmem:[#allocation4 + $0x2e8] ss:$12 sps:$4 sm:$0xff]   ;;  %v12105_v40 = vld [vmem:[#allocation4 + $0x258] ss:$12 sps:$4 sm:$0xff]  }
 0x3a0   :  { %v1224_v42 = vpop.f32.mrf.mxu1  ;;  %v11687_v43 = vpop.f32.mrf.mxu0 }
 0x3a1   :  { %v1296_v51 = vadd.f32 %v11687_v43, %v1005_v44  ;;  %v1291_v9 = vadd.f32 %v1224_v42, %v13511_v10  ;;  %vm1301_vm15 = vcmp.gt.f32.partialorder %v1289_v16, 0.0  ;;  %v12089_v42 = vld [vmem:[#allocation4 + $0x2d4] ss:$12 sps:$4 sm:$0xff]   ;;  %v12108_v43 = vld [vmem:[#allocation4 + $0x450] ss:$12 sps:$4 sm:$0xff]  }
 0x3a2   :  { %v1226_v45 = vpop.f32.mrf.mxu1  ;;  %v1273_v46 = vpop.f32.mrf.mxu0  ;;  %v12116_v44 = vld [vmem:[#allocation4 + $0x43c] ss:$12 sps:$4 sm:$0xff]  }
 0x3a3   :  { %v1320_v62 = vmul.f32 0.2, %v1296_v51  ;;  %v1290_v63 = vadd.f32 %v1273_v46, %v999_v57  ;;  %vm1308_vm6 = vcmp.gt.f32.partialorder %v1296_v51, 0.0  ;;  %v1292_v5 = vadd.f32 %v1226_v45, %v13513_v12  ;;  %v12087_v45 = vld [vmem:[#allocation4 + $0x2d0] ss:$12 sps:$4 sm:$0xff]  }
 0x3a4   :  { %v1230_v55 = vpop.f32.mrf.mxu1  ;;  %v11688_v56 = vpop.f32.mrf.mxu0  ;;  %v1288_v12 = vadd.f32 %v1220_v39, %v13506_v6  ;;  %v1315_v22 = vmul.f32 0.2, %v1291_v9  ;;  %v1337_v6 = vld [vmem:[%s16061_s29 + $0x8] sm:$0xff]  ;;  %vm1303_vm14 = vcmp.gt.f32.partialorder %v1291_v9, 0.0 }
 0x3a5   :  { %v1299_v58 = vadd.f32 %v11688_v56, %v1008_v48  ;;  %v1294_v3 = vadd.f32 %v1230_v55, %v1003_v15  ;;  %v13544_v21 = vsel %vm1308_vm6, %v1296_v51, %v1320_v62  ;;  %v1314_v8 = vmul.f32 0.2, %v1290_v63  ;;  %v12086_v39 = vld [vmem:[#allocation4 + $0x2ec] ss:$12 sps:$4 sm:$0xff]   ;;  %v12092_v46 = vld [vmem:[#allocation4 + $0x2bc] ss:$12 sps:$4 sm:$0xff]  }
 0x3a6   :  { %v1232_v61 = vpop.f32.mrf.mxu1  ;;  %v1276_v50 = vpop.f32.mrf.mxu0  ;;  %vm1302_vm8 = vcmp.gt.f32.partialorder %v1290_v63, 0.0  ;;  %v1316_v19 = vmul.f32 0.2, %v1292_v5  ;;  %vm1304_vm13 = vcmp.gt.f32.partialorder %v1292_v5, 0.0  ;;  %v1312_v26 = vmul.f32 0.2, %v1288_v12 }
 0x3a7   :  { %vm1311_vm5 = vcmp.gt.f32.partialorder %v1299_v58, 0.0  ;;  %v1323_v0 = vmul.f32 0.2, %v1299_v58  ;;  %v1295_v52 = vadd.f32 %v1232_v61, %v1004_v18  ;;  %v1293_v53 = vadd.f32 %v1276_v50, %v1002_v60  ;;  %v12122_v48 = vld [vmem:[#allocation4 + $0x424] ss:$12 sps:$4 sm:$0xff]  }
 0x3a8   :  { %v1234_v1 = vpop.f32.mrf.mxu1  ;;  %v1318_v17 = vmul.f32 0.2, %v1294_v3  ;;  %v13555_v18 = vsel %vm1302_vm8, %v1290_v63, %v1314_v8  ;;  %vm1306_vm12 = vcmp.gt.f32.partialorder %v1294_v3, 0.0  ;;  %vm1300_vm0 = vcmp.gt.f32.partialorder %v1288_v12, 0.0  ;;  %v12090_v51 = vld [vmem:[#allocation4 + $0x2b8] ss:$12 sps:$4 sm:$0xff]  }
 0x3a9   :  { %v13541_v47 = vsel %vm1311_vm5, %v1299_v58, %v1323_v0  ;;  %v1297_v2 = vadd.f32 %v1234_v1, %v1006_v23  ;;  %vm1305_vm7 = vcmp.gt.f32.partialorder %v1293_v53, 0.0  ;;  %v1317_v4 = vmul.f32 0.2, %v1293_v53  ;;  %v12120_v55 = vld [vmem:[#allocation4 + $0x420] ss:$12 sps:$4 sm:$0xff]  }
 0x3aa   :  { %v1236_v20 = vpop.f32.mrf.mxu1  ;;  %11689 = vmatprep.subr.mxu1 %v13541_v47  ;;  %v1319_v11 = vmul.f32 0.2, %v1295_v52  ;;  %vm1307_vm11 = vcmp.gt.f32.partialorder %v1295_v52, 0.0  ;;  %v13575_v27 = vsel %vm1306_vm12, %v1294_v3, %v1318_v17  ;;  %v13579_v28 = vsel %vm1304_vm13, %v1292_v5, %v1316_v19  ;;  %v12128_v56 = vld [vmem:[#allocation4 + $0x40c] ss:$12 sps:$4 sm:$0xff]  }
 0x3ab   :  { %v1298_v7 = vadd.f32 %v1236_v20, %v1007_v24  ;;  %11690 = vmatpush3.msra.mxu1 %v13541_v47  ;;  %v1321_v13 = vmul.f32 0.2, %v1297_v2  ;;  %v13550_v14 = vsel %vm1305_vm7, %v1293_v53, %v1317_v4  ;;  %vm1309_vm9 = vcmp.gt.f32.partialorder %v1297_v2, 0.0  ;;  %v12093_v57 = vld [vmem:[#allocation4 + $0x2a0] ss:$12 sps:$4 sm:$0xff]  }
 0x3ac   :  { %11691 = vmatprep.subr.mxu1 %v13544_v21  ;;  %v13570_v25 = vsel %vm1307_vm11, %v1295_v52, %v1319_v11  ;;  %v1313_v24 = vmul.f32 0.2, %v1289_v16  ;;  %v13584_v32 = vsel %vm1303_vm14, %v1291_v9, %v1315_v22  ;;  %v13592_v29 = vsel %vm1300_vm0, %v1288_v12, %v1312_v26  ;;  %v12098_v58 = vld [vmem:[#allocation4 + $0x28c] ss:$12 sps:$4 sm:$0xff]   ;;  %v12134_v60 = vld [vmem:[#allocation4 + $0x3f4] ss:$12 sps:$4 sm:$0xff]  }
 0x3ad   :  { %11692 = vmatpush3.msra.mxu1 %v13544_v21  ;;  %vm1310_vm10 = vcmp.gt.f32.partialorder %v1298_v7, 0.0  ;;  %v1322_v15 = vmul.f32 0.2, %v1298_v7  ;;  %v13563_v23 = vsel %vm1309_vm9, %v1297_v2, %v1321_v13  ;;  %v12096_v61 = vld [vmem:[#allocation4 + $0x288] ss:$12 sps:$4 sm:$0xff]   ;;  %vm4649_vm6 = vcmask 130048  }
 0x3ae   :  { %11693 = vmatprep.subr.mxu1 %v13550_v14  ;;  %v13588_v30 = vsel %vm1301_vm15, %v1289_v16, %v1313_v24  ;;  %v12101_v50 = vld [vmem:[#allocation4 + $0x274] ss:$12 sps:$4 sm:$0xff]   ;;  %v12132_v62 = vld [vmem:[#allocation4 + $0x3f0] ss:$12 sps:$4 sm:$0xff]   ;;  %v12119_v1 = vld [vmem:[#allocation4 + $0x3ac] ss:$12 sps:$4 sm:$0xff]  }
 0x3af   :  { %11694 = vmatpush3.msra.mxu1 %v13550_v14  ;;  %v13558_v10 = vsel %vm1310_vm10, %v1298_v7, %v1322_v15  ;;  %v12099_v63 = vld [vmem:[#allocation4 + $0x270] ss:$12 sps:$4 sm:$0xff]   ;;  %v12111_v53 = vld [vmem:[#allocation4 + $0x240] ss:$12 sps:$4 sm:$0xff]   ;;  %v12117_v2 = vld [vmem:[#allocation4 + $0x3a8] ss:$12 sps:$4 sm:$0xff]  }
 0x3b0   :  { %1369 = vmatprep.subr.mxu0 %v13558_v10  ;;  %11695 = vmatprep.subr.mxu1 %v13555_v18  ;;  %v12107_v0 = vld [vmem:[#allocation4 + $0x25c] ss:$12 sps:$4 sm:$0xff]   ;;  %v12113_v52 = vld [vmem:[#allocation4 + $0x244] ss:$12 sps:$4 sm:$0xff]   ;;  %v12125_v16 = vld [vmem:[#allocation4 + $0x394] ss:$12 sps:$4 sm:$0xff]  }
 0x3b1   :  { %1370 = vmatpush1.msra.mxu0 %v13563_v23  ;;  %11696 = vmatpush3.msra.mxu1 %v13555_v18  ;;  %v12123_v3 = vld [vmem:[#allocation4 + $0x390] ss:$12 sps:$4 sm:$0xff]   ;;  %v12129_v20 = vld [vmem:[#allocation4 + $0x378] ss:$12 sps:$4 sm:$0xff]   ;;  %v12135_v8 = vld [vmem:[#allocation4 + $0x360] ss:$12 sps:$4 sm:$0xff]  }
 0x3b2   :  { %1371 = vmatprep.subr.mxu0 %v13570_v25  ;;  %11700 = vmatprep.subr.mxu1 %v13541_v47  ;;  %v12131_v4 = vld [vmem:[#allocation4 + $0x37c] ss:$12 sps:$4 sm:$0xff]   ;;  %v12137_v5 = vld [vmem:[#allocation4 + $0x364] ss:$12 sps:$4 sm:$0xff]   ;;  %v12143_v13 = vld [vmem:[#allocation4 + $0x34c] ss:$12 sps:$4 sm:$0xff]  }
 0x3b3   :  { %1372 = vmatpush1.msra.mxu0 %v13575_v27  ;;  %11698 = vmatmul.mubr.msk.f32.vlgmr.msra.gmra.mxu1 %vm1338_vm4, %v1337_v6  ;;  %v12138_v7 = vld [vmem:[#allocation4 + $0x3d8] ss:$12 sps:$4 sm:$0xff]   ;;  %v12140_v9 = vld [vmem:[#allocation4 + $0x3dc] ss:$12 sps:$4 sm:$0xff]   ;;  %v12144_v12 = vld [vmem:[#allocation4 + $0x3c0] ss:$12 sps:$4 sm:$0xff]  }
 0x3b4   :  { %11701 = vmatpush3.msra.mxu1 %v13541_v47  ;;  %1373 = vmatprep.subr.mxu0 %v13579_v28  ;;  %v12141_v11 = vld [vmem:[#allocation4 + $0x348] ss:$12 sps:$4 sm:$0xff]   ;;  %v12146_v15 = vld [vmem:[#allocation4 + $0x3c4] ss:$12 sps:$4 sm:$0xff]   ;;  %vm7865_vm11 = vcmask 64512   ;;  %vm9425_vm13 = vcmask 1043456  }
 0x3b5   :  { %11702 = vmatprep.subr.mxu1 %v13544_v21  ;;  %1374 = vmatpush1.msra.mxu0 %v13584_v32  ;;  %v12149_v17 = vld [vmem:[#allocation4 + $0x334] ss:$12 sps:$4 sm:$0xff]   ;;  %v12147_v19 = vld [vmem:[#allocation4 + $0x330] ss:$12 sps:$4 sm:$0xff]   ;;  %vm9725_vm0 = vcmask 31744  }
 0x3b6   :  { %11703 = vmatpush3.msra.mxu1 %v13544_v21  ;;  %1375 = vmatprep.subr.mxu0 %v13588_v30  ;;  %v12150_v22 = vld [vmem:[#allocation4 + $0x3b0] ss:$12 sps:$4 sm:$0xff]  }
 0x3b7   :  { %11704 = vmatprep.subr.mxu1 %v13550_v14  ;;  %1376 = vmatpush1.msra.mxu0 %v13592_v29  ;;  %v12154_v24 = vld [vmem:[#allocation4 + $0x31c] ss:$12 sps:$4 sm:$0xff]   ;;  %v12159_v26 = vld [vmem:[#allocation4 + $0x304] ss:$12 sps:$4 sm:$0xff]  }
 0x3b8   :  { %11705 = vmatpush3.msra.mxu1 %v13550_v14  ;;  %10343 = vmatmul.mubr.msk.f32.vlgmr.msra.gmra.mxu0 %vm1338_vm4, %v13529_v31  ;;  %v12102_v31 = vld [vmem:[#allocation4 + $0x468] ss:$12 sps:$4 sm:$0xff]  }
 0x3b9   :  { %1629 = vmatprep.subr.mxu0 %v13558_v10  ;;  %11706 = vmatprep.subr.mxu1 %v13555_v18 }
 0x3ba   :  { %1630 = vmatpush1.msra.mxu0 %v13563_v23  ;;  %11707 = vmatpush3.msra.mxu1 %v13555_v18 }
 0x3bb   :  { %11708 = vmatprep.mubr.msk.f32.mxu1 %vm1338_vm4, %v10347_v34  ;;  %1631 = vmatprep.subr.mxu0 %v13570_v25 }
 0x3bc   :  { %11709 = vmatmul.mubr.msk.f32.vlgmr.msra.gmra.mxu1 %vm1338_vm4, %v10348_v36  ;;  %1415 = vmatprep.mubr.f32.mxu0 %v15907_v33 }
 0x3bd   :  { %1632 = vmatpush1.msra.mxu0 %v13575_v27  ;;  %2284 = vmatprep.subr.bf16.mxu1 %v12104_v37 }
 0x3be   :  { %10344 = vmatmul.mubr.msk.f32.gmra.mxu0 %vm1338_vm4, %v1337_v6  ;;  %1633 = vmatprep.subr.mxu0 %v13579_v28  ;;  %v12152_v6 = vld [vmem:[#allocation4 + $0x318] ss:$12 sps:$4 sm:$0xff]  }
 0x3bf   :  { %1634 = vmatpush1.msra.mxu0 %v13584_v32  ;;  %1669 = vmatprep.mubr.f32.mxu0 %v15907_v33 }
 0x3c0   :  { %1635 = vmatprep.subr.mxu0 %v13588_v30  ;;  %2285 = vmatpush1.bf16.msra.mxu1 %v12102_v31 }
 0x3c1   :  { %1636 = vmatpush1.msra.mxu0 %v13592_v29  ;;  %2286 = vmatprep.subr.bf16.mxu1 %v12110_v38 }
 0x3c2   :  { %10349 = vmatmul.mubr.msk.f32.vlgmr.msra.gmra.mxu0 %vm1338_vm4, %v10347_v34  ;;  %2241 = vmatprep.subr.bf16.mxu0 %v12086_v39  ;;  %v12157_v34 = vld [vmem:[#allocation4 + $0x300] ss:$12 sps:$4 sm:$0xff]  }
 0x3c3   :  { %1675 = vmatprep.mubr.f32.mxu0 %v15907_v33  ;;  %2242 = vmatpush1.bf16.msra.mxu0 %v12084_v41 }
 0x3c4   :  { %2243 = vmatprep.subr.bf16.mxu0 %v12089_v42  ;;  %2287 = vmatpush1.bf16.msra.mxu1 %v12108_v43 }
 0x3c5   :  { %2288 = vmatprep.subr.bf16.mxu1 %v12116_v44  ;;  %2316 = vmatprep.mubr.bf16.mxu1 %v15905_v35  ;;  %v12151_v44 = vld [vmem:[#allocation4 + $0x2f0] ss:$12 sps:$4 sm:$0xff]  }
 0x3c6   :  { %10350 = vmatmul.mubr.msk.f32.gmra.mxu0 %vm1338_vm4, %v10348_v36 }
 0x3c7   :  { %2244 = vmatpush1.bf16.msra.mxu0 %v12087_v45 }
 0x3c8   :  { %2245 = vmatprep.subr.bf16.mxu0 %v12092_v46  ;;  %2289 = vmatpush1.bf16.msra.mxu1 %v12114_v49  ;;  %v12155_v49 = vld [vmem:[#allocation4 + $0x398] ss:$12 sps:$4 sm:$0xff]  }
 0x3c9   :  { %2290 = vmatprep.subr.bf16.mxu1 %v12122_v48 }
 0x3cb   :  { %2246 = vmatpush1.bf16.msra.mxu0 %v12090_v51 }
 0x3cc   :  { %2247 = vmatprep.subr.bf16.mxu0 %v12095_v54  ;;  %2291 = vmatpush1.bf16.msra.mxu1 %v12120_v55  ;;  %v12156_v54 = vld [vmem:[#allocation4 + $0x2d8] ss:$12 sps:$4 sm:$0xff]   ;;  %v12160_v55 = vld [vmem:[#allocation4 + $0x380] ss:$12 sps:$4 sm:$0xff]  }
 0x3cd   :  { %2292 = vmatprep.subr.bf16.mxu1 %v12128_v56 }
 0x3cf   :  { %2248 = vmatpush1.bf16.msra.mxu0 %v12093_v57 }
 0x3d0   :  { %2249 = vmatprep.subr.bf16.mxu0 %v12098_v58  ;;  %2293 = vmatpush1.bf16.msra.mxu1 %v12126_v59  ;;  %v12161_v58 = vld [vmem:[#allocation4 + $0x2c0] ss:$12 sps:$4 sm:$0xff]   ;;  %v12162_v59 = vld [vmem:[#allocation4 + $0x368] ss:$12 sps:$4 sm:$0xff]  }
 0x3d1   :  { %2294 = vmatprep.subr.bf16.mxu1 %v12134_v60 }
 0x3d3   :  { %2250 = vmatpush1.bf16.msra.mxu0 %v12096_v61 }
 0x3d4   :  { %2251 = vmatprep.subr.bf16.mxu0 %v12101_v50  ;;  %2295 = vmatpush1.bf16.msra.mxu1 %v12132_v62  ;;  %v12163_v62 = vld [vmem:[#allocation4 + $0x470] ss:$12 sps:$4 sm:$0xff]  }
 0x3d5   :  { %2296 = vmatprep.subr.bf16.mxu1 %v12140_v9  ;;  %v12177_v9 = vld [vmem:[#allocation4 + $0x3f8] ss:$12 sps:$4 sm:$0xff]  }
 0x3d7   :  { %2252 = vmatpush1.bf16.msra.mxu0 %v12099_v63  ;;  %v12164_v63 = vld [vmem:[#allocation4 + $0x2a8] ss:$12 sps:$4 sm:$0xff]  }
 0x3d8   :  { %2253 = vmatprep.subr.bf16.mxu0 %v12107_v0  ;;  %2297 = vmatpush1.bf16.msra.mxu1 %v12138_v7  ;;  %v12165_v0 = vld [vmem:[#allocation4 + $0x350] ss:$12 sps:$4 sm:$0xff]   ;;  %v12180_v7 = vld [vmem:[#allocation4 + $0xac] ss:$12 sps:$4 sm:$0xff]  }
 0x3d9   :  { %2298 = vmatprep.subr.bf16.mxu1 %v12146_v15 }
 0x3db   :  { %2254 = vmatpush1.bf16.msra.mxu0 %v12105_v40  ;;  %v12166_v40 = vld [vmem:[#allocation4 + $0x458] ss:$12 sps:$4 sm:$0xff]  }
 0x3dc   :  { %2255 = vmatprep.subr.bf16.mxu0 %v12113_v52  ;;  %2299 = vmatpush1.bf16.msra.mxu1 %v12144_v12  ;;  %v12167_v52 = vld [vmem:[#allocation4 + $0x290] ss:$12 sps:$4 sm:$0xff]   ;;  %v12181_v12 = vld [vmem:[#allocation4 + $0x3e0] ss:$12 sps:$4 sm:$0xff]  }
 0x3dd   :  { %11102 = vmatprep.subr.bf16.mxu1 %v12150_v22  ;;  %v12185_v22 = vld [vmem:[#allocation4 + $0x3c8] ss:$12 sps:$4 sm:$0xff]  }
 0x3df   :  { %2256 = vmatpush1.bf16.msra.mxu0 %v12111_v53  ;;  %v12168_v53 = vld [vmem:[#allocation4 + $0x338] ss:$12 sps:$4 sm:$0xff]  }
 0x3e0   :  { %2257 = vmatprep.subr.bf16.mxu0 %v12119_v1  ;;  %v12169_v1 = vld [vmem:[#allocation4 + $0x440] ss:$12 sps:$4 sm:$0xff]  }
 0x3e3   :  { %2258 = vmatpush2.bf16.msra.mxu0 %v12117_v2  ;;  %v12170_v2 = vld [vmem:[#allocation4 + $0x278] ss:$12 sps:$4 sm:$0xff]  }
 0x3e4   :  { %2259 = vmatprep.subr.bf16.mxu0 %v12125_v16  ;;  %v12171_v16 = vld [vmem:[#allocation4 + $0x320] ss:$12 sps:$4 sm:$0xff]  }
 0x3e7   :  { %2260 = vmatpush2.bf16.msra.mxu0 %v12123_v3  ;;  %v12172_v3 = vld [vmem:[#allocation4 + $0x428] ss:$12 sps:$4 sm:$0xff]  }
 0x3e8   :  { %2261 = vmatprep.subr.bf16.mxu0 %v12131_v4  ;;  %v12173_v4 = vld [vmem:[#allocation4 + $0x260] ss:$12 sps:$4 sm:$0xff]  }
 0x3eb   :  { %2262 = vmatpush2.bf16.msra.mxu0 %v12129_v20  ;;  %v12174_v20 = vld [vmem:[#allocation4 + $0x308] ss:$12 sps:$4 sm:$0xff]  }
 0x3ec   :  { %2263 = vmatprep.subr.bf16.mxu0 %v12137_v5  ;;  %v12175_v5 = vld [vmem:[#allocation4 + $0x410] ss:$12 sps:$4 sm:$0xff]  }
 0x3ef   :  { %2264 = vmatpush2.bf16.msra.mxu0 %v12135_v8  ;;  %v12176_v8 = vld [vmem:[#allocation4 + $0x248] ss:$12 sps:$4 sm:$0xff]  }
 0x3f0   :  { %2265 = vmatprep.subr.bf16.mxu0 %v12143_v13  ;;  %v12184_v13 = vld [vmem:[#allocation4 + $0x94] ss:$12 sps:$4 sm:$0xff]  }
 0x3f3   :  { %2266 = vmatpush2.bf16.msra.mxu0 %v12141_v11  ;;  %v12178_v11 = vld [vmem:[#allocation4 + $0xa8] ss:$12 sps:$4 sm:$0xff]  }
 0x3f4   :  { %2267 = vmatprep.subr.bf16.mxu0 %v12149_v17  ;;  %v12182_v17 = vld [vmem:[#allocation4 + $0x90] ss:$12 sps:$4 sm:$0xff]  }
 0x3f7   :  { %2268 = vmatpush2.bf16.msra.mxu0 %v12147_v19  ;;  %v12188_v19 = vld [vmem:[#allocation4 + $0x7c] ss:$12 sps:$4 sm:$0xff]  }
 0x3f8   :  { %2269 = vmatprep.subr.bf16.mxu0 %v12154_v24  ;;  %v12191_v24 = vld [vmem:[#allocation4 + $0x22c] ss:$12 sps:$4 sm:$0xff]  }
 0x3fb   :  { %2270 = vmatpush2.bf16.msra.mxu0 %v12152_v6  ;;  %v12186_v6 = vld [vmem:[#allocation4 + $0x78] ss:$12 sps:$4 sm:$0xff]  }
 0x3fc   :  { %2271 = vmatprep.subr.bf16.mxu0 %v12159_v26  ;;  %v12194_v26 = vld [vmem:[#allocation4 + $0x64] ss:$12 sps:$4 sm:$0xff]  }
 0x3ff   :  { %2272 = vmatpush2.bf16.msra.mxu0 %v12157_v34  ;;  %v12189_v34 = vld [vmem:[#allocation4 + $0x228] ss:$12 sps:$4 sm:$0xff]  }
 0x400   :  { %11711 = vmatprep.subr.bf16.mxu0 %v15907_v33 }
 0x473   :  { %v11699_v36 = vpop.f32.mrf.mxu1 }
 0x475   :  { %v1488_v37 = vpop.f32.mrf.mxu1 }
 0x476   :  { %v13625_v31 = vpack.c.bf16 %v11699_v36, %v1488_v37  ;;  %v12192_v36 = vld [vmem:[#allocation4 + $0x60] ss:$12 sps:$4 sm:$0xff]  }
 0x477   :  { %v12197_v37 = vld [vmem:[#allocation4 + $0x214] ss:$12 sps:$4 sm:$0xff]  }
 0x478   :  { %v1411_v38 = vpop.f32.mrf.mxu0 }
 0x47a   :  { %v13627_v39 = vpop.f32.mrf.mxu0 }
 0x47c   :  { %v11710_v41 = vpop.f32.mrf.mxu1 }
 0x47e   :  { %v1417_v42 = vpop.f32.mrf.mxu0  ;;  %v1748_v43 = vpop.f32.mrf.mxu1 }
 0x47f   :  { %v13629_v45 = vpack.c.bf16 %v1417_v42, %v1411_v38  ;;  %v13631_v46 = vpack.c.bf16 %v11710_v41, %v1748_v43  ;;  %v12200_v38 = vld [vmem:[#allocation4 + $0x4c] ss:$12 sps:$4 sm:$0xff]   ;;  %v12198_v41 = vld [vmem:[#allocation4 + $0x48] ss:$12 sps:$4 sm:$0xff]  }
 0x480   :  { %v1419_v48 = vpop.f32.mrf.mxu0  ;;  %v12203_v42 = vld [vmem:[#allocation4 + $0x1fc] ss:$12 sps:$4 sm:$0xff]   ;;  %v12206_v43 = vld [vmem:[#allocation4 + $0x34] ss:$12 sps:$4 sm:$0xff]  }
 0x481   :  { %2317 = vmatmul.mubr.bf16.vlgmr.msra.gmra.mxu1 %v13631_v46  ;;  %v13642_v15 = vpack.c.bf16 %v1419_v48, %v13627_v39  ;;  %v12195_v39 = vld [vmem:[#allocation4 + $0x210] ss:$12 sps:$4 sm:$0xff]  }
 0x482   :  { %11103 = vmatpush3.bf16.msra.mxu1 %v12151_v44  ;;  %v1671_v51 = vpop.f32.mrf.mxu0  ;;  %v12201_v44 = vld [vmem:[#allocation4 + $0x1f8] ss:$12 sps:$4 sm:$0xff]  }
 0x483   :  { %11104 = vmatprep.subr.bf16.mxu1 %v12155_v49  ;;  %v12204_v49 = vld [vmem:[#allocation4 + $0x30] ss:$12 sps:$4 sm:$0xff]  }
 0x484   :  { %v1673_v56 = vpop.f32.mrf.mxu0  ;;  %v12209_v48 = vld [vmem:[#allocation4 + $0x1e4] ss:$12 sps:$4 sm:$0xff]  }
 0x486   :  { %11105 = vmatpush3.bf16.msra.mxu1 %v12156_v54  ;;  %v1677_v57 = vpop.f32.mrf.mxu0  ;;  %v12210_v54 = vld [vmem:[#allocation4 + $0x18] ss:$12 sps:$4 sm:$0xff]  }
 0x487   :  { %11106 = vmatprep.subr.bf16.mxu1 %v12160_v55  ;;  %v1757_v60 = vpack.c.bf16 %v1677_v57, %v1671_v51  ;;  %v12212_v51 = vld [vmem:[#allocation4 + $0x1c] ss:$12 sps:$4 sm:$0xff]   ;;  %v12215_v55 = vld [vmem:[#allocation4 + $0x1cc] ss:$12 sps:$4 sm:$0xff]  }
 0x488   :  { %v1679_v61 = vpop.f32.mrf.mxu0  ;;  %v12213_v57 = vld [vmem:[#allocation4 + $0x1c8] ss:$12 sps:$4 sm:$0xff]  }
 0x489   :  { %v1758_v50 = vpack.c.bf16 %v1679_v61, %v1673_v56  ;;  %v12218_v56 = vld [vmem:[#allocation4 + $0x4] ss:$12 sps:$4 sm:$0xff]  }
 0x48a   :  { %11107 = vmatpush3.bf16.msra.mxu1 %v12161_v58  ;;  %v12216_v58 = vld [vmem:[#allocation4] ss:$12 sps:$4 sm:$0xff]   ;;  %v12219_v61 = vld [vmem:[#allocation4 + $0x1b0] ss:$12 sps:$4 sm:$0xff]  }
 0x48b   :  { %2273 = vmatprep.mubr.bf16.mxu0 %v1758_v50  ;;  %11108 = vmatprep.subr.bf16.mxu1 %v12162_v59  ;;  %v12221_v59 = vld [vmem:[#allocation4 + $0x1b4] ss:$12 sps:$4 sm:$0xff]  }
 0x48c   :  { %2274 = vmatmul.mubr.bf16.vlgmr.msra.gmra.mxu0 %v1757_v60  ;;  %2359 = vmatprep.mubr.bf16.mxu1 %v1758_v50  ;;  %v12222_v50 = vld [vmem:[#allocation4 + $0x168] ss:$12 sps:$4 sm:$0xff]  }
 0x48d   :  { %11712 = vmatpush3.bf16.msra.mxu0 %v12163_v62  ;;  %11727 = vmatprep.mubr.msk.bf16.mxu0 %vm13081_vm1, %v15907_v33  ;;  %v12227_v62 = vld [vmem:[#allocation4 + $0x19c] ss:$12 sps:$4 sm:$0xff]  }
 0x48e   :  { %11109 = vmatpush3.bf16.msra.mxu1 %v12164_v63  ;;  %11713 = vmatprep.subr.bf16.mxu0 %v15907_v33  ;;  %v12230_v63 = vld [vmem:[#allocation4 + $0x154] ss:$12 sps:$4 sm:$0xff]  }
 0x48f   :  { %11110 = vmatprep.subr.bf16.mxu1 %v12165_v0  ;;  %v12225_v0 = vld [vmem:[#allocation4 + $0x198] ss:$12 sps:$4 sm:$0xff]  }
 0x491   :  { %11714 = vmatpush3.bf16.msra.mxu0 %v12166_v40  ;;  %v12228_v40 = vld [vmem:[#allocation4 + $0x150] ss:$12 sps:$4 sm:$0xff]  }
 0x492   :  { %11111 = vmatpush3.bf16.msra.mxu1 %v12167_v52  ;;  %11715 = vmatprep.subr.bf16.mxu0 %v15907_v33  ;;  %v12233_v52 = vld [vmem:[#allocation4 + $0x184] ss:$12 sps:$4 sm:$0xff]  }
 0x493   :  { %11112 = vmatprep.subr.bf16.mxu1 %v12168_v53  ;;  %v12236_v53 = vld [vmem:[#allocation4 + $0x13c] ss:$12 sps:$4 sm:$0xff]  }
 0x495   :  { %11716 = vmatpush3.bf16.msra.mxu0 %v12169_v1  ;;  %v12231_v1 = vld [vmem:[#allocation4 + $0x180] ss:$12 sps:$4 sm:$0xff]  }
 0x496   :  { %11113 = vmatpush3.bf16.msra.mxu1 %v12170_v2  ;;  %11717 = vmatprep.subr.bf16.mxu0 %v15907_v33  ;;  %v12234_v2 = vld [vmem:[#allocation4 + $0x138] ss:$12 sps:$4 sm:$0xff]  }
 0x497   :  { %11114 = vmatprep.subr.bf16.mxu1 %v12171_v16  ;;  %v12237_v16 = vld [vmem:[#allocation4 + $0x170] ss:$12 sps:$4 sm:$0xff]  }
 0x499   :  { %11718 = vmatpush3.bf16.msra.mxu0 %v12172_v3  ;;  %v12240_v3 = vld [vmem:[#allocation4 + $0x124] ss:$12 sps:$4 sm:$0xff]  }
 0x49a   :  { %11115 = vmatpush3.bf16.msra.mxu1 %v12173_v4  ;;  %11719 = vmatprep.subr.bf16.mxu0 %v15907_v33  ;;  %v12241_v4 = vld [vmem:[#allocation4 + $0xb0] ss:$12 sps:$4 sm:$0xff]  }
 0x49b   :  { %11116 = vmatprep.subr.bf16.mxu1 %v12174_v20  ;;  %v12238_v20 = vld [vmem:[#allocation4 + $0x120] ss:$12 sps:$4 sm:$0xff]  }
 0x49d   :  { %11720 = vmatpush3.bf16.msra.mxu0 %v12175_v5  ;;  %v12242_v5 = vld [vmem:[#allocation4 + $0x158] ss:$12 sps:$4 sm:$0xff]  }
 0x49e   :  { %11117 = vmatpush3.bf16.msra.mxu1 %v12176_v8  ;;  %11721 = vmatprep.subr.bf16.mxu0 %v15907_v33  ;;  %v12245_v8 = vld [vmem:[#allocation4 + $0x10c] ss:$12 sps:$4 sm:$0xff]  }
 0x49f   :  { %2793 = vmatprep.subr.bf16.mxu1 %v12180_v7  ;;  %v12246_v7 = vld [vmem:[#allocation4 + $0x98] ss:$12 sps:$4 sm:$0xff]  }
 0x4a1   :  { %2360 = vmatmul.mubr.bf16.vlgmr.msra.gmra.mxu1 %v1757_v60  ;;  %11722 = vmatpush3.bf16.msra.mxu0 %v12177_v9  ;;  %v12224_v60 = vld [vmem:[#allocation4 + $0x16c] ss:$12 sps:$4 sm:$0xff]   ;;  %v12243_v9 = vld [vmem:[#allocation4 + $0x108] ss:$12 sps:$4 sm:$0xff]  }
 0x4a2   :  { %2794 = vmatpush1.bf16.msra.mxu1 %v12178_v11  ;;  %2825 = vmatprep.mubr.bf16.mxu1 %v13642_v15  ;;  %v12247_v11 = vld [vmem:[#allocation4 + $0x140] ss:$12 sps:$4 sm:$0xff]  }
 0x4a3   :  { %11723 = vmatprep.subr.bf16.mxu0 %v15907_v33  ;;  %2795 = vmatprep.subr.bf16.mxu1 %v12184_v13  ;;  %v12250_v13 = vld [vmem:[#allocation4 + $0xf4] ss:$12 sps:$4 sm:$0xff]  }
 0x4a5   :  { %11724 = vmatpush3.bf16.msra.mxu0 %v12181_v12  ;;  %v12251_v12 = vld [vmem:[#allocation4 + $0x80] ss:$12 sps:$4 sm:$0xff]  }
 0x4a6   :  { %2796 = vmatpush1.bf16.msra.mxu1 %v12182_v17  ;;  %11725 = vmatprep.subr.bf16.mxu0 %v15907_v33  ;;  %v12248_v17 = vld [vmem:[#allocation4 + $0xf0] ss:$12 sps:$4 sm:$0xff]  }
 0x4a7   :  { %2797 = vmatprep.subr.bf16.mxu1 %v12188_v19  ;;  %v12252_v19 = vld [vmem:[#allocation4 + $0x128] ss:$12 sps:$4 sm:$0xff]  }
 0x4a9   :  { %11726 = vmatpush3.bf16.msra.mxu0 %v12185_v22  ;;  %v12255_v22 = vld [vmem:[#allocation4 + $0xdc] ss:$12 sps:$4 sm:$0xff]  }
 0x4aa   :  { %2798 = vmatpush1.bf16.msra.mxu1 %v12186_v6  ;;  %2836 = vmatprep.subr.bf16.mxu0 %v12191_v24  ;;  %v12256_v6 = vld [vmem:[#allocation4 + $0x68] ss:$12 sps:$4 sm:$0xff]   ;;  %v12257_v24 = vld [vmem:[#allocation4 + $0x110] ss:$12 sps:$4 sm:$0xff]  }
 0x4ab   :  { %2799 = vmatprep.subr.bf16.mxu1 %v12194_v26  ;;  %v12260_v26 = vld [vmem:[#allocation4 + $0xc4] ss:$12 sps:$4 sm:$0xff]  }
 0x4ac   :  { %11728 = vmatmul.mubr.bf16.vlgmr.msra.gmra.mxu0 %v13631_v46  ;;  %v12207_v46 = vld [vmem:[#allocation4 + $0x1e0] ss:$12 sps:$4 sm:$0xff]  }
 0x4ad   :  { %2837 = vmatpush1.bf16.msra.mxu0 %v12189_v34  ;;  %2868 = vmatprep.mubr.bf16.mxu0 %v15905_v35  ;;  %v12261_v34 = vld [vmem:[#allocation4 + $0x50] ss:$12 sps:$4 sm:$0xff]  }
 0x4ae   :  { %2800 = vmatpush1.bf16.msra.mxu1 %v12192_v36  ;;  %2838 = vmatprep.subr.bf16.mxu0 %v12197_v37  ;;  %v12258_v36 = vld [vmem:[#allocation4 + $0xc0] ss:$12 sps:$4 sm:$0xff]   ;;  %v12262_v37 = vld [vmem:[#allocation4 + $0xf8] ss:$12 sps:$4 sm:$0xff]  }
 0x4af   :  { %2801 = vmatprep.subr.bf16.mxu1 %v12200_v38  ;;  %v12263_v38 = vld [vmem:[#allocation4 + $0x38] ss:$12 sps:$4 sm:$0xff]  }
 0x4b1   :  { %2839 = vmatpush1.bf16.msra.mxu0 %v12195_v39  ;;  %v12264_v39 = vld [vmem:[#allocation4 + $0x230] ss:$12 sps:$4 sm:$0xff]  }
 0x4b2   :  { %2802 = vmatpush1.bf16.msra.mxu1 %v12198_v41  ;;  %2840 = vmatprep.subr.bf16.mxu0 %v12203_v42  ;;  %v12265_v41 = vld [vmem:[#allocation4 + $0xe0] ss:$12 sps:$4 sm:$0xff]  }
 0x4b3   :  { %2803 = vmatprep.subr.bf16.mxu1 %v12206_v43  ;;  %v12266_v42 = vld [vmem:[#allocation4 + $0x20] ss:$12 sps:$4 sm:$0xff]   ;;  %v12267_v43 = vld [vmem:[#allocation4 + $0x218] ss:$12 sps:$4 sm:$0xff]  }
 0x4b5   :  { %2841 = vmatpush1.bf16.msra.mxu0 %v12201_v44  ;;  %v12268_v44 = vld [vmem:[#allocation4 + $0xc8] ss:$12 sps:$4 sm:$0xff]  }
 0x4b6   :  { %2804 = vmatpush1.bf16.msra.mxu1 %v12204_v49  ;;  %2842 = vmatprep.subr.bf16.mxu0 %v12209_v48  ;;  %v12269_v49 = vld [vmem:[#allocation4 + $0x8] ss:$12 sps:$4 sm:$0xff]   ;;  %v12270_v48 = vld [vmem:[#allocation4 + $0x200] ss:$12 sps:$4 sm:$0xff]  }
 0x4b7   :  { %2805 = vmatprep.subr.bf16.mxu1 %v12212_v51  ;;  %v12271_v51 = vld [vmem:[#allocation4 + $0x1e8] ss:$12 sps:$4 sm:$0xff]  }
 0x4b9   :  { %2843 = vmatpush1.bf16.msra.mxu0 %v12207_v46  ;;  %v12272_v46 = vld [vmem:[#allocation4 + $0x1d0] ss:$12 sps:$4 sm:$0xff]  }
 0x4ba   :  { %2806 = vmatpush1.bf16.msra.mxu1 %v12210_v54  ;;  %2844 = vmatprep.subr.bf16.mxu0 %v12215_v55  ;;  %v12278_v54 = vld [vmem:[#allocation4 + $0x52c] ss:$12 sps:$4 sm:$0xff]   ;;  %v12275_v55 = vld [vmem:[#allocation4 + $0x188] ss:$12 sps:$4 sm:$0xff]  }
 0x4bb   :  { %2807 = vmatprep.subr.bf16.mxu1 %v12218_v56  ;;  %v12287_v56 = vld [vmem:[#allocation4 + $0x4e4] ss:$12 sps:$4 sm:$0xff]  }
 0x4bd   :  { %2845 = vmatpush1.bf16.msra.mxu0 %v12213_v57  ;;  %v12285_v57 = vld [vmem:[#allocation4 + $0x4e0] ss:$12 sps:$4 sm:$0xff]  }
 0x4be   :  { %2808 = vmatpush1.bf16.msra.mxu1 %v12216_v58  ;;  %2846 = vmatprep.subr.bf16.mxu0 %v12221_v59  ;;  %v12293_v58 = vld [vmem:[#allocation4 + $0x4b4] ss:$12 sps:$4 sm:$0xff]   ;;  %v12291_v59 = vld [vmem:[#allocation4 + $0x4b0] ss:$12 sps:$4 sm:$0xff]  }
 0x4bf   :  { %2809 = vmatprep.subr.bf16.mxu1 %v12224_v60  ;;  %v12296_v60 = vld [vmem:[#allocation4 + $0x49c] ss:$12 sps:$4 sm:$0xff]  }
 0x4c1   :  { %2847 = vmatpush1.bf16.msra.mxu0 %v12219_v61  ;;  %v12299_v61 = vld [vmem:[#allocation4 + $0x484] ss:$12 sps:$4 sm:$0xff]  }
 0x4c2   :  { %2810 = vmatpush2.bf16.msra.mxu1 %v12222_v50  ;;  %2848 = vmatprep.subr.bf16.mxu0 %v12227_v62  ;;  %v12300_v50 = vld [vmem:[#allocation4 + $0x5e8] ss:$12 sps:$4 sm:$0xff]  }
 0x4c3   :  { %2811 = vmatprep.subr.bf16.mxu1 %v12230_v63  ;;  %v12305_v62 = vld [vmem:[#allocation4 + $0x5d4] ss:$12 sps:$4 sm:$0xff]   ;;  %v12303_v63 = vld [vmem:[#allocation4 + $0x5d0] ss:$12 sps:$4 sm:$0xff]  }
 0x4c5   :  { %2849 = vmatpush1.bf16.msra.mxu0 %v12225_v0  ;;  %v12308_v0 = vld [vmem:[#allocation4 + $0x5bc] ss:$12 sps:$4 sm:$0xff]  }
 0x4c6   :  { %2812 = vmatpush2.bf16.msra.mxu1 %v12228_v40  ;;  %2850 = vmatprep.subr.bf16.mxu0 %v12233_v52  ;;  %v12306_v40 = vld [vmem:[#allocation4 + $0x5b8] ss:$12 sps:$4 sm:$0xff]  }
 0x4c7   :  { %2813 = vmatprep.subr.bf16.mxu1 %v12236_v53  ;;  %v12311_v52 = vld [vmem:[#allocation4 + $0x5a4] ss:$12 sps:$4 sm:$0xff]   ;;  %v12309_v53 = vld [vmem:[#allocation4 + $0x5a0] ss:$12 sps:$4 sm:$0xff]  }
 0x4c9   :  { %2851 = vmatpush1.bf16.msra.mxu0 %v12231_v1  ;;  %v12314_v1 = vld [vmem:[#allocation4 + $0x58c] ss:$12 sps:$4 sm:$0xff]  }
 0x4ca   :  { %2814 = vmatpush2.bf16.msra.mxu1 %v12234_v2  ;;  %11133 = vmatprep.subr.bf16.mxu0 %v12237_v16  ;;  %v12317_v2 = vld [vmem:[#allocation4 + $0x6ac] ss:$12 sps:$4 sm:$0xff]   ;;  %v12312_v16 = vld [vmem:[#allocation4 + $0x588] ss:$12 sps:$4 sm:$0xff]  }
 0x4cb   :  { %2815 = vmatprep.subr.bf16.mxu1 %v12240_v3  ;;  %v12315_v3 = vld [vmem:[#allocation4 + $0x6a8] ss:$12 sps:$4 sm:$0xff]  }
 0x4cc   :  { %2869 = vmatmul.mubr.bf16.vlgmr.msra.gmra.mxu0 %v13625_v31 }
 0x4cd   :  { %11134 = vmatpush3.bf16.msra.mxu0 %v12241_v4  ;;  %2911 = vmatprep.mubr.bf16.mxu0 %v13642_v15  ;;  %v12253_v15 = vld [vmem:[#allocation4 + $0xd8] ss:$12 sps:$4 sm:$0xff]   ;;  %v12320_v4 = vld [vmem:[#allocation4 + $0x574] ss:$12 sps:$4 sm:$0xff]  }
 0x4ce   :  { %2816 = vmatpush2.bf16.msra.mxu1 %v12238_v20  ;;  %11135 = vmatprep.subr.bf16.mxu0 %v12242_v5  ;;  %v12323_v20 = vld [vmem:[#allocation4 + $0x694] ss:$12 sps:$4 sm:$0xff]   ;;  %v12318_v5 = vld [vmem:[#allocation4 + $0x570] ss:$12 sps:$4 sm:$0xff]  }
 0x4cf   :  { %2817 = vmatprep.subr.bf16.mxu1 %v12245_v8  ;;  %v12321_v8 = vld [vmem:[#allocation4 + $0x690] ss:$12 sps:$4 sm:$0xff]  }
 0x4d1   :  { %11136 = vmatpush3.bf16.msra.mxu0 %v12246_v7  ;;  %v12326_v7 = vld [vmem:[#allocation4 + $0x55c] ss:$12 sps:$4 sm:$0xff]  }
 0x4d2   :  { %2818 = vmatpush2.bf16.msra.mxu1 %v12243_v9  ;;  %11137 = vmatprep.subr.bf16.mxu0 %v12247_v11  ;;  %v12329_v9 = vld [vmem:[#allocation4 + $0x67c] ss:$12 sps:$4 sm:$0xff]   ;;  %v12324_v11 = vld [vmem:[#allocation4 + $0x558] ss:$12 sps:$4 sm:$0xff]  }
 0x4d3   :  { %2819 = vmatprep.subr.bf16.mxu1 %v12250_v13  ;;  %v12327_v13 = vld [vmem:[#allocation4 + $0x678] ss:$12 sps:$4 sm:$0xff]  }
 0x4d5   :  { %11138 = vmatpush3.bf16.msra.mxu0 %v12251_v12  ;;  %v12332_v12 = vld [vmem:[#allocation4 + $0x544] ss:$12 sps:$4 sm:$0xff]  }
 0x4d6   :  { %2820 = vmatpush2.bf16.msra.mxu1 %v12248_v17  ;;  %11139 = vmatprep.subr.bf16.mxu0 %v12252_v19  ;;  %v12335_v17 = vld [vmem:[#allocation4 + $0x664] ss:$12 sps:$4 sm:$0xff]   ;;  %v12330_v19 = vld [vmem:[#allocation4 + $0x540] ss:$12 sps:$4 sm:$0xff]  }
 0x4d7   :  { %2821 = vmatprep.subr.bf16.mxu1 %v12255_v22  ;;  %v12333_v22 = vld [vmem:[#allocation4 + $0x660] ss:$12 sps:$4 sm:$0xff]  }
 0x4d9   :  { %11140 = vmatpush3.bf16.msra.mxu0 %v12256_v6  ;;  %v12338_v6 = vld [vmem:[#allocation4 + $0x64c] ss:$12 sps:$4 sm:$0xff]  }
 0x4da   :  { %2822 = vmatpush2.bf16.msra.mxu1 %v12253_v15  ;;  %11141 = vmatprep.subr.bf16.mxu0 %v12257_v24  ;;  %v12336_v15 = vld [vmem:[#allocation4 + $0x648] ss:$12 sps:$4 sm:$0xff]  }
 0x4db   :  { %2823 = vmatprep.subr.bf16.mxu1 %v12260_v26  ;;  %v12342_v24 = vld [vmem:[#allocation4 + $0x634] ss:$12 sps:$4 sm:$0xff]   ;;  %v12340_v26 = vld [vmem:[#allocation4 + $0x630] ss:$12 sps:$4 sm:$0xff]  }
 0x4dd   :  { %11142 = vmatpush3.bf16.msra.mxu0 %v12261_v34  ;;  %v12346_v34 = vld [vmem:[#allocation4 + $0x61c] ss:$12 sps:$4 sm:$0xff]  }
 0x4de   :  { %2824 = vmatpush2.bf16.msra.mxu1 %v12258_v36  ;;  %11143 = vmatprep.subr.bf16.mxu0 %v12262_v37  ;;  %v12344_v36 = vld [vmem:[#allocation4 + $0x618] ss:$12 sps:$4 sm:$0xff]  }
 0x4df   :  { %11731 = vmatprep.subr.bf16.mxu1 %v15907_v33 }
 0x4e1   :  { %2826 = vmatmul.mubr.bf16.vlgmr.msra.gmra.mxu1 %v13629_v45  ;;  %11144 = vmatpush3.bf16.msra.mxu0 %v12263_v38  ;;  %v12350_v38 = vld [vmem:[#allocation4 + $0x604] ss:$12 sps:$4 sm:$0xff]  }
 0x4e2   :  { %11732 = vmatpush3.bf16.msra.mxu1 %v12264_v39  ;;  %11145 = vmatprep.subr.bf16.mxu0 %v12265_v41  ;;  %v12348_v39 = vld [vmem:[#allocation4 + $0x600] ss:$12 sps:$4 sm:$0xff]  }
 0x4e3   :  { %11733 = vmatprep.subr.bf16.mxu1 %v15907_v33  ;;  %11747 = vmatprep.mubr.msk.bf16.mxu1 %vm13081_vm1, %v15907_v33 }
 0x4e5   :  { %11146 = vmatpush3.bf16.msra.mxu0 %v12266_v42 }
 0x4e6   :  { %11734 = vmatpush3.bf16.msra.mxu1 %v12267_v43  ;;  %11147 = vmatprep.subr.bf16.mxu0 %v12268_v44  ;;  %v12352_v43 = vld [vmem:[#allocation4 + $0x5f0] ss:$12 sps:$4 sm:$0xff]  }
 0x4e7   :  { %11735 = vmatprep.subr.bf16.mxu1 %v15907_v33 }
 0x4e9   :  { %11148 = vmatpush3.bf16.msra.mxu0 %v12269_v49 }
 0x4ea   :  { %11736 = vmatpush3.bf16.msra.mxu1 %v12270_v48  ;;  %2994 = vmatprep.subr.mxu0 %v13558_v10  ;;  %v10497_v10 = vld [vmem:[%s16061_s29 + $0x20] sm:$0xff] }
 0x4eb   :  { %11737 = vmatprep.subr.bf16.mxu1 %v15907_v33 }
 0x4ec   :  { %2912 = vmatmul.mubr.bf16.vlgmr.msra.gmra.mxu0 %v13629_v45  ;;  %v12276_v45 = vld [vmem:[#allocation4 + $0x528] ss:$12 sps:$4 sm:$0xff]  }
 0x4ed   :  { %2995 = vmatpush1.msra.mxu0 %v13563_v23  ;;  %3034 = vmatprep.mubr.f32.mxu0 %v15907_v33  ;;  %v12273_v23 = vld [vmem:[#allocation4 + $0x1b8] ss:$12 sps:$4 sm:$0xff]  }
 0x4ee   :  { %11738 = vmatpush3.bf16.msra.mxu1 %v12271_v51  ;;  %2996 = vmatprep.subr.mxu0 %v13570_v25  ;;  %v12281_v25 = vld [vmem:[#allocation4 + $0x514] ss:$12 sps:$4 sm:$0xff]  }
 0x4ef   :  { %2997 = vmatpush1.msra.mxu0 %v13575_v27  ;;  %11739 = vmatprep.subr.bf16.mxu1 %v15907_v33  ;;  %v10498_v27 = vld [vmem:[%s16061_s29 + $0x28] sm:$0xff] }
 0x4f0   :  { %2998 = vmatprep.subr.mxu0 %v13579_v28  ;;  %v12279_v28 = vld [vmem:[#allocation4 + $0x510] ss:$12 sps:$4 sm:$0xff]  }
 0x4f1   :  { %2999 = vmatpush1.msra.mxu0 %v13584_v32  ;;  %v12274_v32 = vld [vmem:[#allocation4 + $0x1a0] ss:$12 sps:$4 sm:$0xff]  }
 0x4f2   :  { %11740 = vmatpush3.bf16.msra.mxu1 %v12272_v46  ;;  %3000 = vmatprep.subr.mxu0 %v13588_v30  ;;  %v12284_v30 = vld [vmem:[#allocation4 + $0x4fc] ss:$12 sps:$4 sm:$0xff]  }
 0x4f3   :  { %3001 = vmatpush1.msra.mxu0 %v13592_v29  ;;  %11741 = vmatprep.subr.bf16.mxu1 %v15907_v33  ;;  %v12282_v29 = vld [vmem:[#allocation4 + $0x4f8] ss:$12 sps:$4 sm:$0xff]  }
 0x4f4   :  { %10499 = vmatmul.mubr.msk.f32.vlgmr.msra.gmra.mxu0 %vm1338_vm4, %v10497_v10  ;;  %3606 = vmatprep.subr.bf16.mxu0 %v12278_v54 }
 0x4f5   :  { %3040 = vmatprep.mubr.f32.mxu0 %v15907_v33  ;;  %3607 = vmatpush1.bf16.msra.mxu0 %v12276_v45 }
 0x4f6   :  { %11742 = vmatpush3.bf16.msra.mxu1 %v12273_v23  ;;  %3608 = vmatprep.subr.bf16.mxu0 %v12281_v25 }
 0x4f7   :  { %11743 = vmatprep.subr.bf16.mxu1 %v15907_v33 }
 0x4f8   :  { %10500 = vmatmul.mubr.msk.f32.gmra.mxu0 %vm1338_vm4, %v10498_v27 }
 0x4f9   :  { %3609 = vmatpush1.bf16.msra.mxu0 %v12279_v28 }
 0x4fa   :  { %11744 = vmatpush3.bf16.msra.mxu1 %v12274_v32  ;;  %3610 = vmatprep.subr.bf16.mxu0 %v12284_v30 }
 0x4fb   :  { %11745 = vmatprep.subr.bf16.mxu1 %v15907_v33 }
 0x4fd   :  { %3611 = vmatpush1.bf16.msra.mxu0 %v12282_v29 }
 0x4fe   :  { %11746 = vmatpush3.bf16.msra.mxu1 %v12275_v55  ;;  %3612 = vmatprep.subr.bf16.mxu0 %v12287_v56 }
 0x4ff   :  { %11751 = vmatprep.subr.mxu1 %v13541_v47 }
 0x501   :  { %11748 = vmatmul.mubr.bf16.vlgmr.msra.gmra.mxu1 %v13625_v31  ;;  %3613 = vmatpush1.bf16.msra.mxu0 %v12285_v57  ;;  %v12290_v31 = vld [vmem:[#allocation4 + $0x4cc] ss:$12 sps:$4 sm:$0xff]  }
 0x502   :  { %11752 = vmatpush3.msra.mxu1 %v13541_v47  ;;  %11759 = vmatprep.mubr.msk.f32.mxu1 %vm1338_vm4, %v10497_v10  ;;  %v12288_v47 = vld [vmem:[#allocation4 + $0x4c8] ss:$12 sps:$4 sm:$0xff]  }
 0x503   :  { %11753 = vmatprep.subr.mxu1 %v13544_v21  ;;  %3614 = vmatprep.subr.bf16.mxu0 %v12290_v31 }
 0x504   :  { %11754 = vmatpush3.msra.mxu1 %v13544_v21  ;;  %v12294_v21 = vld [vmem:[#allocation4 + $0x498] ss:$12 sps:$4 sm:$0xff]  }
 0x505   :  { %11755 = vmatprep.subr.mxu1 %v13550_v14  ;;  %3615 = vmatpush1.bf16.msra.mxu0 %v12288_v47 }
 0x506   :  { %11756 = vmatpush3.msra.mxu1 %v13550_v14  ;;  %3616 = vmatprep.subr.bf16.mxu0 %v12293_v58  ;;  %v12297_v14 = vld [vmem:[#allocation4 + $0x480] ss:$12 sps:$4 sm:$0xff]  }
 0x507   :  { %11757 = vmatprep.subr.mxu1 %v13555_v18 }
 0x508   :  { %11758 = vmatpush3.msra.mxu1 %v13555_v18  ;;  %v12302_v18 = vld [vmem:[#allocation4 + $0x5ec] ss:$12 sps:$4 sm:$0xff]  }
 0x509   :  { %11760 = vmatmul.mubr.msk.f32.vlgmr.msra.gmra.mxu1 %vm1338_vm4, %v10498_v27  ;;  %3617 = vmatpush1.bf16.msra.mxu0 %v12291_v59 }
 0x50a   :  { %3681 = vmatprep.mubr.bf16.mxu1 %v15905_v35  ;;  %3618 = vmatprep.subr.bf16.mxu0 %v12296_v60  ;;  %v14057_v35 = vld [vmem:[%s15884_s5 + $0x1d0] sm:$0xff] }
 0x50b   :  { %3649 = vmatprep.subr.bf16.mxu1 %v12317_v2  ;;  %16113 = vst [vmem:[#allocation67_spill] sm:$0xff] %v14057_v35 }
 0x50c   :  { %3650 = vmatpush1.bf16.msra.mxu1 %v12315_v3 }
 0x50d   :  { %3619 = vmatpush1.bf16.msra.mxu0 %v12294_v21  ;;  %3651 = vmatprep.subr.bf16.mxu1 %v12323_v20 }
 0x50e   :  { %3620 = vmatprep.subr.bf16.mxu0 %v12299_v61 }
 0x510   :  { %3652 = vmatpush1.bf16.msra.mxu1 %v12321_v8 }
 0x511   :  { %3621 = vmatpush1.bf16.msra.mxu0 %v12297_v14  ;;  %3653 = vmatprep.subr.bf16.mxu1 %v12329_v9 }
 0x512   :  { %3622 = vmatprep.subr.bf16.mxu0 %v12302_v18 }
 0x514   :  { %3654 = vmatpush1.bf16.msra.mxu1 %v12327_v13 }
 0x515   :  { %3623 = vmatpush2.bf16.msra.mxu0 %v12300_v50  ;;  %3655 = vmatprep.subr.bf16.mxu1 %v12335_v17 }
 0x516   :  { %3624 = vmatprep.subr.bf16.mxu0 %v12305_v62 }
 0x518   :  { %3656 = vmatpush1.bf16.msra.mxu1 %v12333_v22 }
 0x519   :  { %3625 = vmatpush2.bf16.msra.mxu0 %v12303_v63  ;;  %3657 = vmatprep.subr.bf16.mxu1 %v12338_v6 }
 0x51a   :  { %3626 = vmatprep.subr.bf16.mxu0 %v12308_v0 }
 0x51c   :  { %3658 = vmatpush1.bf16.msra.mxu1 %v12336_v15  ;;  %v12339_v15 = vld [vmem:[#allocation4 + $0x6b0] ss:$12 sps:$4 sm:$0xff]  }
 0x51d   :  { %3627 = vmatpush2.bf16.msra.mxu0 %v12306_v40  ;;  %3659 = vmatprep.subr.bf16.mxu1 %v12342_v24  ;;  %v12343_v24 = vld [vmem:[#allocation4 + $0x698] ss:$12 sps:$4 sm:$0xff]  }
 0x51e   :  { %3628 = vmatprep.subr.bf16.mxu0 %v12311_v52 }
 0x520   :  { %3660 = vmatpush1.bf16.msra.mxu1 %v12340_v26 }
 0x521   :  { %3629 = vmatpush2.bf16.msra.mxu0 %v12309_v53  ;;  %3661 = vmatprep.subr.bf16.mxu1 %v12346_v34 }
 0x522   :  { %3630 = vmatprep.subr.bf16.mxu0 %v12314_v1 }
 0x524   :  { %3662 = vmatpush1.bf16.msra.mxu1 %v12344_v36 }
 0x525   :  { %3631 = vmatpush2.bf16.msra.mxu0 %v12312_v16  ;;  %3663 = vmatprep.subr.bf16.mxu1 %v12350_v38 }
 0x526   :  { %3632 = vmatprep.subr.bf16.mxu0 %v12320_v4 }
 0x528   :  { %3664 = vmatpush1.bf16.msra.mxu1 %v12348_v39 }
 0x529   :  { %3633 = vmatpush2.bf16.msra.mxu0 %v12318_v5  ;;  %11170 = vmatprep.subr.bf16.mxu1 %v12352_v43 }
 0x52a   :  { %3634 = vmatprep.subr.bf16.mxu0 %v12326_v7 }
 0x52d   :  { %3635 = vmatpush2.bf16.msra.mxu0 %v12324_v11 }
 0x52e   :  { %3636 = vmatprep.subr.bf16.mxu0 %v12332_v12 }
 0x531   :  { %3637 = vmatpush2.bf16.msra.mxu0 %v12330_v19 }
 0x532   :  { %11762 = vmatprep.subr.bf16.mxu0 %v15907_v33 }
 0x541   :  { %v2318_v37 = vpop.f32.mrf.mxu1 }
 0x543   :  { %v2320_v41 = vpop.f32.mrf.mxu1 }
 0x545   :  { %v2322_v49 = vpop.f32.mrf.mxu1 }
 0x547   :  { %v2324_v23 = vpop.f32.mrf.mxu1 }
 0x54c   :  { %v2275_v42 = vpop.f32.mrf.mxu0 }
 0x54d   :  { %v2319_v44 = vadd.f32 %v2318_v37, %v2275_v42  ;;  %v12347_v37 = vld [vmem:[#allocation4 + $0x680] ss:$12 sps:$4 sm:$0xff]   ;;  %v12351_v42 = vld [vmem:[#allocation4 + $0x668] ss:$12 sps:$4 sm:$0xff]  }
 0x54e   :  { %v2277_v48 = vpop.f32.mrf.mxu0 }
 0x54f   :  { %v2321_v51 = vadd.f32 %v2320_v41, %v2277_v48  ;;  %v12354_v48 = vld [vmem:[#allocation4 + $0x650] ss:$12 sps:$4 sm:$0xff]  }
 0x550   :  { %v2279_v46 = vpop.f32.mrf.mxu0 }
 0x551   :  { %v2323_v10 = vadd.f32 %v2322_v49, %v2279_v46  ;;  %v12353_v49 = vld [vmem:[#allocation4 + $0x530] ss:$12 sps:$4 sm:$0xff]   ;;  %v12355_v46 = vld [vmem:[#allocation4 + $0x5d8] ss:$12 sps:$4 sm:$0xff]  }
 0x552   :  { %v2281_v45 = vpop.f32.mrf.mxu0 }
 0x553   :  { %v2325_v54 = vadd.f32 %v2324_v23, %v2281_v45  ;;  %v12357_v23 = vld [vmem:[#allocation4 + $0x638] ss:$12 sps:$4 sm:$0xff]   ;;  %v12358_v45 = vld [vmem:[#allocation4 + $0x5c0] ss:$12 sps:$4 sm:$0xff]  }
 0x561   :  { %v11118_v25 = vpop.f32.mrf.mxu1 }
 0x563   :  { %v11119_v27 = vpop.f32.mrf.mxu1 }
 0x564   :  { %v11120_v28 = vadd.f32 %v11119_v27, %v11118_v25  ;;  %v12360_v25 = vld [vmem:[#allocation4 + $0x620] ss:$12 sps:$4 sm:$0xff]   ;;  %v12361_v27 = vld [vmem:[#allocation4 + $0x5a8] ss:$12 sps:$4 sm:$0xff]  }
 0x565   :  { %v11121_v32 = vpop.f32.mrf.mxu1 }
 0x567   :  { %v11122_v30 = vpop.f32.mrf.mxu1 }
 0x568   :  { %v11123_v29 = vadd.f32 %v11122_v30, %v11121_v32  ;;  %v12363_v32 = vld [vmem:[#allocation4 + $0x608] ss:$12 sps:$4 sm:$0xff]   ;;  %v12364_v30 = vld [vmem:[#allocation4 + $0x590] ss:$12 sps:$4 sm:$0xff]  }
 0x56c   :  { %v2402_v55 = vpop.f32.mrf.mxu0 }
 0x56d   :  { %v2403_v56 = vadd.f32 %v11120_v28, %v2402_v55  ;;  %v12362_v28 = vld [vmem:[#allocation4 + $0x4e8] ss:$12 sps:$4 sm:$0xff]   ;;  %v12366_v55 = vld [vmem:[#allocation4 + $0x578] ss:$12 sps:$4 sm:$0xff]  }
 0x56e   :  { %v11729_v57 = vpop.f32.mrf.mxu0 }
 0x56f   :  { %v12368_v57 = vld [vmem:[#allocation4 + $0x560] ss:$12 sps:$4 sm:$0xff]  }
 0x570   :  { %v2405_v31 = vpop.f32.mrf.mxu0 }
 0x571   :  { %v2406_v47 = vadd.f32 %v11123_v29, %v2405_v31  ;;  %v12365_v29 = vld [vmem:[#allocation4 + $0x4d0] ss:$12 sps:$4 sm:$0xff]   ;;  %v12369_v31 = vld [vmem:[#allocation4 + $0x4a0] ss:$12 sps:$4 sm:$0xff]  }
 0x572   :  { %v11730_v58 = vpop.f32.mrf.mxu0 }
 0x573   :  { %v12371_v58 = vld [vmem:[#allocation4 + $0x488] ss:$12 sps:$4 sm:$0xff]  }
 0x58c   :  { %v2870_v59 = vpop.f32.mrf.mxu0 }
 0x58e   :  { %v2872_v21 = vpop.f32.mrf.mxu0 }
 0x590   :  { %v2874_v62 = vpop.f32.mrf.mxu0 }
 0x592   :  { %v2876_v2 = vpop.f32.mrf.mxu0 }
 0x5a1   :  { %v2827_v60 = vpop.f32.mrf.mxu1 }
 0x5a2   :  { %v2828_v61 = vadd.f32 %v2827_v60, %v2319_v44  ;;  %v13733_v60 = vld [vmem:[%s15884_s5 + $0x158] sm:$0xff] }
 0x5a3   :  { %v2829_v14 = vpop.f32.mrf.mxu1 }
 0x5a4   :  { %v13694_v18 = vadd.f32 %v2870_v59, %v2828_v61  ;;  %v2830_v50 = vadd.f32 %v2829_v14, %v2321_v51  ;;  %v13722_v59 = vld [vmem:[%s15884_s5 + $0x170] sm:$0xff]  ;;  %v13745_v14 = vld [vmem:[%s15884_s5 + $0x140] sm:$0xff] }
 0x5a5   :  { %v2831_v63 = vpop.f32.mrf.mxu1  ;;  %v13739_v61 = vld [vmem:[%s15884_s5 + $0x150] sm:$0xff] }
 0x5a6   :  { %v13696_v0 = vadd.f32 %v2872_v21, %v2830_v50  ;;  %v2832_v40 = vadd.f32 %v2831_v63, %v2323_v10  ;;  %v12356_v10 = vld [vmem:[#allocation4 + $0x518] ss:$12 sps:$4 sm:$0xff]   ;;  %v13728_v21 = vld [vmem:[%s15884_s5 + $0x168] sm:$0xff] }
 0x5a7   :  { %v2833_v52 = vpop.f32.mrf.mxu1  ;;  %v13751_v50 = vld [vmem:[%s15884_s5 + $0x138] sm:$0xff]  ;;  %v13763_v63 = vld [vmem:[%s15884_s5 + $0x120] sm:$0xff] }
 0x5a8   :  { %v13698_v53 = vadd.f32 %v2874_v62, %v2832_v40  ;;  %v2834_v1 = vadd.f32 %v2833_v52, %v2325_v54  ;;  %v12359_v54 = vld [vmem:[#allocation4 + $0x500] ss:$12 sps:$4 sm:$0xff]   ;;  %16062 = vst [vmem:[#allocation16_spill] sm:$0xff] %v13751_v50  ;;  %16064 = vst [vmem:[#allocation18_spill] sm:$0xff] %v13763_v63  ;;  %v13769_v40 = vld [vmem:[%s15884_s5 + $0x110] sm:$0xff] }
 0x5a9   :  { %v13757_v62 = vld [vmem:[%s15884_s5 + $0x128] sm:$0xff]  ;;  %16065 = vst [vmem:[#allocation19_spill] sm:$0xff] %v13769_v40 }
 0x5aa   :  { %v13700_v16 = vadd.f32 %v2876_v2, %v2834_v1  ;;  %16063 = vst [vmem:[#allocation17_spill] sm:$0xff] %v13757_v62  ;;  %v13775_v52 = vld [vmem:[%s15884_s5 + $0x108] sm:$0xff]  ;;  %v13781_v1 = vld [vmem:[%s15884_s5 + $0xf8] sm:$0xff]  ;;  %v13787_v2 = vld [vmem:[%s15884_s5 + $0xf0] sm:$0xff] }
 0x5ab   :  { %16066 = vst [vmem:[#allocation20_spill] sm:$0xff] %v13775_v52  ;;  %16067 = vst [vmem:[#allocation21_spill] sm:$0xff] %v13781_v1 }
 0x5ac   :  { %v11149_v3 = vpop.f32.mrf.mxu0  ;;  %16068 = vst [vmem:[#allocation22_spill] sm:$0xff] %v13787_v2 }
 0x5ae   :  { %v11150_v4 = vpop.f32.mrf.mxu0 }
 0x5af   :  { %v11151_v20 = vadd.f32 %v11150_v4, %v11149_v3  ;;  %v13793_v3 = vld [vmem:[%s15884_s5 + $0xe0] sm:$0xff]  ;;  %v13799_v4 = vld [vmem:[%s15884_s5 + $0xd8] sm:$0xff] }
 0x5b0   :  { %v11152_v5 = vpop.f32.mrf.mxu0  ;;  %16069 = vst [vmem:[#allocation23_spill] sm:$0xff] %v13793_v3  ;;  %16070 = vst [vmem:[#allocation24_spill] sm:$0xff] %v13799_v4 }
 0x5b1   :  { %v2914_v8 = vadd.f32 %v11151_v20, %v2403_v56  ;;  %v12367_v56 = vld [vmem:[#allocation4 + $0x4b8] ss:$12 sps:$4 sm:$0xff]   ;;  %v13805_v20 = vld [vmem:[%s15884_s5 + $0xc8] sm:$0xff] }
 0x5b2   :  { %v11153_v7 = vpop.f32.mrf.mxu0  ;;  %16071 = vst [vmem:[#allocation25_spill] sm:$0xff] %v13805_v20 }
 0x5b3   :  { %v11154_v9 = vadd.f32 %v11153_v7, %v11152_v5  ;;  %v13811_v5 = vld [vmem:[%s15884_s5 + $0xc0] sm:$0xff]  ;;  %v13823_v7 = vld [vmem:[%s15884_s5 + $0xa8] sm:$0xff] }
 0x5b4   :  { %v3036_v11 = vpop.f32.mrf.mxu0  ;;  %16072 = vst [vmem:[#allocation26_spill] sm:$0xff] %v13811_v5  ;;  %16074 = vst [vmem:[#allocation28_spill] sm:$0xff] %v13823_v7 }
 0x5b5   :  { %v2917_v13 = vadd.f32 %v11154_v9, %v2406_v47  ;;  %v12370_v47 = vld [vmem:[#allocation4 + $0x548] ss:$12 sps:$4 sm:$0xff]   ;;  %v13829_v9 = vld [vmem:[%s15884_s5 + $0x98] sm:$0xff] }
 0x5b6   :  { %v3038_v12 = vpop.f32.mrf.mxu0  ;;  %16075 = vst [vmem:[#allocation29_spill] sm:$0xff] %v13829_v9 }
 0x5b8   :  { %v3042_v17 = vpop.f32.mrf.mxu0 }
 0x5b9   :  { %v13702_v19 = vpack.c.bf16 %v3042_v17, %v3036_v11  ;;  %v13835_v11 = vld [vmem:[%s15884_s5 + $0x90] sm:$0xff]  ;;  %v13853_v17 = vld [vmem:[%s15884_s5 + $0x68] sm:$0xff] }
 0x5ba   :  { %v3044_v22 = vpop.f32.mrf.mxu0  ;;  %16076 = vst [vmem:[#allocation30_spill] sm:$0xff] %v13835_v11  ;;  %16079 = vst [vmem:[#allocation33_spill] sm:$0xff] %v13853_v17 }
 0x5bb   :  { %v3123_v6 = vpack.c.bf16 %v3044_v22, %v3038_v12  ;;  %v13847_v12 = vld [vmem:[%s15884_s5 + $0x78] sm:$0xff]  ;;  %v13865_v22 = vld [vmem:[%s15884_s5 + $0x50] sm:$0xff] }
 0x5bc   :  { %16078 = vst [vmem:[#allocation32_spill] sm:$0xff] %v13847_v12  ;;  %16081 = vst [vmem:[#allocation35_spill] sm:$0xff] %v13865_v22 }
 0x5bd   :  { %3638 = vmatprep.mubr.bf16.mxu0 %v3123_v6 }
 0x5be   :  { %3639 = vmatmul.mubr.bf16.vlgmr.msra.gmra.mxu0 %v13702_v19 }
 0x5bf   :  { %11763 = vmatpush3.bf16.msra.mxu0 %v12339_v15  ;;  %11778 = vmatprep.mubr.msk.bf16.mxu0 %vm13081_vm1, %v15907_v33  ;;  %v13877_v15 = vld [vmem:[%s15884_s5 + $0x38] sm:$0xff] }
 0x5c0   :  { %11764 = vmatprep.subr.bf16.mxu0 %v15907_v33  ;;  %16083 = vst [vmem:[#allocation37_spill] sm:$0xff] %v13877_v15 }
 0x5c1   :  { %v2954_v26 = vpop.f32.mrf.mxu1 }
 0x5c2   :  { %v13708_v34 = vadd.f32 %v2954_v26, %v2914_v8  ;;  %v13817_v8 = vld [vmem:[%s15884_s5 + $0xb0] sm:$0xff]  ;;  %v13889_v26 = vld [vmem:[%s15884_s5 + $0x20] sm:$0xff] }
 0x5c3   :  { %11765 = vmatpush3.bf16.msra.mxu0 %v12343_v24  ;;  %v11749_v36 = vpop.f32.mrf.mxu1  ;;  %16073 = vst [vmem:[#allocation27_spill] sm:$0xff] %v13817_v8  ;;  %v13883_v24 = vld [vmem:[%s15884_s5 + $0x30] sm:$0xff]  ;;  %16085 = vst [vmem:[#allocation39_spill] sm:$0xff] %v13889_v26 }
 0x5c4   :  { %11766 = vmatprep.subr.bf16.mxu0 %v15907_v33  ;;  %16084 = vst [vmem:[#allocation38_spill] sm:$0xff] %v13883_v24  ;;  %v13895_v36 = vld [vmem:[%s15884_s5 + $0x18] sm:$0xff] }
 0x5c5   :  { %v2957_v38 = vpop.f32.mrf.mxu1  ;;  %16086 = vst [vmem:[#allocation40_spill] sm:$0xff] %v13895_v36 }
 0x5c6   :  { %v13711_v39 = vadd.f32 %v2957_v38, %v2917_v13  ;;  %v13841_v13 = vld [vmem:[%s15884_s5 + $0x80] sm:$0xff] }
 0x5c7   :  { %11767 = vmatpush3.bf16.msra.mxu0 %v12347_v37  ;;  %v11750_v41 = vpop.f32.mrf.mxu1  ;;  %16077 = vst [vmem:[#allocation31_spill] sm:$0xff] %v13841_v13  ;;  %v13901_v37 = vld [vmem:[%s15884_s5 + $0x8] sm:$0xff]  ;;  %v13907_v38 = vld [vmem:[%s15884_s5] sm:$0xff] }
 0x5c8   :  { %11768 = vmatprep.subr.bf16.mxu0 %v15907_v33  ;;  %16087 = vst [vmem:[#allocation41_spill] sm:$0xff] %v13901_v37  ;;  %16088 = vst [vmem:[#allocation42_spill] sm:$0xff] %v13907_v38  ;;  %v13913_v41 = vld [vmem:[%s15884_s5 + $0x2f0] sm:$0xff] }
 0x5c9   :  { %v11761_v43 = vpop.f32.mrf.mxu1  ;;  %16089 = vst [vmem:[#allocation43_spill] sm:$0xff] %v13913_v41 }
 0x5cb   :  { %11769 = vmatpush3.bf16.msra.mxu0 %v12351_v42  ;;  %v3113_v44 = vpop.f32.mrf.mxu1  ;;  %v13919_v42 = vld [vmem:[%s15884_s5 + $0x2e8] sm:$0xff] }
 0x5cc   :  { %v3124_v51 = vpack.c.bf16 %v11761_v43, %v3113_v44  ;;  %11770 = vmatprep.subr.bf16.mxu0 %v15907_v33  ;;  %16090 = vst [vmem:[#allocation44_spill] sm:$0xff] %v13919_v42  ;;  %v13925_v43 = vld [vmem:[%s15884_s5 + $0x2d8] sm:$0xff]  ;;  %v13931_v44 = vld [vmem:[%s15884_s5 + $0x2d0] sm:$0xff] }
 0x5cd   :  { %16091 = vst [vmem:[#allocation45_spill] sm:$0xff] %v13925_v43  ;;  %16092 = vst [vmem:[#allocation46_spill] sm:$0xff] %v13931_v44 }
 0x5ce   :  { %3682 = vmatmul.mubr.bf16.vlgmr.msra.gmra.mxu1 %v3124_v51 }
 0x5cf   :  { %11171 = vmatpush3.bf16.msra.mxu1 %v12353_v49  ;;  %11771 = vmatpush3.bf16.msra.mxu0 %v12354_v48  ;;  %v13937_v49 = vld [vmem:[%s15884_s5 + $0x2c0] sm:$0xff]  ;;  %v13943_v48 = vld [vmem:[%s15884_s5 + $0x2b8] sm:$0xff] }
 0x5d0   :  { %3724 = vmatprep.mubr.bf16.mxu1 %v3123_v6  ;;  %11172 = vmatprep.subr.bf16.mxu1 %v12355_v46  ;;  %v13871_v6 = vld [vmem:[%s15884_s5 + $0x48] sm:$0xff]  ;;  %16093 = vst [vmem:[#allocation47_spill] sm:$0xff] %v13937_v49  ;;  %16094 = vst [vmem:[#allocation48_spill] sm:$0xff] %v13943_v48  ;;  %v13955_v46 = vld [vmem:[%s15884_s5 + $0x2a0] sm:$0xff] }
 0x5d1   :  { %11772 = vmatprep.subr.bf16.mxu0 %v15907_v33  ;;  %16082 = vst [vmem:[#allocation36_spill] sm:$0xff] %v13871_v6  ;;  %16096 = vst [vmem:[#allocation50_spill] sm:$0xff] %v13955_v46 }
 0x5d3   :  { %11173 = vmatpush3.bf16.msra.mxu1 %v12356_v10  ;;  %11773 = vmatpush3.bf16.msra.mxu0 %v12357_v23  ;;  %v13961_v10 = vld [vmem:[%s15884_s5 + $0x290] sm:$0xff]  ;;  %v13967_v23 = vld [vmem:[%s15884_s5 + $0x288] sm:$0xff] }
 0x5d4   :  { %11174 = vmatprep.subr.bf16.mxu1 %v12358_v45  ;;  %11774 = vmatprep.subr.bf16.mxu0 %v15907_v33  ;;  %16097 = vst [vmem:[#allocation51_spill] sm:$0xff] %v13961_v10  ;;  %16098 = vst [vmem:[#allocation52_spill] sm:$0xff] %v13967_v23  ;;  %v13973_v45 = vld [vmem:[%s15884_s5 + $0x278] sm:$0xff] }
 0x5d5   :  { %16099 = vst [vmem:[#allocation53_spill] sm:$0xff] %v13973_v45 }
 0x5d7   :  { %11175 = vmatpush3.bf16.msra.mxu1 %v12359_v54  ;;  %11775 = vmatpush3.bf16.msra.mxu0 %v12360_v25  ;;  %v13979_v54 = vld [vmem:[%s15884_s5 + $0x270] sm:$0xff]  ;;  %v13985_v25 = vld [vmem:[%s15884_s5 + $0x260] sm:$0xff] }
 0x5d8   :  { %11176 = vmatprep.subr.bf16.mxu1 %v12361_v27  ;;  %11776 = vmatprep.subr.bf16.mxu0 %v15907_v33  ;;  %16100 = vst [vmem:[#allocation54_spill] sm:$0xff] %v13979_v54  ;;  %16101 = vst [vmem:[#allocation55_spill] sm:$0xff] %v13985_v25  ;;  %v13991_v27 = vld [vmem:[%s15884_s5 + $0x258] sm:$0xff] }
 0x5d9   :  { %16102 = vst [vmem:[#allocation56_spill] sm:$0xff] %v13991_v27 }
 0x5db   :  { %11177 = vmatpush3.bf16.msra.mxu1 %v12362_v28  ;;  %11777 = vmatpush3.bf16.msra.mxu0 %v12363_v32  ;;  %v13997_v28 = vld [vmem:[%s15884_s5 + $0x248] sm:$0xff]  ;;  %v14003_v32 = vld [vmem:[%s15884_s5 + $0x240] sm:$0xff] }
 0x5dc   :  { %11178 = vmatprep.subr.bf16.mxu1 %v12364_v30  ;;  %16103 = vst [vmem:[#allocation57_spill] sm:$0xff] %v13997_v28  ;;  %16104 = vst [vmem:[#allocation58_spill] sm:$0xff] %v14003_v32  ;;  %v14009_v30 = vld [vmem:[%s15884_s5 + $0x230] sm:$0xff] }
 0x5dd   :  { %16105 = vst [vmem:[#allocation59_spill] sm:$0xff] %v14009_v30 }
 0x5de   :  { %11779 = vmatmul.mubr.bf16.vlgmr.msra.gmra.mxu0 %v3124_v51  ;;  %v13949_v51 = vld [vmem:[%s15884_s5 + $0x2a8] sm:$0xff] }
 0x5df   :  { %11179 = vmatpush3.bf16.msra.mxu1 %v12365_v29  ;;  %4107 = vmatprep.mubr.f32.mxu0 %v15907_v33  ;;  %16095 = vst [vmem:[#allocation49_spill] sm:$0xff] %v13949_v51  ;;  %v14015_v29 = vld [vmem:[%s15884_s5 + $0x228] sm:$0xff] }
 0x5e0   :  { %11180 = vmatprep.subr.bf16.mxu1 %v12366_v55  ;;  %16106 = vst [vmem:[#allocation60_spill] sm:$0xff] %v14015_v29  ;;  %v14021_v55 = vld [vmem:[%s15884_s5 + $0x218] sm:$0xff]  ;;  %v14063_v33 = vld [vmem:[%s15884_s5 + $0x1c8] sm:$0xff] }
 0x5e1   :  { %16107 = vst [vmem:[#allocation61_spill] sm:$0xff] %v14021_v55  ;;  %16114 = vst [vmem:[#allocation68_spill] sm:$0xff] %v14063_v33 }
 0x5e3   :  { %11181 = vmatpush3.bf16.msra.mxu1 %v12367_v56  ;;  %v14027_v56 = vld [vmem:[%s15884_s5 + $0x210] sm:$0xff] }
 0x5e4   :  { %11182 = vmatprep.subr.bf16.mxu1 %v12368_v57  ;;  %16108 = vst [vmem:[#allocation62_spill] sm:$0xff] %v14027_v56  ;;  %v14033_v57 = vld [vmem:[%s15884_s5 + $0x200] sm:$0xff] }
 0x5e5   :  { %16109 = vst [vmem:[#allocation63_spill] sm:$0xff] %v14033_v57 }
 0x5e7   :  { %11183 = vmatpush3.bf16.msra.mxu1 %v12369_v31  ;;  %v14039_v31 = vld [vmem:[%s15884_s5 + $0x1f8] sm:$0xff] }
 0x5e8   :  { %11184 = vmatprep.subr.bf16.mxu1 %v12370_v47  ;;  %16110 = vst [vmem:[#allocation64_spill] sm:$0xff] %v14039_v31  ;;  %v14045_v47 = vld [vmem:[%s15884_s5 + $0x1e8] sm:$0xff] }
 0x5e9   :  { %16111 = vst [vmem:[#allocation65_spill] sm:$0xff] %v14045_v47 }
 0x5eb   :  { %11185 = vmatpush3.bf16.msra.mxu1 %v12371_v58  ;;  %v14051_v58 = vld [vmem:[%s15884_s5 + $0x1e0] sm:$0xff] }
 0x5ec   :  { %3972 = vmatprep.subr.mxu1 %v13722_v59  ;;  %16112 = vst [vmem:[#allocation66_spill] sm:$0xff] %v14051_v58 }
 0x5ee   :  { %3725 = vmatmul.mubr.bf16.vlgmr.msra.gmra.mxu1 %v13702_v19  ;;  %v13859_v19 = vld [vmem:[%s15884_s5 + $0x60] sm:$0xff] }
 0x5ef   :  { %3973 = vmatpush1.msra.mxu1 %v13728_v21  ;;  %16080 = vst [vmem:[#allocation34_spill] sm:$0xff] %v13859_v19 }
 0x5f0   :  { %3974 = vmatprep.subr.mxu1 %v13733_v60 }
 0x5f1   :  { %3975 = vmatpush1.msra.mxu1 %v13739_v61 }
 0x5f2   :  { %3976 = vmatprep.subr.mxu1 %v13745_v14 }
 0x5f3   :  { %3977 = vmatpush1.msra.mxu1 %v13751_v50 }
 0x5f4   :  { %3978 = vmatprep.subr.mxu1 %v13757_v62 }
 0x5f5   :  { %3979 = vmatpush1.msra.mxu1 %v13763_v63 }
 0x5f6   :  { %3980 = vmatprep.subr.mxu1 %v13769_v40 }
 0x5f7   :  { %3981 = vmatpush1.msra.mxu1 %v13775_v52 }
 0x5f8   :  { %3982 = vmatprep.subr.mxu1 %v13781_v1 }
 0x5f9   :  { %3983 = vmatpush1.msra.mxu1 %v13787_v2 }
 0x5fa   :  { %3984 = vmatprep.subr.mxu1 %v13793_v3 }
 0x5fb   :  { %3985 = vmatpush1.msra.mxu1 %v13799_v4 }
 0x5fc   :  { %3986 = vmatprep.subr.mxu1 %v13805_v20 }
 0x5fd   :  { %3987 = vmatpush1.msra.mxu1 %v13811_v5 }
 0x5fe   :  { %3988 = vmatprep.subr.mxu1 %v13817_v8 }
 0x5ff   :  { %3989 = vmatpush1.msra.mxu1 %v13823_v7 }
 0x600   :  { %3990 = vmatprep.subr.mxu1 %v13829_v9 }
 0x601   :  { %3991 = vmatpush1.msra.mxu1 %v13835_v11 }
 0x602   :  { %3992 = vmatprep.subr.mxu1 %v13841_v13 }
 0x603   :  { %3993 = vmatpush1.msra.mxu1 %v13847_v12 }
 0x604   :  { %3994 = vmatprep.subr.mxu1 %v13853_v17 }
 0x605   :  { %3995 = vmatpush1.msra.mxu1 %v13859_v19 }
 0x606   :  { %3996 = vmatprep.subr.mxu1 %v13865_v22  ;;  %v14300_v22 = vld [vmem:[%s15884_s5 + $0x2f8] sm:$0xff] }
 0x607   :  { %3997 = vmatpush1.msra.mxu1 %v13871_v6  ;;  %v14294_v6 = vld [vmem:[%s15884_s5 + $0x300] sm:$0xff] }
 0x608   :  { %3998 = vmatprep.subr.mxu1 %v13877_v15  ;;  %v14288_v15 = vld [vmem:[%s15884_s5 + $0x308] sm:$0xff] }
 0x609   :  { %3999 = vmatpush1.msra.mxu1 %v13883_v24  ;;  %v14282_v24 = vld [vmem:[%s15884_s5 + $0x318] sm:$0xff] }
 0x60a   :  { %4000 = vmatprep.subr.mxu1 %v13889_v26  ;;  %v14276_v26 = vld [vmem:[%s15884_s5 + $0x320] sm:$0xff] }
 0x60b   :  { %4001 = vmatpush1.msra.mxu1 %v13895_v36  ;;  %v14270_v36 = vld [vmem:[%s15884_s5 + $0x330] sm:$0xff] }
 0x60c   :  { %4002 = vmatprep.subr.mxu1 %v13901_v37  ;;  %v14264_v37 = vld [vmem:[%s15884_s5 + $0x338] sm:$0xff] }
 0x60d   :  { %4003 = vmatpush1.msra.mxu1 %v13907_v38  ;;  %v14258_v38 = vld [vmem:[%s15884_s5 + $0x348] sm:$0xff] }
 0x60e   :  { %4004 = vmatprep.subr.mxu1 %v13913_v41  ;;  %v14252_v41 = vld [vmem:[%s15884_s5 + $0x350] sm:$0xff] }
 0x60f   :  { %4005 = vmatpush2.msra.mxu1 %v13919_v42  ;;  %v14246_v42 = vld [vmem:[%s15884_s5 + $0x360] sm:$0xff] }
 0x610   :  { %4006 = vmatprep.subr.mxu1 %v13925_v43  ;;  %v14240_v43 = vld [vmem:[%s15884_s5 + $0x368] sm:$0xff] }
 0x611   :  { %4007 = vmatpush2.msra.mxu1 %v13931_v44  ;;  %v14234_v44 = vld [vmem:[%s15884_s5 + $0x378] sm:$0xff] }
 0x612   :  { %4008 = vmatprep.subr.mxu1 %v13937_v49  ;;  %v14228_v49 = vld [vmem:[%s15884_s5 + $0x380] sm:$0xff] }
 0x613   :  { %4009 = vmatpush2.msra.mxu1 %v13943_v48  ;;  %v14222_v48 = vld [vmem:[%s15884_s5 + $0x390] sm:$0xff] }
 0x614   :  { %4010 = vmatprep.subr.mxu1 %v13949_v51  ;;  %v14216_v51 = vld [vmem:[%s15884_s5 + $0x398] sm:$0xff] }
 0x615   :  { %4011 = vmatpush2.msra.mxu1 %v13955_v46  ;;  %v14210_v46 = vld [vmem:[%s15884_s5 + $0x3a8] sm:$0xff] }
 0x616   :  { %4012 = vmatprep.subr.mxu1 %v13961_v10  ;;  %v14204_v10 = vld [vmem:[%s15884_s5 + $0x3b0] sm:$0xff] }
 0x617   :  { %4013 = vmatpush2.msra.mxu1 %v13967_v23  ;;  %v14198_v23 = vld [vmem:[%s15884_s5 + $0x3c0] sm:$0xff] }
 0x618   :  { %4014 = vmatprep.subr.mxu1 %v13973_v45  ;;  %v14192_v45 = vld [vmem:[%s15884_s5 + $0x3c8] sm:$0xff] }
 0x619   :  { %4015 = vmatpush2.msra.mxu1 %v13979_v54  ;;  %v14186_v54 = vld [vmem:[%s15884_s5 + $0x3d8] sm:$0xff] }
 0x61a   :  { %4016 = vmatprep.subr.mxu1 %v13985_v25  ;;  %v14180_v25 = vld [vmem:[%s15884_s5 + $0x3e0] sm:$0xff] }
 0x61b   :  { %4017 = vmatpush2.msra.mxu1 %v13991_v27  ;;  %v14174_v27 = vld [vmem:[%s15884_s5 + $0x3f0] sm:$0xff] }
 0x61c   :  { %4018 = vmatprep.subr.mxu1 %v13997_v28  ;;  %v14168_v28 = vld [vmem:[%s15884_s5 + $0x3f8] sm:$0xff] }
 0x61d   :  { %4019 = vmatpush2.msra.mxu1 %v14003_v32  ;;  %v14162_v32 = vld [vmem:[%s15884_s5 + $0x408] sm:$0xff] }
 0x61e   :  { %4020 = vmatprep.subr.mxu1 %v14009_v30  ;;  %v16121_v30 = vmov 0.0  }
 0x61f   :  { %4021 = vmatpush2.msra.mxu1 %v14015_v29  ;;  %v14136_v29 = vld [vmem:[%s15884_s5 + $0x438] sm:$0xff] }
 0x620   :  { %4022 = vmatprep.subr.mxu1 %v14021_v55  ;;  %v14116_v55 = vld [vmem:[%s15884_s5 + $0x180] sm:$0xff] }
 0x621   :  { %4023 = vmatpush2.msra.mxu1 %v14027_v56  ;;  %v14104_v56 = vld [vmem:[%s15884_s5 + $0x188] sm:$0xff]  ;;  %16120 = vst [vmem:[#allocation74_spill] sm:$0xff] %v14116_v55 }
 0x622   :  { %4024 = vmatprep.subr.mxu1 %v14033_v57  ;;  %v14069_v57 = vld [vmem:[%s15884_s5 + $0x1b8] sm:$0xff]  ;;  %16119 = vst [vmem:[#allocation73_spill] sm:$0xff] %v14104_v56 }
 0x623   :  { %4025 = vmatpush2.msra.mxu1 %v14039_v31  ;;  %16115 = vst [vmem:[#allocation69_spill] sm:$0xff] %v14069_v57  ;;  %v14075_v31 = vld [vmem:[%s15884_s5 + $0x1b0] sm:$0xff] }
 0x624   :  { %4026 = vmatprep.subr.mxu1 %v14045_v47  ;;  %16116 = vst [vmem:[#allocation70_spill] sm:$0xff] %v14075_v31  ;;  %v14081_v47 = vld [vmem:[%s15884_s5 + $0x1a0] sm:$0xff] }
 0x625   :  { %4027 = vmatpush2.msra.mxu1 %v14051_v58  ;;  %16117 = vst [vmem:[#allocation71_spill] sm:$0xff] %v14081_v47  ;;  %v14086_v58 = vld [vmem:[%s15884_s5 + $0x470] sm:$0xff] }
 0x626   :  { %4028 = vmatprep.subr.mxu1 %v14057_v35  ;;  %v14092_v35 = vld [vmem:[%s15884_s5 + $0x198] sm:$0xff]  ;;  %4043 = vmatprep.subr.mxu0 %v14086_v58 }
 0x627   :  { %4029 = vmatpush2.msra.mxu1 %v14063_v33  ;;  %16118 = vst [vmem:[#allocation72_spill] sm:$0xff] %v14092_v35  ;;  %v14098_v33 = vld [vmem:[%s15884_s5 + $0x468] sm:$0xff] }
 0x628   :  { %4030 = vmatprep.subr.mxu1 %v14069_v57  ;;  %4044 = vmatpush1.msra.mxu0 %v14098_v33  ;;  %v14110_v57 = vld [vmem:[%s15884_s5 + $0x458] sm:$0xff] }
 0x629   :  { %4031 = vmatpush2.msra.mxu1 %v14075_v31  ;;  %4045 = vmatprep.subr.mxu0 %v14110_v57  ;;  %v14122_v31 = vld [vmem:[%s15884_s5 + $0x450] sm:$0xff] }
 0x62a   :  { %4032 = vmatprep.subr.mxu1 %v14081_v47  ;;  %4046 = vmatpush1.msra.mxu0 %v14122_v31  ;;  %v14129_v47 = vld [vmem:[%s15884_s5 + $0x440] sm:$0xff] }
 0x62b   :  { %4033 = vmatpush2.msra.mxu1 %v14092_v35  ;;  %4047 = vmatprep.subr.mxu0 %v14129_v47  ;;  %v14143_v35 = vld [vmem:[%s15884_s5 + $0x428] sm:$0xff] }
 0x62c   :  { %4034 = vmatprep.subr.mxu1 %v14104_v56  ;;  %4048 = vmatpush1.msra.mxu0 %v14136_v29  ;;  %v14150_v56 = vld [vmem:[%s15884_s5 + $0x420] sm:$0xff] }
 0x62d   :  { %4035 = vmatpush2.msra.mxu1 %v14116_v55  ;;  %4049 = vmatprep.subr.mxu0 %v14143_v35  ;;  %v14156_v55 = vld [vmem:[%s15884_s5 + $0x410] sm:$0xff] }
 0x62e   :  { %11782 = vmatprep.subr.mxu1 %v16121_v30  ;;  %4050 = vmatpush1.msra.mxu0 %v14150_v56 }
 0x62f   :  { %4051 = vmatprep.subr.mxu0 %v14156_v55 }
 0x630   :  { %4052 = vmatpush1.msra.mxu0 %v14162_v32 }
 0x631   :  { %4053 = vmatprep.subr.mxu0 %v14168_v28 }
 0x632   :  { %4054 = vmatpush1.msra.mxu0 %v14174_v27 }
 0x633   :  { %4055 = vmatprep.subr.mxu0 %v14180_v25 }
 0x634   :  { %4056 = vmatpush1.msra.mxu0 %v14186_v54 }
 0x635   :  { %4057 = vmatprep.subr.mxu0 %v14192_v45 }
 0x636   :  { %4058 = vmatpush1.msra.mxu0 %v14198_v23 }
 0x637   :  { %4059 = vmatprep.subr.mxu0 %v14204_v10 }
 0x638   :  { %4060 = vmatpush1.msra.mxu0 %v14210_v46 }
 0x639   :  { %4061 = vmatprep.subr.mxu0 %v14216_v51 }
 0x63a   :  { %4062 = vmatpush1.msra.mxu0 %v14222_v48 }
 0x63b   :  { %4063 = vmatprep.subr.mxu0 %v14228_v49 }
 0x63c   :  { %4064 = vmatpush1.msra.mxu0 %v14234_v44 }
 0x63d   :  { %4065 = vmatprep.subr.mxu0 %v14240_v43 }
 0x63e   :  { %4066 = vmatpush1.msra.mxu0 %v14246_v42 }
 0x63f   :  { %4067 = vmatprep.subr.mxu0 %v14252_v41 }
 0x640   :  { %4068 = vmatpush1.msra.mxu0 %v14258_v38 }
 0x641   :  { %4069 = vmatprep.subr.mxu0 %v14264_v37 }
 0x642   :  { %4070 = vmatpush1.msra.mxu0 %v14270_v36 }
 0x643   :  { %4071 = vmatprep.subr.mxu0 %v14276_v26 }
 0x644   :  { %4072 = vmatpush1.msra.mxu0 %v14282_v24 }
 0x645   :  { %4073 = vmatprep.subr.mxu0 %v14288_v15 }
 0x646   :  { %4074 = vmatpush1.msra.mxu0 %v14294_v6 }
 0x647   :  { %11201 = vmatprep.subr.mxu0 %v14300_v22 }
 0x67e   :  { %v3640_v19 = vpop.f32.mrf.mxu0 }
 0x680   :  { %v3642_v17 = vpop.f32.mrf.mxu0 }
 0x682   :  { %v3644_v13 = vpop.f32.mrf.mxu0 }
 0x684   :  { %v3646_v20 = vpop.f32.mrf.mxu0 }
 0x68e   :  { %v3683_v12 = vpop.f32.mrf.mxu1 }
 0x68f   :  { %v3684_v9 = vadd.f32 %v3683_v12, %v3640_v19 }
 0x690   :  { %v3685_v11 = vpop.f32.mrf.mxu1 }
 0x691   :  { %v3686_v8 = vadd.f32 %v3685_v11, %v3642_v17  ;;  %v14304_v3 = vadd.f32 %v3684_v9, %v13694_v18 }
 0x692   :  { %v3687_v7 = vpop.f32.mrf.mxu1 }
 0x693   :  { %v3688_v5 = vadd.f32 %v3687_v7, %v3644_v13  ;;  %v14310_v52 = vadd.f32 %v3686_v8, %v13696_v0 }
 0x694   :  { %v3689_v4 = vpop.f32.mrf.mxu1 }
 0x695   :  { %v14307_v2 = vadd.f32 %v3688_v5, %v13698_v53  ;;  %v3690_v1 = vadd.f32 %v3689_v4, %v3646_v20  ;;  %16122 = vst [vmem:[#allocation75_spill] sm:$0xff] %v14310_v52 }
 0x697   :  { %v3780_v40 = vadd.f32 %v14307_v2, %v14304_v3  ;;  %v14315_v12 = vadd.f32 %v3690_v1, %v13700_v16  ;;  %v14333_v1 = vld [vmem:[%s15884_s5 + $0x460] sm:$0xff] }
 0x699   :  { %16123 = vst [vmem:[#allocation76_spill] sm:$0xff] %v14315_v12  ;;  %v3781_v11 = vrot.slane %v3780_v40, 4  ;;  %v3787_v7 = vadd.f32 %v14315_v12, %v14310_v52 }
 0x69b   :  { %v3782_v13 = vadd.f32 %v3781_v11, %v3780_v40  ;;  %v3788_v18 = vrot.slane %v3787_v7, 4  ;;  %v14326_v40 = vld [vmem:[%s15884_s5 + $0x478] sm:$0xff] }
 0x69d   :  { %v3783_v9 = vrot.slane %v3782_v13, 2  ;;  %v3789_v17 = vadd.f32 %v3788_v18, %v3787_v7  ;;  %v14356_v7 = vld [vmem:[%s15884_s5 + $0x418] sm:$0xff]  ;;  %v14363_v18 = vld [vmem:[%s15884_s5 + $0x400] sm:$0xff] }
 0x69e   :  { %v3767_v53 = vpop.f32.mrf.mxu0  ;;  %16124 = vst [vmem:[#allocation77_spill] sm:$0xff] %v14363_v18 }
 0x69f   :  { %v3790_v5 = vrot.slane %v3789_v17, 2  ;;  %v3784_v4 = vadd.f32 %v3783_v9, %v3782_v13 }
 0x6a0   :  { %v11780_v20 = vpop.f32.mrf.mxu0 }
 0x6a1   :  { %v3791_v0 = vadd.f32 %v3790_v5, %v3789_v17  ;;  %v3785_v19 = vrot.slane %v3784_v4, 1  ;;  %v14370_v5 = vld [vmem:[%s15884_s5 + $0x3e8] sm:$0xff]  ;;  %v14377_v20 = vld [vmem:[%s15884_s5 + $0x3d0] sm:$0xff] }
 0x6a2   :  { %v3770_v8 = vpop.f32.mrf.mxu0 }
 0x6a3   :  { %v3792_v63 = vrot.slane %v3791_v0, 1  ;;  %v14321_v16 = vadd.f32 %v3785_v19, %v3784_v4 }
 0x6a4   :  { %v11781_v62 = vpop.f32.mrf.mxu0 }
 0x6a5   :  { %v14319_v50 = vadd.f32 %v3792_v63, %v3791_v0  ;;  %v14342_v62 = vld [vmem:[%s15884_s5 + $0x448] sm:$0xff]  ;;  %v14349_v63 = vld [vmem:[%s15884_s5 + $0x430] sm:$0xff] }
 0x6a7   :  { %4036 = vmatprep.mubr.f32.mxu1 %v14319_v50 }
 0x6a8   :  { %4037 = vmatmul.mubr.f32.vlgmr.msra.gmra.mxu1 %v14321_v16 }
 0x6a9   :  { %11783 = vmatpush3.msra.mxu1 %v14326_v40  ;;  %11814 = vmatprep.mubr.msk.f32.mxu1 %vm13081_vm1, %v16121_v30 }
 0x6aa   :  { %11784 = vmatprep.subr.mxu1 %v16121_v30 }
 0x6ab   :  { %11785 = vmatpush3.msra.mxu1 %v14333_v1 }
 0x6ac   :  { %11786 = vmatprep.subr.mxu1 %v16121_v30 }
 0x6ad   :  { %11787 = vmatpush3.msra.mxu1 %v14342_v62 }
 0x6ae   :  { %v11186_v11 = vpop.f32.mrf.mxu1  ;;  %11788 = vmatprep.subr.mxu1 %v16121_v30 }
 0x6af   :  { %11789 = vmatpush3.msra.mxu1 %v14349_v63 }
 0x6b0   :  { %v11187_v13 = vpop.f32.mrf.mxu1  ;;  %11790 = vmatprep.subr.mxu1 %v16121_v30 }
 0x6b1   :  { %v11188_v9 = vadd.f32 %v11187_v13, %v11186_v11  ;;  %11791 = vmatpush3.msra.mxu1 %v14356_v7  ;;  %v14384_v11 = vld [vmem:[%s15884_s5 + $0x3b8] sm:$0xff] }
 0x6b2   :  { %v11189_v17 = vpop.f32.mrf.mxu1  ;;  %11792 = vmatprep.subr.mxu1 %v16121_v30 }
 0x6b3   :  { %11793 = vmatpush3.msra.mxu1 %v14363_v18  ;;  %v3768_v0 = vadd.f32 %v11188_v9, %v3767_v53  ;;  %v14391_v18 = vld [vmem:[%s15884_s5 + $0x3a0] sm:$0xff] }
 0x6b4   :  { %v11190_v4 = vpop.f32.mrf.mxu1  ;;  %11794 = vmatprep.subr.mxu1 %v16121_v30 }
 0x6b5   :  { %v11191_v19 = vadd.f32 %v11190_v4, %v11189_v17  ;;  %11795 = vmatpush3.msra.mxu1 %v14370_v5  ;;  %v14394_v53 = vadd.f32 %v3768_v0, %v13708_v34  ;;  %v14413_v34 = vld [vmem:[%s15884_s5 + $0x370] sm:$0xff]  ;;  %v14420_v4 = vld [vmem:[%s15884_s5 + $0x358] sm:$0xff] }
 0x6b6   :  { %11796 = vmatprep.subr.mxu1 %v16121_v30  ;;  %16128 = vst [vmem:[#allocation81_spill] sm:$0xff] %v14413_v34  ;;  %16129 = vst [vmem:[#allocation82_spill] sm:$0xff] %v14420_v4 }
 0x6b7   :  { %v3771_v13 = vadd.f32 %v11191_v19, %v3770_v8  ;;  %11797 = vmatpush3.msra.mxu1 %v14377_v20  ;;  %16125 = vst [vmem:[#allocation78_spill] sm:$0xff] %v14394_v53  ;;  %v14404_v8 = vld [vmem:[%s15884_s5 + $0x388] sm:$0xff]  ;;  %v14427_v19 = vld [vmem:[%s15884_s5 + $0x340] sm:$0xff] }
 0x6b8   :  { %11798 = vmatprep.subr.mxu1 %v16121_v30  ;;  %16127 = vst [vmem:[#allocation80_spill] sm:$0xff] %v14404_v8  ;;  %16130 = vst [vmem:[#allocation83_spill] sm:$0xff] %v14427_v19 }
 0x6b9   :  { %v14397_v9 = vadd.f32 %v3771_v13, %v13711_v39  ;;  %11799 = vmatpush3.msra.mxu1 %v14384_v11 }
 0x6ba   :  { %11800 = vmatprep.subr.mxu1 %v16121_v30 }
 0x6bb   :  { %16126 = vst [vmem:[#allocation79_spill] sm:$0xff] %v14397_v9  ;;  %v3794_v17 = vadd.f32 %v14397_v9, %v14394_v53  ;;  %11801 = vmatpush3.msra.mxu1 %v14391_v18 }
 0x6bc   :  { %11802 = vmatprep.subr.mxu1 %v16121_v30 }
 0x6bd   :  { %v3795_v39 = vrot.slane %v3794_v17, 4  ;;  %11803 = vmatpush3.msra.mxu1 %v14404_v8  ;;  %v14434_v8 = vld [vmem:[%s15884_s5 + $0x328] sm:$0xff] }
 0x6be   :  { %11804 = vmatprep.subr.mxu1 %v16121_v30 }
 0x6bf   :  { %v3796_v0 = vadd.f32 %v3795_v39, %v3794_v17  ;;  %11805 = vmatpush3.msra.mxu1 %v14413_v34  ;;  %v14441_v39 = vld [vmem:[%s15884_s5 + $0x310] sm:$0xff] }
 0x6c0   :  { %11806 = vmatprep.subr.mxu1 %v16121_v30 }
 0x6c1   :  { %11807 = vmatpush3.msra.mxu1 %v14420_v4  ;;  %v3797_v13 = vrot.slane %v3796_v0, 2 }
 0x6c2   :  { %11808 = vmatprep.subr.mxu1 %v16121_v30 }
 0x6c3   :  { %11809 = vmatpush3.msra.mxu1 %v14427_v19  ;;  %v3798_v17 = vadd.f32 %v3797_v13, %v3796_v0  ;;  %v14449_v19 = vld [vmem:[%s15884_s5 + $0x178] sm:$0xff]  ;;  %v14455_v0 = vld [vmem:[%s15884_s5 + $0x2e0] sm:$0xff] }
 0x6c4   :  { %11810 = vmatprep.subr.mxu1 %v16121_v30  ;;  %v14460_v13 = vld [vmem:[%s15884_s5 + $0x160] sm:$0xff] }
 0x6c5   :  { %11811 = vmatpush3.msra.mxu1 %v14434_v8  ;;  %v3799_v4 = vrot.slane %v3798_v17, 1 }
 0x6c6   :  { %11812 = vmatprep.subr.mxu1 %v16121_v30 }
 0x6c7   :  { %11813 = vmatpush3.msra.mxu1 %v14441_v39  ;;  %v3800_v34 = vadd.f32 %v3799_v4, %v3798_v17  ;;  %v3806_v4 = vmul.f32 %v14397_v9, %v14397_v9  ;;  %v14499_v17 = vld [vmem:[%s15884_s5 + $0x298] sm:$0xff] }
 0x6c8   :  { %4325 = vmatprep.subr.mxu1 %v14086_v58  ;;  %v14467_v58 = vld [vmem:[%s15884_s5 + $0x2c8] sm:$0xff]  ;;  %v14508_v9 = vld [vmem:[%s15884_s5 + $0x118] sm:$0xff] }
 0x6c9   :  { %4108 = vmatmul.mubr.f32.vlgmr.msra.gmra.mxu0 %v3800_v34  ;;  %11815 = vmatmul.mubr.f32.vlgmr.msra.gmra.mxu1 %v3800_v34  ;;  %v14474_v34 = vld [vmem:[%s15884_s5 + $0x148] sm:$0xff] }
 0x6ca   :  { %11202 = vmatpush3.msra.mxu0 %v14449_v19  ;;  %4326 = vmatpush1.msra.mxu1 %v14098_v33  ;;  %v14481_v33 = vld [vmem:[%s15884_s5 + $0x2b0] sm:$0xff] }
 0x6cb   :  { %11203 = vmatprep.subr.mxu0 %v14455_v0  ;;  %4178 = vmatprep.mubr.f32.mxu0 %v14319_v50  ;;  %v14490_v50 = vld [vmem:[%s15884_s5 + $0x130] sm:$0xff] }
 0x6cc   :  { %4327 = vmatprep.subr.mxu1 %v14110_v57  ;;  %11204 = vmatpush3.msra.mxu0 %v14460_v13  ;;  %v3805_v57 = vmul.f32 %v14315_v12, %v14315_v12  ;;  %v14524_v12 = vld [vmem:[%s15884_s5 + $0x100] sm:$0xff] }
 0x6cd   :  { %4328 = vmatpush1.msra.mxu1 %v14122_v31  ;;  %11205 = vmatprep.subr.mxu0 %v14467_v58  ;;  %v3803_v31 = vmul.f32 %v14394_v53, %v14394_v53  ;;  %v14517_v53 = vld [vmem:[%s15884_s5 + $0x280] sm:$0xff] }
 0x6ce   :  { %4329 = vmatprep.subr.mxu1 %v14129_v47  ;;  %11206 = vmatpush3.msra.mxu0 %v14474_v34  ;;  %v3802_v47 = vmul.f32 %v14310_v52, %v14310_v52 }
 0x6cf   :  { %4330 = vmatpush1.msra.mxu1 %v14136_v29  ;;  %11207 = vmatprep.subr.mxu0 %v14481_v33  ;;  %v3821_v29 = vadd.f32 %v3806_v4, %v3803_v31 }
 0x6d0   :  { %4331 = vmatprep.subr.mxu1 %v14143_v35  ;;  %11208 = vmatpush3.msra.mxu0 %v14490_v50  ;;  %v3814_v52 = vadd.f32 %v3805_v57, %v3802_v47  ;;  %v14531_v35 = vld [vmem:[%s15884_s5 + $0x268] sm:$0xff] }
 0x6d1   :  { %4332 = vmatpush1.msra.mxu1 %v14150_v56  ;;  %11209 = vmatprep.subr.mxu0 %v14499_v17  ;;  %v14538_v56 = vld [vmem:[%s15884_s5 + $0xe8] sm:$0xff]  ;;  %v3822_v4 = vrot.slane %v3821_v29, 4 }
 0x6d2   :  { %4333 = vmatprep.subr.mxu1 %v14156_v55  ;;  %11210 = vmatpush3.msra.mxu0 %v14508_v9  ;;  %v14545_v55 = vld [vmem:[%s15884_s5 + $0x250] sm:$0xff]  ;;  %v3815_v57 = vrot.slane %v3814_v52, 4 }
 0x6d3   :  { %4334 = vmatpush1.msra.mxu1 %v14162_v32  ;;  %11211 = vmatprep.subr.mxu0 %v14517_v53  ;;  %v14552_v32 = vld [vmem:[%s15884_s5 + $0xd0] sm:$0xff]  ;;  %v3823_v31 = vadd.f32 %v3822_v4, %v3821_v29 }
 0x6d4   :  { %4335 = vmatprep.subr.mxu1 %v14168_v28  ;;  %11212 = vmatpush3.msra.mxu0 %v14524_v12  ;;  %v14559_v28 = vld [vmem:[%s15884_s5 + $0x238] sm:$0xff]  ;;  %v3816_v47 = vadd.f32 %v3815_v57, %v3814_v52  ;;  %v14608_v52 = vld [vmem:[%s15884_s5 + $0x70] sm:$0xff] }
 0x6d5   :  { %4336 = vmatpush1.msra.mxu1 %v14174_v27  ;;  %11213 = vmatprep.subr.mxu0 %v14531_v35  ;;  %v14566_v27 = vld [vmem:[%s15884_s5 + $0xb8] sm:$0xff] }
 0x6d6   :  { %4337 = vmatprep.subr.mxu1 %v14180_v25  ;;  %11214 = vmatpush3.msra.mxu0 %v14538_v56  ;;  %v14573_v25 = vld [vmem:[%s15884_s5 + $0x220] sm:$0xff]  ;;  %v3817_v29 = vrot.slane %v3816_v47, 2 }
 0x6d7   :  { %4338 = vmatpush1.msra.mxu1 %v14186_v54  ;;  %11215 = vmatprep.subr.mxu0 %v14545_v55  ;;  %v14580_v54 = vld [vmem:[%s15884_s5 + $0xa0] sm:$0xff] }
 0x6d8   :  { %4339 = vmatprep.subr.mxu1 %v14192_v45  ;;  %11216 = vmatpush3.msra.mxu0 %v14552_v32  ;;  %v14587_v45 = vld [vmem:[%s15884_s5 + $0x208] sm:$0xff]  ;;  %v3818_v57 = vadd.f32 %v3817_v29, %v3816_v47  ;;  %v16153_v47 = vld [vmem:[#allocation38_spill] sm:$0xff]  ;;  %v16158_v29 = vld [vmem:[#allocation43_spill] sm:$0xff] }
 0x6d9   :  { %4340 = vmatpush1.msra.mxu1 %v14198_v23  ;;  %11217 = vmatprep.subr.mxu0 %v14559_v28  ;;  %v14594_v23 = vld [vmem:[%s15884_s5 + $0x88] sm:$0xff] }
 0x6da   :  { %4341 = vmatprep.subr.mxu1 %v14204_v10  ;;  %11218 = vmatpush3.msra.mxu0 %v14566_v27  ;;  %v14601_v10 = vld [vmem:[%s15884_s5 + $0x1f0] sm:$0xff] }
 0x6db   :  { %4342 = vmatpush1.msra.mxu1 %v14210_v46  ;;  %11219 = vmatprep.subr.mxu0 %v14573_v25  ;;  %v3824_v46 = vrot.slane %v3823_v31, 2 }
 0x6dc   :  { %4343 = vmatprep.subr.mxu1 %v14216_v51  ;;  %11220 = vmatpush3.msra.mxu0 %v14580_v54  ;;  %v14615_v51 = vld [vmem:[%s15884_s5 + $0x1d8] sm:$0xff] }
 0x6dd   :  { %4344 = vmatpush1.msra.mxu1 %v14222_v48  ;;  %11221 = vmatprep.subr.mxu0 %v14587_v45  ;;  %v14622_v48 = vld [vmem:[%s15884_s5 + $0x58] sm:$0xff]  ;;  %v3825_v4 = vadd.f32 %v3824_v46, %v3823_v31 }
 0x6de   :  { %4345 = vmatprep.subr.mxu1 %v14228_v49  ;;  %11222 = vmatpush3.msra.mxu0 %v14594_v23  ;;  %v14629_v49 = vld [vmem:[%s15884_s5 + $0x1c0] sm:$0xff] }
 0x6df   :  { %4346 = vmatpush1.msra.mxu1 %v14234_v44  ;;  %11223 = vmatprep.subr.mxu0 %v14601_v10  ;;  %v14636_v44 = vld [vmem:[%s15884_s5 + $0x40] sm:$0xff]  ;;  %v3826_v31 = vrot.slane %v3825_v4, 1 }
 0x6e0   :  { %4347 = vmatprep.subr.mxu1 %v14240_v43  ;;  %11224 = vmatpush3.msra.mxu0 %v14608_v52  ;;  %v14643_v43 = vld [vmem:[%s15884_s5 + $0x1a8] sm:$0xff] }
 0x6e1   :  { %4348 = vmatpush1.msra.mxu1 %v14246_v42  ;;  %11225 = vmatprep.subr.mxu0 %v14615_v51  ;;  %v14650_v42 = vld [vmem:[%s15884_s5 + $0x28] sm:$0xff] }
 0x6e2   :  { %4349 = vmatprep.subr.mxu1 %v14252_v41  ;;  %11226 = vmatpush3.msra.mxu0 %v14622_v48  ;;  %v14657_v41 = vld [vmem:[%s15884_s5 + $0x190] sm:$0xff] }
 0x6e3   :  { %4350 = vmatpush1.msra.mxu1 %v14258_v38  ;;  %11227 = vmatprep.subr.mxu0 %v14629_v49  ;;  %v14664_v38 = vld [vmem:[%s15884_s5 + $0x10] sm:$0xff] }
 0x6e4   :  { %4351 = vmatprep.subr.mxu1 %v14264_v37  ;;  %11228 = vmatpush3.msra.mxu0 %v14636_v44  ;;  %v3819_v37 = vrot.slane %v3818_v57, 1 }
 0x6e5   :  { %4352 = vmatpush1.msra.mxu1 %v14270_v36  ;;  %11229 = vmatprep.subr.mxu0 %v14643_v43  ;;  %v14674_v36 = vadd.f32 %v3826_v31, %v3825_v4  ;;  %v16162_v4 = vld [vmem:[#allocation47_spill] sm:$0xff]  ;;  %v16168_v31 = vld [vmem:[#allocation53_spill] sm:$0xff] }
 0x6e6   :  { %4353 = vmatprep.subr.mxu1 %v14276_v26  ;;  %11230 = vmatpush3.msra.mxu0 %v14650_v42  ;;  %v3820_v26 = vadd.f32 %v3819_v37, %v3818_v57  ;;  %v16164_v57 = vld [vmem:[#allocation49_spill] sm:$0xff]  ;;  %v16169_v37 = vld [vmem:[#allocation54_spill] sm:$0xff] }
 0x6e7   :  { %4354 = vmatpush1.msra.mxu1 %v14282_v24  ;;  %11231 = vmatprep.subr.mxu0 %v14657_v41 }
 0x6e8   :  { %4355 = vmatprep.subr.mxu1 %v14288_v15  ;;  %11232 = vmatpush3.msra.mxu0 %v14664_v38  ;;  %v16132_v15 = vld [vmem:[#allocation17_spill] sm:$0xff] }
 0x6e9   :  { %4356 = vmatpush1.msra.mxu1 %v14294_v6  ;;  %4389 = vmatprep.mubr.f32.mxu1 %v16121_v30  ;;  %v3804_v6 = vmul.f32 %v14307_v2, %v14307_v2 }
 0x6ea   :  { %4179 = vmatmul.mubr.f32.vlgmr.msra.gmra.mxu0 %v14321_v16  ;;  %4254 = vmatprep.subr.mxu0 %v13722_v59  ;;  %v3801_v59 = vmul.f32 %v14304_v3, %v14304_v3  ;;  %v16136_v16 = vld [vmem:[#allocation21_spill] sm:$0xff] }
 0x6eb   :  { %4390 = vmatmul.mubr.f32.vlgmr.msra.gmra.mxu1 %v14674_v36  ;;  %11253 = vmatprep.subr.mxu1 %v14300_v22 }
 0x6ec   :  { %4255 = vmatpush1.msra.mxu0 %v13728_v21  ;;  %4318 = vmatprep.mubr.f32.mxu0 %v3820_v26  ;;  %v16131_v21 = vld [vmem:[#allocation16_spill] sm:$0xff]  ;;  %v3807_v22 = vadd.f32 %v3804_v6, %v3801_v59  ;;  %v16172_v59 = vld [vmem:[#allocation57_spill] sm:$0xff] }
 0x6ed   :  { %11254 = vmatpush3.msra.mxu1 %v14449_v19  ;;  %4460 = vmatprep.mubr.f32.mxu1 %v3820_v26  ;;  %v16137_v19 = vld [vmem:[#allocation22_spill] sm:$0xff]  ;;  %v16170_v26 = vld [vmem:[#allocation55_spill] sm:$0xff]  ;;  %v16171_v6 = vld [vmem:[#allocation56_spill] sm:$0xff] }
 0x6ee   :  { %4256 = vmatprep.subr.mxu0 %v13733_v60  ;;  %11255 = vmatprep.subr.mxu1 %v14455_v0  ;;  %v16133_v60 = vld [vmem:[#allocation18_spill] sm:$0xff]  ;;  %v3808_v24 = vrot.slane %v3807_v22, 4  ;;  %v16138_v0 = vld [vmem:[#allocation23_spill] sm:$0xff] }
 0x6ef   :  { %4257 = vmatpush1.msra.mxu0 %v13739_v61  ;;  %11256 = vmatpush3.msra.mxu1 %v14460_v13  ;;  %v16134_v61 = vld [vmem:[#allocation19_spill] sm:$0xff]  ;;  %v16139_v13 = vld [vmem:[#allocation24_spill] sm:$0xff] }
 0x6f0   :  { %4258 = vmatprep.subr.mxu0 %v13745_v14  ;;  %11257 = vmatprep.subr.mxu1 %v14467_v58  ;;  %v16135_v14 = vld [vmem:[#allocation20_spill] sm:$0xff]  ;;  %v3809_v58 = vadd.f32 %v3808_v24, %v3807_v22  ;;  %v16174_v22 = vld [vmem:[#allocation59_spill] sm:$0xff] }
 0x6f1   :  { %4259 = vmatpush1.msra.mxu0 %v16131_v21  ;;  %11258 = vmatpush3.msra.mxu1 %v14474_v34  ;;  %v16140_v34 = vld [vmem:[#allocation25_spill] sm:$0xff]  ;;  %v16173_v21 = vld [vmem:[#allocation58_spill] sm:$0xff]  ;;  %v16179_v24 = vld [vmem:[#allocation64_spill] sm:$0xff] }
 0x6f2   :  { %4260 = vmatprep.subr.mxu0 %v16132_v15  ;;  %11259 = vmatprep.subr.mxu1 %v14481_v33  ;;  %v16144_v33 = vld [vmem:[#allocation29_spill] sm:$0xff]  ;;  %v16175_v15 = vld [vmem:[#allocation60_spill] sm:$0xff] }
 0x6f3   :  { %4261 = vmatpush1.msra.mxu0 %v16133_v60  ;;  %11260 = vmatpush3.msra.mxu1 %v14490_v50  ;;  %v3810_v50 = vrot.slane %v3809_v58, 2  ;;  %v16176_v60 = vld [vmem:[#allocation61_spill] sm:$0xff] }
 0x6f4   :  { %4262 = vmatprep.subr.mxu0 %v16134_v61  ;;  %11261 = vmatprep.subr.mxu1 %v14499_v17  ;;  %v16145_v17 = vld [vmem:[#allocation30_spill] sm:$0xff] }
 0x6f5   :  { %4263 = vmatpush1.msra.mxu0 %v16135_v14  ;;  %11262 = vmatpush3.msra.mxu1 %v14508_v9  ;;  %v16141_v9 = vld [vmem:[#allocation26_spill] sm:$0xff]  ;;  %v16178_v14 = vld [vmem:[#allocation63_spill] sm:$0xff] }
 0x6f6   :  { %4264 = vmatprep.subr.mxu0 %v16136_v16  ;;  %11263 = vmatprep.subr.mxu1 %v14517_v53  ;;  %v16142_v53 = vld [vmem:[#allocation27_spill] sm:$0xff]  ;;  %v16177_v61 = vld [vmem:[#allocation62_spill] sm:$0xff]  ;;  %v16180_v16 = vld [vmem:[#allocation65_spill] sm:$0xff] }
 0x6f7   :  { %4265 = vmatpush1.msra.mxu0 %v16137_v19  ;;  %11264 = vmatpush3.msra.mxu1 %v14524_v12  ;;  %v16143_v12 = vld [vmem:[#allocation28_spill] sm:$0xff]  ;;  %v16181_v19 = vld [vmem:[#allocation66_spill] sm:$0xff] }
 0x6f8   :  { %4266 = vmatprep.subr.mxu0 %v16138_v0  ;;  %11265 = vmatprep.subr.mxu1 %v14531_v35  ;;  %v16146_v35 = vld [vmem:[#allocation31_spill] sm:$0xff] }
 0x6f9   :  { %4267 = vmatpush1.msra.mxu0 %v16139_v13  ;;  %11266 = vmatpush3.msra.mxu1 %v14538_v56  ;;  %v16147_v56 = vld [vmem:[#allocation32_spill] sm:$0xff]  ;;  %v16182_v0 = vld [vmem:[#allocation67_spill] sm:$0xff] }
 0x6fa   :  { %4268 = vmatprep.subr.mxu0 %v16140_v34  ;;  %11267 = vmatprep.subr.mxu1 %v14545_v55  ;;  %v16148_v55 = vld [vmem:[#allocation33_spill] sm:$0xff]  ;;  %v16183_v13 = vld [vmem:[#allocation68_spill] sm:$0xff]  ;;  %v16185_v34 = vld [vmem:[#allocation70_spill] sm:$0xff] }
 0x6fb   :  { %4269 = vmatpush1.msra.mxu0 %v16141_v9  ;;  %11268 = vmatpush3.msra.mxu1 %v14552_v32  ;;  %v3811_v32 = vadd.f32 %v3810_v50, %v3809_v58  ;;  %v16184_v58 = vld [vmem:[#allocation69_spill] sm:$0xff]  ;;  %v16186_v9 = vld [vmem:[#allocation71_spill] sm:$0xff] }
 0x6fc   :  { %4270 = vmatprep.subr.mxu0 %v16142_v53  ;;  %11269 = vmatprep.subr.mxu1 %v14559_v28  ;;  %v16149_v28 = vld [vmem:[#allocation34_spill] sm:$0xff]  ;;  %v16187_v53 = vld [vmem:[#allocation72_spill] sm:$0xff] }
 0x6fd   :  { %4271 = vmatpush1.msra.mxu0 %v16143_v12  ;;  %11270 = vmatpush3.msra.mxu1 %v14566_v27  ;;  %v16150_v27 = vld [vmem:[#allocation35_spill] sm:$0xff]  ;;  %v16188_v12 = vld [vmem:[#allocation73_spill] sm:$0xff] }
 0x6fe   :  { %4272 = vmatprep.subr.mxu0 %v16144_v33  ;;  %11271 = vmatprep.subr.mxu1 %v14573_v25  ;;  %v16151_v25 = vld [vmem:[#allocation36_spill] sm:$0xff]  ;;  %v16189_v33 = vld [vmem:[#allocation74_spill] sm:$0xff] }
 0x6ff   :  { %4273 = vmatpush1.msra.mxu0 %v16145_v17  ;;  %11272 = vmatpush3.msra.mxu1 %v14580_v54  ;;  %v16152_v54 = vld [vmem:[#allocation37_spill] sm:$0xff] }
 0x700   :  { %4274 = vmatprep.subr.mxu0 %v16146_v35  ;;  %11273 = vmatprep.subr.mxu1 %v14587_v45  ;;  %v3812_v45 = vrot.slane %v3811_v32, 1  ;;  %v12399_v17 = vld [vmem:[#allocation6 + $0x468] ss:$12 sps:$4 sm:$0xff]   ;;  %v12401_v35 = vld [vmem:[#allocation6 + $0x46c] ss:$12 sps:$4 sm:$0xff]  }
 0x701   :  { %4275 = vmatpush1.msra.mxu0 %v16147_v56  ;;  %11274 = vmatpush3.msra.mxu1 %v14594_v23  ;;  %v16154_v23 = vld [vmem:[#allocation39_spill] sm:$0xff] }
 0x702   :  { %4276 = vmatprep.subr.mxu0 %v16148_v55  ;;  %11275 = vmatprep.subr.mxu1 %v14601_v10  ;;  %v16155_v10 = vld [vmem:[#allocation40_spill] sm:$0xff]  ;;  %v3813_v46 = vadd.f32 %v3812_v45, %v3811_v32  ;;  %v12405_v56 = vld [vmem:[#allocation6 + $0x450] ss:$12 sps:$4 sm:$0xff]   ;;  %v12425_v45 = vld [vmem:[#allocation6 + $0x40c] ss:$12 sps:$4 sm:$0xff]  }
 0x703   :  { %4277 = vmatpush1.msra.mxu0 %v16149_v28  ;;  %11276 = vmatpush3.msra.mxu1 %v14608_v52  ;;  %v16156_v52 = vld [vmem:[#allocation41_spill] sm:$0xff]  ;;  %v12407_v55 = vld [vmem:[#allocation6 + $0x454] ss:$12 sps:$4 sm:$0xff]   ;;  %v12411_v32 = vld [vmem:[#allocation6 + $0x438] ss:$12 sps:$4 sm:$0xff]  }
 0x704   :  { %4278 = vmatprep.subr.mxu0 %v16150_v27  ;;  %11277 = vmatprep.subr.mxu1 %v14615_v51  ;;  %v16157_v51 = vld [vmem:[#allocation42_spill] sm:$0xff]  ;;  %v12417_v28 = vld [vmem:[#allocation6 + $0x420] ss:$12 sps:$4 sm:$0xff]  }
 0x705   :  { %4279 = vmatpush1.msra.mxu0 %v16151_v25  ;;  %11278 = vmatpush3.msra.mxu1 %v14622_v48  ;;  %v16159_v48 = vld [vmem:[#allocation44_spill] sm:$0xff] }
 0x706   :  { %4280 = vmatprep.subr.mxu0 %v16152_v54  ;;  %11279 = vmatprep.subr.mxu1 %v14629_v49  ;;  %v16160_v49 = vld [vmem:[#allocation45_spill] sm:$0xff]  ;;  %v12419_v27 = vld [vmem:[#allocation6 + $0x424] ss:$12 sps:$4 sm:$0xff]  }
 0x707   :  { %4281 = vmatpush1.msra.mxu0 %v16153_v47  ;;  %11280 = vmatpush3.msra.mxu1 %v14636_v44  ;;  %v16161_v44 = vld [vmem:[#allocation46_spill] sm:$0xff] }
 0x708   :  { %4282 = vmatprep.subr.mxu0 %v16154_v23  ;;  %11281 = vmatprep.subr.mxu1 %v14643_v43  ;;  %v16163_v43 = vld [vmem:[#allocation48_spill] sm:$0xff]  ;;  %v12423_v54 = vld [vmem:[#allocation6 + $0x408] ss:$12 sps:$4 sm:$0xff]  }
 0x709   :  { %4283 = vmatpush1.msra.mxu0 %v16155_v10  ;;  %11282 = vmatpush3.msra.mxu1 %v14650_v42  ;;  %v16165_v42 = vld [vmem:[#allocation50_spill] sm:$0xff] }
 0x70a   :  { %4284 = vmatprep.subr.mxu0 %v16156_v52  ;;  %11283 = vmatprep.subr.mxu1 %v14657_v41  ;;  %v16166_v41 = vld [vmem:[#allocation51_spill] sm:$0xff] }
 0x70b   :  { %4285 = vmatpush1.msra.mxu0 %v16157_v51  ;;  %11284 = vmatpush3.msra.mxu1 %v14664_v38  ;;  %v16167_v38 = vld [vmem:[#allocation52_spill] sm:$0xff] }
 0x70c   :  { %4286 = vmatprep.subr.mxu0 %v16158_v29  ;;  %4461 = vmatmul.mubr.f32.vlgmr.msra.gmra.mxu1 %v3813_v46 }
 0x70d   :  { %4287 = vmatpush2.msra.mxu0 %v16159_v48  ;;  %4717 = vmatprep.mubr.f32.mxu1 %v16121_v30 }
 0x70e   :  { %4288 = vmatprep.subr.mxu0 %v16160_v49 }
 0x70f   :  { %4289 = vmatpush2.msra.mxu0 %v16161_v44 }
 0x710   :  { %4290 = vmatprep.subr.mxu0 %v16162_v4 }
 0x711   :  { %4291 = vmatpush2.msra.mxu0 %v16163_v43 }
 0x712   :  { %4292 = vmatprep.subr.mxu0 %v16164_v57  ;;  %v4548_v57 = vlaneseq }
 0x713   :  { %4293 = vmatpush2.msra.mxu0 %v16165_v42 }
 0x714   :  { %4294 = vmatprep.subr.mxu0 %v16166_v41 }
 0x715   :  { %4295 = vmatpush2.msra.mxu0 %v16167_v38 }
 0x716   :  { %4296 = vmatprep.subr.mxu0 %v16168_v31  ;;  %v14817_v31 = vshrl.u32 %v4548_v57, 7  ;;  %v16202_v57 = vld [vmem:[#allocation79_spill] sm:$0xff] }
 0x717   :  { %4297 = vmatpush2.msra.mxu0 %v16169_v37 }
 0x718   :  { %4298 = vmatprep.subr.mxu0 %v16170_v26  ;;  %v14820_v37 = vsub.s32 0, %v14817_v31 }
 0x719   :  { %4299 = vmatpush2.msra.mxu0 %v16171_v6 }
 0x71a   :  { %4300 = vmatprep.subr.mxu0 %v16172_v59  ;;  %16196 = vst [vmem:[#allocation16_spill] sm:$0xff] %v14820_v37  ;;  %v14827_v59 = vld [vmem:[%s15885_s6] sm:$0x7] }
 0x71b   :  { %4301 = vmatpush2.msra.mxu0 %v16173_v21  ;;  %v14830_v21 = vsub.s32 1, %v14817_v31 }
 0x71c   :  { %4302 = vmatprep.subr.mxu0 %v16174_v22  ;;  %v14835_v22 = vld [vmem:[%s15886_s7] sm:$0x7] }
 0x71d   :  { %4303 = vmatpush2.msra.mxu0 %v16175_v15  ;;  %16197 = vst [vmem:[#allocation17_spill] sm:$0xff] %v14830_v21 }
 0x71e   :  { %4304 = vmatprep.subr.mxu0 %v16176_v60 }
 0x71f   :  { %4305 = vmatpush2.msra.mxu0 %v16177_v61 }
 0x720   :  { %4306 = vmatprep.subr.mxu0 %v16178_v14 }
 0x721   :  { %4307 = vmatpush2.msra.mxu0 %v16179_v24  ;;  %v4589_v24 = vrot.slane %v14827_v59, %v14820_v37 }
 0x722   :  { %4308 = vmatprep.subr.mxu0 %v16180_v16 }
 0x723   :  { %4309 = vmatpush2.msra.mxu0 %v16181_v19  ;;  %v16198_v19 = vld [vmem:[#allocation75_spill] sm:$0xff] }
 0x724   :  { %4310 = vmatprep.subr.mxu0 %v16182_v0 }
 0x725   :  { %4311 = vmatpush2.msra.mxu0 %v16183_v13  ;;  %v4593_v13 = vrot.slane %v14827_v59, %v14830_v21 }
 0x726   :  { %4312 = vmatprep.subr.mxu0 %v16184_v58  ;;  %v4612_v58 = vrot.slane %v14835_v22, %v14820_v37 }
 0x727   :  { %4313 = vmatpush2.msra.mxu0 %v16185_v34  ;;  %v16199_v34 = vld [vmem:[#allocation76_spill] sm:$0xff] }
 0x728   :  { %4314 = vmatprep.subr.mxu0 %v16186_v9 }
 0x729   :  { %4315 = vmatpush2.msra.mxu0 %v16187_v53 }
 0x72a   :  { %4316 = vmatprep.subr.mxu0 %v16188_v12 }
 0x72b   :  { %4317 = vmatpush2.msra.mxu0 %v16189_v33 }
 0x72c   :  { %4319 = vmatmul.mubr.f32.vlgmr.msra.gmra.mxu0 %v3813_v46  ;;  %11817 = vmatprep.subr.mxu0 %v16121_v30 }
 0x72d   :  { %11818 = vmatpush3.msra.mxu0 %v14326_v40  ;;  %11849 = vmatprep.mubr.msk.f32.mxu0 %vm13081_vm1, %v16121_v30  ;;  %v16190_v40 = vld [vmem:[#allocation77_spill] sm:$0xff] }
 0x72e   :  { %11819 = vmatprep.subr.mxu0 %v16121_v30 }
 0x72f   :  { %11820 = vmatpush3.msra.mxu0 %v14333_v1  ;;  %v16191_v1 = vld [vmem:[#allocation80_spill] sm:$0xff] }
 0x730   :  { %11821 = vmatprep.subr.mxu0 %v16121_v30 }
 0x731   :  { %11822 = vmatpush3.msra.mxu0 %v14342_v62  ;;  %v16192_v62 = vld [vmem:[#allocation81_spill] sm:$0xff] }
 0x732   :  { %11823 = vmatprep.subr.mxu0 %v16121_v30 }
 0x733   :  { %11824 = vmatpush3.msra.mxu0 %v14349_v63  ;;  %v16193_v63 = vld [vmem:[#allocation82_spill] sm:$0xff] }
 0x734   :  { %11825 = vmatprep.subr.mxu0 %v16121_v30 }
 0x735   :  { %11826 = vmatpush3.msra.mxu0 %v14356_v7  ;;  %v16194_v7 = vld [vmem:[#allocation83_spill] sm:$0xff] }
 0x736   :  { %11827 = vmatprep.subr.mxu0 %v16121_v30 }
 0x737   :  { %11828 = vmatpush3.msra.mxu0 %v16190_v40  ;;  %v4616_v40 = vrot.slane %v14835_v22, %v14830_v21  ;;  %v15165_v21 = vld [vmem:[#allocation7 + $0x468] sm:$0xff] }
 0x738   :  { %11829 = vmatprep.subr.mxu0 %v16121_v30 }
 0x739   :  { %11830 = vmatpush3.msra.mxu0 %v14370_v5 }
 0x73a   :  { %11831 = vmatprep.subr.mxu0 %v16121_v30 }
 0x73b   :  { %11832 = vmatpush3.msra.mxu0 %v14377_v20 }
 0x73c   :  { %11833 = vmatprep.subr.mxu0 %v16121_v30 }
 0x73d   :  { %11834 = vmatpush3.msra.mxu0 %v14384_v11 }
 0x73e   :  { %11835 = vmatprep.subr.mxu0 %v16121_v30 }
 0x73f   :  { %11836 = vmatpush3.msra.mxu0 %v14391_v18  ;;  %v16195_v18 = vmov 0  }
 0x740   :  { %11837 = vmatprep.subr.mxu0 %v16121_v30 }
 0x741   :  { %11838 = vmatpush3.msra.mxu0 %v16191_v1 }
 0x742   :  { %11839 = vmatprep.subr.mxu0 %v16121_v30 }
 0x743   :  { %11840 = vmatpush3.msra.mxu0 %v16192_v62 }
 0x744   :  { %11841 = vmatprep.subr.mxu0 %v16121_v30 }
 0x745   :  { %11842 = vmatpush3.msra.mxu0 %v16193_v63 }
 0x746   :  { %11843 = vmatprep.subr.mxu0 %v16121_v30 }
 0x747   :  { %11844 = vmatpush3.msra.mxu0 %v16194_v7 }
 0x748   :  { %11845 = vmatprep.subr.mxu0 %v16121_v30 }
 0x749   :  { %11846 = vmatpush3.msra.mxu0 %v14434_v8 }
 0x74a   :  { %11847 = vmatprep.subr.mxu0 %v16121_v30 }
 0x74b   :  { %11848 = vmatpush3.msra.mxu0 %v14441_v39  ;;  %v12413_v39 = vld [vmem:[#allocation6 + $0x43c] ss:$12 sps:$4 sm:$0xff]  }
 0x74c   :  { %11850 = vmatmul.mubr.f32.vlgmr.msra.gmra.mxu0 %v14674_v36  ;;  %5564 = vmatprep.subr.bf16.mxu0 %v12401_v35 }
 0x74d   :  { %5596 = vmatprep.mubr.bf16.mxu0 %v16195_v18  ;;  %5565 = vmatpush1.bf16.msra.mxu0 %v12399_v17 }
 0x74e   :  { %5566 = vmatprep.subr.bf16.mxu0 %v12407_v55 }
 0x751   :  { %5567 = vmatpush1.bf16.msra.mxu0 %v12405_v56 }
 0x752   :  { %5568 = vmatprep.subr.bf16.mxu0 %v12413_v39 }
 0x755   :  { %5569 = vmatpush1.bf16.msra.mxu0 %v12411_v32 }
 0x756   :  { %5570 = vmatprep.subr.bf16.mxu0 %v12419_v27 }
 0x759   :  { %5571 = vmatpush1.bf16.msra.mxu0 %v12417_v28 }
 0x75a   :  { %5572 = vmatprep.subr.bf16.mxu0 %v12425_v45 }
 0x75d   :  { %5573 = vmatpush1.bf16.msra.mxu0 %v12423_v54 }
 0x768   :  { %v4038_v5 = vpop.f32.mrf.mxu1 }
 0x76a   :  { %v4040_v20 = vpop.f32.mrf.mxu1 }
 0x789   :  { %v14815_v11 = vpop.f32.mrf.mxu1  ;;  %v4109_v8 = vpop.f32.mrf.mxu0 }
 0x78a   :  { %v4110_v47 = vadd.f32 %v4109_v8, %v4038_v5 }
 0x78b   :  { %v11816_v50 = vpop.f32.mrf.mxu1  ;;  %v4111_v36 = vpop.f32.mrf.mxu0 }
 0x78c   :  { %v4112_v52 = vadd.f32 %v4111_v36, %v4040_v20  ;;  %v4536_v51 = vmul.f32 %v4110_v47, %v4110_v47  ;;  %v4551_v26 = vrot.slane %v4110_v47, %v14820_v37 }
 0x78e   :  { %v4537_v44 = vmul.f32 %v4112_v52, %v4112_v52  ;;  %v4555_v6 = vrot.slane %v4112_v52, %v14820_v37  ;;  %v4560_v60 = vsub.f32 %v14304_v3, %v4551_v26  ;;  %v4563_v61 = vsub.f32 %v14307_v2, %v4551_v26 }
 0x790   :  { %v4561_v0 = vsub.f32 %v16198_v19, %v4555_v6  ;;  %v4564_v9 = vsub.f32 %v16199_v34, %v4555_v6  ;;  %v12375_v34 = vld [vmem:[#allocation6 + $0x2d0] ss:$12 sps:$4 sm:$0xff]  }
 0x7aa   :  { %v11233_v25 = vpop.f32.mrf.mxu0 }
 0x7ab   :  { %v4391_v23 = vpop.f32.mrf.mxu1 }
 0x7ac   :  { %v11234_v10 = vpop.f32.mrf.mxu0 }
 0x7ad   :  { %v4393_v48 = vpop.f32.mrf.mxu1  ;;  %v11235_v12 = vadd.f32 %v11234_v10, %v11233_v25 }
 0x7af   :  { %v4251_v56 = vadd.f32 %v11235_v12, %v14815_v11  ;;  %v12386_v12 = vld [vmem:[#allocation6 + $0x28c] ss:$12 sps:$4 sm:$0xff]  }
 0x7b1   :  { %v4538_v45 = vmul.f32 %v4251_v56, %v4251_v56 }
 0x7cc   :  { %v11285_v33 = vpop.f32.mrf.mxu1 }
 0x7ce   :  { %v11286_v17 = vpop.f32.mrf.mxu1 }
 0x7cf   :  { %v11287_v39 = vadd.f32 %v11286_v17, %v11285_v33  ;;  %v12384_v33 = vld [vmem:[#allocation6 + $0x288] ss:$12 sps:$4 sm:$0xff]  }
 0x7d0   :  { %v12404_v17 = vld [vmem:[#allocation6 + $0x394] ss:$12 sps:$4 sm:$0xff]  }
 0x7ec   :  { %v4320_v46 = vpop.f32.mrf.mxu0 }
 0x7ed   :  { %v4392_v29 = vadd.f32 %v4391_v23, %v4320_v46  ;;  %v4648_v46 = vld [vmem:[%s15887_s8] sm:$0xff] }
 0x7ee   :  { %v4322_v49 = vpop.f32.mrf.mxu0 }
 0x7ef   :  { %v4539_v4 = vsub.f32 %v4392_v29, %v4536_v51  ;;  %v4394_v43 = vadd.f32 %v4393_v48, %v4322_v49  ;;  %v4559_v48 = vrot.slane %v4251_v56, %v14820_v37  ;;  %v14873_v49 = vsub.s32 2, %v14817_v31  ;;  %v12431_v56 = vld [vmem:[#allocation6 + $0x3f4] ss:$12 sps:$4 sm:$0xff]  }
 0x7f0   :  { %5574 = vmatprep.subr.bf16.mxu0 %v12431_v56  ;;  %v12470_v56 = vld [vmem:[#allocation6 + $0x22c] ss:$12 sps:$4 sm:$0xff]  }
 0x7f1   :  { %v4542_v42 = vadd.f32 1e-05, %v4539_v4  ;;  %v4540_v41 = vsub.f32 %v4394_v43, %v4537_v44  ;;  %16200 = vst [vmem:[#allocation18_spill] sm:$0xff] %v14873_v49  ;;  %v16201_v4 = vld [vmem:[#allocation78_spill] sm:$0xff]  ;;  %v4620_v6 = vrot.slane %v14835_v22, %v14873_v49  ;;  %v10577_v22 = vld [vmem:[%s15887_s8 + $0x8] sm:$0xff] }
 0x7f2   :  { %v4562_v43 = vsub.f32 %v16201_v4, %v4559_v48  ;;  %v12441_v4 = vld [vmem:[#allocation6 + $0x3c0] ss:$12 sps:$4 sm:$0xff]  }
 0x7f3   :  { %12908 = vrsqrt.f32 %v4542_v42  ;;  %v4543_v38 = vadd.f32 1e-05, %v4540_v41  ;;  %v4565_v42 = vsub.f32 %v16202_v57, %v4559_v48  ;;  %v12438_v48 = vld [vmem:[#allocation6 + $0x300] ss:$12 sps:$4 sm:$0xff]  }
 0x7f5   :  { %12910 = vrsqrt.f32 %v4543_v38  ;;  %v4597_v38 = vrot.slane %v14827_v59, %v14873_v49  ;;  %v15162_v49 = vld [vmem:[#allocation7 + $0x1e0] sm:$0xff] }
 0x7f6   :  { %16247 = vst [vmem:[#allocation63_spill] sm:$0xff] %v15162_v49 }
 0x800   :  { %v12909_v15 = vpop.eup %12908 }
 0x801   :  { %v4569_v14 = vrot.slane %v12909_v15, %v14820_v37 }
 0x802   :  { %v12911_v16 = vpop.eup %12910 }
 0x803   :  { %v4573_v3 = vrot.slane %v12911_v16, %v14820_v37  ;;  %v4581_v53 = vmul.f32 %v4569_v14, %v4563_v61  ;;  %v4578_v2 = vmul.f32 %v4569_v14, %v4560_v60 }
 0x805   :  { %v4582_v1 = vmul.f32 %v4573_v3, %v4564_v9  ;;  %v4604_v62 = vmul.f32 %v4589_v24, %v4581_v53  ;;  %v4579_v63 = vmul.f32 %v4573_v3, %v4561_v0  ;;  %v4601_v7 = vmul.f32 %v4589_v24, %v4578_v2  ;;  %v12374_v0 = vld [vmem:[#allocation6 + $0x2ec] ss:$12 sps:$4 sm:$0xff]   ;;  %v12380_v9 = vld [vmem:[#allocation6 + $0x2bc] ss:$12 sps:$4 sm:$0xff]   ;;  %v12383_v53 = vld [vmem:[#allocation6 + $0x2a4] ss:$12 sps:$4 sm:$0xff]  }
 0x806   :  { %v12378_v3 = vld [vmem:[#allocation6 + $0x2b8] ss:$12 sps:$4 sm:$0xff]   ;;  %v12381_v2 = vld [vmem:[#allocation6 + $0x2a0] ss:$12 sps:$4 sm:$0xff]  }
 0x807   :  { %v4605_v5 = vmul.f32 %v4593_v13, %v4582_v1  ;;  %v4627_v20 = vadd.f32 %v4612_v58, %v4604_v62  ;;  %v4602_v50 = vmul.f32 %v4593_v13, %v4579_v63  ;;  %v4624_v35 = vadd.f32 %v4612_v58, %v4601_v7  ;;  %v12372_v13 = vld [vmem:[#allocation6 + $0x2e8] ss:$12 sps:$4 sm:$0xff]   ;;  %v12387_v1 = vld [vmem:[#allocation6 + $0x270] ss:$12 sps:$4 sm:$0xff]   ;;  %v12390_v63 = vld [vmem:[#allocation6 + $0x258] ss:$12 sps:$4 sm:$0xff]  }
 0x808   :  { %v12377_v58 = vld [vmem:[#allocation6 + $0x2d4] ss:$12 sps:$4 sm:$0xff]   ;;  %v12392_v62 = vld [vmem:[#allocation6 + $0x25c] ss:$12 sps:$4 sm:$0xff]   ;;  %v12395_v7 = vld [vmem:[#allocation6 + $0x244] ss:$12 sps:$4 sm:$0xff]  }
 0x809   :  { %v4628_v55 = vadd.f32 %v4616_v40, %v4605_v5  ;;  %v4625_v8 = vadd.f32 %v4616_v40, %v4602_v50  ;;  %v4639_v32 = vmul.f32 0.2, %v4627_v20  ;;  %vm4633_vm3 = vcmp.gt.f32.partialorder %v4627_v20, 0.0  ;;  %v12389_v40 = vld [vmem:[#allocation6 + $0x274] ss:$12 sps:$4 sm:$0xff]  }
 0x80a   :  { %v4636_v25 = vmul.f32 0.2, %v4624_v35  ;;  %vm4630_vm5 = vcmp.gt.f32.partialorder %v4624_v35, 0.0  ;;  %v12393_v5 = vld [vmem:[#allocation6 + $0x240] ss:$12 sps:$4 sm:$0xff]  }
 0x80b   :  { %vm4634_vm2 = vcmp.gt.f32.partialorder %v4628_v55, 0.0  ;;  %v4640_v36 = vmul.f32 0.2, %v4628_v55  ;;  %vm4631_vm4 = vcmp.gt.f32.partialorder %v4625_v8, 0.0  ;;  %v4637_v27 = vmul.f32 0.2, %v4625_v8 }
 0x80c   :  { %v4532_v28 = vpop.f32.mrf.mxu0  ;;  %v14855_v11 = vsel %vm4633_vm3, %v4627_v20, %v4639_v32  ;;  %v14864_v51 = vsel %vm4630_vm5, %v4624_v35, %v4636_v25  ;;  %v12398_v20 = vld [vmem:[#allocation6 + $0x3ac] ss:$12 sps:$4 sm:$0xff]   ;;  %v12396_v50 = vld [vmem:[#allocation6 + $0x3a8] ss:$12 sps:$4 sm:$0xff]   ;;  %v12429_v35 = vld [vmem:[#allocation6 + $0x3f0] ss:$12 sps:$4 sm:$0xff]  }
 0x80d   :  { %v4533_v54 = vadd.f32 %v11287_v39, %v4532_v28  ;;  %v14852_v47 = vsel %vm4634_vm2, %v4628_v55, %v4640_v36  ;;  %v14858_v52 = vsel %vm4631_vm4, %v4625_v8, %v4637_v27  ;;  %v12402_v55 = vld [vmem:[#allocation6 + $0x390] ss:$12 sps:$4 sm:$0xff]   ;;  %5575 = vmatpush1.bf16.msra.mxu0 %v12429_v35  ;;  %v12408_v32 = vld [vmem:[#allocation6 + $0x378] ss:$12 sps:$4 sm:$0xff]   ;;  %v12414_v36 = vld [vmem:[#allocation6 + $0x360] ss:$12 sps:$4 sm:$0xff]  }
 0x80e   :  { %v11851_v23 = vpop.f32.mrf.mxu0  ;;  %4681 = vmatprep.subr.mxu1 %v14852_v47  ;;  %v12410_v8 = vld [vmem:[#allocation6 + $0x37c] ss:$12 sps:$4 sm:$0xff]   ;;  %v12416_v39 = vld [vmem:[#allocation6 + $0x364] ss:$12 sps:$4 sm:$0xff]   ;;  %v12422_v28 = vld [vmem:[#allocation6 + $0x34c] ss:$12 sps:$4 sm:$0xff]  }
 0x80f   :  { %v4541_v10 = vsub.f32 %v4533_v54, %v4538_v45  ;;  %4682 = vmatpush1.msra.mxu1 %v14855_v11  ;;  %v12420_v27 = vld [vmem:[#allocation6 + $0x348] ss:$12 sps:$4 sm:$0xff]   ;;  %v12426_v54 = vld [vmem:[#allocation6 + $0x330] ss:$12 sps:$4 sm:$0xff]   ;;  %v12432_v23 = vld [vmem:[#allocation6 + $0x318] ss:$12 sps:$4 sm:$0xff]  }
 0x810   :  { %4683 = vmatprep.subr.mxu1 %v14858_v52  ;;  %v12428_v25 = vld [vmem:[#allocation6 + $0x334] ss:$12 sps:$4 sm:$0xff]   ;;  %v12434_v45 = vld [vmem:[#allocation6 + $0x31c] ss:$12 sps:$4 sm:$0xff]  }
 0x811   :  { %v4544_v29 = vadd.f32 1e-05, %v4541_v10  ;;  %4684 = vmatpush1.msra.mxu1 %v14864_v51  ;;  %v12437_v10 = vld [vmem:[#allocation6 + $0x3dc] ss:$12 sps:$4 sm:$0xff]  }
 0x812   :  { %10575 = vmatmul.mubr.msk.f32.vlgmr.msra.gmra.mxu1 %vm4649_vm6, %v4648_v46  ;;  %11852 = vmatprep.subr.mxu1 %v16121_v30  ;;  %v12467_v35 = vld [vmem:[#allocation6 + $0x248] ss:$12 sps:$4 sm:$0xff]  }
 0x813   :  { %12912 = vrsqrt.f32 %v4544_v29  ;;  %11856 = vmatprep.mubr.msk.f32.mxu1 %vm13081_vm1, %v16121_v30  ;;  %5576 = vmatprep.subr.bf16.mxu0 %v12437_v10  ;;  %v12440_v29 = vld [vmem:[#allocation6 + $0x304] ss:$12 sps:$4 sm:$0xff]  }
 0x814   :  { %v12483_v10 = vld [vmem:[#allocation6 + $0x78] ss:$12 sps:$4 sm:$0xff]  }
 0x820   :  { %v12913_v44 = vpop.eup %12912 }
 0x821   :  { %v4577_v41 = vrot.slane %v12913_v44, %v14820_v37  ;;  %v12443_v44 = vld [vmem:[#allocation6 + $0x3c4] ss:$12 sps:$4 sm:$0xff]  }
 0x822   :  { %v15168_v37 = vld [vmem:[#allocation7 + $0x1d0] sm:$0xff] }
 0x823   :  { %v4583_v26 = vmul.f32 %v4577_v41, %v4565_v42  ;;  %v4580_v15 = vmul.f32 %v4577_v41, %v4562_v43  ;;  %v12444_v43 = vld [vmem:[#allocation6 + $0x3b0] ss:$12 sps:$4 sm:$0xff]   ;;  %16248 = vst [vmem:[#allocation64_spill] sm:$0xff] %v15168_v37 }
 0x825   :  { %v4606_v60 = vmul.f32 %v4597_v38, %v4583_v26  ;;  %v4603_v61 = vmul.f32 %v4597_v38, %v4580_v15 }
 0x827   :  { %v4629_v14 = vadd.f32 %v4620_v6, %v4606_v60  ;;  %v4626_v31 = vadd.f32 %v4620_v6, %v4603_v61  ;;  %v12445_v60 = vld [vmem:[#allocation6 + $0x470] ss:$12 sps:$4 sm:$0xff]  }
 0x829   :  { %vm4635_vm7 = vcmp.gt.f32.partialorder %v4629_v14, 0.0  ;;  %v4641_v24 = vmul.f32 0.2, %v4629_v14  ;;  %v4638_v16 = vmul.f32 0.2, %v4626_v31  ;;  %vm4632_vm8 = vcmp.gt.f32.partialorder %v4626_v31, 0.0 }
 0x82b   :  { %v14882_v19 = vsel %vm4635_vm7, %v4629_v14, %v4641_v24  ;;  %v14886_v59 = vsel %vm4632_vm8, %v4626_v31, %v4638_v16  ;;  %v12446_v31 = vld [vmem:[#allocation6 + $0x2f0] ss:$12 sps:$4 sm:$0xff]   ;;  %v12447_v16 = vld [vmem:[#allocation6 + $0x398] ss:$12 sps:$4 sm:$0xff]  }
 0x82c   :  { %11853 = vmatpush3.msra.mxu1 %v14882_v19 }
 0x82d   :  { %11854 = vmatprep.subr.mxu1 %v16121_v30 }
 0x82e   :  { %11855 = vmatpush3.msra.mxu1 %v14886_v59 }
 0x82f   :  { %11857 = vmatmul.mubr.msk.f32.vlgmr.msra.gmra.mxu1 %vm4649_vm6, %v4648_v46  ;;  %4926 = vmatprep.subr.mxu1 %v14852_v47  ;;  %v12435_v46 = vld [vmem:[#allocation6 + $0x3d8] ss:$12 sps:$4 sm:$0xff]  }
 0x830   :  { %4927 = vmatpush1.msra.mxu1 %v14855_v11  ;;  %4962 = vmatprep.mubr.f32.mxu1 %v16121_v30 }
 0x831   :  { %4928 = vmatprep.subr.mxu1 %v14858_v52  ;;  %5577 = vmatpush1.bf16.msra.mxu0 %v12435_v46  ;;  %v12488_v46 = vld [vmem:[#allocation6 + $0x1e4] ss:$12 sps:$4 sm:$0xff]  }
 0x832   :  { %4929 = vmatpush1.msra.mxu1 %v14864_v51  ;;  %5578 = vmatprep.subr.bf16.mxu0 %v12443_v44  ;;  %v12489_v44 = vld [vmem:[#allocation6 + $0x60] ss:$12 sps:$4 sm:$0xff]  }
 0x833   :  { %10578 = vmatmul.mubr.msk.f32.vlgmr.msra.gmra.mxu1 %vm4649_vm6, %v10577_v22  ;;  %11859 = vmatprep.subr.mxu1 %v16121_v30 }
 0x834   :  { %11860 = vmatpush3.msra.mxu1 %v14882_v19  ;;  %11863 = vmatprep.mubr.msk.f32.mxu1 %vm13081_vm1, %v16121_v30 }
 0x835   :  { %11861 = vmatprep.subr.mxu1 %v16121_v30  ;;  %5579 = vmatpush1.bf16.msra.mxu0 %v12441_v4  ;;  %v12494_v4 = vld [vmem:[#allocation6 + $0x1cc] ss:$12 sps:$4 sm:$0xff]  }
 0x836   :  { %11862 = vmatpush3.msra.mxu1 %v14886_v59  ;;  %11311 = vmatprep.subr.bf16.mxu0 %v12444_v43  ;;  %v12497_v43 = vld [vmem:[#allocation6 + $0x4c] ss:$12 sps:$4 sm:$0xff]  }
 0x837   :  { %11864 = vmatmul.mubr.msk.f32.vlgmr.msra.gmra.mxu1 %vm4649_vm6, %v10577_v22  ;;  %5523 = vmatprep.subr.bf16.mxu1 %v12374_v0  ;;  %v12448_v0 = vld [vmem:[#allocation6 + $0x458] ss:$12 sps:$4 sm:$0xff]  }
 0x838   :  { %5524 = vmatpush1.bf16.msra.mxu1 %v12372_v13  ;;  %v12449_v13 = vld [vmem:[#allocation6 + $0x2d8] ss:$12 sps:$4 sm:$0xff]  }
 0x839   :  { %5525 = vmatprep.subr.bf16.mxu1 %v12377_v58  ;;  %v12450_v58 = vld [vmem:[#allocation6 + $0x380] ss:$12 sps:$4 sm:$0xff]  }
 0x83c   :  { %5526 = vmatpush1.bf16.msra.mxu1 %v12375_v34  ;;  %v12451_v34 = vld [vmem:[#allocation6 + $0x440] ss:$12 sps:$4 sm:$0xff]  }
 0x83d   :  { %5527 = vmatprep.subr.bf16.mxu1 %v12380_v9  ;;  %v12452_v9 = vld [vmem:[#allocation6 + $0x2c0] ss:$12 sps:$4 sm:$0xff]  }
 0x840   :  { %5528 = vmatpush1.bf16.msra.mxu1 %v12378_v3  ;;  %v12453_v3 = vld [vmem:[#allocation6 + $0x368] ss:$12 sps:$4 sm:$0xff]  }
 0x841   :  { %5529 = vmatprep.subr.bf16.mxu1 %v12383_v53  ;;  %v12454_v53 = vld [vmem:[#allocation6 + $0x428] ss:$12 sps:$4 sm:$0xff]  }
 0x844   :  { %5530 = vmatpush1.bf16.msra.mxu1 %v12381_v2  ;;  %v12455_v2 = vld [vmem:[#allocation6 + $0x2a8] ss:$12 sps:$4 sm:$0xff]  }
 0x845   :  { %5531 = vmatprep.subr.bf16.mxu1 %v12386_v12  ;;  %v12456_v12 = vld [vmem:[#allocation6 + $0x350] ss:$12 sps:$4 sm:$0xff]  }
 0x848   :  { %5532 = vmatpush1.bf16.msra.mxu1 %v12384_v33  ;;  %v12457_v33 = vld [vmem:[#allocation6 + $0x410] ss:$12 sps:$4 sm:$0xff]  }
 0x849   :  { %5533 = vmatprep.subr.bf16.mxu1 %v12389_v40  ;;  %v12458_v40 = vld [vmem:[#allocation6 + $0x290] ss:$12 sps:$4 sm:$0xff]  }
 0x84c   :  { %5534 = vmatpush1.bf16.msra.mxu1 %v12387_v1  ;;  %v12459_v1 = vld [vmem:[#allocation6 + $0x338] ss:$12 sps:$4 sm:$0xff]  }
 0x84d   :  { %5535 = vmatprep.subr.bf16.mxu1 %v12392_v62  ;;  %v12460_v62 = vld [vmem:[#allocation6 + $0x3f8] ss:$12 sps:$4 sm:$0xff]  }
 0x850   :  { %5536 = vmatpush1.bf16.msra.mxu1 %v12390_v63  ;;  %v12461_v63 = vld [vmem:[#allocation6 + $0x278] ss:$12 sps:$4 sm:$0xff]  }
 0x851   :  { %5537 = vmatprep.subr.bf16.mxu1 %v12395_v7  ;;  %v12462_v7 = vld [vmem:[#allocation6 + $0x320] ss:$12 sps:$4 sm:$0xff]  }
 0x854   :  { %5538 = vmatpush1.bf16.msra.mxu1 %v12393_v5  ;;  %v12463_v5 = vld [vmem:[#allocation6 + $0x3e0] ss:$12 sps:$4 sm:$0xff]  }
 0x855   :  { %5539 = vmatprep.subr.bf16.mxu1 %v12398_v20  ;;  %v12464_v20 = vld [vmem:[#allocation6 + $0x260] ss:$12 sps:$4 sm:$0xff]  }
 0x858   :  { %5540 = vmatpush2.bf16.msra.mxu1 %v12396_v50  ;;  %v12465_v50 = vld [vmem:[#allocation6 + $0x308] ss:$12 sps:$4 sm:$0xff]  }
 0x859   :  { %5541 = vmatprep.subr.bf16.mxu1 %v12404_v17  ;;  %v12466_v17 = vld [vmem:[#allocation6 + $0x3c8] ss:$12 sps:$4 sm:$0xff]  }
 0x85c   :  { %5542 = vmatpush2.bf16.msra.mxu1 %v12402_v55  ;;  %v12473_v55 = vld [vmem:[#allocation6 + $0xac] ss:$12 sps:$4 sm:$0xff]  }
 0x85d   :  { %5543 = vmatprep.subr.bf16.mxu1 %v12410_v8  ;;  %v12468_v8 = vld [vmem:[#allocation6 + $0x228] ss:$12 sps:$4 sm:$0xff]  }
 0x860   :  { %5544 = vmatpush2.bf16.msra.mxu1 %v12408_v32  ;;  %v12471_v32 = vld [vmem:[#allocation6 + $0xa8] ss:$12 sps:$4 sm:$0xff]  }
 0x861   :  { %5545 = vmatprep.subr.bf16.mxu1 %v12416_v39  ;;  %v12476_v39 = vld [vmem:[#allocation6 + $0x214] ss:$12 sps:$4 sm:$0xff]  }
 0x864   :  { %5546 = vmatpush2.bf16.msra.mxu1 %v12414_v36  ;;  %v12479_v36 = vld [vmem:[#allocation6 + $0x94] ss:$12 sps:$4 sm:$0xff]  }
 0x865   :  { %5547 = vmatprep.subr.bf16.mxu1 %v12422_v28 }
 0x868   :  { %5548 = vmatpush2.bf16.msra.mxu1 %v12420_v27  ;;  %v12474_v27 = vld [vmem:[#allocation6 + $0x210] ss:$12 sps:$4 sm:$0xff]  }
 0x869   :  { %5549 = vmatprep.subr.bf16.mxu1 %v12428_v25  ;;  %v12477_v25 = vld [vmem:[#allocation6 + $0x90] ss:$12 sps:$4 sm:$0xff]  }
 0x86c   :  { %5550 = vmatpush2.bf16.msra.mxu1 %v12426_v54  ;;  %v12482_v54 = vld [vmem:[#allocation6 + $0x1fc] ss:$12 sps:$4 sm:$0xff]  }
 0x86d   :  { %5551 = vmatprep.subr.bf16.mxu1 %v12434_v45  ;;  %v12485_v45 = vld [vmem:[#allocation6 + $0x7c] ss:$12 sps:$4 sm:$0xff]  }
 0x870   :  { %5552 = vmatpush2.bf16.msra.mxu1 %v12432_v23  ;;  %v12480_v23 = vld [vmem:[#allocation6 + $0x1f8] ss:$12 sps:$4 sm:$0xff]  }
 0x871   :  { %5553 = vmatprep.subr.bf16.mxu1 %v12440_v29  ;;  %v12491_v29 = vld [vmem:[#allocation6 + $0x64] ss:$12 sps:$4 sm:$0xff]  }
 0x874   :  { %5554 = vmatpush2.bf16.msra.mxu1 %v12438_v48  ;;  %v12486_v48 = vld [vmem:[#allocation6 + $0x1e0] ss:$12 sps:$4 sm:$0xff]  }
 0x875   :  { %11866 = vmatprep.subr.bf16.mxu1 %v16121_v30 }
 0x8d2   :  { %v14907_v57 = vpop.f32.mrf.mxu1 }
 0x8d4   :  { %v14909_v42 = vpop.f32.mrf.mxu1 }
 0x8d5   :  { %v14930_v28 = vpack.c.bf16 %v14909_v42, %v14909_v42  ;;  %v12492_v42 = vld [vmem:[#allocation6 + $0x1c8] ss:$12 sps:$4 sm:$0xff]  }
 0x8ef   :  { %v14911_v41 = vpop.f32.mrf.mxu1 }
 0x8f1   :  { %v11858_v38 = vpop.f32.mrf.mxu1 }
 0x8f2   :  { %v12495_v38 = vld [vmem:[#allocation6 + $0x48] ss:$12 sps:$4 sm:$0xff]  }
 0x8f3   :  { %v4964_v26 = vpop.f32.mrf.mxu1 }
 0x8f4   :  { %v14913_v61 = vpack.c.bf16 %v4964_v26, %v4964_v26  ;;  %v12500_v26 = vld [vmem:[#allocation6 + $0x1b4] ss:$12 sps:$4 sm:$0xff]  }
 0x8f5   :  { %v4966_v6 = vpop.f32.mrf.mxu1 }
 0x8f6   :  { %v5040_v15 = vpack.c.bf16 %v4966_v6, %v4966_v6  ;;  %v12503_v6 = vld [vmem:[#allocation6 + $0x34] ss:$12 sps:$4 sm:$0xff]  }
 0x8f7   :  { %v5035_v14 = vpop.f32.mrf.mxu1 }
 0x8f8   :  { %v14915_v24 = vpack.c.bf16 %v5035_v14, %v5035_v14  ;;  %5555 = vmatprep.mubr.bf16.mxu1 %v5040_v15  ;;  %v12509_v14 = vld [vmem:[#allocation6 + $0x1c] ss:$12 sps:$4 sm:$0xff]  }
 0x8f9   :  { %5556 = vmatmul.mubr.bf16.vlgmr.msra.gmra.mxu1 %v14913_v61  ;;  %v11865_v22 = vpop.f32.mrf.mxu1 }
 0x8fa   :  { %11867 = vmatpush3.bf16.msra.mxu1 %v12445_v60  ;;  %5597 = vmatmul.mubr.bf16.vlgmr.msra.gmra.mxu0 %v14915_v24  ;;  %v12501_v60 = vld [vmem:[#allocation6 + $0x30] ss:$12 sps:$4 sm:$0xff]  }
 0x8fb   :  { %11312 = vmatpush3.bf16.msra.mxu0 %v12446_v31  ;;  %5637 = vmatprep.mubr.bf16.mxu0 %v5040_v15  ;;  %v12498_v15 = vld [vmem:[#allocation6 + $0x1b0] ss:$12 sps:$4 sm:$0xff]   ;;  %v12504_v31 = vld [vmem:[#allocation6 + $0x198] ss:$12 sps:$4 sm:$0xff]  }
 0x8fc   :  { %11868 = vmatprep.subr.bf16.mxu1 %v16121_v30  ;;  %11313 = vmatprep.subr.bf16.mxu0 %v12447_v16  ;;  %v12512_v16 = vld [vmem:[#allocation6 + $0x184] ss:$12 sps:$4 sm:$0xff]  }
 0x8fd   :  { %11882 = vmatprep.mubr.msk.bf16.mxu1 %vm13081_vm1, %v16121_v30  ;;  %v12515_v22 = vld [vmem:[#allocation6 + $0x4] ss:$12 sps:$4 sm:$0xff]  }
 0x8fe   :  { %11869 = vmatpush3.bf16.msra.mxu1 %v12448_v0  ;;  %v12510_v0 = vld [vmem:[#allocation6 + $0x180] ss:$12 sps:$4 sm:$0xff]  }
 0x8ff   :  { %11314 = vmatpush3.bf16.msra.mxu0 %v12449_v13  ;;  %11870 = vmatprep.subr.bf16.mxu1 %v16121_v30  ;;  %v12513_v13 = vld [vmem:[#allocation6] ss:$12 sps:$4 sm:$0xff]  }
 0x900   :  { %11315 = vmatprep.subr.bf16.mxu0 %v12450_v58  ;;  %v12516_v58 = vld [vmem:[#allocation6 + $0x170] ss:$12 sps:$4 sm:$0xff]  }
 0x902   :  { %11871 = vmatpush3.bf16.msra.mxu1 %v12451_v34  ;;  %v12519_v34 = vld [vmem:[#allocation6 + $0x16c] ss:$12 sps:$4 sm:$0xff]  }
 0x903   :  { %11316 = vmatpush3.bf16.msra.mxu0 %v12452_v9  ;;  %11872 = vmatprep.subr.bf16.mxu1 %v16121_v30  ;;  %v12520_v9 = vld [vmem:[#allocation6 + $0xb0] ss:$12 sps:$4 sm:$0xff]  }
 0x904   :  { %11317 = vmatprep.subr.bf16.mxu0 %v12453_v3  ;;  %v14938_v3 = vpack.c.bf16 %v14911_v41, %v14911_v41  ;;  %v12530_v41 = vld [vmem:[#allocation6 + $0x80] ss:$12 sps:$4 sm:$0xff]  }
 0x906   :  { %11873 = vmatpush3.bf16.msra.mxu1 %v12454_v53  ;;  %v12517_v53 = vld [vmem:[#allocation6 + $0x168] ss:$12 sps:$4 sm:$0xff]  }
 0x907   :  { %11318 = vmatpush3.bf16.msra.mxu0 %v12455_v2  ;;  %11874 = vmatprep.subr.bf16.mxu1 %v16121_v30  ;;  %v12521_v2 = vld [vmem:[#allocation6 + $0x158] ss:$12 sps:$4 sm:$0xff]  }
 0x908   :  { %11319 = vmatprep.subr.bf16.mxu0 %v12456_v12  ;;  %v12524_v12 = vld [vmem:[#allocation6 + $0x154] ss:$12 sps:$4 sm:$0xff]  }
 0x90a   :  { %11875 = vmatpush3.bf16.msra.mxu1 %v12457_v33  ;;  %v12525_v33 = vld [vmem:[#allocation6 + $0x98] ss:$12 sps:$4 sm:$0xff]  }
 0x90b   :  { %11320 = vmatpush3.bf16.msra.mxu0 %v12458_v40  ;;  %11876 = vmatprep.subr.bf16.mxu1 %v16121_v30  ;;  %v12522_v40 = vld [vmem:[#allocation6 + $0x150] ss:$12 sps:$4 sm:$0xff]  }
 0x90c   :  { %11321 = vmatprep.subr.bf16.mxu0 %v12459_v1  ;;  %v12526_v1 = vld [vmem:[#allocation6 + $0x140] ss:$12 sps:$4 sm:$0xff]  }
 0x90e   :  { %11877 = vmatpush3.bf16.msra.mxu1 %v12460_v62  ;;  %v12529_v62 = vld [vmem:[#allocation6 + $0x13c] ss:$12 sps:$4 sm:$0xff]  }
 0x90f   :  { %11322 = vmatpush3.bf16.msra.mxu0 %v12461_v63  ;;  %11878 = vmatprep.subr.bf16.mxu1 %v16121_v30  ;;  %v12527_v63 = vld [vmem:[#allocation6 + $0x138] ss:$12 sps:$4 sm:$0xff]  }
 0x910   :  { %11323 = vmatprep.subr.bf16.mxu0 %v12462_v7  ;;  %v12531_v7 = vld [vmem:[#allocation6 + $0x128] ss:$12 sps:$4 sm:$0xff]  }
 0x912   :  { %11879 = vmatpush3.bf16.msra.mxu1 %v12463_v5  ;;  %v12534_v5 = vld [vmem:[#allocation6 + $0x124] ss:$12 sps:$4 sm:$0xff]  }
 0x913   :  { %11324 = vmatpush3.bf16.msra.mxu0 %v12464_v20  ;;  %11880 = vmatprep.subr.bf16.mxu1 %v16121_v30  ;;  %v12535_v20 = vld [vmem:[#allocation6 + $0x68] ss:$12 sps:$4 sm:$0xff]  }
 0x914   :  { %11325 = vmatprep.subr.bf16.mxu0 %v12465_v50  ;;  %v12532_v50 = vld [vmem:[#allocation6 + $0x120] ss:$12 sps:$4 sm:$0xff]  }
 0x916   :  { %11881 = vmatpush3.bf16.msra.mxu1 %v12466_v17  ;;  %v12536_v17 = vld [vmem:[#allocation6 + $0x110] ss:$12 sps:$4 sm:$0xff]  }
 0x917   :  { %11326 = vmatpush3.bf16.msra.mxu0 %v12467_v35  ;;  %6110 = vmatprep.subr.bf16.mxu1 %v12470_v56  ;;  %v12539_v35 = vld [vmem:[#allocation6 + $0x10c] ss:$12 sps:$4 sm:$0xff]   ;;  %v12540_v56 = vld [vmem:[#allocation6 + $0x50] ss:$12 sps:$4 sm:$0xff]  }
 0x918   :  { %6069 = vmatprep.subr.bf16.mxu0 %v12473_v55  ;;  %v12537_v55 = vld [vmem:[#allocation6 + $0x108] ss:$12 sps:$4 sm:$0xff]  }
 0x919   :  { %11883 = vmatmul.mubr.bf16.vlgmr.msra.gmra.mxu1 %v14915_v24  ;;  %v12507_v24 = vld [vmem:[#allocation6 + $0x18] ss:$12 sps:$4 sm:$0xff]  }
 0x91a   :  { %5638 = vmatmul.mubr.bf16.vlgmr.msra.gmra.mxu0 %v14913_v61  ;;  %6111 = vmatpush1.bf16.msra.mxu1 %v12468_v8  ;;  %v12506_v61 = vld [vmem:[#allocation6 + $0x19c] ss:$12 sps:$4 sm:$0xff]   ;;  %v12541_v8 = vld [vmem:[#allocation6 + $0xf8] ss:$12 sps:$4 sm:$0xff]  }
 0x91b   :  { %6070 = vmatpush1.bf16.msra.mxu0 %v12471_v32  ;;  %6101 = vmatprep.mubr.bf16.mxu0 %v14930_v28  ;;  %v12544_v32 = vld [vmem:[#allocation6 + $0xf4] ss:$12 sps:$4 sm:$0xff]  }
 0x91c   :  { %6112 = vmatprep.subr.bf16.mxu1 %v12476_v39  ;;  %6071 = vmatprep.subr.bf16.mxu0 %v12479_v36  ;;  %v12545_v39 = vld [vmem:[#allocation6 + $0x38] ss:$12 sps:$4 sm:$0xff]   ;;  %v12542_v36 = vld [vmem:[#allocation6 + $0xf0] ss:$12 sps:$4 sm:$0xff]  }
 0x91d   :  { %6142 = vmatprep.mubr.bf16.mxu1 %v16195_v18 }
 0x91e   :  { %6113 = vmatpush1.bf16.msra.mxu1 %v12474_v27  ;;  %v12549_v27 = vld [vmem:[#allocation6 + $0xdc] ss:$12 sps:$4 sm:$0xff]  }
 0x91f   :  { %6072 = vmatpush1.bf16.msra.mxu0 %v12477_v25  ;;  %6114 = vmatprep.subr.bf16.mxu1 %v12482_v54  ;;  %v12550_v25 = vld [vmem:[#allocation6 + $0x20] ss:$12 sps:$4 sm:$0xff]   ;;  %v12547_v54 = vld [vmem:[#allocation6 + $0xd8] ss:$12 sps:$4 sm:$0xff]  }
 0x920   :  { %6073 = vmatprep.subr.bf16.mxu0 %v12485_v45  ;;  %v12551_v45 = vld [vmem:[#allocation6 + $0xc8] ss:$12 sps:$4 sm:$0xff]  }
 0x922   :  { %6115 = vmatpush1.bf16.msra.mxu1 %v12480_v23  ;;  %v12554_v23 = vld [vmem:[#allocation6 + $0xc4] ss:$12 sps:$4 sm:$0xff]  }
 0x923   :  { %6074 = vmatpush1.bf16.msra.mxu0 %v12483_v10  ;;  %6116 = vmatprep.subr.bf16.mxu1 %v12488_v46  ;;  %v12555_v10 = vld [vmem:[#allocation6 + $0x8] ss:$12 sps:$4 sm:$0xff]   ;;  %v12552_v46 = vld [vmem:[#allocation6 + $0xc0] ss:$12 sps:$4 sm:$0xff]  }
 0x924   :  { %6075 = vmatprep.subr.bf16.mxu0 %v12491_v29  ;;  %v4794_v29 = vpack.c.bf16 %v14907_v57, %v14907_v57  ;;  %v12562_v57 = vld [vmem:[#allocation6 + $0x1a0] ss:$12 sps:$4 sm:$0xff]  }
 0x926   :  { %6117 = vmatpush1.bf16.msra.mxu1 %v12486_v48  ;;  %v12556_v48 = vld [vmem:[#allocation6 + $0x230] ss:$12 sps:$4 sm:$0xff]  }
 0x927   :  { %6076 = vmatpush1.bf16.msra.mxu0 %v12489_v44  ;;  %6118 = vmatprep.subr.bf16.mxu1 %v12494_v4  ;;  %v12557_v44 = vld [vmem:[#allocation6 + $0x218] ss:$12 sps:$4 sm:$0xff]  }
 0x928   :  { %6077 = vmatprep.subr.bf16.mxu0 %v12497_v43  ;;  %v12566_v4 = vld [vmem:[#allocation6 + $0x52c] ss:$12 sps:$4 sm:$0xff]   ;;  %v12564_v43 = vld [vmem:[#allocation6 + $0x528] ss:$12 sps:$4 sm:$0xff]  }
 0x92a   :  { %6119 = vmatpush1.bf16.msra.mxu1 %v12492_v42  ;;  %v12569_v42 = vld [vmem:[#allocation6 + $0x514] ss:$12 sps:$4 sm:$0xff]  }
 0x92b   :  { %6078 = vmatpush1.bf16.msra.mxu0 %v12495_v38  ;;  %6120 = vmatprep.subr.bf16.mxu1 %v12500_v26  ;;  %v12567_v38 = vld [vmem:[#allocation6 + $0x510] ss:$12 sps:$4 sm:$0xff]  }
 0x92c   :  { %6079 = vmatprep.subr.bf16.mxu0 %v12503_v6  ;;  %v12572_v26 = vld [vmem:[#allocation6 + $0x4fc] ss:$12 sps:$4 sm:$0xff]   ;;  %v12570_v6 = vld [vmem:[#allocation6 + $0x4f8] ss:$12 sps:$4 sm:$0xff]  }
 0x92e   :  { %6121 = vmatpush1.bf16.msra.mxu1 %v12498_v15  ;;  %v12575_v15 = vld [vmem:[#allocation6 + $0x4e4] ss:$12 sps:$4 sm:$0xff]  }
 0x92f   :  { %6080 = vmatpush1.bf16.msra.mxu0 %v12501_v60  ;;  %6122 = vmatprep.subr.bf16.mxu1 %v12506_v61  ;;  %v12591_v60 = vld [vmem:[#allocation6 + $0x6a8] ss:$12 sps:$4 sm:$0xff]   ;;  %v12593_v61 = vld [vmem:[#allocation6 + $0x6ac] ss:$12 sps:$4 sm:$0xff]  }
 0x930   :  { %6081 = vmatprep.subr.bf16.mxu0 %v12509_v14  ;;  %v12599_v14 = vld [vmem:[#allocation6 + $0x694] ss:$12 sps:$4 sm:$0xff]  }
 0x932   :  { %6123 = vmatpush1.bf16.msra.mxu1 %v12504_v31  ;;  %v12573_v31 = vld [vmem:[#allocation6 + $0x4e0] ss:$12 sps:$4 sm:$0xff]  }
 0x933   :  { %6082 = vmatpush1.bf16.msra.mxu0 %v12507_v24  ;;  %6124 = vmatprep.subr.bf16.mxu1 %v12512_v16  ;;  %v12597_v24 = vld [vmem:[#allocation6 + $0x690] ss:$12 sps:$4 sm:$0xff]   ;;  %v12578_v16 = vld [vmem:[#allocation6 + $0x4cc] ss:$12 sps:$4 sm:$0xff]  }
 0x934   :  { %6083 = vmatprep.subr.bf16.mxu0 %v12515_v22  ;;  %v12605_v22 = vld [vmem:[#allocation6 + $0x67c] ss:$12 sps:$4 sm:$0xff]  }
 0x936   :  { %6125 = vmatpush1.bf16.msra.mxu1 %v12510_v0  ;;  %v12576_v0 = vld [vmem:[#allocation6 + $0x4c8] ss:$12 sps:$4 sm:$0xff]  }
 0x937   :  { %6084 = vmatpush1.bf16.msra.mxu0 %v12513_v13  ;;  %11342 = vmatprep.subr.bf16.mxu1 %v12516_v58  ;;  %v12603_v13 = vld [vmem:[#allocation6 + $0x678] ss:$12 sps:$4 sm:$0xff]   ;;  %v12581_v58 = vld [vmem:[#allocation6 + $0x4b4] ss:$12 sps:$4 sm:$0xff]  }
 0x938   :  { %6085 = vmatprep.subr.bf16.mxu0 %v12519_v34  ;;  %v12611_v34 = vld [vmem:[#allocation6 + $0x664] ss:$12 sps:$4 sm:$0xff]  }
 0x939   :  { %6143 = vmatmul.mubr.bf16.vlgmr.msra.gmra.mxu1 %v14938_v3 }
 0x93a   :  { %11343 = vmatpush3.bf16.msra.mxu1 %v12520_v9  ;;  %6183 = vmatprep.mubr.bf16.mxu1 %v14930_v28  ;;  %v12546_v28 = vld [vmem:[#allocation6 + $0xe0] ss:$12 sps:$4 sm:$0xff]   ;;  %v12579_v9 = vld [vmem:[#allocation6 + $0x4b0] ss:$12 sps:$4 sm:$0xff]  }
 0x93b   :  { %6086 = vmatpush2.bf16.msra.mxu0 %v12517_v53  ;;  %11344 = vmatprep.subr.bf16.mxu1 %v12521_v2  ;;  %v12584_v53 = vld [vmem:[#allocation6 + $0x49c] ss:$12 sps:$4 sm:$0xff]   ;;  %v12617_v2 = vld [vmem:[#allocation6 + $0x64c] ss:$12 sps:$4 sm:$0xff]  }
 0x93c   :  { %6087 = vmatprep.subr.bf16.mxu0 %v12524_v12  ;;  %v12582_v12 = vld [vmem:[#allocation6 + $0x498] ss:$12 sps:$4 sm:$0xff]  }
 0x93e   :  { %11345 = vmatpush3.bf16.msra.mxu1 %v12525_v33  ;;  %v12615_v33 = vld [vmem:[#allocation6 + $0x648] ss:$12 sps:$4 sm:$0xff]  }
 0x93f   :  { %6088 = vmatpush2.bf16.msra.mxu0 %v12522_v40  ;;  %11346 = vmatprep.subr.bf16.mxu1 %v12526_v1  ;;  %v12587_v40 = vld [vmem:[#allocation6 + $0x484] ss:$12 sps:$4 sm:$0xff]   ;;  %v12585_v1 = vld [vmem:[#allocation6 + $0x480] ss:$12 sps:$4 sm:$0xff]  }
 0x940   :  { %6089 = vmatprep.subr.bf16.mxu0 %v12529_v62  ;;  %v12590_v62 = vld [vmem:[#allocation6 + $0x5ec] ss:$12 sps:$4 sm:$0xff]  }
 0x942   :  { %11347 = vmatpush3.bf16.msra.mxu1 %v12530_v41  ;;  %v12588_v41 = vld [vmem:[#allocation6 + $0x5e8] ss:$12 sps:$4 sm:$0xff]  }
 0x943   :  { %6090 = vmatpush2.bf16.msra.mxu0 %v12527_v63  ;;  %11348 = vmatprep.subr.bf16.mxu1 %v12531_v7  ;;  %v12596_v63 = vld [vmem:[#allocation6 + $0x5d4] ss:$12 sps:$4 sm:$0xff]  }
 0x944   :  { %6091 = vmatprep.subr.bf16.mxu0 %v12534_v5  ;;  %v12623_v7 = vld [vmem:[#allocation6 + $0x634] ss:$12 sps:$4 sm:$0xff]   ;;  %v12594_v5 = vld [vmem:[#allocation6 + $0x5d0] ss:$12 sps:$4 sm:$0xff]  }
 0x946   :  { %11349 = vmatpush3.bf16.msra.mxu1 %v12535_v20  ;;  %v12621_v20 = vld [vmem:[#allocation6 + $0x630] ss:$12 sps:$4 sm:$0xff]  }
 0x947   :  { %6092 = vmatpush2.bf16.msra.mxu0 %v12532_v50  ;;  %11350 = vmatprep.subr.bf16.mxu1 %v12536_v17  ;;  %v12602_v50 = vld [vmem:[#allocation6 + $0x5bc] ss:$12 sps:$4 sm:$0xff]  }
 0x948   :  { %6093 = vmatprep.subr.bf16.mxu0 %v12539_v35  ;;  %v12629_v17 = vld [vmem:[#allocation6 + $0x61c] ss:$12 sps:$4 sm:$0xff]   ;;  %v12600_v35 = vld [vmem:[#allocation6 + $0x5b8] ss:$12 sps:$4 sm:$0xff]  }
 0x94a   :  { %11351 = vmatpush3.bf16.msra.mxu1 %v12540_v56  ;;  %v12627_v56 = vld [vmem:[#allocation6 + $0x618] ss:$12 sps:$4 sm:$0xff]  }
 0x94b   :  { %6094 = vmatpush2.bf16.msra.mxu0 %v12537_v55  ;;  %11352 = vmatprep.subr.bf16.mxu1 %v12541_v8  ;;  %v12608_v55 = vld [vmem:[#allocation6 + $0x5a4] ss:$12 sps:$4 sm:$0xff]  }
 0x94c   :  { %6095 = vmatprep.subr.bf16.mxu0 %v12544_v32  ;;  %v12635_v8 = vld [vmem:[#allocation6 + $0x604] ss:$12 sps:$4 sm:$0xff]   ;;  %v12606_v32 = vld [vmem:[#allocation6 + $0x5a0] ss:$12 sps:$4 sm:$0xff]  }
 0x94e   :  { %11353 = vmatpush3.bf16.msra.mxu1 %v12545_v39  ;;  %v12633_v39 = vld [vmem:[#allocation6 + $0x600] ss:$12 sps:$4 sm:$0xff]  }
 0x94f   :  { %6096 = vmatpush2.bf16.msra.mxu0 %v12542_v36  ;;  %11354 = vmatprep.subr.bf16.mxu1 %v12546_v28  ;;  %v12614_v36 = vld [vmem:[#allocation6 + $0x58c] ss:$12 sps:$4 sm:$0xff]   ;;  %v12636_v28 = vld [vmem:[#allocation6 + $0x5f0] ss:$12 sps:$4 sm:$0xff]  }
 0x950   :  { %6097 = vmatprep.subr.bf16.mxu0 %v12549_v27  ;;  %v12612_v27 = vld [vmem:[#allocation6 + $0x588] ss:$12 sps:$4 sm:$0xff]  }
 0x952   :  { %11355 = vmatpush3.bf16.msra.mxu1 %v12550_v25  ;;  %v12620_v25 = vld [vmem:[#allocation6 + $0x574] ss:$12 sps:$4 sm:$0xff]  }
 0x953   :  { %6098 = vmatpush2.bf16.msra.mxu0 %v12547_v54  ;;  %11356 = vmatprep.subr.bf16.mxu1 %v12551_v45  ;;  %v12618_v54 = vld [vmem:[#allocation6 + $0x570] ss:$12 sps:$4 sm:$0xff]  }
 0x954   :  { %6099 = vmatprep.subr.bf16.mxu0 %v12554_v23  ;;  %v12626_v45 = vld [vmem:[#allocation6 + $0x55c] ss:$12 sps:$4 sm:$0xff]   ;;  %v12624_v23 = vld [vmem:[#allocation6 + $0x558] ss:$12 sps:$4 sm:$0xff]  }
 0x956   :  { %11357 = vmatpush3.bf16.msra.mxu1 %v12555_v10  ;;  %v12632_v10 = vld [vmem:[#allocation6 + $0x544] ss:$12 sps:$4 sm:$0xff]  }
 0x957   :  { %6100 = vmatpush2.bf16.msra.mxu0 %v12552_v46  ;;  %6264 = vmatprep.subr.mxu1 %v14852_v47  ;;  %v10724_v47 = vld [vmem:[%s15887_s8 + $0x10] sm:$0xff]  ;;  %v12630_v46 = vld [vmem:[#allocation6 + $0x540] ss:$12 sps:$4 sm:$0xff]  }
 0x958   :  { %11886 = vmatprep.subr.bf16.mxu0 %v16121_v30 }
 0x959   :  { %6184 = vmatmul.mubr.bf16.vlgmr.msra.gmra.mxu1 %v4794_v29 }
 0x95a   :  { %6102 = vmatmul.mubr.bf16.vlgmr.msra.gmra.mxu0 %v4794_v29  ;;  %6265 = vmatpush1.msra.mxu1 %v14855_v11  ;;  %v12558_v11 = vld [vmem:[#allocation6 + $0x200] ss:$12 sps:$4 sm:$0xff]  }
 0x95b   :  { %11887 = vmatpush3.bf16.msra.mxu0 %v12556_v48  ;;  %6266 = vmatprep.subr.mxu1 %v14858_v52  ;;  %v12559_v52 = vld [vmem:[#allocation6 + $0x1e8] ss:$12 sps:$4 sm:$0xff]  }
 0x95c   :  { %6267 = vmatpush1.msra.mxu1 %v14864_v51  ;;  %11888 = vmatprep.subr.bf16.mxu0 %v16121_v30  ;;  %v12560_v51 = vld [vmem:[#allocation6 + $0x1d0] ss:$12 sps:$4 sm:$0xff]  }
 0x95d   :  { %6300 = vmatprep.mubr.f32.mxu1 %v16121_v30  ;;  %11906 = vmatprep.subr.mxu1 %v16121_v30 }
 0x95e   :  { %11902 = vmatprep.mubr.msk.bf16.mxu0 %vm13081_vm1, %v16121_v30 }
 0x95f   :  { %11889 = vmatpush3.bf16.msra.mxu0 %v12557_v44 }
 0x960   :  { %11890 = vmatprep.subr.bf16.mxu0 %v16121_v30 }
 0x961   :  { %10725 = vmatmul.mubr.msk.f32.vlgmr.msra.gmra.mxu1 %vm4649_vm6, %v10724_v47 }
 0x962   :  { %11907 = vmatpush3.msra.mxu1 %v14882_v19  ;;  %11910 = vmatprep.mubr.msk.f32.mxu1 %vm13081_vm1, %v16121_v30  ;;  %v12561_v19 = vld [vmem:[#allocation6 + $0x1b8] ss:$12 sps:$4 sm:$0xff]  }
 0x963   :  { %11908 = vmatprep.subr.mxu1 %v16121_v30  ;;  %11891 = vmatpush3.bf16.msra.mxu0 %v12558_v11 }
 0x964   :  { %11909 = vmatpush3.msra.mxu1 %v14886_v59  ;;  %11892 = vmatprep.subr.bf16.mxu0 %v16121_v30  ;;  %v12563_v59 = vld [vmem:[#allocation6 + $0x188] ss:$12 sps:$4 sm:$0xff]  }
 0x965   :  { %11911 = vmatmul.mubr.msk.f32.vlgmr.msra.gmra.mxu1 %vm4649_vm6, %v10724_v47  ;;  %6902 = vmatprep.subr.bf16.mxu1 %v12593_v61 }
 0x966   :  { %6934 = vmatprep.mubr.bf16.mxu1 %v16195_v18  ;;  %6903 = vmatpush1.bf16.msra.mxu1 %v12591_v60  ;;  %v15171_v18 = vld [vmem:[#allocation7 + $0x458] sm:$0xff] }
 0x967   :  { %11893 = vmatpush3.bf16.msra.mxu0 %v12559_v52  ;;  %6904 = vmatprep.subr.bf16.mxu1 %v12599_v14 }
 0x968   :  { %11894 = vmatprep.subr.bf16.mxu0 %v16121_v30 }
 0x96a   :  { %6905 = vmatpush1.bf16.msra.mxu1 %v12597_v24 }
 0x96b   :  { %11895 = vmatpush3.bf16.msra.mxu0 %v12560_v51  ;;  %6906 = vmatprep.subr.bf16.mxu1 %v12605_v22 }
 0x96c   :  { %11896 = vmatprep.subr.bf16.mxu0 %v16121_v30 }
 0x96e   :  { %6907 = vmatpush1.bf16.msra.mxu1 %v12603_v13 }
 0x96f   :  { %11897 = vmatpush3.bf16.msra.mxu0 %v12561_v19  ;;  %6908 = vmatprep.subr.bf16.mxu1 %v12611_v34 }
 0x970   :  { %11898 = vmatprep.subr.bf16.mxu0 %v16121_v30 }
 0x973   :  { %11899 = vmatpush3.bf16.msra.mxu0 %v12562_v57 }
 0x974   :  { %11900 = vmatprep.subr.bf16.mxu0 %v16121_v30 }
 0x977   :  { %11901 = vmatpush3.bf16.msra.mxu0 %v12563_v59 }
 0x978   :  { %6861 = vmatprep.subr.bf16.mxu0 %v12566_v4 }
 0x97a   :  { %11903 = vmatmul.mubr.bf16.vlgmr.msra.gmra.mxu0 %v14938_v3  ;;  %v12609_v3 = vld [vmem:[#allocation6 + $0x660] ss:$12 sps:$4 sm:$0xff]  }
 0x97b   :  { %6862 = vmatpush1.bf16.msra.mxu0 %v12564_v43  ;;  %6909 = vmatpush1.bf16.msra.mxu1 %v12609_v3 }
 0x97c   :  { %6863 = vmatprep.subr.bf16.mxu0 %v12569_v42  ;;  %6910 = vmatprep.subr.bf16.mxu1 %v12617_v2 }
 0x97f   :  { %6864 = vmatpush1.bf16.msra.mxu0 %v12567_v38  ;;  %6911 = vmatpush1.bf16.msra.mxu1 %v12615_v33 }
 0x980   :  { %6865 = vmatprep.subr.bf16.mxu0 %v12572_v26  ;;  %6912 = vmatprep.subr.bf16.mxu1 %v12623_v7 }
 0x983   :  { %6866 = vmatpush1.bf16.msra.mxu0 %v12570_v6  ;;  %6913 = vmatpush1.bf16.msra.mxu1 %v12621_v20  ;;  %v12637_v20 = vld [vmem:[#allocation6 + $0x6b0] ss:$12 sps:$4 sm:$0xff]  }
 0x984   :  { %6867 = vmatprep.subr.bf16.mxu0 %v12575_v15  ;;  %6914 = vmatprep.subr.bf16.mxu1 %v12629_v17 }
 0x987   :  { %6868 = vmatpush1.bf16.msra.mxu0 %v12573_v31  ;;  %6915 = vmatpush1.bf16.msra.mxu1 %v12627_v56 }
 0x988   :  { %6869 = vmatprep.subr.bf16.mxu0 %v12578_v16  ;;  %6916 = vmatprep.subr.bf16.mxu1 %v12635_v8 }
 0x98b   :  { %6870 = vmatpush1.bf16.msra.mxu0 %v12576_v0  ;;  %6917 = vmatpush1.bf16.msra.mxu1 %v12633_v39  ;;  %v12641_v39 = vld [vmem:[#allocation6 + $0x518] ss:$12 sps:$4 sm:$0xff]  }
 0x98c   :  { %6871 = vmatprep.subr.bf16.mxu0 %v12581_v58  ;;  %11376 = vmatprep.subr.bf16.mxu1 %v12636_v28  ;;  %v12643_v28 = vld [vmem:[#allocation6 + $0x680] ss:$12 sps:$4 sm:$0xff]  }
 0x98f   :  { %6872 = vmatpush1.bf16.msra.mxu0 %v12579_v9 }
 0x990   :  { %6873 = vmatprep.subr.bf16.mxu0 %v12584_v53 }
 0x993   :  { %6874 = vmatpush1.bf16.msra.mxu0 %v12582_v12 }
 0x994   :  { %6875 = vmatprep.subr.bf16.mxu0 %v12587_v40 }
 0x997   :  { %6876 = vmatpush1.bf16.msra.mxu0 %v12585_v1 }
 0x998   :  { %6877 = vmatprep.subr.bf16.mxu0 %v12590_v62 }
 0x99b   :  { %6878 = vmatpush2.bf16.msra.mxu0 %v12588_v41 }
 0x99c   :  { %6879 = vmatprep.subr.bf16.mxu0 %v12596_v63 }
 0x99f   :  { %6880 = vmatpush2.bf16.msra.mxu0 %v12594_v5 }
 0x9a0   :  { %6881 = vmatprep.subr.bf16.mxu0 %v12602_v50 }
 0x9a3   :  { %6882 = vmatpush2.bf16.msra.mxu0 %v12600_v35  ;;  %v12638_v35 = vld [vmem:[#allocation6 + $0x530] ss:$12 sps:$4 sm:$0xff]  }
 0x9a4   :  { %6883 = vmatprep.subr.bf16.mxu0 %v12608_v55  ;;  %v12639_v55 = vld [vmem:[#allocation6 + $0x5d8] ss:$12 sps:$4 sm:$0xff]  }
 0x9a7   :  { %6884 = vmatpush2.bf16.msra.mxu0 %v12606_v32  ;;  %v12640_v32 = vld [vmem:[#allocation6 + $0x698] ss:$12 sps:$4 sm:$0xff]  }
 0x9a8   :  { %6885 = vmatprep.subr.bf16.mxu0 %v12614_v36  ;;  %v12642_v36 = vld [vmem:[#allocation6 + $0x5c0] ss:$12 sps:$4 sm:$0xff]  }
 0x9ab   :  { %6886 = vmatpush2.bf16.msra.mxu0 %v12612_v27  ;;  %v12644_v27 = vld [vmem:[#allocation6 + $0x500] ss:$12 sps:$4 sm:$0xff]  }
 0x9ac   :  { %6887 = vmatprep.subr.bf16.mxu0 %v12620_v25  ;;  %v12645_v25 = vld [vmem:[#allocation6 + $0x5a8] ss:$12 sps:$4 sm:$0xff]  }
 0x9af   :  { %6888 = vmatpush2.bf16.msra.mxu0 %v12618_v54  ;;  %v12646_v54 = vld [vmem:[#allocation6 + $0x668] ss:$12 sps:$4 sm:$0xff]  }
 0x9b0   :  { %6889 = vmatprep.subr.bf16.mxu0 %v12626_v45  ;;  %v12647_v45 = vld [vmem:[#allocation6 + $0x4e8] ss:$12 sps:$4 sm:$0xff]  }
 0x9b3   :  { %6890 = vmatpush2.bf16.msra.mxu0 %v12624_v23  ;;  %v12648_v23 = vld [vmem:[#allocation6 + $0x590] ss:$12 sps:$4 sm:$0xff]  }
 0x9b4   :  { %6891 = vmatprep.subr.bf16.mxu0 %v12632_v10  ;;  %v12649_v10 = vld [vmem:[#allocation6 + $0x650] ss:$12 sps:$4 sm:$0xff]  }
 0x9b7   :  { %6892 = vmatpush2.bf16.msra.mxu0 %v12630_v46  ;;  %v12650_v46 = vld [vmem:[#allocation6 + $0x4d0] ss:$12 sps:$4 sm:$0xff]  }
 0x9b8   :  { %11913 = vmatprep.subr.bf16.mxu0 %v16121_v30 }
 0x9b9   :  { %v5557_v29 = vpop.f32.mrf.mxu1 }
 0x9ba   :  { %v5598_v48 = vpop.f32.mrf.mxu0 }
 0x9bb   :  { %v5599_v44 = vadd.f32 %v5598_v48, %v5557_v29  ;;  %v5559_v47 = vpop.f32.mrf.mxu1  ;;  %v12651_v29 = vld [vmem:[#allocation6 + $0x578] ss:$12 sps:$4 sm:$0xff]  }
 0x9bc   :  { %v5600_v11 = vpop.f32.mrf.mxu0  ;;  %v12652_v48 = vld [vmem:[#allocation6 + $0x638] ss:$12 sps:$4 sm:$0xff]  }
 0x9bd   :  { %v5601_v52 = vadd.f32 %v5600_v11, %v5559_v47  ;;  %v5561_v51 = vpop.f32.mrf.mxu1  ;;  %v12654_v11 = vld [vmem:[#allocation6 + $0x560] ss:$12 sps:$4 sm:$0xff]  }
 0x9be   :  { %v5602_v19 = vpop.f32.mrf.mxu0 }
 0x9bf   :  { %v5562_v57 = vpop.f32.mrf.mxu1  ;;  %v12655_v19 = vld [vmem:[#allocation6 + $0x620] ss:$12 sps:$4 sm:$0xff]  }
 0x9c0   :  { %v5603_v59 = vpop.f32.mrf.mxu0  ;;  %v12656_v57 = vld [vmem:[#allocation6 + $0x4a0] ss:$12 sps:$4 sm:$0xff]  }
 0x9d9   :  { %v5679_v4 = vpop.f32.mrf.mxu1 }
 0x9da   :  { %v11327_v43 = vpop.f32.mrf.mxu0 }
 0x9db   :  { %v11884_v42 = vpop.f32.mrf.mxu1 }
 0x9dc   :  { %v11328_v38 = vpop.f32.mrf.mxu0  ;;  %v12658_v42 = vld [vmem:[#allocation6 + $0x608] ss:$12 sps:$4 sm:$0xff]  }
 0x9dd   :  { %v11329_v26 = vadd.f32 %v11328_v38, %v11327_v43  ;;  %v5682_v6 = vpop.f32.mrf.mxu1  ;;  %v12659_v38 = vld [vmem:[#allocation6 + $0x488] ss:$12 sps:$4 sm:$0xff]  }
 0x9de   :  { %v11330_v15 = vpop.f32.mrf.mxu0  ;;  %v14997_v6 = vld [vmem:[#allocation7 + $0x168] sm:$0xff] }
 0x9df   :  { %v5680_v60 = vadd.f32 %v11329_v26, %v5679_v4  ;;  %v11885_v61 = vpop.f32.mrf.mxu1  ;;  %v12657_v4 = vld [vmem:[#allocation6 + $0x548] ss:$12 sps:$4 sm:$0xff]   ;;  %v15000_v15 = vld [vmem:[#allocation7 + $0x158] sm:$0xff] }
 0x9e0   :  { %v11331_v14 = vpop.f32.mrf.mxu0  ;;  %v14994_v26 = vld [vmem:[#allocation7 + $0x170] sm:$0xff]  ;;  %v15007_v61 = vld [vmem:[#allocation7 + $0x140] sm:$0xff] }
 0x9e1   :  { %v15010_v14 = vld [vmem:[#allocation7 + $0x138] sm:$0xff] }
 0x9f9   :  { %v6144_v31 = vpop.f32.mrf.mxu1 }
 0x9fb   :  { %v6146_v24 = vpop.f32.mrf.mxu1 }
 0x9fd   :  { %v6148_v16 = vpop.f32.mrf.mxu1 }
 0x9fe   :  { %v15019_v16 = vld [vmem:[#allocation7 + $0x110] sm:$0xff] }
 0x9ff   :  { %v6149_v22 = vpop.f32.mrf.mxu1 }
 0xa00   :  { %v15022_v22 = vld [vmem:[#allocation7 + $0x108] sm:$0xff] }
 0xa19   :  { %v11358_v0 = vpop.f32.mrf.mxu1 }
 0xa1a   :  { %v6103_v13 = vpop.f32.mrf.mxu0 }
 0xa1b   :  { %v6104_v58 = vadd.f32 %v6103_v13, %v5599_v44  ;;  %v11359_v34 = vpop.f32.mrf.mxu1  ;;  %v12653_v44 = vld [vmem:[#allocation6 + $0x4b8] ss:$12 sps:$4 sm:$0xff]   ;;  %v15028_v13 = vld [vmem:[#allocation7 + $0xf0] sm:$0xff] }
 0xa1c   :  { %v11360_v9 = vadd.f32 %v11359_v34, %v11358_v0  ;;  %v6105_v3 = vpop.f32.mrf.mxu0  ;;  %v15025_v0 = vld [vmem:[#allocation7 + $0xf8] sm:$0xff]  ;;  %16203 = vst [vmem:[#allocation19_spill] sm:$0xff] %v15028_v13 }
 0xa1d   :  { %v14973_v53 = vadd.f32 %v6144_v31, %v6104_v58  ;;  %v6106_v2 = vadd.f32 %v6105_v3, %v5601_v52  ;;  %v11361_v12 = vpop.f32.mrf.mxu1  ;;  %v15013_v31 = vld [vmem:[#allocation7 + $0x128] sm:$0xff]  ;;  %v15031_v58 = vld [vmem:[#allocation7 + $0xe0] sm:$0xff]  ;;  %v15034_v34 = vld [vmem:[#allocation7 + $0xd8] sm:$0xff] }
 0xa1e   :  { %v6107_v33 = vpop.f32.mrf.mxu0  ;;  %v6186_v40 = vadd.f32 %v11360_v9, %v5680_v60  ;;  %v15003_v60 = vld [vmem:[#allocation7 + $0x150] sm:$0xff]  ;;  %16204 = vst [vmem:[#allocation20_spill] sm:$0xff] %v15031_v58  ;;  %16205 = vst [vmem:[#allocation21_spill] sm:$0xff] %v15034_v34  ;;  %v15037_v9 = vld [vmem:[#allocation7 + $0xc8] sm:$0xff] }
 0xa1f   :  { %v14975_v1 = vadd.f32 %v6146_v24, %v6106_v2  ;;  %v11362_v62 = vpop.f32.mrf.mxu1  ;;  %v15016_v24 = vld [vmem:[#allocation7 + $0x120] sm:$0xff]  ;;  %16206 = vst [vmem:[#allocation22_spill] sm:$0xff] %v15037_v9  ;;  %v15043_v2 = vld [vmem:[#allocation7 + $0xb0] sm:$0xff]  ;;  %v15046_v12 = vld [vmem:[#allocation7 + $0xa8] sm:$0xff] }
 0xa20   :  { %v6108_v41 = vpop.f32.mrf.mxu0  ;;  %v15040_v3 = vld [vmem:[#allocation7 + $0xc0] sm:$0xff]  ;;  %16208 = vst [vmem:[#allocation24_spill] sm:$0xff] %v15043_v2  ;;  %16209 = vst [vmem:[#allocation25_spill] sm:$0xff] %v15046_v12  ;;  %v15049_v33 = vld [vmem:[#allocation7 + $0x98] sm:$0xff] }
 0xa21   :  { %v6302_v63 = vpop.f32.mrf.mxu1  ;;  %16207 = vst [vmem:[#allocation23_spill] sm:$0xff] %v15040_v3  ;;  %16210 = vst [vmem:[#allocation26_spill] sm:$0xff] %v15049_v33  ;;  %v15055_v62 = vld [vmem:[#allocation7 + $0x80] sm:$0xff]  ;;  %v15058_v41 = vld [vmem:[#allocation7 + $0x78] sm:$0xff] }
 0xa22   :  { %v14977_v50 = vpack.c.bf16 %v6302_v63, %v6302_v63  ;;  %16212 = vst [vmem:[#allocation28_spill] sm:$0xff] %v15055_v62  ;;  %16213 = vst [vmem:[#allocation29_spill] sm:$0xff] %v15058_v41  ;;  %v15061_v63 = vld [vmem:[#allocation7 + $0x68] sm:$0xff] }
 0xa23   :  { %v6304_v7 = vpop.f32.mrf.mxu1  ;;  %16214 = vst [vmem:[#allocation30_spill] sm:$0xff] %v15061_v63 }
 0xa24   :  { %v6378_v5 = vpack.c.bf16 %v6304_v7, %v6304_v7  ;;  %v15064_v7 = vld [vmem:[#allocation7 + $0x60] sm:$0xff] }
 0xa25   :  { %v6373_v17 = vpop.f32.mrf.mxu1  ;;  %16215 = vst [vmem:[#allocation31_spill] sm:$0xff] %v15064_v7 }
 0xa26   :  { %v14979_v56 = vpack.c.bf16 %v6373_v17, %v6373_v17  ;;  %6893 = vmatprep.mubr.bf16.mxu0 %v6378_v5  ;;  %v15076_v17 = vld [vmem:[#allocation7 + $0x30] sm:$0xff] }
 0xa27   :  { %6894 = vmatmul.mubr.bf16.vlgmr.msra.gmra.mxu0 %v14977_v50  ;;  %v11912_v8 = vpop.f32.mrf.mxu1  ;;  %16219 = vst [vmem:[#allocation35_spill] sm:$0xff] %v15076_v17 }
 0xa28   :  { %11914 = vmatpush3.bf16.msra.mxu0 %v12637_v20  ;;  %6935 = vmatmul.mubr.bf16.vlgmr.msra.gmra.mxu1 %v14979_v56  ;;  %v15070_v20 = vld [vmem:[#allocation7 + $0x48] sm:$0xff]  ;;  %v15088_v8 = vld [vmem:[#allocation7] sm:$0xff] }
 0xa29   :  { %11377 = vmatpush3.bf16.msra.mxu1 %v12638_v35  ;;  %6975 = vmatprep.mubr.bf16.mxu1 %v6378_v5  ;;  %v15067_v5 = vld [vmem:[#allocation7 + $0x50] sm:$0xff]  ;;  %16217 = vst [vmem:[#allocation33_spill] sm:$0xff] %v15070_v20  ;;  %v15079_v35 = vld [vmem:[#allocation7 + $0x20] sm:$0xff]  ;;  %16223 = vst [vmem:[#allocation39_spill] sm:$0xff] %v15088_v8 }
 0xa2a   :  { %11915 = vmatprep.subr.bf16.mxu0 %v16121_v30  ;;  %11378 = vmatprep.subr.bf16.mxu1 %v12639_v55  ;;  %16216 = vst [vmem:[#allocation32_spill] sm:$0xff] %v15067_v5  ;;  %16220 = vst [vmem:[#allocation36_spill] sm:$0xff] %v15079_v35  ;;  %v15085_v55 = vld [vmem:[#allocation7 + $0x8] sm:$0xff] }
 0xa2b   :  { %11929 = vmatprep.mubr.msk.bf16.mxu0 %vm13081_vm1, %v16121_v30  ;;  %16222 = vst [vmem:[#allocation38_spill] sm:$0xff] %v15085_v55 }
 0xa2c   :  { %11916 = vmatpush3.bf16.msra.mxu0 %v12640_v32  ;;  %v15091_v32 = vld [vmem:[#allocation7 + $0x2f0] sm:$0xff] }
 0xa2d   :  { %11379 = vmatpush3.bf16.msra.mxu1 %v12641_v39  ;;  %11917 = vmatprep.subr.bf16.mxu0 %v16121_v30  ;;  %16224 = vst [vmem:[#allocation40_spill] sm:$0xff] %v15091_v32  ;;  %v15094_v39 = vld [vmem:[#allocation7 + $0x2e8] sm:$0xff] }
 0xa2e   :  { %11380 = vmatprep.subr.bf16.mxu1 %v12642_v36  ;;  %16225 = vst [vmem:[#allocation41_spill] sm:$0xff] %v15094_v39  ;;  %v15097_v36 = vld [vmem:[#allocation7 + $0x2d8] sm:$0xff] }
 0xa2f   :  { %16226 = vst [vmem:[#allocation42_spill] sm:$0xff] %v15097_v36 }
 0xa30   :  { %11918 = vmatpush3.bf16.msra.mxu0 %v12643_v28  ;;  %v15100_v28 = vld [vmem:[#allocation7 + $0x2d0] sm:$0xff] }
 0xa31   :  { %11381 = vmatpush3.bf16.msra.mxu1 %v12644_v27  ;;  %11919 = vmatprep.subr.bf16.mxu0 %v16121_v30  ;;  %16227 = vst [vmem:[#allocation43_spill] sm:$0xff] %v15100_v28  ;;  %v15103_v27 = vld [vmem:[#allocation7 + $0x2c0] sm:$0xff] }
 0xa32   :  { %11382 = vmatprep.subr.bf16.mxu1 %v12645_v25  ;;  %16228 = vst [vmem:[#allocation44_spill] sm:$0xff] %v15103_v27  ;;  %v15106_v25 = vld [vmem:[#allocation7 + $0x2b8] sm:$0xff] }
 0xa33   :  { %16229 = vst [vmem:[#allocation45_spill] sm:$0xff] %v15106_v25 }
 0xa34   :  { %11920 = vmatpush3.bf16.msra.mxu0 %v12646_v54  ;;  %v15109_v54 = vld [vmem:[#allocation7 + $0x2a8] sm:$0xff] }
 0xa35   :  { %11383 = vmatpush3.bf16.msra.mxu1 %v12647_v45  ;;  %11921 = vmatprep.subr.bf16.mxu0 %v16121_v30  ;;  %16230 = vst [vmem:[#allocation46_spill] sm:$0xff] %v15109_v54  ;;  %v15112_v45 = vld [vmem:[#allocation7 + $0x2a0] sm:$0xff] }
 0xa36   :  { %11384 = vmatprep.subr.bf16.mxu1 %v12648_v23  ;;  %16231 = vst [vmem:[#allocation47_spill] sm:$0xff] %v15112_v45  ;;  %v15115_v23 = vld [vmem:[#allocation7 + $0x290] sm:$0xff] }
 0xa37   :  { %16232 = vst [vmem:[#allocation48_spill] sm:$0xff] %v15115_v23 }
 0xa38   :  { %11922 = vmatpush3.bf16.msra.mxu0 %v12649_v10  ;;  %v15118_v10 = vld [vmem:[#allocation7 + $0x288] sm:$0xff] }
 0xa39   :  { %11385 = vmatpush3.bf16.msra.mxu1 %v12650_v46  ;;  %11923 = vmatprep.subr.bf16.mxu0 %v16121_v30  ;;  %16233 = vst [vmem:[#allocation49_spill] sm:$0xff] %v15118_v10  ;;  %v15121_v46 = vld [vmem:[#allocation7 + $0x278] sm:$0xff] }
 0xa3a   :  { %v6225_v47 = vpop.f32.mrf.mxu0  ;;  %11386 = vmatprep.subr.bf16.mxu1 %v12651_v29  ;;  %16234 = vst [vmem:[#allocation50_spill] sm:$0xff] %v15121_v46  ;;  %v15124_v29 = vld [vmem:[#allocation7 + $0x270] sm:$0xff] }
 0xa3b   :  { %v14990_v52 = vadd.f32 %v6225_v47, %v6186_v40  ;;  %v15052_v40 = vld [vmem:[#allocation7 + $0x90] sm:$0xff]  ;;  %16235 = vst [vmem:[#allocation51_spill] sm:$0xff] %v15124_v29  ;;  %v15133_v47 = vld [vmem:[#allocation7 + $0x248] sm:$0xff] }
 0xa3c   :  { %11924 = vmatpush3.bf16.msra.mxu0 %v12652_v48  ;;  %v11904_v51 = vpop.f32.mrf.mxu0  ;;  %16211 = vst [vmem:[#allocation27_spill] sm:$0xff] %v15052_v40  ;;  %v15127_v48 = vld [vmem:[#allocation7 + $0x260] sm:$0xff]  ;;  %16238 = vst [vmem:[#allocation54_spill] sm:$0xff] %v15133_v47 }
 0xa3d   :  { %11387 = vmatpush3.bf16.msra.mxu1 %v12653_v44  ;;  %11925 = vmatprep.subr.bf16.mxu0 %v16121_v30  ;;  %16236 = vst [vmem:[#allocation52_spill] sm:$0xff] %v15127_v48  ;;  %v15130_v44 = vld [vmem:[#allocation7 + $0x258] sm:$0xff]  ;;  %v15139_v51 = vld [vmem:[#allocation7 + $0x230] sm:$0xff] }
 0xa3e   :  { %v6228_v59 = vpop.f32.mrf.mxu0  ;;  %11388 = vmatprep.subr.bf16.mxu1 %v12654_v11  ;;  %16237 = vst [vmem:[#allocation53_spill] sm:$0xff] %v15130_v44  ;;  %v15136_v11 = vld [vmem:[#allocation7 + $0x240] sm:$0xff]  ;;  %16240 = vst [vmem:[#allocation56_spill] sm:$0xff] %v15139_v51 }
 0xa3f   :  { %16239 = vst [vmem:[#allocation55_spill] sm:$0xff] %v15136_v11  ;;  %v15148_v59 = vld [vmem:[#allocation7 + $0x210] sm:$0xff] }
 0xa40   :  { %11926 = vmatpush3.bf16.msra.mxu0 %v12655_v19  ;;  %v11905_v43 = vpop.f32.mrf.mxu0  ;;  %v15142_v19 = vld [vmem:[#allocation7 + $0x228] sm:$0xff]  ;;  %16243 = vst [vmem:[#allocation59_spill] sm:$0xff] %v15148_v59 }
 0xa41   :  { %11389 = vmatpush3.bf16.msra.mxu1 %v12656_v57  ;;  %11927 = vmatprep.subr.bf16.mxu0 %v16121_v30  ;;  %16241 = vst [vmem:[#allocation57_spill] sm:$0xff] %v15142_v19  ;;  %v15145_v57 = vld [vmem:[#allocation7 + $0x218] sm:$0xff] }
 0xa42   :  { %11390 = vmatprep.subr.bf16.mxu1 %v12657_v4  ;;  %16242 = vst [vmem:[#allocation58_spill] sm:$0xff] %v15145_v57  ;;  %v15151_v4 = vld [vmem:[#allocation7 + $0x200] sm:$0xff]  ;;  %v15154_v43 = vld [vmem:[#allocation7 + $0x1f8] sm:$0xff] }
 0xa43   :  { %16244 = vst [vmem:[#allocation60_spill] sm:$0xff] %v15151_v4  ;;  %16245 = vst [vmem:[#allocation61_spill] sm:$0xff] %v15154_v43 }
 0xa44   :  { %11928 = vmatpush3.bf16.msra.mxu0 %v12658_v42  ;;  %v15157_v42 = vld [vmem:[#allocation7 + $0x1e8] sm:$0xff] }
 0xa45   :  { %11391 = vmatpush3.bf16.msra.mxu1 %v12659_v38  ;;  %16246 = vst [vmem:[#allocation62_spill] sm:$0xff] %v15157_v42  ;;  %v15159_v38 = vld [vmem:[#allocation7 + $0x470] sm:$0xff] }
 0xa46   :  { %7209 = vmatprep.subr.mxu1 %v14994_v26  ;;  %7280 = vmatprep.subr.mxu0 %v15159_v38 }
 0xa47   :  { %11930 = vmatmul.mubr.bf16.vlgmr.msra.gmra.mxu0 %v14979_v56  ;;  %v15082_v56 = vld [vmem:[#allocation7 + $0x18] sm:$0xff] }
 0xa48   :  { %6976 = vmatmul.mubr.bf16.vlgmr.msra.gmra.mxu1 %v14977_v50  ;;  %7344 = vmatprep.mubr.f32.mxu0 %v16121_v30  ;;  %v15073_v50 = vld [vmem:[#allocation7 + $0x38] sm:$0xff]  ;;  %16221 = vst [vmem:[#allocation37_spill] sm:$0xff] %v15082_v56 }
 0xa49   :  { %7210 = vmatpush1.msra.mxu1 %v14997_v6  ;;  %16218 = vst [vmem:[#allocation34_spill] sm:$0xff] %v15073_v50  ;;  %7281 = vmatpush1.msra.mxu0 %v15165_v21 }
 0xa4a   :  { %7211 = vmatprep.subr.mxu1 %v15000_v15  ;;  %7282 = vmatprep.subr.mxu0 %v15171_v18 }
 0xa4b   :  { %7212 = vmatpush1.msra.mxu1 %v15003_v60 }
 0xa4c   :  { %7213 = vmatprep.subr.mxu1 %v15007_v61 }
 0xa4d   :  { %7214 = vmatpush1.msra.mxu1 %v15010_v14 }
 0xa4e   :  { %7215 = vmatprep.subr.mxu1 %v15013_v31 }
 0xa4f   :  { %7216 = vmatpush1.msra.mxu1 %v15016_v24 }
 0xa50   :  { %7217 = vmatprep.subr.mxu1 %v15019_v16 }
 0xa51   :  { %7218 = vmatpush1.msra.mxu1 %v15022_v22 }
 0xa52   :  { %7219 = vmatprep.subr.mxu1 %v15025_v0 }
 0xa53   :  { %7220 = vmatpush1.msra.mxu1 %v15028_v13 }
 0xa54   :  { %7221 = vmatprep.subr.mxu1 %v15031_v58 }
 0xa55   :  { %7222 = vmatpush1.msra.mxu1 %v15034_v34 }
 0xa56   :  { %7223 = vmatprep.subr.mxu1 %v15037_v9 }
 0xa57   :  { %7224 = vmatpush1.msra.mxu1 %v15040_v3 }
 0xa58   :  { %7225 = vmatprep.subr.mxu1 %v15043_v2 }
 0xa59   :  { %7226 = vmatpush1.msra.mxu1 %v15046_v12 }
 0xa5a   :  { %7227 = vmatprep.subr.mxu1 %v15049_v33 }
 0xa5b   :  { %7228 = vmatpush1.msra.mxu1 %v15052_v40 }
 0xa5c   :  { %7229 = vmatprep.subr.mxu1 %v15055_v62 }
 0xa5d   :  { %7230 = vmatpush1.msra.mxu1 %v15058_v41 }
 0xa5e   :  { %7231 = vmatprep.subr.mxu1 %v15061_v63 }
 0xa5f   :  { %7232 = vmatpush1.msra.mxu1 %v15064_v7 }
 0xa60   :  { %7233 = vmatprep.subr.mxu1 %v15067_v5 }
 0xa61   :  { %7234 = vmatpush1.msra.mxu1 %v15070_v20 }
 0xa62   :  { %7235 = vmatprep.subr.mxu1 %v15073_v50 }
 0xa63   :  { %7236 = vmatpush1.msra.mxu1 %v15076_v17  ;;  %v15286_v17 = vld [vmem:[#allocation7 + $0x2f8] sm:$0xff] }
 0xa64   :  { %7237 = vmatprep.subr.mxu1 %v15079_v35  ;;  %v15283_v35 = vld [vmem:[#allocation7 + $0x300] sm:$0xff] }
 0xa65   :  { %7238 = vmatpush1.msra.mxu1 %v15082_v56  ;;  %v15280_v56 = vld [vmem:[#allocation7 + $0x308] sm:$0xff] }
 0xa66   :  { %7239 = vmatprep.subr.mxu1 %v15085_v55  ;;  %v15277_v55 = vld [vmem:[#allocation7 + $0x318] sm:$0xff] }
 0xa67   :  { %7240 = vmatpush1.msra.mxu1 %v15088_v8  ;;  %v15274_v8 = vld [vmem:[#allocation7 + $0x320] sm:$0xff] }
 0xa68   :  { %7241 = vmatprep.subr.mxu1 %v15091_v32  ;;  %v15271_v32 = vld [vmem:[#allocation7 + $0x330] sm:$0xff] }
 0xa69   :  { %7242 = vmatpush2.msra.mxu1 %v15094_v39  ;;  %v15268_v39 = vld [vmem:[#allocation7 + $0x338] sm:$0xff] }
 0xa6a   :  { %7243 = vmatprep.subr.mxu1 %v15097_v36  ;;  %v15265_v36 = vld [vmem:[#allocation7 + $0x348] sm:$0xff] }
 0xa6b   :  { %7244 = vmatpush2.msra.mxu1 %v15100_v28  ;;  %v15262_v28 = vld [vmem:[#allocation7 + $0x350] sm:$0xff] }
 0xa6c   :  { %7245 = vmatprep.subr.mxu1 %v15103_v27  ;;  %v15259_v27 = vld [vmem:[#allocation7 + $0x360] sm:$0xff] }
 0xa6d   :  { %7246 = vmatpush2.msra.mxu1 %v15106_v25  ;;  %v15256_v25 = vld [vmem:[#allocation7 + $0x368] sm:$0xff] }
 0xa6e   :  { %7247 = vmatprep.subr.mxu1 %v15109_v54  ;;  %v15253_v54 = vld [vmem:[#allocation7 + $0x378] sm:$0xff] }
 0xa6f   :  { %7248 = vmatpush2.msra.mxu1 %v15112_v45  ;;  %v15250_v45 = vld [vmem:[#allocation7 + $0x380] sm:$0xff] }
 0xa70   :  { %7249 = vmatprep.subr.mxu1 %v15115_v23  ;;  %v15247_v23 = vld [vmem:[#allocation7 + $0x390] sm:$0xff] }
 0xa71   :  { %7250 = vmatpush2.msra.mxu1 %v15118_v10  ;;  %v15244_v10 = vld [vmem:[#allocation7 + $0x398] sm:$0xff] }
 0xa72   :  { %7251 = vmatprep.subr.mxu1 %v15121_v46  ;;  %v15241_v46 = vld [vmem:[#allocation7 + $0x3a8] sm:$0xff] }
 0xa73   :  { %7252 = vmatpush2.msra.mxu1 %v15124_v29  ;;  %v15232_v29 = vld [vmem:[#allocation7 + $0x3c8] sm:$0xff] }
 0xa74   :  { %7253 = vmatprep.subr.mxu1 %v15127_v48  ;;  %v15217_v48 = vld [vmem:[#allocation7 + $0x3f8] sm:$0xff] }
 0xa75   :  { %7254 = vmatpush2.msra.mxu1 %v15130_v44  ;;  %v15210_v44 = vld [vmem:[#allocation7 + $0x180] sm:$0xff] }
 0xa76   :  { %7255 = vmatprep.subr.mxu1 %v15133_v47  ;;  %v15204_v47 = vld [vmem:[#allocation7 + $0x188] sm:$0xff]  ;;  %16255 = vst [vmem:[#allocation71_spill] sm:$0xff] %v15210_v44 }
 0xa77   :  { %7256 = vmatpush2.msra.mxu1 %v15136_v11  ;;  %v15198_v11 = vld [vmem:[#allocation7 + $0x198] sm:$0xff]  ;;  %16254 = vst [vmem:[#allocation70_spill] sm:$0xff] %v15204_v47 }
 0xa78   :  { %7257 = vmatprep.subr.mxu1 %v15139_v51  ;;  %v15192_v51 = vld [vmem:[#allocation7 + $0x1a0] sm:$0xff]  ;;  %16253 = vst [vmem:[#allocation69_spill] sm:$0xff] %v15198_v11 }
 0xa79   :  { %7258 = vmatpush2.msra.mxu1 %v15142_v19  ;;  %v15186_v19 = vld [vmem:[#allocation7 + $0x1b0] sm:$0xff]  ;;  %16252 = vst [vmem:[#allocation68_spill] sm:$0xff] %v15192_v51 }
 0xa7a   :  { %7259 = vmatprep.subr.mxu1 %v15145_v57  ;;  %v15180_v57 = vld [vmem:[#allocation7 + $0x1b8] sm:$0xff]  ;;  %16251 = vst [vmem:[#allocation67_spill] sm:$0xff] %v15186_v19 }
 0xa7b   :  { %7260 = vmatpush2.msra.mxu1 %v15148_v59  ;;  %v15174_v59 = vld [vmem:[#allocation7 + $0x1c8] sm:$0xff]  ;;  %16250 = vst [vmem:[#allocation66_spill] sm:$0xff] %v15180_v57 }
 0xa7c   :  { %7261 = vmatprep.subr.mxu1 %v15151_v4  ;;  %16249 = vst [vmem:[#allocation65_spill] sm:$0xff] %v15174_v59  ;;  %v15177_v4 = vld [vmem:[#allocation7 + $0x450] sm:$0xff] }
 0xa7d   :  { %7262 = vmatpush2.msra.mxu1 %v15154_v43  ;;  %7283 = vmatpush1.msra.mxu0 %v15177_v4  ;;  %v15183_v43 = vld [vmem:[#allocation7 + $0x440] sm:$0xff] }
 0xa7e   :  { %7263 = vmatprep.subr.mxu1 %v15157_v42  ;;  %7284 = vmatprep.subr.mxu0 %v15183_v43  ;;  %v15189_v42 = vld [vmem:[#allocation7 + $0x438] sm:$0xff] }
 0xa7f   :  { %7264 = vmatpush2.msra.mxu1 %v15162_v49  ;;  %7285 = vmatpush1.msra.mxu0 %v15189_v42  ;;  %v15195_v49 = vld [vmem:[#allocation7 + $0x428] sm:$0xff] }
 0xa80   :  { %7265 = vmatprep.subr.mxu1 %v15168_v37  ;;  %7286 = vmatprep.subr.mxu0 %v15195_v49  ;;  %v15201_v37 = vld [vmem:[#allocation7 + $0x420] sm:$0xff] }
 0xa81   :  { %7266 = vmatpush2.msra.mxu1 %v15174_v59  ;;  %7287 = vmatpush1.msra.mxu0 %v15201_v37  ;;  %v15207_v59 = vld [vmem:[#allocation7 + $0x410] sm:$0xff] }
 0xa82   :  { %7267 = vmatprep.subr.mxu1 %v15180_v57  ;;  %7288 = vmatprep.subr.mxu0 %v15207_v59  ;;  %v15213_v57 = vld [vmem:[#allocation7 + $0x408] sm:$0xff] }
 0xa83   :  { %7268 = vmatpush2.msra.mxu1 %v15186_v19  ;;  %7289 = vmatpush1.msra.mxu0 %v15213_v57  ;;  %v15221_v19 = vld [vmem:[#allocation7 + $0x3f0] sm:$0xff] }
 0xa84   :  { %7269 = vmatprep.subr.mxu1 %v15192_v51  ;;  %7290 = vmatprep.subr.mxu0 %v15217_v48  ;;  %v15225_v51 = vld [vmem:[#allocation7 + $0x3e0] sm:$0xff] }
 0xa85   :  { %7270 = vmatpush2.msra.mxu1 %v15198_v11  ;;  %7291 = vmatpush1.msra.mxu0 %v15221_v19  ;;  %v15229_v11 = vld [vmem:[#allocation7 + $0x3d8] sm:$0xff] }
 0xa86   :  { %7271 = vmatprep.subr.mxu1 %v15204_v47  ;;  %7292 = vmatprep.subr.mxu0 %v15225_v51  ;;  %v15235_v47 = vld [vmem:[#allocation7 + $0x3c0] sm:$0xff] }
 0xa87   :  { %7272 = vmatpush2.msra.mxu1 %v15210_v44  ;;  %7293 = vmatpush1.msra.mxu0 %v15229_v11  ;;  %v15238_v44 = vld [vmem:[#allocation7 + $0x3b0] sm:$0xff] }
 0xa88   :  { %11933 = vmatprep.subr.mxu1 %v16121_v30  ;;  %7294 = vmatprep.subr.mxu0 %v15232_v29 }
 0xa89   :  { %7295 = vmatpush1.msra.mxu0 %v15235_v47 }
 0xa8a   :  { %7296 = vmatprep.subr.mxu0 %v15238_v44 }
 0xa8b   :  { %7297 = vmatpush1.msra.mxu0 %v15241_v46 }
 0xa8c   :  { %7298 = vmatprep.subr.mxu0 %v15244_v10 }
 0xa8d   :  { %7299 = vmatpush1.msra.mxu0 %v15247_v23 }
 0xa8e   :  { %7300 = vmatprep.subr.mxu0 %v15250_v45 }
 0xa8f   :  { %7301 = vmatpush1.msra.mxu0 %v15253_v54 }
 0xa90   :  { %7302 = vmatprep.subr.mxu0 %v15256_v25 }
 0xa91   :  { %7303 = vmatpush1.msra.mxu0 %v15259_v27 }
 0xa92   :  { %7304 = vmatprep.subr.mxu0 %v15262_v28 }
 0xa93   :  { %7305 = vmatpush1.msra.mxu0 %v15265_v36 }
 0xa94   :  { %7306 = vmatprep.subr.mxu0 %v15268_v39 }
 0xa95   :  { %7307 = vmatpush1.msra.mxu0 %v15271_v32 }
 0xa96   :  { %7308 = vmatprep.subr.mxu0 %v15274_v8 }
 0xa97   :  { %7309 = vmatpush1.msra.mxu0 %v15277_v55 }
 0xa98   :  { %7310 = vmatprep.subr.mxu0 %v15280_v56 }
 0xa99   :  { %7311 = vmatpush1.msra.mxu0 %v15283_v35 }
 0xa9a   :  { %11407 = vmatprep.subr.mxu0 %v15286_v17 }
 0xae7   :  { %v6895_v50 = vpop.f32.mrf.mxu0 }
 0xae8   :  { %v6936_v20 = vpop.f32.mrf.mxu1 }
 0xae9   :  { %v6937_v5 = vadd.f32 %v6936_v20, %v6895_v50  ;;  %v6897_v7 = vpop.f32.mrf.mxu0 }
 0xaea   :  { %v6938_v63 = vpop.f32.mrf.mxu1 }
 0xaeb   :  { %v15290_v41 = vadd.f32 %v6937_v5, %v14973_v53  ;;  %v6939_v62 = vadd.f32 %v6938_v63, %v6897_v7  ;;  %v6899_v40 = vpop.f32.mrf.mxu0 }
 0xaec   :  { %v6940_v33 = vpop.f32.mrf.mxu1 }
 0xaed   :  { %v7026_v12 = vrot.slane %v15290_v41, 4  ;;  %v15294_v2 = vadd.f32 %v6939_v62, %v14975_v1  ;;  %v6900_v3 = vpop.f32.mrf.mxu0  ;;  %v15303_v1 = vld [vmem:[#allocation7 + $0x478] sm:$0xff] }
 0xaee   :  { %v6941_v9 = vpop.f32.mrf.mxu1  ;;  %16257 = vst [vmem:[#allocation73_spill] sm:$0xff] %v15303_v1  ;;  %v15325_v3 = vld [vmem:[#allocation7 + $0x400] sm:$0xff] }
 0xaef   :  { %16256 = vst [vmem:[#allocation72_spill] sm:$0xff] %v15294_v2  ;;  %v7027_v34 = vadd.f32 %v7026_v12, %v15290_v41  ;;  %v7032_v58 = vrot.slane %v15294_v2, 4  ;;  %v15307_v9 = vld [vmem:[#allocation7 + $0x460] sm:$0xff]  ;;  %16262 = vst [vmem:[#allocation82_spill] sm:$0xff] %v15325_v3  ;;  %v15329_v12 = vld [vmem:[#allocation7 + $0x3e8] sm:$0xff] }
 0xaf0   :  { %16258 = vst [vmem:[#allocation74_spill] sm:$0xff] %v15307_v9  ;;  %16263 = vst [vmem:[#allocation83_spill] sm:$0xff] %v15329_v12 }
 0xaf1   :  { %v7033_v20 = vadd.f32 %v7032_v58, %v15294_v2  ;;  %v7028_v50 = vrot.slane %v7027_v34, 2  ;;  %v15317_v58 = vld [vmem:[#allocation7 + $0x430] sm:$0xff] }
 0xaf2   :  { %16260 = vst [vmem:[#allocation80_spill] sm:$0xff] %v15317_v58 }
 0xaf3   :  { %v7034_v13 = vrot.slane %v7033_v20, 2  ;;  %v7029_v53 = vadd.f32 %v7028_v50, %v7027_v34  ;;  %v15321_v34 = vld [vmem:[#allocation7 + $0x418] sm:$0xff]  ;;  %v15333_v50 = vld [vmem:[#allocation7 + $0x3d0] sm:$0xff] }
 0xaf4   :  { %16261 = vst [vmem:[#allocation81_spill] sm:$0xff] %v15321_v34 }
 0xaf5   :  { %v7035_v5 = vadd.f32 %v7034_v13, %v7033_v20  ;;  %v7030_v63 = vrot.slane %v7029_v53, 1  ;;  %v15313_v13 = vld [vmem:[#allocation7 + $0x448] sm:$0xff] }
 0xaf6   :  { %16259 = vst [vmem:[#allocation77_spill] sm:$0xff] %v15313_v13 }
 0xaf7   :  { %v7036_v40 = vrot.slane %v7035_v5, 1  ;;  %v15301_v7 = vadd.f32 %v7030_v63, %v7029_v53  ;;  %v15337_v63 = vld [vmem:[#allocation7 + $0x3b8] sm:$0xff] }
 0xaf9   :  { %v15299_v33 = vadd.f32 %v7036_v40, %v7035_v5 }
 0xafb   :  { %7273 = vmatprep.mubr.f32.mxu1 %v15299_v33 }
 0xafc   :  { %7274 = vmatmul.mubr.f32.vlgmr.msra.gmra.mxu1 %v15301_v7 }
 0xafd   :  { %11934 = vmatpush3.msra.mxu1 %v15303_v1  ;;  %11965 = vmatprep.mubr.msk.f32.mxu1 %vm13081_vm1, %v16121_v30 }
 0xafe   :  { %11935 = vmatprep.subr.mxu1 %v16121_v30 }
 0xaff   :  { %11936 = vmatpush3.msra.mxu1 %v15307_v9 }
 0xb00   :  { %11937 = vmatprep.subr.mxu1 %v16121_v30 }
 0xb01   :  { %11938 = vmatpush3.msra.mxu1 %v15313_v13 }
 0xb02   :  { %11939 = vmatprep.subr.mxu1 %v16121_v30 }
 0xb03   :  { %11940 = vmatpush3.msra.mxu1 %v15317_v58 }
 0xb04   :  { %11941 = vmatprep.subr.mxu1 %v16121_v30 }
 0xb05   :  { %11942 = vmatpush3.msra.mxu1 %v15321_v34 }
 0xb06   :  { %11943 = vmatprep.subr.mxu1 %v16121_v30 }
 0xb07   :  { %v7017_v62 = vpop.f32.mrf.mxu0  ;;  %11944 = vmatpush3.msra.mxu1 %v15325_v3  ;;  %v15341_v3 = vld [vmem:[#allocation7 + $0x3a0] sm:$0xff] }
 0xb08   :  { %v11392_v20 = vpop.f32.mrf.mxu1  ;;  %11945 = vmatprep.subr.mxu1 %v16121_v30 }
 0xb09   :  { %v11931_v53 = vpop.f32.mrf.mxu0  ;;  %11946 = vmatpush3.msra.mxu1 %v15329_v12  ;;  %v15345_v12 = vld [vmem:[#allocation7 + $0x388] sm:$0xff] }
 0xb0a   :  { %v11393_v5 = vpop.f32.mrf.mxu1  ;;  %11947 = vmatprep.subr.mxu1 %v16121_v30 }
 0xb0b   :  { %v11394_v40 = vadd.f32 %v11393_v5, %v11392_v20  ;;  %v7020_v34 = vpop.f32.mrf.mxu0  ;;  %11948 = vmatpush3.msra.mxu1 %v15333_v50  ;;  %v15366_v20 = vld [vmem:[#allocation7 + $0x328] sm:$0xff] }
 0xb0c   :  { %v11395_v58 = vpop.f32.mrf.mxu1  ;;  %11949 = vmatprep.subr.mxu1 %v16121_v30  ;;  %16267 = vst [vmem:[#allocation79_spill] sm:$0xff] %v15366_v20 }
 0xb0d   :  { %v7018_v13 = vadd.f32 %v11394_v40, %v7017_v62  ;;  %v11932_v9 = vpop.f32.mrf.mxu0  ;;  %11950 = vmatpush3.msra.mxu1 %v15337_v63  ;;  %v15352_v58 = vld [vmem:[#allocation7 + $0x370] sm:$0xff] }
 0xb0e   :  { %v11396_v53 = vpop.f32.mrf.mxu1  ;;  %11951 = vmatprep.subr.mxu1 %v16121_v30  ;;  %16265 = vst [vmem:[#allocation76_spill] sm:$0xff] %v15352_v58  ;;  %v15357_v9 = vld [vmem:[#allocation7 + $0x358] sm:$0xff]  ;;  %v15370_v40 = vld [vmem:[#allocation7 + $0x310] sm:$0xff] }
 0xb0f   :  { %v15348_v1 = vadd.f32 %v7018_v13, %v14990_v52  ;;  %11952 = vmatpush3.msra.mxu1 %v15341_v3  ;;  %16266 = vst [vmem:[#allocation78_spill] sm:$0xff] %v15357_v9  ;;  %v15362_v52 = vld [vmem:[#allocation7 + $0x340] sm:$0xff]  ;;  %16268 = vst [vmem:[#allocation84_spill] sm:$0xff] %v15370_v40 }
 0xb10   :  { %11953 = vmatprep.subr.mxu1 %v16121_v30 }
 0xb11   :  { %16264 = vst [vmem:[#allocation75_spill] sm:$0xff] %v15348_v1  ;;  %v7038_v34 = vrot.slane %v15348_v1, 4  ;;  %11954 = vmatpush3.msra.mxu1 %v15345_v12 }
 0xb12   :  { %11955 = vmatprep.subr.mxu1 %v16121_v30 }
 0xb13   :  { %11956 = vmatpush3.msra.mxu1 %v15352_v58  ;;  %v7039_v62 = vadd.f32 %v7038_v34, %v15348_v1  ;;  %v15378_v58 = vld [vmem:[#allocation7 + $0x2e0] sm:$0xff] }
 0xb14   :  { %11957 = vmatprep.subr.mxu1 %v16121_v30 }
 0xb15   :  { %11958 = vmatpush3.msra.mxu1 %v15357_v9  ;;  %v7040_v13 = vrot.slane %v7039_v62, 2  ;;  %v15375_v9 = vld [vmem:[#allocation7 + $0x178] sm:$0xff] }
 0xb16   :  { %11959 = vmatprep.subr.mxu1 %v16121_v30 }
 0xb17   :  { %11960 = vmatpush3.msra.mxu1 %v15362_v52  ;;  %v7041_v5 = vadd.f32 %v7040_v13, %v7039_v62  ;;  %v15380_v62 = vld [vmem:[#allocation7 + $0x160] sm:$0xff]  ;;  %v15384_v13 = vld [vmem:[#allocation7 + $0x2c8] sm:$0xff] }
 0xb18   :  { %11961 = vmatprep.subr.mxu1 %v16121_v30 }
 0xb19   :  { %11962 = vmatpush3.msra.mxu1 %v15366_v20  ;;  %v7042_v53 = vrot.slane %v7041_v5, 1 }
 0xb1a   :  { %11963 = vmatprep.subr.mxu1 %v16121_v30 }
 0xb1b   :  { %11964 = vmatpush3.msra.mxu1 %v15370_v40  ;;  %v7043_v34 = vadd.f32 %v7042_v53, %v7041_v5  ;;  %v15388_v5 = vld [vmem:[#allocation7 + $0x148] sm:$0xff]  ;;  %v15396_v53 = vld [vmem:[#allocation7 + $0x130] sm:$0xff] }
 0xb1c   :  { %7562 = vmatprep.subr.mxu1 %v15159_v38  ;;  %v15392_v38 = vld [vmem:[#allocation7 + $0x2b0] sm:$0xff] }
 0xb1d   :  { %7345 = vmatmul.mubr.f32.vlgmr.msra.gmra.mxu0 %v7043_v34  ;;  %11966 = vmatmul.mubr.f32.vlgmr.msra.gmra.mxu1 %v7043_v34  ;;  %v15424_v34 = vld [vmem:[#allocation7 + $0xe8] sm:$0xff] }
 0xb1e   :  { %11408 = vmatpush3.msra.mxu0 %v15375_v9  ;;  %7563 = vmatpush1.msra.mxu1 %v15165_v21  ;;  %v15400_v21 = vld [vmem:[#allocation7 + $0x298] sm:$0xff] }
 0xb1f   :  { %11409 = vmatprep.subr.mxu0 %v15378_v58  ;;  %7415 = vmatprep.mubr.f32.mxu0 %v15299_v33  ;;  %v7046_v33 = vmul.f32 %v15348_v1, %v15348_v1 }
 0xb20   :  { %7564 = vmatprep.subr.mxu1 %v15171_v18  ;;  %11410 = vmatpush3.msra.mxu0 %v15380_v62  ;;  %v15404_v18 = vld [vmem:[#allocation7 + $0x118] sm:$0xff] }
 0xb21   :  { %7565 = vmatpush1.msra.mxu1 %v15177_v4  ;;  %11411 = vmatprep.subr.mxu0 %v15384_v13  ;;  %v15408_v4 = vld [vmem:[#allocation7 + $0x280] sm:$0xff]  ;;  %v7059_v1 = vrot.slane %v7046_v33, 4 }
 0xb22   :  { %7566 = vmatprep.subr.mxu1 %v15183_v43  ;;  %11412 = vmatpush3.msra.mxu0 %v15388_v5  ;;  %v15414_v43 = vld [vmem:[#allocation7 + $0x100] sm:$0xff] }
 0xb23   :  { %7567 = vmatpush1.msra.mxu1 %v15189_v42  ;;  %11413 = vmatprep.subr.mxu0 %v15392_v38  ;;  %v15418_v42 = vld [vmem:[#allocation7 + $0x268] sm:$0xff]  ;;  %v7060_v40 = vadd.f32 %v7059_v1, %v7046_v33 }
 0xb24   :  { %7568 = vmatprep.subr.mxu1 %v15195_v49  ;;  %11414 = vmatpush3.msra.mxu0 %v15396_v53  ;;  %v7045_v49 = vmul.f32 %v15294_v2, %v15294_v2 }
 0xb25   :  { %7569 = vmatpush1.msra.mxu1 %v15201_v37  ;;  %11415 = vmatprep.subr.mxu0 %v15400_v21  ;;  %v15428_v37 = vld [vmem:[#allocation7 + $0x250] sm:$0xff]  ;;  %v7061_v1 = vrot.slane %v7060_v40, 2 }
 0xb26   :  { %7570 = vmatprep.subr.mxu1 %v15207_v59  ;;  %11416 = vmatpush3.msra.mxu0 %v15404_v18  ;;  %v15432_v59 = vld [vmem:[#allocation7 + $0xd0] sm:$0xff]  ;;  %v7053_v2 = vrot.slane %v7045_v49, 4 }
 0xb27   :  { %7571 = vmatpush1.msra.mxu1 %v15213_v57  ;;  %11417 = vmatprep.subr.mxu0 %v15408_v4  ;;  %v15436_v57 = vld [vmem:[#allocation7 + $0x238] sm:$0xff]  ;;  %v7062_v33 = vadd.f32 %v7061_v1, %v7060_v40  ;;  %v16303_v1 = vld [vmem:[#allocation53_spill] sm:$0xff] }
 0xb28   :  { %7572 = vmatprep.subr.mxu1 %v15217_v48  ;;  %11418 = vmatpush3.msra.mxu0 %v15414_v43  ;;  %v15440_v48 = vld [vmem:[#allocation7 + $0xb8] sm:$0xff]  ;;  %v7054_v20 = vadd.f32 %v7053_v2, %v7045_v49 }
 0xb29   :  { %7573 = vmatpush1.msra.mxu1 %v15221_v19  ;;  %11419 = vmatprep.subr.mxu0 %v15418_v42  ;;  %v15444_v19 = vld [vmem:[#allocation7 + $0x220] sm:$0xff]  ;;  %v15468_v2 = vld [vmem:[#allocation7 + $0x1d8] sm:$0xff]  ;;  %v7063_v40 = vrot.slane %v7062_v33, 1 }
 0xb2a   :  { %7574 = vmatprep.subr.mxu1 %v15225_v51  ;;  %11420 = vmatpush3.msra.mxu0 %v15424_v34  ;;  %v15448_v51 = vld [vmem:[#allocation7 + $0xa0] sm:$0xff] }
 0xb2b   :  { %7575 = vmatpush1.msra.mxu1 %v15229_v11  ;;  %11421 = vmatprep.subr.mxu0 %v15428_v37  ;;  %v15452_v11 = vld [vmem:[#allocation7 + $0x208] sm:$0xff] }
 0xb2c   :  { %7576 = vmatprep.subr.mxu1 %v15232_v29  ;;  %11422 = vmatpush3.msra.mxu0 %v15432_v59  ;;  %v15456_v29 = vld [vmem:[#allocation7 + $0x88] sm:$0xff] }
 0xb2d   :  { %7577 = vmatpush1.msra.mxu1 %v15235_v47  ;;  %11423 = vmatprep.subr.mxu0 %v15436_v57  ;;  %v15460_v47 = vld [vmem:[#allocation7 + $0x1f0] sm:$0xff] }
 0xb2e   :  { %7578 = vmatprep.subr.mxu1 %v15238_v44  ;;  %11424 = vmatpush3.msra.mxu0 %v15440_v48  ;;  %v15464_v44 = vld [vmem:[#allocation7 + $0x70] sm:$0xff] }
 0xb2f   :  { %7579 = vmatpush1.msra.mxu1 %v15241_v46  ;;  %11425 = vmatprep.subr.mxu0 %v15444_v19  ;;  %v7055_v46 = vrot.slane %v7054_v20, 2 }
 0xb30   :  { %7580 = vmatprep.subr.mxu1 %v15244_v10  ;;  %11426 = vmatpush3.msra.mxu0 %v15448_v51  ;;  %v15472_v10 = vld [vmem:[#allocation7 + $0x58] sm:$0xff] }
 0xb31   :  { %7581 = vmatpush1.msra.mxu1 %v15247_v23  ;;  %11427 = vmatprep.subr.mxu0 %v15452_v11  ;;  %v15476_v23 = vld [vmem:[#allocation7 + $0x1c0] sm:$0xff]  ;;  %v7056_v49 = vadd.f32 %v7055_v46, %v7054_v20  ;;  %v16283_v20 = vld [vmem:[#allocation33_spill] sm:$0xff]  ;;  %v16305_v46 = vld [vmem:[#allocation55_spill] sm:$0xff] }
 0xb32   :  { %7582 = vmatprep.subr.mxu1 %v15250_v45  ;;  %11428 = vmatpush3.msra.mxu0 %v15456_v29  ;;  %v15480_v45 = vld [vmem:[#allocation7 + $0x40] sm:$0xff] }
 0xb33   :  { %7583 = vmatpush1.msra.mxu1 %v15253_v54  ;;  %11429 = vmatprep.subr.mxu0 %v15460_v47  ;;  %v15484_v54 = vld [vmem:[#allocation7 + $0x1a8] sm:$0xff] }
 0xb34   :  { %7584 = vmatprep.subr.mxu1 %v15256_v25  ;;  %11430 = vmatpush3.msra.mxu0 %v15464_v44  ;;  %v15488_v25 = vld [vmem:[#allocation7 + $0x28] sm:$0xff] }
 0xb35   :  { %7585 = vmatpush1.msra.mxu1 %v15259_v27  ;;  %11431 = vmatprep.subr.mxu0 %v15468_v2  ;;  %v15492_v27 = vld [vmem:[#allocation7 + $0x190] sm:$0xff] }
 0xb36   :  { %7586 = vmatprep.subr.mxu1 %v15262_v28  ;;  %11432 = vmatpush3.msra.mxu0 %v15472_v10  ;;  %v15496_v28 = vld [vmem:[#allocation7 + $0x10] sm:$0xff] }
 0xb37   :  { %7587 = vmatpush1.msra.mxu1 %v15265_v36  ;;  %11433 = vmatprep.subr.mxu0 %v15476_v23  ;;  %v7057_v36 = vrot.slane %v7056_v49, 1 }
 0xb38   :  { %7588 = vmatprep.subr.mxu1 %v15268_v39  ;;  %11434 = vmatpush3.msra.mxu0 %v15480_v45  ;;  %v16280_v39 = vld [vmem:[#allocation30_spill] sm:$0xff] }
 0xb39   :  { %7589 = vmatpush1.msra.mxu1 %v15271_v32  ;;  %11435 = vmatprep.subr.mxu0 %v15484_v54  ;;  %v15506_v32 = vadd.f32 %v7063_v40, %v7062_v33  ;;  %v16309_v33 = vld [vmem:[#allocation59_spill] sm:$0xff]  ;;  %v16315_v40 = vld [vmem:[#allocation65_spill] sm:$0xff] }
 0xb3a   :  { %7590 = vmatprep.subr.mxu1 %v15274_v8  ;;  %11436 = vmatpush3.msra.mxu0 %v15488_v25  ;;  %v7058_v8 = vadd.f32 %v7057_v36, %v7056_v49  ;;  %v16311_v49 = vld [vmem:[#allocation61_spill] sm:$0xff]  ;;  %v16316_v36 = vld [vmem:[#allocation66_spill] sm:$0xff] }
 0xb3b   :  { %7591 = vmatpush1.msra.mxu1 %v15277_v55  ;;  %11437 = vmatprep.subr.mxu0 %v15492_v27  ;;  %v16279_v55 = vld [vmem:[#allocation29_spill] sm:$0xff] }
 0xb3c   :  { %7592 = vmatprep.subr.mxu1 %v15280_v56  ;;  %11438 = vmatpush3.msra.mxu0 %v15496_v28  ;;  %v16278_v56 = vld [vmem:[#allocation28_spill] sm:$0xff] }
 0xb3d   :  { %7593 = vmatpush1.msra.mxu1 %v15283_v35  ;;  %7626 = vmatprep.mubr.f32.mxu1 %v16121_v30  ;;  %v16277_v35 = vld [vmem:[#allocation27_spill] sm:$0xff] }
 0xb3e   :  { %7416 = vmatmul.mubr.f32.vlgmr.msra.gmra.mxu0 %v15301_v7  ;;  %7491 = vmatprep.subr.mxu0 %v14994_v26  ;;  %v7044_v26 = vmul.f32 %v15290_v41, %v15290_v41 }
 0xb3f   :  { %7627 = vmatmul.mubr.f32.vlgmr.msra.gmra.mxu1 %v15506_v32  ;;  %11459 = vmatprep.subr.mxu1 %v15286_v17 }
 0xb40   :  { %7492 = vmatpush1.msra.mxu0 %v14997_v6  ;;  %7555 = vmatprep.mubr.f32.mxu0 %v7058_v8  ;;  %v7047_v6 = vrot.slane %v7044_v26, 4 }
 0xb41   :  { %11460 = vmatpush3.msra.mxu1 %v15375_v9  ;;  %7697 = vmatprep.mubr.f32.mxu1 %v7058_v8  ;;  %v16282_v9 = vld [vmem:[#allocation32_spill] sm:$0xff]  ;;  %v16317_v8 = vld [vmem:[#allocation67_spill] sm:$0xff] }
 0xb42   :  { %7493 = vmatprep.subr.mxu0 %v15000_v15  ;;  %11461 = vmatprep.subr.mxu1 %v15378_v58  ;;  %v16269_v15 = vld [vmem:[#allocation19_spill] sm:$0xff] }
 0xb43   :  { %7494 = vmatpush1.msra.mxu0 %v15003_v60  ;;  %11462 = vmatpush3.msra.mxu1 %v15380_v62  ;;  %v16270_v60 = vld [vmem:[#allocation20_spill] sm:$0xff]  ;;  %v16281_v58 = vld [vmem:[#allocation31_spill] sm:$0xff]  ;;  %v16284_v62 = vld [vmem:[#allocation34_spill] sm:$0xff] }
 0xb44   :  { %7495 = vmatprep.subr.mxu0 %v15007_v61  ;;  %11463 = vmatprep.subr.mxu1 %v15384_v13  ;;  %v16271_v61 = vld [vmem:[#allocation21_spill] sm:$0xff] }
 0xb45   :  { %7496 = vmatpush1.msra.mxu0 %v15010_v14  ;;  %11464 = vmatpush3.msra.mxu1 %v15388_v5  ;;  %v16272_v14 = vld [vmem:[#allocation22_spill] sm:$0xff]  ;;  %v16285_v5 = vld [vmem:[#allocation35_spill] sm:$0xff] }
 0xb46   :  { %7497 = vmatprep.subr.mxu0 %v15013_v31  ;;  %11465 = vmatprep.subr.mxu1 %v15392_v38  ;;  %v7048_v31 = vadd.f32 %v7047_v6, %v7044_v26  ;;  %v16286_v38 = vld [vmem:[#allocation36_spill] sm:$0xff]  ;;  %v16319_v6 = vld [vmem:[#allocation69_spill] sm:$0xff] }
 0xb47   :  { %7498 = vmatpush1.msra.mxu0 %v15016_v24  ;;  %11466 = vmatpush3.msra.mxu1 %v15396_v53  ;;  %v16273_v24 = vld [vmem:[#allocation23_spill] sm:$0xff]  ;;  %v16287_v53 = vld [vmem:[#allocation37_spill] sm:$0xff]  ;;  %v16318_v26 = vld [vmem:[#allocation68_spill] sm:$0xff] }
 0xb48   :  { %7499 = vmatprep.subr.mxu0 %v15019_v16  ;;  %11467 = vmatprep.subr.mxu1 %v15400_v21  ;;  %v16274_v16 = vld [vmem:[#allocation24_spill] sm:$0xff]  ;;  %v7049_v17 = vrot.slane %v7048_v31, 2  ;;  %v16288_v21 = vld [vmem:[#allocation38_spill] sm:$0xff] }
 0xb49   :  { %7500 = vmatpush1.msra.mxu0 %v15022_v22  ;;  %11468 = vmatpush3.msra.mxu1 %v15404_v18  ;;  %v16275_v22 = vld [vmem:[#allocation25_spill] sm:$0xff] }
 0xb4a   :  { %7501 = vmatprep.subr.mxu0 %v15025_v0  ;;  %11469 = vmatprep.subr.mxu1 %v15408_v4  ;;  %v16276_v0 = vld [vmem:[#allocation26_spill] sm:$0xff]  ;;  %v7050_v7 = vadd.f32 %v7049_v17, %v7048_v31  ;;  %v16289_v4 = vld [vmem:[#allocation39_spill] sm:$0xff]  ;;  %v16324_v31 = vld [vmem:[#allocation77_spill] sm:$0xff] }
 0xb4b   :  { %7502 = vmatpush1.msra.mxu0 %v16269_v15  ;;  %11470 = vmatpush3.msra.mxu1 %v15414_v43  ;;  %v16290_v43 = vld [vmem:[#allocation40_spill] sm:$0xff]  ;;  %v16320_v15 = vld [vmem:[#allocation70_spill] sm:$0xff] }
 0xb4c   :  { %7503 = vmatprep.subr.mxu0 %v16270_v60  ;;  %11471 = vmatprep.subr.mxu1 %v15418_v42  ;;  %v7051_v13 = vrot.slane %v7050_v7, 1  ;;  %v16291_v42 = vld [vmem:[#allocation41_spill] sm:$0xff]  ;;  %v16321_v60 = vld [vmem:[#allocation71_spill] sm:$0xff]  ;;  %v16329_v17 = vld [vmem:[#allocation76_spill] sm:$0xff] }
 0xb4d   :  { %7504 = vmatpush1.msra.mxu0 %v16271_v61  ;;  %11472 = vmatpush3.msra.mxu1 %v15424_v34  ;;  %v16292_v34 = vld [vmem:[#allocation42_spill] sm:$0xff]  ;;  %v16322_v61 = vld [vmem:[#allocation73_spill] sm:$0xff] }
 0xb4e   :  { %7505 = vmatprep.subr.mxu0 %v16272_v14  ;;  %11473 = vmatprep.subr.mxu1 %v15428_v37  ;;  %v7052_v18 = vadd.f32 %v7051_v13, %v7050_v7  ;;  %v16293_v37 = vld [vmem:[#allocation43_spill] sm:$0xff]  ;;  %v16323_v14 = vld [vmem:[#allocation74_spill] sm:$0xff] }
 0xb4f   :  { %7506 = vmatpush1.msra.mxu0 %v16273_v24  ;;  %11474 = vmatpush3.msra.mxu1 %v15432_v59  ;;  %v16294_v59 = vld [vmem:[#allocation44_spill] sm:$0xff]  ;;  %v12687_v7 = vld [vmem:[#allocation9 + $0x2f0] ss:$8 sps:$4 sm:$0xff]  }
 0xb50   :  { %7507 = vmatprep.subr.mxu0 %v16274_v16  ;;  %11475 = vmatprep.subr.mxu1 %v15436_v57  ;;  %v16295_v57 = vld [vmem:[#allocation45_spill] sm:$0xff]  ;;  %v16325_v24 = vld [vmem:[#allocation80_spill] sm:$0xff] }
 0xb51   :  { %7508 = vmatpush1.msra.mxu0 %v16275_v22  ;;  %11476 = vmatpush3.msra.mxu1 %v15440_v48  ;;  %v16296_v48 = vld [vmem:[#allocation46_spill] sm:$0xff]  ;;  %v16326_v16 = vld [vmem:[#allocation81_spill] sm:$0xff] }
 0xb52   :  { %7509 = vmatprep.subr.mxu0 %v16276_v0  ;;  %11477 = vmatprep.subr.mxu1 %v15444_v19  ;;  %v16297_v19 = vld [vmem:[#allocation47_spill] sm:$0xff]  ;;  %v16327_v22 = vld [vmem:[#allocation82_spill] sm:$0xff] }
 0xb53   :  { %7510 = vmatpush1.msra.mxu0 %v16277_v35  ;;  %11478 = vmatpush3.msra.mxu1 %v15448_v51  ;;  %v16298_v51 = vld [vmem:[#allocation48_spill] sm:$0xff]  ;;  %v16328_v0 = vld [vmem:[#allocation83_spill] sm:$0xff]  ;;  %v16330_v35 = vld [vmem:[#allocation78_spill] sm:$0xff] }
 0xb54   :  { %7511 = vmatprep.subr.mxu0 %v16278_v56  ;;  %11479 = vmatprep.subr.mxu1 %v15452_v11  ;;  %v16299_v11 = vld [vmem:[#allocation49_spill] sm:$0xff] }
 0xb55   :  { %7512 = vmatpush1.msra.mxu0 %v16279_v55  ;;  %11480 = vmatpush3.msra.mxu1 %v15456_v29  ;;  %v16300_v29 = vld [vmem:[#allocation50_spill] sm:$0xff] }
 0xb56   :  { %7513 = vmatprep.subr.mxu0 %v16280_v39  ;;  %11481 = vmatprep.subr.mxu1 %v15460_v47  ;;  %v16301_v47 = vld [vmem:[#allocation51_spill] sm:$0xff] }
 0xb57   :  { %7514 = vmatpush1.msra.mxu0 %v16281_v58  ;;  %11482 = vmatpush3.msra.mxu1 %v15464_v44  ;;  %v16302_v44 = vld [vmem:[#allocation52_spill] sm:$0xff]  ;;  %v12689_v58 = vld [vmem:[#allocation9 + $0x2f4] ss:$8 sps:$4 sm:$0xff]  }
 0xb58   :  { %7515 = vmatprep.subr.mxu0 %v16282_v9  ;;  %11483 = vmatprep.subr.mxu1 %v15468_v2  ;;  %v16304_v2 = vld [vmem:[#allocation54_spill] sm:$0xff]  ;;  %v12695_v9 = vld [vmem:[#allocation9 + $0x2e4] ss:$8 sps:$4 sm:$0xff]  }
 0xb59   :  { %7516 = vmatpush1.msra.mxu0 %v16283_v20  ;;  %11484 = vmatpush3.msra.mxu1 %v15472_v10  ;;  %v16306_v10 = vld [vmem:[#allocation56_spill] sm:$0xff]  ;;  %v12699_v20 = vld [vmem:[#allocation9 + $0x2d0] ss:$8 sps:$4 sm:$0xff]  }
 0xb5a   :  { %7517 = vmatprep.subr.mxu0 %v16284_v62  ;;  %11485 = vmatprep.subr.mxu1 %v15476_v23  ;;  %v16307_v23 = vld [vmem:[#allocation57_spill] sm:$0xff]  ;;  %v12701_v62 = vld [vmem:[#allocation9 + $0x2d4] ss:$8 sps:$4 sm:$0xff]  }
 0xb5b   :  { %7518 = vmatpush1.msra.mxu0 %v16285_v5  ;;  %11486 = vmatpush3.msra.mxu1 %v15480_v45  ;;  %v16308_v45 = vld [vmem:[#allocation58_spill] sm:$0xff]  ;;  %v12707_v5 = vld [vmem:[#allocation9 + $0x2c4] ss:$8 sps:$4 sm:$0xff]  }
 0xb5c   :  { %7519 = vmatprep.subr.mxu0 %v16286_v38  ;;  %11487 = vmatprep.subr.mxu1 %v15484_v54  ;;  %v16310_v54 = vld [vmem:[#allocation60_spill] sm:$0xff] }
 0xb5d   :  { %7520 = vmatpush1.msra.mxu0 %v16287_v53  ;;  %11488 = vmatpush3.msra.mxu1 %v15488_v25  ;;  %v16312_v25 = vld [vmem:[#allocation62_spill] sm:$0xff] }
 0xb5e   :  { %7521 = vmatprep.subr.mxu0 %v16288_v21  ;;  %11489 = vmatprep.subr.mxu1 %v15492_v27  ;;  %v16313_v27 = vld [vmem:[#allocation63_spill] sm:$0xff] }
 0xb5f   :  { %7522 = vmatpush1.msra.mxu0 %v16289_v4  ;;  %11490 = vmatpush3.msra.mxu1 %v15496_v28  ;;  %v16314_v28 = vld [vmem:[#allocation64_spill] sm:$0xff]  ;;  %v12711_v21 = vld [vmem:[#allocation9 + $0x2b0] ss:$8 sps:$4 sm:$0xff]  }
 0xb60   :  { %7523 = vmatprep.subr.mxu0 %v16290_v43  ;;  %7698 = vmatmul.mubr.f32.vlgmr.msra.gmra.mxu1 %v7052_v18 }
 0xb61   :  { %7524 = vmatpush2.msra.mxu0 %v16291_v42  ;;  %7933 = vmatprep.mubr.f32.mxu1 %v16121_v30 }
 0xb62   :  { %7525 = vmatprep.subr.mxu0 %v16292_v34 }
 0xb63   :  { %7526 = vmatpush2.msra.mxu0 %v16293_v37 }
 0xb64   :  { %7527 = vmatprep.subr.mxu0 %v16294_v59 }
 0xb65   :  { %7528 = vmatpush2.msra.mxu0 %v16295_v57 }
 0xb66   :  { %7529 = vmatprep.subr.mxu0 %v16296_v48 }
 0xb67   :  { %7530 = vmatpush2.msra.mxu0 %v16297_v19 }
 0xb68   :  { %7531 = vmatprep.subr.mxu0 %v16298_v51 }
 0xb69   :  { %7532 = vmatpush2.msra.mxu0 %v16299_v11 }
 0xb6a   :  { %7533 = vmatprep.subr.mxu0 %v16300_v29 }
 0xb6b   :  { %7534 = vmatpush2.msra.mxu0 %v16301_v47 }
 0xb6c   :  { %7535 = vmatprep.subr.mxu0 %v16302_v44 }
 0xb6d   :  { %7536 = vmatpush2.msra.mxu0 %v16303_v1 }
 0xb6e   :  { %7537 = vmatprep.subr.mxu0 %v16304_v2  ;;  %v16334_v2 = vld [vmem:[#allocation16_spill] sm:$0xff] }
 0xb6f   :  { %7538 = vmatpush2.msra.mxu0 %v16305_v46 }
 0xb70   :  { %7539 = vmatprep.subr.mxu0 %v16306_v10  ;;  %v7815_v10 = vld [vmem:[%s15890_s11] sm:$0x7] }
 0xb71   :  { %7540 = vmatpush2.msra.mxu0 %v16307_v23 }
 0xb72   :  { %7541 = vmatprep.subr.mxu0 %v16308_v45 }
 0xb73   :  { %7542 = vmatpush2.msra.mxu0 %v16309_v33  ;;  %v7835_v33 = vld [vmem:[%s15891_s12] sm:$0x7] }
 0xb74   :  { %7543 = vmatprep.subr.mxu0 %v16310_v54 }
 0xb75   :  { %7544 = vmatpush2.msra.mxu0 %v16311_v49 }
 0xb76   :  { %7545 = vmatprep.subr.mxu0 %v16312_v25  ;;  %v7820_v25 = vrot.slane %v7815_v10, %v16334_v2 }
 0xb77   :  { %7546 = vmatpush2.msra.mxu0 %v16313_v27 }
 0xb78   :  { %7547 = vmatprep.subr.mxu0 %v16314_v28  ;;  %v16335_v28 = vld [vmem:[#allocation17_spill] sm:$0xff] }
 0xb79   :  { %7548 = vmatpush2.msra.mxu0 %v16315_v40  ;;  %v7824_v40 = vrot.slane %v7815_v10, %v16335_v28 }
 0xb7a   :  { %7549 = vmatprep.subr.mxu0 %v16316_v36  ;;  %v16336_v36 = vld [vmem:[#allocation72_spill] sm:$0xff] }
 0xb7b   :  { %7550 = vmatpush2.msra.mxu0 %v16317_v8 }
 0xb7c   :  { %7551 = vmatprep.subr.mxu0 %v16318_v26 }
 0xb7d   :  { %7552 = vmatpush2.msra.mxu0 %v16319_v6 }
 0xb7e   :  { %7553 = vmatprep.subr.mxu0 %v16320_v15  ;;  %v7840_v15 = vrot.slane %v7835_v33, %v16334_v2 }
 0xb7f   :  { %7554 = vmatpush2.msra.mxu0 %v16321_v60 }
 0xb80   :  { %7556 = vmatmul.mubr.f32.vlgmr.msra.gmra.mxu0 %v7052_v18  ;;  %11968 = vmatprep.subr.mxu0 %v16121_v30  ;;  %v12713_v18 = vld [vmem:[#allocation9 + $0x2b4] ss:$8 sps:$4 sm:$0xff]  }
 0xb81   :  { %11969 = vmatpush3.msra.mxu0 %v16322_v61  ;;  %12000 = vmatprep.mubr.msk.f32.mxu0 %vm13081_vm1, %v16121_v30 }
 0xb82   :  { %11970 = vmatprep.subr.mxu0 %v16121_v30 }
 0xb83   :  { %11971 = vmatpush3.msra.mxu0 %v16323_v14 }
 0xb84   :  { %11972 = vmatprep.subr.mxu0 %v16121_v30 }
 0xb85   :  { %11973 = vmatpush3.msra.mxu0 %v16324_v31  ;;  %v7844_v31 = vrot.slane %v7835_v33, %v16335_v28 }
 0xb86   :  { %11974 = vmatprep.subr.mxu0 %v16121_v30 }
 0xb87   :  { %11975 = vmatpush3.msra.mxu0 %v16325_v24 }
 0xb88   :  { %11976 = vmatprep.subr.mxu0 %v16121_v30 }
 0xb89   :  { %11977 = vmatpush3.msra.mxu0 %v16326_v16 }
 0xb8a   :  { %11978 = vmatprep.subr.mxu0 %v16121_v30 }
 0xb8b   :  { %11979 = vmatpush3.msra.mxu0 %v16327_v22 }
 0xb8c   :  { %11980 = vmatprep.subr.mxu0 %v16121_v30 }
 0xb8d   :  { %11981 = vmatpush3.msra.mxu0 %v16328_v0 }
 0xb8e   :  { %11982 = vmatprep.subr.mxu0 %v16121_v30 }
 0xb8f   :  { %11983 = vmatpush3.msra.mxu0 %v15333_v50  ;;  %v16331_v50 = vld [vmem:[#allocation79_spill] sm:$0xff] }
 0xb90   :  { %11984 = vmatprep.subr.mxu0 %v16121_v30 }
 0xb91   :  { %11985 = vmatpush3.msra.mxu0 %v15337_v63 }
 0xb92   :  { %11986 = vmatprep.subr.mxu0 %v16121_v30 }
 0xb93   :  { %11987 = vmatpush3.msra.mxu0 %v15341_v3  ;;  %v16332_v3 = vld [vmem:[#allocation84_spill] sm:$0xff] }
 0xb94   :  { %11988 = vmatprep.subr.mxu0 %v16121_v30 }
 0xb95   :  { %11989 = vmatpush3.msra.mxu0 %v15345_v12  ;;  %v16333_v12 = vmov 0  }
 0xb96   :  { %11990 = vmatprep.subr.mxu0 %v16121_v30 }
 0xb97   :  { %11991 = vmatpush3.msra.mxu0 %v16329_v17 }
 0xb98   :  { %11992 = vmatprep.subr.mxu0 %v16121_v30 }
 0xb99   :  { %11993 = vmatpush3.msra.mxu0 %v16330_v35 }
 0xb9a   :  { %11994 = vmatprep.subr.mxu0 %v16121_v30 }
 0xb9b   :  { %11995 = vmatpush3.msra.mxu0 %v15362_v52  ;;  %v12693_v52 = vld [vmem:[#allocation9 + $0x2e0] ss:$8 sps:$4 sm:$0xff]  }
 0xb9c   :  { %11996 = vmatprep.subr.mxu0 %v16121_v30 }
 0xb9d   :  { %11997 = vmatpush3.msra.mxu0 %v16331_v50 }
 0xb9e   :  { %11998 = vmatprep.subr.mxu0 %v16121_v30 }
 0xb9f   :  { %11999 = vmatpush3.msra.mxu0 %v16332_v3 }
 0xba0   :  { %12001 = vmatmul.mubr.f32.vlgmr.msra.gmra.mxu0 %v15506_v32  ;;  %8540 = vmatprep.subr.bf16.mxu0 %v12689_v58  ;;  %v12705_v32 = vld [vmem:[#allocation9 + $0x2c0] ss:$8 sps:$4 sm:$0xff]  }
 0xba1   :  { %8572 = vmatprep.mubr.bf16.mxu0 %v16333_v12  ;;  %8541 = vmatpush1.bf16.msra.mxu0 %v12687_v7  ;;  %v7864_v58 = vld [vmem:[%s15892_s13] sm:$0xf] }
 0xba2   :  { %8542 = vmatprep.subr.bf16.mxu0 %v12695_v9 }
 0xba5   :  { %8543 = vmatpush1.bf16.msra.mxu0 %v12693_v52 }
 0xba6   :  { %8544 = vmatprep.subr.bf16.mxu0 %v12701_v62 }
 0xba9   :  { %8545 = vmatpush1.bf16.msra.mxu0 %v12699_v20 }
 0xbaa   :  { %8546 = vmatprep.subr.bf16.mxu0 %v12707_v5 }
 0xbad   :  { %8547 = vmatpush1.bf16.msra.mxu0 %v12705_v32  ;;  %v16337_v32 = vld [vmem:[#allocation75_spill] sm:$0xff] }
 0xbae   :  { %8548 = vmatprep.subr.bf16.mxu0 %v12713_v18 }
 0xbb1   :  { %8549 = vmatpush1.bf16.msra.mxu0 %v12711_v21 }
 0xbbc   :  { %v7275_v63 = vpop.f32.mrf.mxu1 }
 0xbbe   :  { %v7277_v56 = vpop.f32.mrf.mxu1 }
 0xbdd   :  { %v15645_v55 = vpop.f32.mrf.mxu1  ;;  %v7346_v13 = vpop.f32.mrf.mxu0 }
 0xbde   :  { %v7347_v4 = vadd.f32 %v7346_v13, %v7275_v63 }
 0xbdf   :  { %v11967_v39 = vpop.f32.mrf.mxu1  ;;  %v7348_v38 = vpop.f32.mrf.mxu0 }
 0xbe0   :  { %v7349_v34 = vadd.f32 %v7348_v38, %v7277_v56  ;;  %v7773_v59 = vmul.f32 %v7347_v4, %v7347_v4  ;;  %v7788_v46 = vrot.slane %v7347_v4, %v16334_v2 }
 0xbe2   :  { %v7774_v51 = vmul.f32 %v7349_v34, %v7349_v34  ;;  %v7792_v23 = vrot.slane %v7349_v34, %v16334_v2  ;;  %v7797_v54 = vsub.f32 %v15290_v41, %v7788_v46  ;;  %v12672_v46 = vld [vmem:[#allocation9 + $0x1b0] ss:$8 sps:$4 sm:$0xff]  }
 0xbe4   :  { %v7798_v8 = vsub.f32 %v16336_v36, %v7792_v23  ;;  %v12675_v23 = vld [vmem:[#allocation9 + $0x1a0] ss:$8 sps:$4 sm:$0xff]  }
 0xbe5   :  { %v12717_v36 = vld [vmem:[#allocation9 + $0x2a0] ss:$8 sps:$4 sm:$0xff]  }
 0xbfe   :  { %v11439_v53 = vpop.f32.mrf.mxu0 }
 0xbff   :  { %v7628_v43 = vpop.f32.mrf.mxu1 }
 0xc00   :  { %v11440_v42 = vpop.f32.mrf.mxu0 }
 0xc01   :  { %v7630_v48 = vpop.f32.mrf.mxu1  ;;  %v11441_v61 = vadd.f32 %v11440_v42, %v11439_v53  ;;  %v16338_v53 = vld [vmem:[#allocation18_spill] sm:$0xff] }
 0xc02   :  { %v7828_v21 = vrot.slane %v7815_v10, %v16338_v53  ;;  %v7848_v4 = vrot.slane %v7835_v33, %v16338_v53  ;;  %v12677_v10 = vld [vmem:[#allocation9 + $0x1a4] ss:$8 sps:$4 sm:$0xff]   ;;  %v12678_v33 = vld [vmem:[#allocation9 + $0x190] ss:$8 sps:$4 sm:$0xff]  }
 0xc03   :  { %v7488_v0 = vadd.f32 %v11441_v61, %v15645_v55  ;;  %v12702_v61 = vld [vmem:[#allocation9 + $0x240] ss:$8 sps:$4 sm:$0xff]  }
 0xc05   :  { %v7775_v39 = vmul.f32 %v7488_v0, %v7488_v0  ;;  %v7796_v62 = vrot.slane %v7488_v0, %v16334_v2  ;;  %v12725_v0 = vld [vmem:[#allocation9 + $0x294] ss:$8 sps:$4 sm:$0xff]  }
 0xc07   :  { %v7799_v5 = vsub.f32 %v16337_v32, %v7796_v62 }
 0xc20   :  { %v11491_v60 = vpop.f32.mrf.mxu1 }
 0xc22   :  { %v11492_v22 = vpop.f32.mrf.mxu1 }
 0xc23   :  { %v11493_v50 = vadd.f32 %v11492_v22, %v11491_v60  ;;  %v12704_v60 = vld [vmem:[#allocation9 + $0x244] ss:$8 sps:$4 sm:$0xff]   ;;  %v12720_v22 = vld [vmem:[#allocation9 + $0x210] ss:$8 sps:$4 sm:$0xff]  }
 0xc40   :  { %v7557_v37 = vpop.f32.mrf.mxu0 }
 0xc41   :  { %v7629_v57 = vadd.f32 %v7628_v43, %v7557_v37 }
 0xc42   :  { %v7559_v19 = vpop.f32.mrf.mxu0 }
 0xc43   :  { %v7776_v11 = vsub.f32 %v7629_v57, %v7773_v59  ;;  %v7631_v29 = vadd.f32 %v7630_v48, %v7559_v19  ;;  %v10801_v59 = vld [vmem:[%s15892_s13 + $0x4] sm:$0xf]  ;;  %v12662_v57 = vld [vmem:[#allocation9 + $0x1f4] ss:$8 sps:$4 sm:$0xff]   ;;  %v12660_v48 = vld [vmem:[#allocation9 + $0x1f0] ss:$8 sps:$4 sm:$0xff]  }
 0xc44   :  { %v12665_v19 = vld [vmem:[#allocation9 + $0x1e4] ss:$8 sps:$4 sm:$0xff]  }
 0xc45   :  { %v7779_v47 = vadd.f32 1e-05, %v7776_v11  ;;  %v7777_v44 = vsub.f32 %v7631_v29, %v7774_v51  ;;  %v12663_v51 = vld [vmem:[#allocation9 + $0x1e0] ss:$8 sps:$4 sm:$0xff]   ;;  %v12668_v11 = vld [vmem:[#allocation9 + $0x1d4] ss:$8 sps:$4 sm:$0xff]  }
 0xc46   :  { %v12666_v29 = vld [vmem:[#allocation9 + $0x1d0] ss:$8 sps:$4 sm:$0xff]  }
 0xc47   :  { %12914 = vrsqrt.f32 %v7779_v47  ;;  %v7780_v1 = vadd.f32 1e-05, %v7777_v44  ;;  %v12671_v47 = vld [vmem:[#allocation9 + $0x1c4] ss:$8 sps:$4 sm:$0xff]   ;;  %v12669_v44 = vld [vmem:[#allocation9 + $0x1c0] ss:$8 sps:$4 sm:$0xff]  }
 0xc49   :  { %12916 = vrsqrt.f32 %v7780_v1  ;;  %v12674_v1 = vld [vmem:[#allocation9 + $0x1b4] ss:$8 sps:$4 sm:$0xff]  }
 0xc54   :  { %v12915_v45 = vpop.eup %12914 }
 0xc55   :  { %v7803_v49 = vrot.slane %v12915_v45, %v16334_v2  ;;  %v12680_v45 = vld [vmem:[#allocation9 + $0x194] ss:$8 sps:$4 sm:$0xff]  }
 0xc56   :  { %v12917_v27 = vpop.eup %12916 }
 0xc57   :  { %v7807_v26 = vrot.slane %v12917_v27, %v16334_v2  ;;  %v7812_v6 = vmul.f32 %v7803_v49, %v7797_v54  ;;  %v12683_v54 = vld [vmem:[#allocation9 + $0x184] ss:$8 sps:$4 sm:$0xff]   ;;  %v12681_v49 = vld [vmem:[#allocation9 + $0x180] ss:$8 sps:$4 sm:$0xff]   ;;  %v12684_v27 = vld [vmem:[#allocation9 + $0x270] ss:$8 sps:$4 sm:$0xff]  }
 0xc59   :  { %v7813_v14 = vmul.f32 %v7807_v26, %v7798_v8  ;;  %v7832_v41 = vmul.f32 %v7820_v25, %v7812_v6  ;;  %v12686_v25 = vld [vmem:[#allocation9 + $0x274] ss:$8 sps:$4 sm:$0xff]   ;;  %v12719_v8 = vld [vmem:[#allocation9 + $0x2a4] ss:$8 sps:$4 sm:$0xff]   ;;  %v12690_v26 = vld [vmem:[#allocation9 + $0x260] ss:$8 sps:$4 sm:$0xff]  }
 0xc5a   :  { %8550 = vmatprep.subr.bf16.mxu0 %v12719_v8  ;;  %v12698_v6 = vld [vmem:[#allocation9 + $0x254] ss:$8 sps:$4 sm:$0xff]   ;;  %v12771_v8 = vld [vmem:[#allocation9 + $0x10] ss:$8 sps:$4 sm:$0xff]  }
 0xc5b   :  { %v7833_v24 = vmul.f32 %v7824_v40, %v7813_v14  ;;  %v7852_v16 = vadd.f32 %v7840_v15, %v7832_v41  ;;  %v12692_v40 = vld [vmem:[#allocation9 + $0x264] ss:$8 sps:$4 sm:$0xff]   ;;  %8551 = vmatpush1.bf16.msra.mxu0 %v12717_v36  ;;  %v12696_v15 = vld [vmem:[#allocation9 + $0x250] ss:$8 sps:$4 sm:$0xff]   ;;  %v12710_v14 = vld [vmem:[#allocation9 + $0x234] ss:$8 sps:$4 sm:$0xff]  }
 0xc5c   :  { %v12716_v41 = vld [vmem:[#allocation9 + $0x224] ss:$8 sps:$4 sm:$0xff]   ;;  %8552 = vmatprep.subr.bf16.mxu0 %v12725_v0  ;;  %v12768_v36 = vld [vmem:[#allocation9 + $0x110] ss:$8 sps:$4 sm:$0xff]   ;;  %v12806_v0 = vld [vmem:[#allocation9 + $0x374] ss:$8 sps:$4 sm:$0xff]  }
 0xc5d   :  { %v7853_v17 = vadd.f32 %v7844_v31, %v7833_v24  ;;  %v7858_v35 = vmul.f32 0.2, %v7852_v16  ;;  %vm7855_vm10 = vcmp.gt.f32.partialorder %v7852_v16, 0.0  ;;  %v12708_v31 = vld [vmem:[#allocation9 + $0x230] ss:$8 sps:$4 sm:$0xff]  }
 0xc5e   :  { %v12714_v24 = vld [vmem:[#allocation9 + $0x220] ss:$8 sps:$4 sm:$0xff]  }
 0xc5f   :  { %vm7856_vm9 = vcmp.gt.f32.partialorder %v7853_v17, 0.0  ;;  %v7859_v3 = vmul.f32 0.2, %v7853_v17  ;;  %v15670_v55 = vsel %vm7855_vm10, %v7852_v16, %v7858_v35  ;;  %v12722_v16 = vld [vmem:[#allocation9 + $0x214] ss:$8 sps:$4 sm:$0xff]  }
 0xc60   :  { %v7769_v63 = vpop.f32.mrf.mxu0  ;;  %v12728_v35 = vld [vmem:[#allocation9 + $0x204] ss:$8 sps:$4 sm:$0xff]  }
 0xc61   :  { %v7770_v56 = vadd.f32 %v11493_v50, %v7769_v63  ;;  %v15664_v7 = vsel %vm7856_vm9, %v7853_v17, %v7859_v3  ;;  %v12723_v17 = vld [vmem:[#allocation9 + $0x290] ss:$8 sps:$4 sm:$0xff]   ;;  %v12726_v50 = vld [vmem:[#allocation9 + $0x200] ss:$8 sps:$4 sm:$0xff]   ;;  %v12731_v3 = vld [vmem:[#allocation9 + $0x284] ss:$8 sps:$4 sm:$0xff]  }
 0xc62   :  { %v12002_v52 = vpop.f32.mrf.mxu0  ;;  %7899 = vmatprep.subr.mxu1 %v15664_v7  ;;  %8553 = vmatpush1.bf16.msra.mxu0 %v12723_v17  ;;  %v12729_v63 = vld [vmem:[#allocation9 + $0x280] ss:$8 sps:$4 sm:$0xff]   ;;  %v12791_v17 = vld [vmem:[#allocation9 + $0xc4] ss:$8 sps:$4 sm:$0xff]  }
 0xc63   :  { %v7778_v9 = vsub.f32 %v7770_v56, %v7775_v39  ;;  %7900 = vmatpush1.msra.mxu1 %v15670_v55  ;;  %8554 = vmatprep.subr.bf16.mxu0 %v12731_v3  ;;  %v12734_v56 = vld [vmem:[#allocation9 + $0x174] ss:$8 sps:$4 sm:$0xff]  }
 0xc64   :  { %10799 = vmatmul.mubr.msk.f32.vlgmr.msra.gmra.mxu1 %vm7865_vm11, %v7864_v58  ;;  %12003 = vmatprep.subr.mxu1 %v16121_v30  ;;  %v12737_v39 = vld [vmem:[#allocation9 + $0x74] ss:$8 sps:$4 sm:$0xff]  }
 0xc65   :  { %v7781_v20 = vadd.f32 1e-05, %v7778_v9  ;;  %12005 = vmatprep.mubr.msk.f32.mxu1 %vm13081_vm1, %v16121_v30  ;;  %v12794_v3 = vld [vmem:[#allocation9 + $0xb4] ss:$8 sps:$4 sm:$0xff]  }
 0xc66   :  { %8555 = vmatpush1.bf16.msra.mxu0 %v12729_v63  ;;  %v12807_v63 = vld [vmem:[#allocation9 + $0x360] ss:$8 sps:$4 sm:$0xff]  }
 0xc67   :  { %12918 = vrsqrt.f32 %v7781_v20  ;;  %8821 = vmatprep.subr.bf16.mxu0 %v12737_v39  ;;  %v12812_v39 = vld [vmem:[#allocation9 + $0x354] ss:$8 sps:$4 sm:$0xff]  }
 0xc74   :  { %v12919_v13 = vpop.eup %12918 }
 0xc75   :  { %v7811_v38 = vrot.slane %v12919_v13, %v16334_v2 }
 0xc77   :  { %v7814_v18 = vmul.f32 %v7811_v38, %v7799_v5  ;;  %v12732_v5 = vld [vmem:[#allocation9 + $0x170] ss:$8 sps:$4 sm:$0xff]  }
 0xc79   :  { %v7834_v43 = vmul.f32 %v7828_v21, %v7814_v18  ;;  %v12735_v21 = vld [vmem:[#allocation9 + $0x70] ss:$8 sps:$4 sm:$0xff]  }
 0xc7b   :  { %v7854_v42 = vadd.f32 %v7848_v4, %v7834_v43  ;;  %v12740_v4 = vld [vmem:[#allocation9 + $0x164] ss:$8 sps:$4 sm:$0xff]  }
 0xc7c   :  { %v12743_v43 = vld [vmem:[#allocation9 + $0x64] ss:$8 sps:$4 sm:$0xff]  }
 0xc7d   :  { %vm7857_vm12 = vcmp.gt.f32.partialorder %v7854_v42, 0.0  ;;  %v7860_v34 = vmul.f32 0.2, %v7854_v42 }
 0xc7f   :  { %v15682_v37 = vsel %vm7857_vm12, %v7854_v42, %v7860_v34 }
 0xc80   :  { %12004 = vmatpush3.msra.mxu1 %v15682_v37 }
 0xc81   :  { %12006 = vmatmul.mubr.msk.f32.vlgmr.msra.gmra.mxu1 %vm7865_vm11, %v7864_v58  ;;  %8096 = vmatprep.subr.mxu1 %v15664_v7 }
 0xc82   :  { %8097 = vmatpush1.msra.mxu1 %v15670_v55  ;;  %8130 = vmatprep.mubr.f32.mxu1 %v16121_v30 }
 0xc83   :  { %12008 = vmatprep.subr.mxu1 %v16121_v30 }
 0xc85   :  { %10802 = vmatmul.mubr.msk.f32.vlgmr.msra.gmra.mxu1 %vm7865_vm11, %v10801_v59 }
 0xc86   :  { %12009 = vmatpush3.msra.mxu1 %v15682_v37  ;;  %12010 = vmatprep.mubr.msk.f32.mxu1 %vm13081_vm1, %v16121_v30 }
 0xc87   :  { %8499 = vmatprep.subr.bf16.mxu1 %v12662_v57  ;;  %v12741_v57 = vld [vmem:[#allocation9 + $0x60] ss:$8 sps:$4 sm:$0xff]  }
 0xc89   :  { %12011 = vmatmul.mubr.msk.f32.vlgmr.msra.gmra.mxu1 %vm7865_vm11, %v10801_v59  ;;  %v12738_v59 = vld [vmem:[#allocation9 + $0x160] ss:$8 sps:$4 sm:$0xff]  }
 0xc8a   :  { %8500 = vmatpush1.bf16.msra.mxu1 %v12660_v48  ;;  %v12746_v48 = vld [vmem:[#allocation9 + $0x154] ss:$8 sps:$4 sm:$0xff]  }
 0xc8b   :  { %8501 = vmatprep.subr.bf16.mxu1 %v12665_v19  ;;  %v12749_v19 = vld [vmem:[#allocation9 + $0x54] ss:$8 sps:$4 sm:$0xff]  }
 0xc8e   :  { %8502 = vmatpush1.bf16.msra.mxu1 %v12663_v51  ;;  %v12744_v51 = vld [vmem:[#allocation9 + $0x150] ss:$8 sps:$4 sm:$0xff]  }
 0xc8f   :  { %8503 = vmatprep.subr.bf16.mxu1 %v12668_v11  ;;  %v12747_v11 = vld [vmem:[#allocation9 + $0x50] ss:$8 sps:$4 sm:$0xff]  }
 0xc92   :  { %8504 = vmatpush1.bf16.msra.mxu1 %v12666_v29  ;;  %v12752_v29 = vld [vmem:[#allocation9 + $0x144] ss:$8 sps:$4 sm:$0xff]  }
 0xc93   :  { %8505 = vmatprep.subr.bf16.mxu1 %v12671_v47  ;;  %v12755_v47 = vld [vmem:[#allocation9 + $0x44] ss:$8 sps:$4 sm:$0xff]  }
 0xc96   :  { %8506 = vmatpush1.bf16.msra.mxu1 %v12669_v44  ;;  %v12750_v44 = vld [vmem:[#allocation9 + $0x140] ss:$8 sps:$4 sm:$0xff]  }
 0xc97   :  { %8507 = vmatprep.subr.bf16.mxu1 %v12674_v1  ;;  %v12753_v1 = vld [vmem:[#allocation9 + $0x40] ss:$8 sps:$4 sm:$0xff]  }
 0xc9a   :  { %8508 = vmatpush1.bf16.msra.mxu1 %v12672_v46  ;;  %v12758_v46 = vld [vmem:[#allocation9 + $0x134] ss:$8 sps:$4 sm:$0xff]  }
 0xc9b   :  { %8509 = vmatprep.subr.bf16.mxu1 %v12677_v10  ;;  %v12761_v10 = vld [vmem:[#allocation9 + $0x34] ss:$8 sps:$4 sm:$0xff]  }
 0xc9e   :  { %8510 = vmatpush1.bf16.msra.mxu1 %v12675_v23  ;;  %v12756_v23 = vld [vmem:[#allocation9 + $0x130] ss:$8 sps:$4 sm:$0xff]  }
 0xc9f   :  { %8511 = vmatprep.subr.bf16.mxu1 %v12680_v45  ;;  %v12759_v45 = vld [vmem:[#allocation9 + $0x30] ss:$8 sps:$4 sm:$0xff]  }
 0xca2   :  { %8512 = vmatpush1.bf16.msra.mxu1 %v12678_v33  ;;  %v12764_v33 = vld [vmem:[#allocation9 + $0x124] ss:$8 sps:$4 sm:$0xff]  }
 0xca3   :  { %8513 = vmatprep.subr.bf16.mxu1 %v12683_v54  ;;  %v12767_v54 = vld [vmem:[#allocation9 + $0x24] ss:$8 sps:$4 sm:$0xff]  }
 0xca6   :  { %8514 = vmatpush1.bf16.msra.mxu1 %v12681_v49  ;;  %v12762_v49 = vld [vmem:[#allocation9 + $0x120] ss:$8 sps:$4 sm:$0xff]  }
 0xca7   :  { %8515 = vmatprep.subr.bf16.mxu1 %v12686_v25  ;;  %v12765_v25 = vld [vmem:[#allocation9 + $0x20] ss:$8 sps:$4 sm:$0xff]  }
 0xcaa   :  { %8516 = vmatpush2.bf16.msra.mxu1 %v12684_v27  ;;  %v12770_v27 = vld [vmem:[#allocation9 + $0x114] ss:$8 sps:$4 sm:$0xff]  }
 0xcab   :  { %8517 = vmatprep.subr.bf16.mxu1 %v12692_v40  ;;  %v12773_v40 = vld [vmem:[#allocation9 + $0x14] ss:$8 sps:$4 sm:$0xff]  }
 0xcae   :  { %8518 = vmatpush2.bf16.msra.mxu1 %v12690_v26  ;;  %v12776_v26 = vld [vmem:[#allocation9 + $0x104] ss:$8 sps:$4 sm:$0xff]  }
 0xcaf   :  { %8519 = vmatprep.subr.bf16.mxu1 %v12698_v6  ;;  %v12779_v6 = vld [vmem:[#allocation9 + $0x4] ss:$8 sps:$4 sm:$0xff]  }
 0xcb2   :  { %8520 = vmatpush2.bf16.msra.mxu1 %v12696_v15  ;;  %v12774_v15 = vld [vmem:[#allocation9 + $0x100] ss:$8 sps:$4 sm:$0xff]  }
 0xcb3   :  { %8521 = vmatprep.subr.bf16.mxu1 %v12704_v60  ;;  %v12777_v60 = vld [vmem:[#allocation9] ss:$8 sps:$4 sm:$0xff]  }
 0xcb6   :  { %8522 = vmatpush2.bf16.msra.mxu1 %v12702_v61  ;;  %v12782_v61 = vld [vmem:[#allocation9 + $0xf4] ss:$8 sps:$4 sm:$0xff]  }
 0xcb7   :  { %8523 = vmatprep.subr.bf16.mxu1 %v12710_v14 }
 0xcba   :  { %8524 = vmatpush2.bf16.msra.mxu1 %v12708_v31  ;;  %v12780_v31 = vld [vmem:[#allocation9 + $0xf0] ss:$8 sps:$4 sm:$0xff]  }
 0xcbb   :  { %8525 = vmatprep.subr.bf16.mxu1 %v12716_v41  ;;  %v12785_v41 = vld [vmem:[#allocation9 + $0xe4] ss:$8 sps:$4 sm:$0xff]  }
 0xcbe   :  { %8526 = vmatpush2.bf16.msra.mxu1 %v12714_v24  ;;  %v12783_v24 = vld [vmem:[#allocation9 + $0xe0] ss:$8 sps:$4 sm:$0xff]  }
 0xcbf   :  { %8527 = vmatprep.subr.bf16.mxu1 %v12722_v16  ;;  %v12788_v16 = vld [vmem:[#allocation9 + $0xd4] ss:$8 sps:$4 sm:$0xff]  }
 0xcc2   :  { %8528 = vmatpush2.bf16.msra.mxu1 %v12720_v22  ;;  %v10900_v22 = vld [vmem:[%s15892_s13 + $0x8] sm:$0xf] }
 0xcc3   :  { %8529 = vmatprep.subr.bf16.mxu1 %v12728_v35  ;;  %v12789_v35 = vld [vmem:[#allocation9 + $0xc0] ss:$8 sps:$4 sm:$0xff]  }
 0xcc6   :  { %8530 = vmatpush2.bf16.msra.mxu1 %v12726_v50  ;;  %v12809_v50 = vld [vmem:[#allocation9 + $0x364] ss:$8 sps:$4 sm:$0xff]  }
 0xcc7   :  { %8862 = vmatprep.subr.bf16.mxu1 %v12734_v56  ;;  %v12792_v56 = vld [vmem:[#allocation9 + $0xb0] ss:$8 sps:$4 sm:$0xff]  }
 0xd24   :  { %v15698_v58 = vpop.f32.mrf.mxu1 }
 0xd26   :  { %v7937_v52 = vpop.f32.mrf.mxu1 }
 0xd27   :  { %v8011_v42 = vpack.c.bf16 %v7937_v52, %v7937_v52  ;;  %v12810_v52 = vld [vmem:[#allocation9 + $0x350] ss:$8 sps:$4 sm:$0xff]  }
 0xd41   :  { %v15700_v9 = vpop.f32.mrf.mxu1 }
 0xd42   :  { %v8012_v14 = vpack.c.bf16 %v15700_v9, %v15700_v9  ;;  %v12795_v9 = vld [vmem:[#allocation9 + $0xa0] ss:$8 sps:$4 sm:$0xff]  }
 0xd43   :  { %v12007_v20 = vpop.f32.mrf.mxu1 }
 0xd44   :  { %v12815_v20 = vld [vmem:[#allocation9 + $0x344] ss:$8 sps:$4 sm:$0xff]  }
 0xd45   :  { %v8132_v62 = vpop.f32.mrf.mxu1 }
 0xd46   :  { %v8207_v38 = vpack.c.bf16 %v8132_v62, %v8132_v62  ;;  %v12800_v62 = vld [vmem:[#allocation9 + $0x94] ss:$8 sps:$4 sm:$0xff]  }
 0xd47   :  { %v8134_v13 = vpop.f32.mrf.mxu1 }
 0xd48   :  { %v8208_v32 = vpack.c.bf16 %v8134_v13, %v8134_v13  ;;  %v12813_v13 = vld [vmem:[#allocation9 + $0x340] ss:$8 sps:$4 sm:$0xff]  }
 0xd49   :  { %v8203_v53 = vpop.f32.mrf.mxu1 }
 0xd4a   :  { %v8209_v18 = vpack.c.bf16 %v8203_v53, %v8203_v53  ;;  %8531 = vmatprep.mubr.bf16.mxu1 %v8208_v32  ;;  %v12798_v32 = vld [vmem:[#allocation9 + $0x90] ss:$8 sps:$4 sm:$0xff]  }
 0xd4b   :  { %8532 = vmatmul.mubr.bf16.vlgmr.msra.gmra.mxu1 %v8207_v38  ;;  %v12012_v34 = vpop.f32.mrf.mxu1  ;;  %v12803_v38 = vld [vmem:[#allocation9 + $0x84] ss:$8 sps:$4 sm:$0xff]   ;;  %v12816_v53 = vld [vmem:[#allocation9 + $0x330] ss:$8 sps:$4 sm:$0xff]  }
 0xd4c   :  { %8863 = vmatpush1.bf16.msra.mxu1 %v12732_v5  ;;  %8573 = vmatmul.mubr.bf16.vlgmr.msra.gmra.mxu0 %v8209_v18  ;;  %v12818_v5 = vld [vmem:[#allocation9 + $0x334] ss:$8 sps:$4 sm:$0xff]   ;;  %v8010_v18 = vpack.c.bf16 %v15698_v58, %v15698_v58  ;;  %v12837_v58 = vld [vmem:[#allocation9 + $0x460] ss:$8 sps:$4 sm:$0xff]  }
 0xd4d   :  { %8822 = vmatpush1.bf16.msra.mxu0 %v12735_v21  ;;  %8853 = vmatprep.mubr.bf16.mxu0 %v8011_v42  ;;  %v12801_v21 = vld [vmem:[#allocation9 + $0x80] ss:$8 sps:$4 sm:$0xff]   ;;  %v12822_v42 = vld [vmem:[#allocation9 + $0x310] ss:$8 sps:$4 sm:$0xff]   ;;  %v12824_v34 = vld [vmem:[#allocation9 + $0x314] ss:$8 sps:$4 sm:$0xff]  }
 0xd4e   :  { %8864 = vmatprep.subr.bf16.mxu1 %v12740_v4  ;;  %8823 = vmatprep.subr.bf16.mxu0 %v12743_v43  ;;  %v12821_v4 = vld [vmem:[#allocation9 + $0x324] ss:$8 sps:$4 sm:$0xff]   ;;  %v12819_v43 = vld [vmem:[#allocation9 + $0x320] ss:$8 sps:$4 sm:$0xff]  }
 0xd4f   :  { %8894 = vmatprep.mubr.bf16.mxu1 %v16333_v12 }
 0xd50   :  { %8865 = vmatpush1.bf16.msra.mxu1 %v12738_v59  ;;  %v12827_v59 = vld [vmem:[#allocation9 + $0x304] ss:$8 sps:$4 sm:$0xff]  }
 0xd51   :  { %8824 = vmatpush1.bf16.msra.mxu0 %v12741_v57  ;;  %8866 = vmatprep.subr.bf16.mxu1 %v12746_v48  ;;  %v12831_v57 = vld [vmem:[#allocation9 + $0x470] ss:$8 sps:$4 sm:$0xff]   ;;  %v12833_v48 = vld [vmem:[#allocation9 + $0x474] ss:$8 sps:$4 sm:$0xff]  }
 0xd52   :  { %8825 = vmatprep.subr.bf16.mxu0 %v12749_v19  ;;  %v12825_v19 = vld [vmem:[#allocation9 + $0x300] ss:$8 sps:$4 sm:$0xff]  }
 0xd54   :  { %8867 = vmatpush1.bf16.msra.mxu1 %v12744_v51  ;;  %v12830_v51 = vld [vmem:[#allocation9 + $0x3f4] ss:$8 sps:$4 sm:$0xff]  }
 0xd55   :  { %8826 = vmatpush1.bf16.msra.mxu0 %v12747_v11  ;;  %8868 = vmatprep.subr.bf16.mxu1 %v12752_v29  ;;  %v12839_v11 = vld [vmem:[#allocation9 + $0x464] ss:$8 sps:$4 sm:$0xff]   ;;  %v12845_v29 = vld [vmem:[#allocation9 + $0x454] ss:$8 sps:$4 sm:$0xff]  }
 0xd56   :  { %8827 = vmatprep.subr.bf16.mxu0 %v12755_v47  ;;  %v12836_v47 = vld [vmem:[#allocation9 + $0x3e4] ss:$8 sps:$4 sm:$0xff]  }
 0xd58   :  { %8869 = vmatpush1.bf16.msra.mxu1 %v12750_v44  ;;  %v12843_v44 = vld [vmem:[#allocation9 + $0x450] ss:$8 sps:$4 sm:$0xff]  }
 0xd59   :  { %8828 = vmatpush1.bf16.msra.mxu0 %v12753_v1  ;;  %8870 = vmatprep.subr.bf16.mxu1 %v12758_v46  ;;  %v12851_v1 = vld [vmem:[#allocation9 + $0x444] ss:$8 sps:$4 sm:$0xff]   ;;  %v12834_v46 = vld [vmem:[#allocation9 + $0x3e0] ss:$8 sps:$4 sm:$0xff]  }
 0xd5a   :  { %8829 = vmatprep.subr.bf16.mxu0 %v12761_v10  ;;  %v12842_v10 = vld [vmem:[#allocation9 + $0x3d4] ss:$8 sps:$4 sm:$0xff]  }
 0xd5c   :  { %8871 = vmatpush1.bf16.msra.mxu1 %v12756_v23  ;;  %v12849_v23 = vld [vmem:[#allocation9 + $0x440] ss:$8 sps:$4 sm:$0xff]  }
 0xd5d   :  { %8830 = vmatpush1.bf16.msra.mxu0 %v12759_v45  ;;  %8872 = vmatprep.subr.bf16.mxu1 %v12764_v33  ;;  %v12857_v45 = vld [vmem:[#allocation9 + $0x434] ss:$8 sps:$4 sm:$0xff]   ;;  %v12840_v33 = vld [vmem:[#allocation9 + $0x3d0] ss:$8 sps:$4 sm:$0xff]  }
 0xd5e   :  { %8831 = vmatprep.subr.bf16.mxu0 %v12767_v54  ;;  %v12848_v54 = vld [vmem:[#allocation9 + $0x3c4] ss:$8 sps:$4 sm:$0xff]  }
 0xd60   :  { %8873 = vmatpush1.bf16.msra.mxu1 %v12762_v49  ;;  %v12855_v49 = vld [vmem:[#allocation9 + $0x430] ss:$8 sps:$4 sm:$0xff]  }
 0xd61   :  { %8832 = vmatpush1.bf16.msra.mxu0 %v12765_v25  ;;  %8874 = vmatprep.subr.bf16.mxu1 %v12770_v27  ;;  %v12846_v25 = vld [vmem:[#allocation9 + $0x3c0] ss:$8 sps:$4 sm:$0xff]   ;;  %v12854_v27 = vld [vmem:[#allocation9 + $0x3b4] ss:$8 sps:$4 sm:$0xff]  }
 0xd62   :  { %8833 = vmatprep.subr.bf16.mxu0 %v12773_v40  ;;  %v12852_v40 = vld [vmem:[#allocation9 + $0x3b0] ss:$8 sps:$4 sm:$0xff]  }
 0xd64   :  { %8875 = vmatpush1.bf16.msra.mxu1 %v12768_v36  ;;  %v12860_v36 = vld [vmem:[#allocation9 + $0x3a4] ss:$8 sps:$4 sm:$0xff]  }
 0xd65   :  { %8834 = vmatpush1.bf16.msra.mxu0 %v12771_v8  ;;  %8876 = vmatprep.subr.bf16.mxu1 %v12776_v26  ;;  %v12858_v8 = vld [vmem:[#allocation9 + $0x3a0] ss:$8 sps:$4 sm:$0xff]  }
 0xd66   :  { %8835 = vmatprep.subr.bf16.mxu0 %v12779_v6  ;;  %v12861_v26 = vld [vmem:[#allocation9 + $0x420] ss:$8 sps:$4 sm:$0xff]   ;;  %v12863_v6 = vld [vmem:[#allocation9 + $0x424] ss:$8 sps:$4 sm:$0xff]  }
 0xd68   :  { %8877 = vmatpush1.bf16.msra.mxu1 %v12774_v15  ;;  %v12866_v15 = vld [vmem:[#allocation9 + $0x394] ss:$8 sps:$4 sm:$0xff]  }
 0xd69   :  { %8836 = vmatpush1.bf16.msra.mxu0 %v12777_v60  ;;  %8938 = vmatprep.subr.mxu1 %v15664_v7  ;;  %v12786_v7 = vld [vmem:[#allocation9 + $0xd0] ss:$8 sps:$4 sm:$0xff]  }
 0xd6a   :  { %8837 = vmatprep.subr.bf16.mxu0 %v12782_v61  ;;  %v12864_v60 = vld [vmem:[#allocation9 + $0x390] ss:$8 sps:$4 sm:$0xff]  }
 0xd6b   :  { %8895 = vmatmul.mubr.bf16.vlgmr.msra.gmra.mxu1 %v8012_v14  ;;  %v12867_v61 = vld [vmem:[#allocation9 + $0x410] ss:$8 sps:$4 sm:$0xff]   ;;  %v12869_v14 = vld [vmem:[#allocation9 + $0x414] ss:$8 sps:$4 sm:$0xff]  }
 0xd6c   :  { %8939 = vmatpush1.msra.mxu1 %v15670_v55  ;;  %8972 = vmatprep.mubr.f32.mxu1 %v16121_v30  ;;  %v12804_v55 = vld [vmem:[#allocation9 + $0x370] ss:$8 sps:$4 sm:$0xff]  }
 0xd6d   :  { %8838 = vmatpush2.bf16.msra.mxu0 %v12780_v31  ;;  %12013 = vmatprep.subr.mxu1 %v16121_v30  ;;  %v12872_v31 = vld [vmem:[#allocation9 + $0x384] ss:$8 sps:$4 sm:$0xff]  }
 0xd6e   :  { %8839 = vmatprep.subr.bf16.mxu0 %v12785_v41  ;;  %v12870_v41 = vld [vmem:[#allocation9 + $0x380] ss:$8 sps:$4 sm:$0xff]  }
 0xd71   :  { %8840 = vmatpush2.bf16.msra.mxu0 %v12783_v24  ;;  %v12875_v24 = vld [vmem:[#allocation9 + $0x404] ss:$8 sps:$4 sm:$0xff]  }
 0xd72   :  { %8841 = vmatprep.subr.bf16.mxu0 %v12788_v16  ;;  %v12873_v16 = vld [vmem:[#allocation9 + $0x400] ss:$8 sps:$4 sm:$0xff]  }
 0xd73   :  { %10901 = vmatmul.mubr.msk.f32.vlgmr.msra.gmra.mxu1 %vm7865_vm11, %v10900_v22 }
 0xd74   :  { %12014 = vmatpush3.msra.mxu1 %v15682_v37  ;;  %12015 = vmatprep.mubr.msk.f32.mxu1 %vm13081_vm1, %v16121_v30  ;;  %v12797_v37 = vld [vmem:[#allocation9 + $0xa4] ss:$8 sps:$4 sm:$0xff]   ;;  %vm10229_vm1 = vcmask 1024  }
 0xd75   :  { %8842 = vmatpush2.bf16.msra.mxu0 %v12786_v7  ;;  %9341 = vmatprep.subr.bf16.mxu1 %v12806_v0 }
 0xd76   :  { %8843 = vmatprep.subr.bf16.mxu0 %v12791_v17 }
 0xd77   :  { %12016 = vmatmul.mubr.msk.f32.vlgmr.msra.gmra.mxu1 %vm7865_vm11, %v10900_v22  ;;  %v9487_v22 = vld [vmem:[#allocation10 + $0xf8] sm:$0xff] }
 0xd78   :  { %9342 = vmatpush1.bf16.msra.mxu1 %v12804_v55 }
 0xd79   :  { %8844 = vmatpush2.bf16.msra.mxu0 %v12789_v35  ;;  %9343 = vmatprep.subr.bf16.mxu1 %v12809_v50 }
 0xd7a   :  { %8845 = vmatprep.subr.bf16.mxu0 %v12794_v3 }
 0xd7c   :  { %9344 = vmatpush1.bf16.msra.mxu1 %v12807_v63 }
 0xd7d   :  { %8846 = vmatpush2.bf16.msra.mxu0 %v12792_v56  ;;  %9345 = vmatprep.subr.bf16.mxu1 %v12812_v39 }
 0xd7e   :  { %8847 = vmatprep.subr.bf16.mxu0 %v12797_v37 }
 0xd80   :  { %9346 = vmatpush1.bf16.msra.mxu1 %v12810_v52 }
 0xd81   :  { %8848 = vmatpush2.bf16.msra.mxu0 %v12795_v9  ;;  %9347 = vmatprep.subr.bf16.mxu1 %v12815_v20 }
 0xd82   :  { %8849 = vmatprep.subr.bf16.mxu0 %v12800_v62 }
 0xd84   :  { %9348 = vmatpush1.bf16.msra.mxu1 %v12813_v13 }
 0xd85   :  { %8850 = vmatpush2.bf16.msra.mxu0 %v12798_v32  ;;  %9349 = vmatprep.subr.bf16.mxu1 %v12818_v5 }
 0xd86   :  { %8851 = vmatprep.subr.bf16.mxu0 %v12803_v38 }
 0xd88   :  { %9350 = vmatpush1.bf16.msra.mxu1 %v12816_v53 }
 0xd89   :  { %8852 = vmatpush2.bf16.msra.mxu0 %v12801_v21  ;;  %9351 = vmatprep.subr.bf16.mxu1 %v12821_v4  ;;  %v9486_v21 = vld [vmem:[#allocation10 + $0xf0] sm:$0xff]  ;;  %v9485_v4 = vld [vmem:[#allocation10 + $0xe8] sm:$0xff] }
 0xd8a   :  { %9382 = vmatprep.subr.bf16.mxu0 %v12833_v48  ;;  %v9479_v48 = vld [vmem:[#allocation10 + $0xb8] sm:$0xff] }
 0xd8c   :  { %8854 = vmatmul.mubr.bf16.vlgmr.msra.gmra.mxu0 %v8010_v18  ;;  %9352 = vmatpush1.bf16.msra.mxu1 %v12819_v43  ;;  %v9484_v43 = vld [vmem:[#allocation10 + $0xe0] sm:$0xff] }
 0xd8d   :  { %9414 = vmatprep.mubr.bf16.mxu0 %v16333_v12  ;;  %9353 = vmatprep.subr.bf16.mxu1 %v12824_v34  ;;  %v12828_v12 = vld [vmem:[#allocation9 + $0x3f0] ss:$8 sps:$4 sm:$0xff]  }
 0xd8e   :  { %9383 = vmatpush1.bf16.msra.mxu0 %v12831_v57  ;;  %v9482_v34 = vld [vmem:[#allocation10 + $0xd0] sm:$0xff]  ;;  %v9480_v57 = vld [vmem:[#allocation10 + $0xc0] sm:$0xff] }
 0xd8f   :  { %9384 = vmatprep.subr.bf16.mxu0 %v12839_v11  ;;  %v9476_v11 = vld [vmem:[#allocation10 + $0xa0] sm:$0xff] }
 0xd90   :  { %9354 = vmatpush1.bf16.msra.mxu1 %v12822_v42  ;;  %v9483_v42 = vld [vmem:[#allocation10 + $0xd8] sm:$0xff] }
 0xd91   :  { %9355 = vmatprep.subr.bf16.mxu1 %v12827_v59  ;;  %v9481_v59 = vld [vmem:[#allocation10 + $0xc8] sm:$0xff] }
 0xd92   :  { %9385 = vmatpush1.bf16.msra.mxu0 %v12837_v58  ;;  %v9475_v58 = vld [vmem:[#allocation10 + $0x98] sm:$0xff] }
 0xd93   :  { %9386 = vmatprep.subr.bf16.mxu0 %v12845_v29  ;;  %v9474_v29 = vld [vmem:[#allocation10 + $0x90] sm:$0xff] }
 0xd94   :  { %9356 = vmatpush1.bf16.msra.mxu1 %v12825_v19  ;;  %v9478_v19 = vld [vmem:[#allocation10 + $0xb0] sm:$0xff] }
 0xd95   :  { %9357 = vmatprep.subr.bf16.mxu1 %v12830_v51  ;;  %v9477_v51 = vld [vmem:[#allocation10 + $0xa8] sm:$0xff] }
 0xd96   :  { %9387 = vmatpush1.bf16.msra.mxu0 %v12843_v44  ;;  %v9471_v44 = vld [vmem:[#allocation10 + $0x78] sm:$0xff] }
 0xd97   :  { %9388 = vmatprep.subr.bf16.mxu0 %v12851_v1  ;;  %v9470_v1 = vld [vmem:[#allocation10 + $0x70] sm:$0xff] }
 0xd98   :  { %9358 = vmatpush2.bf16.msra.mxu1 %v12828_v12  ;;  %v9473_v12 = vld [vmem:[#allocation10 + $0x88] sm:$0xff] }
 0xd99   :  { %9359 = vmatprep.subr.bf16.mxu1 %v12836_v47  ;;  %v9472_v47 = vld [vmem:[#allocation10 + $0x80] sm:$0xff] }
 0xd9a   :  { %9389 = vmatpush1.bf16.msra.mxu0 %v12849_v23  ;;  %v9467_v23 = vld [vmem:[#allocation10 + $0x58] sm:$0xff] }
 0xd9b   :  { %9390 = vmatprep.subr.bf16.mxu0 %v12857_v45 }
 0xd9c   :  { %9360 = vmatpush2.bf16.msra.mxu1 %v12834_v46  ;;  %v9469_v46 = vld [vmem:[#allocation10 + $0x68] sm:$0xff] }
 0xd9d   :  { %9361 = vmatprep.subr.bf16.mxu1 %v12842_v10  ;;  %v9468_v10 = vld [vmem:[#allocation10 + $0x60] sm:$0xff] }
 0xd9e   :  { %9391 = vmatpush1.bf16.msra.mxu0 %v12855_v49  ;;  %v9465_v49 = vld [vmem:[#allocation10 + $0x48] sm:$0xff] }
 0xd9f   :  { %9392 = vmatprep.subr.bf16.mxu0 %v12863_v6  ;;  %v9462_v6 = vld [vmem:[#allocation10 + $0x30] sm:$0xff] }
 0xda0   :  { %9362 = vmatpush2.bf16.msra.mxu1 %v12840_v33  ;;  %v9466_v33 = vld [vmem:[#allocation10 + $0x50] sm:$0xff] }
 0xda1   :  { %9363 = vmatprep.subr.bf16.mxu1 %v12848_v54 }
 0xda2   :  { %9393 = vmatpush1.bf16.msra.mxu0 %v12861_v26 }
 0xda3   :  { %9394 = vmatprep.subr.bf16.mxu0 %v12869_v14  ;;  %v9460_v14 = vld [vmem:[#allocation10 + $0x20] sm:$0xff] }
 0xda4   :  { %9364 = vmatpush2.bf16.msra.mxu1 %v12846_v25 }
 0xda5   :  { %9365 = vmatprep.subr.bf16.mxu1 %v12854_v27  ;;  %v9464_v27 = vld [vmem:[#allocation10 + $0x40] sm:$0xff] }
 0xda6   :  { %9395 = vmatpush1.bf16.msra.mxu0 %v12867_v61 }
 0xda7   :  { %9396 = vmatprep.subr.bf16.mxu0 %v12875_v24  ;;  %v9457_v24 = vld [vmem:[#allocation10 + $0x8] sm:$0xff] }
 0xda8   :  { %9366 = vmatpush2.bf16.msra.mxu1 %v12852_v40 }
 0xda9   :  { %9367 = vmatprep.subr.bf16.mxu1 %v12860_v36 }
 0xdaa   :  { %9397 = vmatpush1.bf16.msra.mxu0 %v12873_v16  ;;  %v9456_v16 = vld [vmem:[#allocation10] sm:$0xff] }
 0xdab   :  { %9520 = vmatprep.subr.mxu0 %v9487_v22 }
 0xdac   :  { %9368 = vmatpush2.bf16.msra.mxu1 %v12858_v8  ;;  %v9463_v8 = vld [vmem:[#allocation10 + $0x38] sm:$0xff] }
 0xdad   :  { %9369 = vmatprep.subr.bf16.mxu1 %v12866_v15 }
 0xdb0   :  { %9370 = vmatpush2.bf16.msra.mxu1 %v12864_v60  ;;  %v9461_v60 = vld [vmem:[#allocation10 + $0x28] sm:$0xff] }
 0xdb1   :  { %9371 = vmatprep.subr.bf16.mxu1 %v12872_v31  ;;  %v9459_v31 = vld [vmem:[#allocation10 + $0x18] sm:$0xff] }
 0xdb4   :  { %9372 = vmatpush2.bf16.msra.mxu1 %v12870_v41  ;;  %v9458_v41 = vld [vmem:[#allocation10 + $0x10] sm:$0xff] }
 0xdb5   :  { %9591 = vmatprep.subr.mxu1 %v9487_v22  ;;  %v9519_v22 = vld [vmem:[#allocation10 + $0x1f8] sm:$0xff] }
 0xe0b   :  { %v8533_v7 = vpop.f32.mrf.mxu1 }
 0xe0c   :  { %v8574_v0 = vpop.f32.mrf.mxu0 }
 0xe0d   :  { %v15720_v17 = vadd.f32 %v8574_v0, %v8533_v7  ;;  %v8535_v55 = vpop.f32.mrf.mxu1  ;;  %v9518_v7 = vld [vmem:[#allocation10 + $0x1f0] sm:$0xff]  ;;  %v9517_v0 = vld [vmem:[#allocation10 + $0x1e8] sm:$0xff] }
 0xe0e   :  { %v8576_v35 = vpop.f32.mrf.mxu0 }
 0xe0f   :  { %v15722_v50 = vadd.f32 %v8576_v35, %v8535_v55  ;;  %v8537_v3 = vpop.f32.mrf.mxu1  ;;  %v9515_v55 = vld [vmem:[#allocation10 + $0x1d8] sm:$0xff]  ;;  %v9514_v35 = vld [vmem:[#allocation10 + $0x1d0] sm:$0xff] }
 0xe10   :  { %v8578_v63 = vpop.f32.mrf.mxu0  ;;  %v9512_v3 = vld [vmem:[#allocation10 + $0x1c0] sm:$0xff] }
 0xe11   :  { %v8538_v56 = vpop.f32.mrf.mxu1  ;;  %v9511_v63 = vld [vmem:[#allocation10 + $0x1b8] sm:$0xff] }
 0xe12   :  { %v8579_v39 = vpop.f32.mrf.mxu0  ;;  %v9510_v56 = vld [vmem:[#allocation10 + $0x1b0] sm:$0xff] }
 0xe13   :  { %v9509_v39 = vld [vmem:[#allocation10 + $0x1a8] sm:$0xff] }
 0xe2b   :  { %v15724_v37 = vpop.f32.mrf.mxu1 }
 0xe2d   :  { %v15726_v52 = vpop.f32.mrf.mxu1 }
 0xe2f   :  { %v8900_v9 = vpop.f32.mrf.mxu1 }
 0xe30   :  { %v9506_v9 = vld [vmem:[#allocation10 + $0x190] sm:$0xff] }
 0xe31   :  { %v8901_v20 = vpop.f32.mrf.mxu1 }
 0xe32   :  { %v9505_v20 = vld [vmem:[#allocation10 + $0x188] sm:$0xff] }
 0xe33   :  { %v8974_v62 = vpop.f32.mrf.mxu1 }
 0xe34   :  { %v9049_v5 = vpack.c.bf16 %v8974_v62, %v8974_v62  ;;  %v9504_v62 = vld [vmem:[#allocation10 + $0x180] sm:$0xff] }
 0xe35   :  { %v8976_v13 = vpop.f32.mrf.mxu1 }
 0xe36   :  { %v9050_v32 = vpack.c.bf16 %v8976_v13, %v8976_v13  ;;  %v9503_v13 = vld [vmem:[#allocation10 + $0x178] sm:$0xff] }
 0xe37   :  { %v9045_v38 = vpop.f32.mrf.mxu1 }
 0xe38   :  { %v9051_v53 = vpack.c.bf16 %v9045_v38, %v9045_v38  ;;  %9373 = vmatprep.mubr.bf16.mxu1 %v9050_v32  ;;  %v9502_v32 = vld [vmem:[#allocation10 + $0x170] sm:$0xff]  ;;  %v9500_v38 = vld [vmem:[#allocation10 + $0x160] sm:$0xff] }
 0xe39   :  { %9374 = vmatmul.mubr.bf16.vlgmr.msra.gmra.mxu1 %v9049_v5  ;;  %v12017_v18 = vpop.f32.mrf.mxu1  ;;  %v9501_v5 = vld [vmem:[#allocation10 + $0x168] sm:$0xff] }
 0xe3a   :  { %9415 = vmatmul.mubr.bf16.vlgmr.msra.gmra.mxu0 %v9051_v53  ;;  %9592 = vmatpush1.msra.mxu1 %v9486_v21  ;;  %v9499_v53 = vld [vmem:[#allocation10 + $0x158] sm:$0xff]  ;;  %v9497_v18 = vld [vmem:[#allocation10 + $0x148] sm:$0xff] }
 0xe3b   :  { %9521 = vmatpush1.msra.mxu0 %v9486_v21  ;;  %9593 = vmatprep.subr.mxu1 %v9485_v4  ;;  %v9498_v21 = vld [vmem:[#allocation10 + $0x150] sm:$0xff] }
 0xe3c   :  { %9522 = vmatprep.subr.mxu0 %v9485_v4  ;;  %9594 = vmatpush1.msra.mxu1 %v9484_v43  ;;  %v9496_v4 = vld [vmem:[#allocation10 + $0x140] sm:$0xff] }
 0xe3d   :  { %9523 = vmatpush1.msra.mxu0 %v9484_v43  ;;  %9595 = vmatprep.subr.mxu1 %v9483_v42  ;;  %v9495_v43 = vld [vmem:[#allocation10 + $0x138] sm:$0xff] }
 0xe3e   :  { %9524 = vmatprep.subr.mxu0 %v9483_v42  ;;  %9596 = vmatpush1.msra.mxu1 %v9482_v34  ;;  %v9494_v42 = vld [vmem:[#allocation10 + $0x130] sm:$0xff] }
 0xe3f   :  { %9525 = vmatpush1.msra.mxu0 %v9482_v34  ;;  %9597 = vmatprep.subr.mxu1 %v9481_v59  ;;  %v9493_v34 = vld [vmem:[#allocation10 + $0x128] sm:$0xff] }
 0xe40   :  { %9526 = vmatprep.subr.mxu0 %v9481_v59  ;;  %9598 = vmatpush1.msra.mxu1 %v9480_v57  ;;  %v9492_v59 = vld [vmem:[#allocation10 + $0x120] sm:$0xff] }
 0xe41   :  { %9527 = vmatpush1.msra.mxu0 %v9480_v57  ;;  %9599 = vmatprep.subr.mxu1 %v9479_v48  ;;  %v9491_v57 = vld [vmem:[#allocation10 + $0x118] sm:$0xff] }
 0xe42   :  { %9528 = vmatprep.subr.mxu0 %v9479_v48  ;;  %9600 = vmatpush1.msra.mxu1 %v9478_v19  ;;  %v9490_v48 = vld [vmem:[#allocation10 + $0x110] sm:$0xff] }
 0xe43   :  { %9529 = vmatpush1.msra.mxu0 %v9478_v19  ;;  %9601 = vmatprep.subr.mxu1 %v9477_v51  ;;  %v9489_v19 = vld [vmem:[#allocation10 + $0x108] sm:$0xff] }
 0xe44   :  { %9530 = vmatprep.subr.mxu0 %v9477_v51  ;;  %9602 = vmatpush1.msra.mxu1 %v9476_v11  ;;  %v9488_v51 = vld [vmem:[#allocation10 + $0x100] sm:$0xff] }
 0xe45   :  { %9531 = vmatpush1.msra.mxu0 %v9476_v11  ;;  %9603 = vmatprep.subr.mxu1 %v9475_v58 }
 0xe46   :  { %9532 = vmatprep.subr.mxu0 %v9475_v58  ;;  %9604 = vmatpush1.msra.mxu1 %v9474_v29 }
 0xe47   :  { %9533 = vmatpush1.msra.mxu0 %v9474_v29  ;;  %9605 = vmatprep.subr.mxu1 %v9473_v12 }
 0xe48   :  { %9534 = vmatprep.subr.mxu0 %v9473_v12  ;;  %9606 = vmatpush1.msra.mxu1 %v9472_v47 }
 0xe49   :  { %9535 = vmatpush1.msra.mxu0 %v9472_v47  ;;  %9607 = vmatprep.subr.mxu1 %v9471_v44 }
 0xe4a   :  { %9536 = vmatprep.subr.mxu0 %v9471_v44  ;;  %9608 = vmatpush1.msra.mxu1 %v9470_v1 }
 0xe4b   :  { %9537 = vmatpush1.msra.mxu0 %v9470_v1  ;;  %9609 = vmatprep.subr.mxu1 %v9469_v46 }
 0xe4c   :  { %v8855_v45 = vpop.f32.mrf.mxu0  ;;  %9538 = vmatprep.subr.mxu0 %v9469_v46  ;;  %9610 = vmatpush1.msra.mxu1 %v9468_v10 }
 0xe4d   :  { %v8856_v54 = vadd.f32 %v8855_v45, %v15720_v17  ;;  %9539 = vmatpush1.msra.mxu0 %v9468_v10  ;;  %9611 = vmatprep.subr.mxu1 %v9467_v23  ;;  %v9516_v17 = vld [vmem:[#allocation10 + $0x1e0] sm:$0xff] }
 0xe4e   :  { %v8857_v25 = vpop.f32.mrf.mxu0  ;;  %9540 = vmatprep.subr.mxu0 %v9467_v23  ;;  %9612 = vmatpush1.msra.mxu1 %v9466_v33 }
 0xe4f   :  { %v15730_v40 = vadd.f32 %v15724_v37, %v8856_v54  ;;  %v8858_v36 = vadd.f32 %v8857_v25, %v15722_v50  ;;  %9541 = vmatpush1.msra.mxu0 %v9466_v33  ;;  %9613 = vmatprep.subr.mxu1 %v9465_v49  ;;  %v9513_v50 = vld [vmem:[#allocation10 + $0x1c8] sm:$0xff]  ;;  %v9508_v37 = vld [vmem:[#allocation10 + $0x1a0] sm:$0xff] }
 0xe50   :  { %v8859_v26 = vpop.f32.mrf.mxu0  ;;  %9542 = vmatprep.subr.mxu0 %v9465_v49  ;;  %9614 = vmatpush1.msra.mxu1 %v9464_v27 }
 0xe51   :  { %v15734_v15 = vadd.f32 %v15726_v52, %v8858_v36  ;;  %9543 = vmatpush1.msra.mxu0 %v9464_v27  ;;  %9615 = vmatprep.subr.mxu1 %v9463_v8  ;;  %v9507_v52 = vld [vmem:[#allocation10 + $0x198] sm:$0xff] }
 0xe52   :  { %v8860_v61 = vpop.f32.mrf.mxu0  ;;  %9544 = vmatprep.subr.mxu0 %v9463_v8  ;;  %9616 = vmatpush1.msra.mxu1 %v9462_v6 }
 0xe53   :  { %9545 = vmatpush1.msra.mxu0 %v9462_v6  ;;  %9617 = vmatprep.subr.mxu1 %v9461_v60 }
 0xe54   :  { %9546 = vmatprep.subr.mxu0 %v9461_v60  ;;  %9618 = vmatpush1.msra.mxu1 %v9460_v14 }
 0xe55   :  { %9547 = vmatpush1.msra.mxu0 %v9460_v14  ;;  %9619 = vmatprep.subr.mxu1 %v9459_v31 }
 0xe56   :  { %9548 = vmatprep.subr.mxu0 %v9459_v31  ;;  %9620 = vmatpush1.msra.mxu1 %v9458_v41 }
 0xe57   :  { %9549 = vmatpush1.msra.mxu0 %v9458_v41  ;;  %9621 = vmatprep.subr.mxu1 %v9457_v24 }
 0xe58   :  { %9550 = vmatprep.subr.mxu0 %v9457_v24  ;;  %9622 = vmatpush1.msra.mxu1 %v9456_v16 }
 0xe59   :  { %9551 = vmatpush1.msra.mxu0 %v9456_v16  ;;  %9623 = vmatprep.subr.mxu1 %v9519_v22 }
 0xe5a   :  { %9552 = vmatprep.subr.mxu0 %v9519_v22  ;;  %9624 = vmatpush2.msra.mxu1 %v9518_v7 }
 0xe5b   :  { %9553 = vmatpush2.msra.mxu0 %v9518_v7  ;;  %9625 = vmatprep.subr.mxu1 %v9517_v0 }
 0xe5c   :  { %9554 = vmatprep.subr.mxu0 %v9517_v0  ;;  %9626 = vmatpush2.msra.mxu1 %v9516_v17 }
 0xe5d   :  { %9555 = vmatpush2.msra.mxu0 %v9516_v17  ;;  %9627 = vmatprep.subr.mxu1 %v9515_v55 }
 0xe5e   :  { %9556 = vmatprep.subr.mxu0 %v9515_v55  ;;  %9628 = vmatpush2.msra.mxu1 %v9514_v35 }
 0xe5f   :  { %9557 = vmatpush2.msra.mxu0 %v9514_v35  ;;  %9629 = vmatprep.subr.mxu1 %v9513_v50 }
 0xe60   :  { %9558 = vmatprep.subr.mxu0 %v9513_v50  ;;  %9630 = vmatpush2.msra.mxu1 %v9512_v3 }
 0xe61   :  { %9559 = vmatpush2.msra.mxu0 %v9512_v3  ;;  %9631 = vmatprep.subr.mxu1 %v9511_v63 }
 0xe62   :  { %9560 = vmatprep.subr.mxu0 %v9511_v63  ;;  %9632 = vmatpush2.msra.mxu1 %v9510_v56 }
 0xe63   :  { %9561 = vmatpush2.msra.mxu0 %v9510_v56  ;;  %9633 = vmatprep.subr.mxu1 %v9509_v39 }
 0xe64   :  { %9562 = vmatprep.subr.mxu0 %v9509_v39  ;;  %9634 = vmatpush2.msra.mxu1 %v9508_v37 }
 0xe65   :  { %9563 = vmatpush2.msra.mxu0 %v9508_v37  ;;  %9635 = vmatprep.subr.mxu1 %v9507_v52 }
 0xe66   :  { %9564 = vmatprep.subr.mxu0 %v9507_v52  ;;  %9636 = vmatpush2.msra.mxu1 %v9506_v9 }
 0xe67   :  { %9565 = vmatpush2.msra.mxu0 %v9506_v9  ;;  %9637 = vmatprep.subr.mxu1 %v9505_v20  ;;  %v12876_v9 = vld [vmem:[%s15898_s19 + $0x78] sm:$0xff]  }
 0xe68   :  { %9566 = vmatprep.subr.mxu0 %v9505_v20  ;;  %9638 = vmatpush2.msra.mxu1 %v9504_v62  ;;  %v12877_v20 = vld [vmem:[%s15898_s19 + $0x38] sm:$0xff]  }
 0xe69   :  { %9567 = vmatpush2.msra.mxu0 %v9504_v62  ;;  %9639 = vmatprep.subr.mxu1 %v9503_v13  ;;  %v12879_v62 = vld [vmem:[%s15898_s19 + $0x70] sm:$0xff]  }
 0xe6a   :  { %9568 = vmatprep.subr.mxu0 %v9503_v13  ;;  %9640 = vmatpush2.msra.mxu1 %v9502_v32  ;;  %v12881_v13 = vld [vmem:[%s15898_s19 + $0x30] sm:$0xff]  }
 0xe6b   :  { %9569 = vmatpush2.msra.mxu0 %v9502_v32  ;;  %9641 = vmatprep.subr.mxu1 %v9501_v5  ;;  %v12883_v32 = vld [vmem:[%s15898_s19 + $0x68] sm:$0xff]  }
 0xe6c   :  { %9570 = vmatprep.subr.mxu0 %v9501_v5  ;;  %9642 = vmatpush2.msra.mxu1 %v9500_v38  ;;  %v12885_v5 = vld [vmem:[%s15898_s19 + $0x28] sm:$0xff]  }
 0xe6d   :  { %9571 = vmatpush2.msra.mxu0 %v9500_v38  ;;  %9643 = vmatprep.subr.mxu1 %v9499_v53  ;;  %v12887_v38 = vld [vmem:[%s15898_s19 + $0x60] sm:$0xff]  }
 0xe6e   :  { %9572 = vmatprep.subr.mxu0 %v9499_v53  ;;  %9644 = vmatpush2.msra.mxu1 %v9498_v21  ;;  %v12889_v53 = vld [vmem:[%s15898_s19 + $0x20] sm:$0xff]  }
 0xe6f   :  { %9573 = vmatpush2.msra.mxu0 %v9498_v21  ;;  %9645 = vmatprep.subr.mxu1 %v9497_v18  ;;  %v12891_v21 = vld [vmem:[%s15898_s19 + $0x58] sm:$0xff]  }
 0xe70   :  { %9574 = vmatprep.subr.mxu0 %v9497_v18  ;;  %9646 = vmatpush2.msra.mxu1 %v9496_v4  ;;  %v12893_v18 = vld [vmem:[%s15898_s19 + $0x18] sm:$0xff]  }
 0xe71   :  { %9575 = vmatpush2.msra.mxu0 %v9496_v4  ;;  %9647 = vmatprep.subr.mxu1 %v9495_v43  ;;  %v12895_v4 = vld [vmem:[%s15898_s19 + $0x50] sm:$0xff]  }
 0xe72   :  { %9576 = vmatprep.subr.mxu0 %v9495_v43  ;;  %9648 = vmatpush2.msra.mxu1 %v9494_v42  ;;  %v12897_v43 = vld [vmem:[%s15898_s19 + $0x10] sm:$0xff]  }
 0xe73   :  { %9577 = vmatpush2.msra.mxu0 %v9494_v42  ;;  %9649 = vmatprep.subr.mxu1 %v9493_v34  ;;  %v12899_v42 = vld [vmem:[%s15898_s19 + $0x48] sm:$0xff]  }
 0xe74   :  { %9578 = vmatprep.subr.mxu0 %v9493_v34  ;;  %9650 = vmatpush2.msra.mxu1 %v9492_v59  ;;  %v12901_v34 = vld [vmem:[%s15898_s19 + $0x8] sm:$0xff]  }
 0xe75   :  { %9579 = vmatpush2.msra.mxu0 %v9492_v59  ;;  %9651 = vmatprep.subr.mxu1 %v9491_v57 }
 0xe76   :  { %9580 = vmatprep.subr.mxu0 %v9491_v57  ;;  %9652 = vmatpush2.msra.mxu1 %v9490_v48 }
 0xe77   :  { %9581 = vmatpush2.msra.mxu0 %v9490_v48  ;;  %9653 = vmatprep.subr.mxu1 %v9489_v19 }
 0xe78   :  { %9582 = vmatprep.subr.mxu0 %v9489_v19  ;;  %9654 = vmatpush2.msra.mxu1 %v9488_v51 }
 0xe79   :  { %9583 = vmatpush2.msra.mxu0 %v9488_v51  ;;  %11539 = vmatprep.subr.bf16.mxu1 %v12876_v9  ;;  %v12904_v9 = vld [vmem:[%s15898_s19 + $0x88] sm:$0xff]  }
 0xef9   :  { %v9375_v11 = vpop.f32.mrf.mxu1 }
 0xefa   :  { %v9416_v58 = vpop.f32.mrf.mxu0 }
 0xefb   :  { %v9417_v29 = vadd.f32 %v9416_v58, %v9375_v11  ;;  %v9377_v12 = vpop.f32.mrf.mxu1 }
 0xefc   :  { %v9418_v47 = vpop.f32.mrf.mxu0 }
 0xefd   :  { %v15737_v44 = vadd.f32 %v9417_v29, %v15730_v40  ;;  %v9419_v1 = vadd.f32 %v9418_v47, %v9377_v12  ;;  %v9379_v46 = vpop.f32.mrf.mxu1 }
 0xefe   :  { %v9420_v10 = vpop.f32.mrf.mxu0  ;;  %v9690_v46 = vld [vmem:[%s15895_s16] sm:$0x3] }
 0xeff   :  { %v9426_v23 = vsel %vm9425_vm13, %v15737_v44, 0.0  ;;  %v9440_v45 = vmul.f32 %v15737_v44, %v15737_v44  ;;  %v15744_v33 = vadd.f32 %v9419_v1, %v15734_v15  ;;  %v9380_v54 = vpop.f32.mrf.mxu1 }
 0xf00   :  { %v9427_v49 = vrot.slane %v9426_v23, 4  ;;  %v9421_v25 = vpop.f32.mrf.mxu0 }
 0xf01   :  { %v9442_v27 = vsel %vm9425_vm13, %v9440_v45, 0.0  ;;  %v9433_v40 = vsel %vm9425_vm13, %v15744_v33, 0.0  ;;  %v9441_v36 = vmul.f32 %v15744_v33, %v15744_v33  ;;  %v9704_v45 = vld [vmem:[%s15896_s17] sm:$0x3]  ;;  %v9695_v25 = vrot.slane %v9690_v46, %v16334_v2 }
 0xf02   :  { %v9428_v8 = vadd.f32 %v9427_v49, %v9426_v23  ;;  %v9443_v26 = vrot.slane %v9442_v27, 4  ;;  %v9434_v6 = vrot.slane %v9433_v40, 4 }
 0xf03   :  { %v9449_v60 = vsel %vm9425_vm13, %v9441_v36, 0.0 }
 0xf04   :  { %v9429_v61 = vrot.slane %v9428_v8, 2  ;;  %v9444_v14 = vadd.f32 %v9443_v26, %v9442_v27  ;;  %v9435_v15 = vadd.f32 %v9434_v6, %v9433_v40  ;;  %v9450_v31 = vrot.slane %v9449_v60, 4 }
 0xf05   :  { %v9699_v40 = vrot.slane %v9690_v46, %v16335_v28  ;;  %v9709_v26 = vrot.slane %v9704_v45, %v16334_v2 }
 0xf06   :  { %v9430_v41 = vadd.f32 %v9429_v61, %v9428_v8  ;;  %v9445_v24 = vrot.slane %v9444_v14, 2  ;;  %v9436_v16 = vrot.slane %v9435_v15, 2  ;;  %v9451_v22 = vadd.f32 %v9450_v31, %v9449_v60 }
 0xf07   :  { %v9713_v61 = vrot.slane %v9704_v45, %v16335_v28  ;;  %v12878_v28 = vld [vmem:[%s15898_s19 + $0xf8] sm:$0xff]  }
 0xf08   :  { %v9446_v7 = vadd.f32 %v9445_v24, %v9444_v14  ;;  %v9437_v0 = vadd.f32 %v9436_v16, %v9435_v15  ;;  %v9452_v17 = vrot.slane %v9451_v22, 2  ;;  %v9431_v55 = vrot.slane %v9430_v41, 1 }
 0xf0a   :  { %v9438_v35 = vrot.slane %v9437_v0, 1  ;;  %v9453_v50 = vadd.f32 %v9452_v17, %v9451_v22  ;;  %v9447_v3 = vrot.slane %v9446_v7, 1  ;;  %v9432_v39 = vadd.f32 %v9431_v55, %v9430_v41  ;;  %v10954_v22 = vld [vmem:[%s15897_s18 + $0x2] sm:$0x3]  ;;  %v12884_v17 = vld [vmem:[%s15898_s19 + $0xb0] sm:$0xff]   ;;  %v12888_v55 = vld [vmem:[%s15898_s19 + $0xa8] sm:$0xff]  }
 0xf0c   :  { %v9439_v63 = vadd.f32 %v9438_v35, %v9437_v0  ;;  %v9454_v56 = vrot.slane %v9453_v50, 1  ;;  %v9448_v52 = vadd.f32 %v9447_v3, %v9446_v7  ;;  %v12880_v7 = vld [vmem:[%s15898_s19 + $0xb8] sm:$0xff]   ;;  %v12882_v0 = vld [vmem:[%s15898_s19 + $0xf0] sm:$0xff]   ;;  %v12890_v35 = vld [vmem:[%s15898_s19 + $0xe0] sm:$0xff]  }
 0xf0d   :  { %v12894_v3 = vld [vmem:[%s15898_s19 + $0xd8] sm:$0xff]  }
 0xf0e   :  { %9584 = vmatprep.mubr.f32.mxu0 %v9439_v63  ;;  %v9455_v37 = vadd.f32 %v9454_v56, %v9453_v50  ;;  %v12892_v50 = vld [vmem:[%s15898_s19 + $0xa0] sm:$0xff]   ;;  %v12896_v63 = vld [vmem:[%s15898_s19 + $0x98] sm:$0xff]   ;;  %v12898_v56 = vld [vmem:[%s15898_s19 + $0xd0] sm:$0xff]  }
 0xf0f   :  { %9585 = vmatmul.mubr.f32.vlgmr.msra.gmra.mxu0 %v9432_v39  ;;  %v12900_v39 = vld [vmem:[%s15898_s19 + $0x90] sm:$0xff]  }
 0xf10   :  { %9655 = vmatprep.mubr.f32.mxu1 %v9455_v37  ;;  %9799 = vmatprep.mubr.f32.mxu0 %v16121_v30  ;;  %v12902_v37 = vld [vmem:[%s15898_s19 + $0xc8] sm:$0xff]  }
 0xf11   :  { %9656 = vmatmul.mubr.f32.vlgmr.msra.gmra.mxu1 %v9448_v52  ;;  %v12903_v52 = vld [vmem:[%s15898_s19 + $0x40] sm:$0xff]  }
 0xf12   :  { %11540 = vmatpush3.bf16.msra.mxu1 %v12877_v20  ;;  %v12905_v20 = vld [vmem:[%s15898_s19] sm:$0xff]  }
 0xf13   :  { %11541 = vmatprep.subr.bf16.mxu1 %v12879_v62  ;;  %v12906_v62 = vld [vmem:[%s15898_s19 + $0xc0] sm:$0xff]  }
 0xf16   :  { %11542 = vmatpush3.bf16.msra.mxu1 %v12881_v13  ;;  %v12907_v13 = vld [vmem:[%s15898_s19 + $0x80] sm:$0xff]  }
 0xf17   :  { %11543 = vmatprep.subr.bf16.mxu1 %v12883_v32 }
 0xf1a   :  { %11544 = vmatpush3.bf16.msra.mxu1 %v12885_v5 }
 0xf1b   :  { %11545 = vmatprep.subr.bf16.mxu1 %v12887_v38 }
 0xf1e   :  { %11546 = vmatpush3.bf16.msra.mxu1 %v12889_v53 }
 0xf1f   :  { %11547 = vmatprep.subr.bf16.mxu1 %v12891_v21 }
 0xf22   :  { %11548 = vmatpush3.bf16.msra.mxu1 %v12893_v18 }
 0xf23   :  { %11549 = vmatprep.subr.bf16.mxu1 %v12895_v4 }
 0xf26   :  { %11550 = vmatpush3.bf16.msra.mxu1 %v12897_v43 }
 0xf27   :  { %11551 = vmatprep.subr.bf16.mxu1 %v12899_v42 }
 0xf2a   :  { %11552 = vmatpush3.bf16.msra.mxu1 %v12901_v34 }
 0xf2b   :  { %11553 = vmatprep.subr.bf16.mxu1 %v12903_v52 }
 0xf2e   :  { %11554 = vmatpush3.bf16.msra.mxu1 %v12905_v20 }
 0xfcf   :  { %v9586_v59 = vpop.f32.mrf.mxu0 }
 0xfd0   :  { %v9662_v57 = vmul.f32 %v9586_v59, %v9586_v59  ;;  %v9673_v1 = vrot.slane %v9586_v59, %v16334_v2 }
 0xfd1   :  { %v9588_v48 = vpop.f32.mrf.mxu0  ;;  %v9657_v19 = vpop.f32.mrf.mxu1 }
 0xfd2   :  { %v9663_v51 = vmul.f32 %v9588_v48, %v9588_v48  ;;  %v9664_v11 = vsub.f32 %v9657_v19, %v9662_v57  ;;  %v9677_v10 = vrot.slane %v9588_v48, %v16334_v2  ;;  %v9678_v54 = vsub.f32 %v15737_v44, %v9673_v1 }
 0xfd3   :  { %v9659_v58 = vpop.f32.mrf.mxu1 }
 0xfd4   :  { %v9666_v29 = vadd.f32 1e-05, %v9664_v11  ;;  %v9665_v12 = vsub.f32 %v9659_v58, %v9663_v51  ;;  %v9679_v36 = vsub.f32 %v15744_v33, %v9677_v10  ;;  %v9724_v33 = vld [vmem:[%s15897_s18] sm:$0x3] }
 0xfd6   :  { %12920 = vrsqrt.f32 %v9666_v29  ;;  %v9667_v47 = vadd.f32 1e-05, %v9665_v12 }
 0xfd8   :  { %12922 = vrsqrt.f32 %v9667_v47 }
 0xfe3   :  { %v12921_v23 = vpop.eup %12920 }
 0xfe4   :  { %v9683_v49 = vrot.slane %v12921_v23, %v16334_v2 }
 0xfe5   :  { %v12923_v27 = vpop.eup %12922 }
 0xfe6   :  { %v9687_v8 = vrot.slane %v12923_v27, %v16334_v2  ;;  %v9688_v6 = vmul.f32 %v9683_v49, %v9678_v54 }
 0xfe8   :  { %v9689_v60 = vmul.f32 %v9687_v8, %v9679_v36  ;;  %v9702_v14 = vmul.f32 %v9695_v25, %v9688_v6 }
 0xfea   :  { %v9703_v15 = vmul.f32 %v9699_v40, %v9689_v60  ;;  %v9716_v44 = vadd.f32 %v9709_v26, %v9702_v14 }
 0xfec   :  { %v9717_v31 = vadd.f32 %v9713_v61, %v9703_v15  ;;  %v9720_v41 = vmul.f32 0.2, %v9716_v44  ;;  %vm9718_vm15 = vcmp.gt.f32.partialorder %v9716_v44, 0.0 }
 0xfee   :  { %vm9719_vm14 = vcmp.gt.f32.partialorder %v9717_v31, 0.0  ;;  %v9721_v24 = vmul.f32 0.2, %v9717_v31  ;;  %v9722_v2 = vsel %vm9718_vm15, %v9716_v44, %v9720_v41 }
 0xff0   :  { %v9723_v16 = vsel %vm9719_vm14, %v9717_v31, %v9721_v24 }
 0xff1   :  { %10951 = vmatprep.subr.msk.mxu0 %vm9425_vm13, %v9723_v16 }
 0xff2   :  { %10952 = vmatpush1.msk.msra.mxu0 %vm9425_vm13, %v9722_v2 }
 0xff3   :  { %10953 = vmatmul.mubr.msk.f32.vlgmr.msra.gmra.mxu0 %vm9725_vm0, %v9724_v33  ;;  %10955 = vmatprep.subr.msk.mxu0 %vm9425_vm13, %v9723_v16 }
 0xff4   :  { %10956 = vmatpush1.msk.msra.mxu0 %vm9425_vm13, %v9722_v2  ;;  %9909 = vmatprep.mubr.f32.mxu0 %v16121_v30  ;;  %v12886_v30 = vld [vmem:[%s15898_s19 + $0xe8] sm:$0xff]  }
 0xff5   :  { %11517 = vmatprep.subr.bf16.mxu0 %v12878_v28 }
 0xff7   :  { %10957 = vmatmul.mubr.msk.f32.vlgmr.msra.gmra.mxu0 %vm9725_vm0, %v10954_v22 }
 0xff8   :  { %11518 = vmatpush3.bf16.msra.mxu0 %v12880_v7 }
 0xff9   :  { %11519 = vmatprep.subr.bf16.mxu0 %v12882_v0 }
 0xffc   :  { %11520 = vmatpush3.bf16.msra.mxu0 %v12884_v17 }
 0xffd   :  { %11521 = vmatprep.subr.bf16.mxu0 %v12886_v30 }
0x1000   :  { %11522 = vmatpush3.bf16.msra.mxu0 %v12888_v55 }
0x1001   :  { %11523 = vmatprep.subr.bf16.mxu0 %v12890_v35 }
0x1004   :  { %11524 = vmatpush3.bf16.msra.mxu0 %v12892_v50 }
0x1005   :  { %11525 = vmatprep.subr.bf16.mxu0 %v12894_v3 }
0x1008   :  { %11526 = vmatpush3.bf16.msra.mxu0 %v12896_v63 }
0x1009   :  { %11527 = vmatprep.subr.bf16.mxu0 %v12898_v56 }
0x100c   :  { %11528 = vmatpush3.bf16.msra.mxu0 %v12900_v39 }
0x100d   :  { %11529 = vmatprep.subr.bf16.mxu0 %v12902_v37 }
0x1010   :  { %11530 = vmatpush3.bf16.msra.mxu0 %v12904_v9 }
0x1011   :  { %11531 = vmatprep.subr.bf16.mxu0 %v12906_v62 }
0x1014   :  { %11532 = vmatpush3.bf16.msra.mxu0 %v12907_v13 }
0x10b3   :  { %v9801_v32 = vpop.f32.mrf.mxu0 }
0x10b4   :  { %v9806_v53 = vpack.c.bf16 %v9801_v32, %v9801_v32 }
0x10b5   :  { %v9803_v5 = vpop.f32.mrf.mxu0 }
0x10b6   :  { %v9807_v38 = vpack.c.bf16 %v9803_v5, %v9803_v5 }
0x10b7   :  { %v9911_v21 = vpop.f32.mrf.mxu0 }
0x10b8   :  { %10215 = vmatprep.mubr.bf16.mxu1 %v9807_v38  ;;  %v9916_v43 = vpack.c.bf16 %v9911_v21, %v9911_v21 }
0x10b9   :  { %v9913_v18 = vpop.f32.mrf.mxu0  ;;  %10216 = vmatmul.mubr.bf16.vlgmr.msra.gmra.mxu1 %v9806_v53 }
0x10ba   :  { %v9917_v4 = vpack.c.bf16 %v9913_v18, %v9913_v18 }
0x10bc   :  { %10079 = vmatprep.mubr.bf16.mxu0 %v9917_v4 }
0x10bd   :  { %10080 = vmatmul.mubr.bf16.vlgmr.msra.gmra.mxu0 %v9916_v43 }
0x1179   :  { %v11555_v42 = vpop.f32.mrf.mxu1 }
0x117b   :  { %v11556_v34 = vpop.f32.mrf.mxu1 }
0x117c   :  { %v11557_v51 = vadd.f32 %v11556_v34, %v11555_v42 }
0x117d   :  { %v11533_v59 = vpop.f32.mrf.mxu0  ;;  %v11558_v57 = vpop.f32.mrf.mxu1 }
0x117f   :  { %v11534_v48 = vpop.f32.mrf.mxu0  ;;  %v11559_v19 = vpop.f32.mrf.mxu1 }
0x1180   :  { %v11535_v11 = vadd.f32 %v11534_v48, %v11533_v59 }
0x1181   :  { %v11536_v58 = vpop.f32.mrf.mxu0 }
0x1182   :  { %v10218_v29 = vadd.f32 %v11557_v51, %v11535_v11 }
0x1183   :  { %v11537_v12 = vpop.f32.mrf.mxu0 }
0x1184   :  { %v10223_v47 = vsub.f32 0.0, %v10218_v29 }
0x1186   :  { %v10224_v1 = vmul.f32 1.442695, %v10223_v47 }
0x1188   :  { %12924 = vpow2.f32 %v10224_v1 }
0x1195   :  { %v12925_v46 = vpop.eup %12924 }
0x1196   :  { %v10226_v10 = vadd.f32 1.0, %v12925_v46 }
0x1198   :  { %12926 = vrcp.f32 %v10226_v10 }
0x11a5   :  { %v12927_v23 = vpop.eup %12926 }
0x11a6   :  { %v10228_v45 = vmin.f32 %v12927_v23, 1.0 }
0x11a8   :  { %10230 = vst.msk [vmem:[%s15899_s20] sm:$0x3] %vm10229_vm1, %v10228_v45 }
0x11a9   :  { %10235 = vsyncpa [#allocation3], 1 }
0x11aa   :  { %10236 = vsyncpa [#allocation5], 1 }
0x11ab   :  { %10237 = vsyncpa [#allocation8], 1 }
0x11ac   :  { %10238 = vsyncpa [#allocation11], 1 }

</bundles_post_ra>
